<compile_context>
chip_gen: v6e
topology: v6e:2x2x1
jax: 0.10.0
libtpu: 0.0.40
codegen_flags: <defaults>
</compile_context>

<pallas_src>
import numpy as np
import jax
import jax.numpy as jnp
from jax.experimental import pallas as pl
from jax.experimental.pallas import tpu as pltpu

# ----------------------------- configuration --------------------------------
PAST_LEN = 8
FUTURE_LEN = 12
DIM_EMBEDDING_KEY = 64      # model_encdec.dim_embedding_key
ST_CONV_OUT = 16            # st_encoder conv channels (traj_abs_past_encoder)
DEC_CONV_OUT = 32           # DecomposeBlock conv channels
DEC_HIDDEN = 96             # DecomposeBlock GRU hidden size
SOCIAL_MLP = 1024           # interaction pre-pool MLP width
NUM_DECOMPOSE = 2

_VMEM = pl.BlockSpec(memory_space=pltpu.MemorySpace.VMEM)
_N_DATA = 6                 # past, abs_past, rel, mask, goal, goal_ramp


def _bf16(x):
    return x.astype(jnp.bfloat16)


# ----------------------------- in-kernel building blocks ----------------------
def _st_gru_flat(x_flat, enc):
    """Conv1d(k=3,pad=1) + ReLU + single-layer GRU on a flat (B, 2T) trajectory -> (B, H).

    Conv matmul and input-side gate pre-activations are hoisted out of the recurrence
    (one (T*B, .) matmul each); gate weights are combined [r|z|n] -> one dot per side.
    `enc` holds already-loaded (value) arrays.
    """
    B = x_flat.shape[0]
    T = x_flat.shape[1] // 2
    H = enc["whh"].shape[0]

    zpad = jnp.zeros((B, 2), jnp.float32)
    xp = jnp.concatenate([zpad, x_flat, zpad], axis=1)                        # (B, 2T+4)
    # im2col with flat (k, c) column order; rows ordered (t, b) so per-step slices
    # of the hoisted gate pre-activations are contiguous 8-sublane blocks.
    cols = jnp.stack([xp[:, 2 * t:2 * t + 6] for t in range(T)], axis=0)      # (T, B, 6)
    cols = _bf16(cols.reshape(T * B, 6))

    ct = jnp.maximum(
        jnp.dot(cols, enc["wc"], preferred_element_type=jnp.float32)
        + enc["bc"], 0.0)                                                     # (T*B, Cout)
    gi = (jnp.dot(_bf16(ct), enc["wih"], preferred_element_type=jnp.float32)
          + enc["bih"])                                                       # (T*B, 3H)

    whh = enc["whh"]                                                          # (H, 3H) bf16
    bhh = enc["bhh"]                                                          # (1, 3H) f32
    h = jnp.zeros((B, H), jnp.float32)
    for t in range(T):                                                        # static unroll (T=8)
        git = gi[t * B:(t + 1) * B, :]                                        # (B, 3H)
        gh = jnp.dot(_bf16(h), whh, preferred_element_type=jnp.float32) + bhh  # one MXU dot
        r = jax.nn.sigmoid(git[:, :H] + gh[:, :H])
        z = jax.nn.sigmoid(git[:, H:2 * H] + gh[:, H:2 * H])
        n = jnp.tanh(git[:, 2 * H:] + r * gh[:, 2 * H:])
        h = n + z * (h - n)                                                   # == (1-z)*n + z*h
    return h


def _social_pool(h, rel, maskf, soc):
    """Masked social pooling, vectorized over all (i, j) agent pairs; layer-1 fused.

    rel   : (B*B, 2)  with row i*B+j = pos[j] - pos[i]
    maskf : (B*B, 1)  with row i*B+j = 1.0 if agents i, j share a scene
    """
    B = h.shape[0]
    e = jnp.maximum(
        jnp.dot(_bf16(rel), soc["ws"], preferred_element_type=jnp.float32)
        + soc["bs"], 0.0)                                                     # (B*B, 64)
    h_rep = jnp.tile(h, (B, 1))                                               # row i*B+j -> h[j]
    eh = _bf16(jnp.concatenate([e, h_rep], axis=1))                           # (B*B, 128)
    m1 = jnp.maximum(
        jnp.dot(eh, soc["w1"], preferred_element_type=jnp.float32)
        + soc["b1"], 0.0)                                                     # (B*B, 1024)
    m2 = (jnp.dot(_bf16(m1), soc["w2"], preferred_element_type=jnp.float32)
          + soc["b2"])                                                        # (B*B, 64)
    masked = jnp.where(maskf > 0.0, m2, -1e30)
    return jnp.max(masked.reshape(B, B, -1), axis=1)                          # (B, 64)


def _mlp(x, layers):
    """Fused MLP: ReLU between hidden layers, none on the last (bf16 weights, f32 acc)."""
    n = len(layers)
    for i, (wk, bk) in enumerate(layers):
        x = jnp.dot(_bf16(x), wk, preferred_element_type=jnp.float32) + bk
        if i != n - 1:
            x = jnp.maximum(x, 0.0)
    return x


# ----------------------------- the single fused kernel ------------------------
def _build_kernel(treedef):
    def kernel(*refs):
        past_ref, abs_ref, rel_ref, maskf_ref, goal_ref, gramp_ref = refs[:_N_DATA]
        out_ref = refs[-1]
        p = jax.tree_util.tree_unflatten(treedef, list(refs[_N_DATA:-1]))

        # load weights into values (each read once)
        enc_abs = {k: v[...] for k, v in p["traj_abs_past_encoder"].items()}
        soc = {k: v[...] for k, v in p["interaction"].items()}
        dest_layers = [(wr[...], br[...]) for (wr, br) in p["encoder_dest"]]
        dp = p["decompose"]

        # abs_past_state = traj_abs_past_encoder(abs_past)
        abs_state = _st_gru_flat(abs_ref[...], enc_abs)                            # (B, 64)
        # abs_past_state_social = interaction(abs_past_state, seq_start_end, end_pose)
        social = _social_pool(abs_state, rel_ref[...], maskf_ref[...], soc)        # (B, 64)
        # destination_feat = encoder_dest(goal)
        dest_feat = _mlp(goal_ref[...], dest_layers)                               # (B, 64)
        # state_conc = cat((abs_past_state_social, destination_feat), dim=1)
        state_conc = jnp.concatenate([social, dest_feat], axis=1)                  # (B, 128)

        x_true = past_ref[...]                                                     # (B, 2*T_p)
        goal_ramp = gramp_ref[...]                                                 # (B, 2*(Tf-1))
        x_hat = jnp.zeros_like(x_true)
        y_sum = jnp.zeros_like(goal_ramp)
        for d in range(NUM_DECOMPOSE):                                             # static unroll
            enc_d = {k: dp["enc"][k][d]
                     for k in ("wc", "bc", "wih", "bih", "whh", "bhh")}
            x_diff = x_true - x_hat
            h_enc = _st_gru_flat(x_diff, enc_d)                                    # (B, 96)
            feat = _bf16(jnp.concatenate([state_conc, h_enc], axis=1))             # (B, 224)
            # fused decoder_x / decoder_y first layer: (224, 1024), split at lane 512 (aligned)
            h1 = jnp.maximum(
                jnp.dot(feat, dp["dec1_w"][d], preferred_element_type=jnp.float32)
                + dp["dec1_b"][d], 0.0)                                            # (B, 1024)
            h2x = jnp.maximum(
                jnp.dot(_bf16(h1[:, :512]), dp["dec2x_w"][d],
                        preferred_element_type=jnp.float32) + dp["dec2x_b"][d], 0.0)  # (B, 256)
            h2y = jnp.maximum(
                jnp.dot(_bf16(h1[:, 512:]), dp["dec2y_w"][d],
                        preferred_element_type=jnp.float32) + dp["dec2y_b"][d], 0.0)  # (B, 256)
            x_hat = (jnp.dot(_bf16(h2x), dp["dec3x_w"][d],
                             preferred_element_type=jnp.float32) + dp["dec3x_b"][d])  # (B, 2*T_p)
            y_hat = (jnp.dot(_bf16(h2y), dp["dec3y_w"][d],
                             preferred_element_type=jnp.float32) + dp["dec3y_b"][d])  # (B, 2*(Tf-1))
            y_sum = y_sum + y_hat
        # (reconstruction accumulation in the PyTorch code never reaches the output -> omitted)

        # prediction_single[:, i-1] += goal * i / future_len  (goal_ramp precomputed in glue)
        out_ref[...] = y_sum + goal_ramp
    return kernel


# ----------------------------- parameters -------------------------------------
def init_params(key):
    keys = iter(jax.random.split(key, 64))

    def w(shape):
        fan_in = shape[-2]
        m = (1.0 / np.sqrt(fan_in)) * jax.random.normal(next(keys), shape, jnp.float32)
        return m.astype(jnp.bfloat16)                       # bf16 weights, f32 accumulation

    def b(shape):
        return 0.01 * jax.random.normal(next(keys), shape, jnp.float32)

    def st_params(cin_k, cout, hidden, stack=()):
        # combined [r|z|n] gate weights: (cout, 3H) input side, (H, 3H) hidden side
        s = tuple(stack)
        return dict(wc=w(s + (cin_k, cout)), bc=b(s + (1, cout)),
                    wih=w(s + (cout, 3 * hidden)), bih=b(s + (1, 3 * hidden)),
                    whh=w(s + (hidden, 3 * hidden)), bhh=b(s + (1, 3 * hidden)))

    D = DIM_EMBEDDING_KEY
    N = NUM_DECOMPOSE
    params = dict(
        traj_abs_past_encoder=st_params(3 * 2, ST_CONV_OUT, D),
        interaction=dict(
            ws=w((2, D)), bs=b((1, D)),
            # layer-1 weight pre-stacked [W1e; W1h] so the kernel does one fused matmul
            w1=w((2 * D, SOCIAL_MLP)), b1=b((1, SOCIAL_MLP)),
            w2=w((SOCIAL_MLP, D)), b2=b((1, D)),
        ),
        encoder_dest=[(w((2, 64)), b((1, 64))),
                      (w((64, 128)), b((1, 128))),
                      (w((128, D)), b((1, D)))],
        # the two DecomposeBlocks stacked along a leading axis (fewer kernel operands / DMAs)
        decompose=dict(
            enc=st_params(3 * 2, DEC_CONV_OUT, DEC_HIDDEN, stack=(N,)),
            # decoder_x / decoder_y layer-1 fused along the output axis (224 -> 512+512)
            dec1_w=w((N, 2 * D + DEC_HIDDEN, 1024)), dec1_b=b((N, 1, 1024)),
            dec2x_w=w((N, 512, 256)), dec2x_b=b((N, 1, 256)),
            dec2y_w=w((N, 512, 256)), dec2y_b=b((N, 1, 256)),
            dec3x_w=w((N, 256, PAST_LEN * 2)), dec3x_b=b((N, 1, PAST_LEN * 2)),
            dec3y_w=w((N, 256, (FUTURE_LEN - 1) * 2)), dec3y_b=b((N, 1, (FUTURE_LEN - 1) * 2)),
        ),
    )
    return params


def build_group_mask_flat(B, seq_start_end):
    gid = np.zeros((B,), np.int32)
    for g, (s, e) in enumerate(seq_start_end):
        gid[s:e] = g
    m = (gid[:, None] == gid[None, :]).astype(np.float32)     # (B, B)
    return jnp.asarray(m.reshape(B * B, 1))                   # row i*B+j = same-scene(i, j)


# ----------------------------- forward pass ------------------------------------
def model_forward(params, past, abs_past, mask_flat, end_pose, goal):
    B, T_p, _ = past.shape
    Tf = FUTURE_LEN

    # tiny XLA-side input prep (no heavy compute, no intermediate round trips between kernels)
    past_flat = past.reshape(B, 2 * T_p)
    abs_flat = abs_past.reshape(B, 2 * T_p)
    rel = (end_pose[None, :, :] - end_pose[:, None, :]).reshape(B * B, 2)      # pos[j]-pos[i]
    ramp = np.repeat(np.arange(1, Tf, dtype=np.float32) / float(Tf), 2)[None, :]
    goal_ramp = jnp.tile(goal, (1, Tf - 1)) * jnp.asarray(ramp)                # (B, 2*(Tf-1))

    leaves, treedef = jax.tree_util.tree_flatten(params)
    kernel = _build_kernel(treedef)

    pred_flat = pl.pallas_call(
        kernel,
        out_shape=jax.ShapeDtypeStruct((B, 2 * (Tf - 1)), jnp.float32),
        in_specs=[_VMEM] * (_N_DATA + len(leaves)),
        out_specs=_VMEM,
    )(past_flat, abs_flat, rel, mask_flat, goal, goal_ramp, *leaves)

    pred = pred_flat.reshape(B, Tf - 1, 2)
    # prediction_single = cat((prediction_single, goal.unsqueeze(1)), dim=1)
    return jnp.concatenate([pred, goal[:, None, :]], axis=1)                   # (B, Tf, 2)


# ----------------------------- main ---------------------------------------------
if __name__ == "__main__":
    B = 8                                   # number of agents (2 scenes of 4)
    seq_start_end = [(0, 4), (4, 8)]

    params = init_params(jax.random.PRNGKey(0))

    kp, ka, ke, kg = jax.random.split(jax.random.PRNGKey(0), 4)
    past = jax.random.normal(kp, (B, PAST_LEN, 2), jnp.float32)
    abs_past = jax.random.normal(ka, (B, PAST_LEN, 2), jnp.float32)
    end_pose = jax.random.normal(ke, (B, 2), jnp.float32)
    goal = jax.random.normal(kg, (B, 2), jnp.float32)
    mask_flat = build_group_mask_flat(B, seq_start_end)   # static scene grouping -> (B*B, 1)

    fwd = jax.jit(model_forward)
    out = jax.block_until_ready(fwd(params, past, abs_past, mask_flat, end_pose, goal))

    assert out.shape == (B, FUTURE_LEN, 2) and out.dtype == jnp.float32
    assert bool(jnp.all(jnp.isfinite(out)))
    # last predicted frame must equal the goal (cat of goal.unsqueeze(1))
    assert bool(jnp.allclose(out[:, -1, :], goal))
    print("KERNEL_OK")
</pallas_src>

<mosaic_0001>
module attributes {stable_mosaic.version = 11 : i64} {
  func.func @kernel(%arg0: memref<8x16xf32, #tpu.memory_space<vmem>>, %arg1: memref<8x16xf32, #tpu.memory_space<vmem>>, %arg2: memref<64x2xf32, #tpu.memory_space<vmem>>, %arg3: memref<64x1xf32, #tpu.memory_space<vmem>>, %arg4: memref<8x2xf32, #tpu.memory_space<vmem>>, %arg5: memref<8x22xf32, #tpu.memory_space<vmem>>, %arg6: memref<2x1x1024xf32, #tpu.memory_space<vmem>>, %arg7: memref<2x224x1024xbf16, #tpu.memory_space<vmem>>, %arg8: memref<2x1x256xf32, #tpu.memory_space<vmem>>, %arg9: memref<2x512x256xbf16, #tpu.memory_space<vmem>>, %arg10: memref<2x1x256xf32, #tpu.memory_space<vmem>>, %arg11: memref<2x512x256xbf16, #tpu.memory_space<vmem>>, %arg12: memref<2x1x16xf32, #tpu.memory_space<vmem>>, %arg13: memref<2x256x16xbf16, #tpu.memory_space<vmem>>, %arg14: memref<2x1x22xf32, #tpu.memory_space<vmem>>, %arg15: memref<2x256x22xbf16, #tpu.memory_space<vmem>>, %arg16: memref<2x1x32xf32, #tpu.memory_space<vmem>>, %arg17: memref<2x1x288xf32, #tpu.memory_space<vmem>>, %arg18: memref<2x1x288xf32, #tpu.memory_space<vmem>>, %arg19: memref<2x6x32xbf16, #tpu.memory_space<vmem>>, %arg20: memref<2x96x288xbf16, #tpu.memory_space<vmem>>, %arg21: memref<2x32x288xbf16, #tpu.memory_space<vmem>>, %arg22: memref<2x64xbf16, #tpu.memory_space<vmem>>, %arg23: memref<1x64xf32, #tpu.memory_space<vmem>>, %arg24: memref<64x128xbf16, #tpu.memory_space<vmem>>, %arg25: memref<1x128xf32, #tpu.memory_space<vmem>>, %arg26: memref<128x64xbf16, #tpu.memory_space<vmem>>, %arg27: memref<1x64xf32, #tpu.memory_space<vmem>>, %arg28: memref<1x1024xf32, #tpu.memory_space<vmem>>, %arg29: memref<1x64xf32, #tpu.memory_space<vmem>>, %arg30: memref<1x64xf32, #tpu.memory_space<vmem>>, %arg31: memref<128x1024xbf16, #tpu.memory_space<vmem>>, %arg32: memref<1024x64xbf16, #tpu.memory_space<vmem>>, %arg33: memref<2x64xbf16, #tpu.memory_space<vmem>>, %arg34: memref<1x16xf32, #tpu.memory_space<vmem>>, %arg35: memref<1x192xf32, #tpu.memory_space<vmem>>, %arg36: memref<1x192xf32, #tpu.memory_space<vmem>>, %arg37: memref<6x16xbf16, #tpu.memory_space<vmem>>, %arg38: memref<64x192xbf16, #tpu.memory_space<vmem>>, %arg39: memref<16x192xbf16, #tpu.memory_space<vmem>>, %arg40: memref<8x22xf32, #tpu.memory_space<vmem>>) attributes {dimension_semantics = [], scalar_prefetch = 0 : i64, scratch_operands = 0 : i64, tpu.core_type = #tpu.core_type<tc>} {
    %c0 = arith.constant 0 : index
    %c0_0 = arith.constant 0 : index
    %0 = vector.load %arg34[%c0, %c0_0] : memref<1x16xf32, #tpu.memory_space<vmem>>, vector<1x16xf32>
    %c0_1 = arith.constant 0 : index
    %c0_2 = arith.constant 0 : index
    %1 = vector.load %arg35[%c0_1, %c0_2] : memref<1x192xf32, #tpu.memory_space<vmem>>, vector<1x192xf32>
    %c0_3 = arith.constant 0 : index
    %c0_4 = arith.constant 0 : index
    %2 = vector.load %arg36[%c0_3, %c0_4] : memref<1x192xf32, #tpu.memory_space<vmem>>, vector<1x192xf32>
    %c0_5 = arith.constant 0 : index
    %c0_6 = arith.constant 0 : index
    %3 = vector.load %arg37[%c0_5, %c0_6] : memref<6x16xbf16, #tpu.memory_space<vmem>>, vector<6x16xbf16>
    %c0_7 = arith.constant 0 : index
    %c0_8 = arith.constant 0 : index
    %4 = vector.load %arg38[%c0_7, %c0_8] : memref<64x192xbf16, #tpu.memory_space<vmem>>, vector<64x192xbf16>
    %c0_9 = arith.constant 0 : index
    %c0_10 = arith.constant 0 : index
    %5 = vector.load %arg39[%c0_9, %c0_10] : memref<16x192xbf16, #tpu.memory_space<vmem>>, vector<16x192xbf16>
    %c0_11 = arith.constant 0 : index
    %c0_12 = arith.constant 0 : index
    %6 = vector.load %arg28[%c0_11, %c0_12] : memref<1x1024xf32, #tpu.memory_space<vmem>>, vector<1x1024xf32>
    %c0_13 = arith.constant 0 : index
    %c0_14 = arith.constant 0 : index
    %7 = vector.load %arg29[%c0_13, %c0_14] : memref<1x64xf32, #tpu.memory_space<vmem>>, vector<1x64xf32>
    %c0_15 = arith.constant 0 : index
    %c0_16 = arith.constant 0 : index
    %8 = vector.load %arg30[%c0_15, %c0_16] : memref<1x64xf32, #tpu.memory_space<vmem>>, vector<1x64xf32>
    %c0_17 = arith.constant 0 : index
    %c0_18 = arith.constant 0 : index
    %9 = vector.load %arg31[%c0_17, %c0_18] : memref<128x1024xbf16, #tpu.memory_space<vmem>>, vector<128x1024xbf16>
    %c0_19 = arith.constant 0 : index
    %c0_20 = arith.constant 0 : index
    %10 = vector.load %arg32[%c0_19, %c0_20] : memref<1024x64xbf16, #tpu.memory_space<vmem>>, vector<1024x64xbf16>
    %c0_21 = arith.constant 0 : index
    %c0_22 = arith.constant 0 : index
    %11 = vector.load %arg33[%c0_21, %c0_22] : memref<2x64xbf16, #tpu.memory_space<vmem>>, vector<2x64xbf16>
    %c0_23 = arith.constant 0 : index
    %c0_24 = arith.constant 0 : index
    %12 = vector.load %arg22[%c0_23, %c0_24] : memref<2x64xbf16, #tpu.memory_space<vmem>>, vector<2x64xbf16>
    %c0_25 = arith.constant 0 : index
    %c0_26 = arith.constant 0 : index
    %13 = vector.load %arg23[%c0_25, %c0_26] : memref<1x64xf32, #tpu.memory_space<vmem>>, vector<1x64xf32>
    %c0_27 = arith.constant 0 : index
    %c0_28 = arith.constant 0 : index
    %14 = vector.load %arg24[%c0_27, %c0_28] : memref<64x128xbf16, #tpu.memory_space<vmem>>, vector<64x128xbf16>
    %c0_29 = arith.constant 0 : index
    %c0_30 = arith.constant 0 : index
    %15 = vector.load %arg25[%c0_29, %c0_30] : memref<1x128xf32, #tpu.memory_space<vmem>>, vector<1x128xf32>
    %c0_31 = arith.constant 0 : index
    %c0_32 = arith.constant 0 : index
    %16 = vector.load %arg26[%c0_31, %c0_32] : memref<128x64xbf16, #tpu.memory_space<vmem>>, vector<128x64xbf16>
    %c0_33 = arith.constant 0 : index
    %c0_34 = arith.constant 0 : index
    %17 = vector.load %arg27[%c0_33, %c0_34] : memref<1x64xf32, #tpu.memory_space<vmem>>, vector<1x64xf32>
    %c0_35 = arith.constant 0 : index
    %c0_36 = arith.constant 0 : index
    %18 = vector.load %arg1[%c0_35, %c0_36] : memref<8x16xf32, #tpu.memory_space<vmem>>, vector<8x16xf32>
    %cst = arith.constant 0.000000e+00 : f32
    %19 = vector.broadcast %cst : f32 to vector<8x2xf32>
    %20 = tpu.concatenate %19, %18, %19 in 1 : vector<8x2xf32>, vector<8x16xf32>, vector<8x2xf32> -> vector<8x20xf32>
    %21 = vector.extract_strided_slice %20 {offsets = [0, 0], sizes = [8, 6], strides = [1, 1]} : vector<8x20xf32> to vector<8x6xf32>
    %22 = vector.extract_strided_slice %20 {offsets = [0, 2], sizes = [8, 6], strides = [1, 1]} : vector<8x20xf32> to vector<8x6xf32>
    %23 = vector.extract_strided_slice %20 {offsets = [0, 4], sizes = [8, 6], strides = [1, 1]} : vector<8x20xf32> to vector<8x6xf32>
    %24 = vector.extract_strided_slice %20 {offsets = [0, 6], sizes = [8, 6], strides = [1, 1]} : vector<8x20xf32> to vector<8x6xf32>
    %25 = vector.extract_strided_slice %20 {offsets = [0, 8], sizes = [8, 6], strides = [1, 1]} : vector<8x20xf32> to vector<8x6xf32>
    %26 = vector.extract_strided_slice %20 {offsets = [0, 10], sizes = [8, 6], strides = [1, 1]} : vector<8x20xf32> to vector<8x6xf32>
    %27 = vector.extract_strided_slice %20 {offsets = [0, 12], sizes = [8, 6], strides = [1, 1]} : vector<8x20xf32> to vector<8x6xf32>
    %28 = vector.extract_strided_slice %20 {offsets = [0, 14], sizes = [8, 6], strides = [1, 1]} : vector<8x20xf32> to vector<8x6xf32>
    %29 = vector.shape_cast %21 : vector<8x6xf32> to vector<1x8x6xf32>
    %30 = vector.shape_cast %22 : vector<8x6xf32> to vector<1x8x6xf32>
    %31 = vector.shape_cast %23 : vector<8x6xf32> to vector<1x8x6xf32>
    %32 = vector.shape_cast %24 : vector<8x6xf32> to vector<1x8x6xf32>
    %33 = vector.shape_cast %25 : vector<8x6xf32> to vector<1x8x6xf32>
    %34 = vector.shape_cast %26 : vector<8x6xf32> to vector<1x8x6xf32>
    %35 = vector.shape_cast %27 : vector<8x6xf32> to vector<1x8x6xf32>
    %36 = vector.shape_cast %28 : vector<8x6xf32> to vector<1x8x6xf32>
    %37 = tpu.concatenate %29, %30, %31, %32, %33, %34, %35, %36 in 0 : vector<1x8x6xf32>, vector<1x8x6xf32>, vector<1x8x6xf32>, vector<1x8x6xf32>, vector<1x8x6xf32>, vector<1x8x6xf32>, vector<1x8x6xf32>, vector<1x8x6xf32> -> vector<8x8x6xf32>
    %38 = vector.shape_cast %37 : vector<8x8x6xf32> to vector<64x6xf32>
    %39 = arith.truncf %38 : vector<64x6xf32> to vector<64x6xbf16>
    %cst_37 = arith.constant dense<0.000000e+00> : vector<64x16xf32>
    %40 = tpu.matmul %39, %3, %cst_37 {dimension_numbers = #tpu.dot_dimension_numbers<[1], [0], [0], [1], [0, 0, 1, 1], [], []>} : vector<64x6xbf16>, vector<6x16xbf16>, vector<64x16xf32> -> vector<64x16xf32>
    %41 = vector.broadcast %0 : vector<1x16xf32> to vector<64x16xf32>
    %42 = arith.addf %40, %41 : vector<64x16xf32>
    %cst_38 = arith.constant 0.000000e+00 : f32
    %43 = vector.broadcast %cst_38 : f32 to vector<64x16xf32>
    %44 = arith.maximumf %42, %43 : vector<64x16xf32>
    %45 = arith.truncf %44 : vector<64x16xf32> to vector<64x16xbf16>
    %cst_39 = arith.constant dense<0.000000e+00> : vector<64x192xf32>
    %46 = tpu.matmul %45, %5, %cst_39 {dimension_numbers = #tpu.dot_dimension_numbers<[1], [0], [0], [1], [0, 0, 1, 1], [], []>} : vector<64x16xbf16>, vector<16x192xbf16>, vector<64x192xf32> -> vector<64x192xf32>
    %47 = vector.broadcast %2 : vector<1x192xf32> to vector<64x192xf32>
    %48 = arith.addf %46, %47 : vector<64x192xf32>
    %cst_40 = arith.constant 0.000000e+00 : f32
    %49 = vector.broadcast %cst_40 : f32 to vector<8x64xf32>
    %50 = vector.extract_strided_slice %48 {offsets = [0, 0], sizes = [8, 192], strides = [1, 1]} : vector<64x192xf32> to vector<8x192xf32>
    %51 = arith.truncf %49 : vector<8x64xf32> to vector<8x64xbf16>
    %cst_41 = arith.constant dense<0.000000e+00> : vector<8x192xf32>
    %52 = tpu.matmul %51, %4, %cst_41 {dimension_numbers = #tpu.dot_dimension_numbers<[1], [0], [0], [1], [0, 0, 1, 1], [], []>} : vector<8x64xbf16>, vector<64x192xbf16>, vector<8x192xf32> -> vector<8x192xf32>
    %53 = vector.broadcast %1 : vector<1x192xf32> to vector<8x192xf32>
    %54 = arith.addf %52, %53 : vector<8x192xf32>
    %55 = vector.extract_strided_slice %50 {offsets = [0, 0], sizes = [8, 64], strides = [1, 1]} : vector<8x192xf32> to vector<8x64xf32>
    %56 = vector.extract_strided_slice %54 {offsets = [0, 0], sizes = [8, 64], strides = [1, 1]} : vector<8x192xf32> to vector<8x64xf32>
    %57 = arith.addf %55, %56 : vector<8x64xf32>
    %58 = arith.negf %57 : vector<8x64xf32>
    %59 = math.exp %58 : vector<8x64xf32>
    %cst_42 = arith.constant 1.000000e+00 : f32
    %60 = vector.broadcast %cst_42 : f32 to vector<8x64xf32>
    %61 = arith.addf %60, %59 : vector<8x64xf32>
    %62 = arith.divf %60, %61 : vector<8x64xf32>
    %63 = vector.extract_strided_slice %50 {offsets = [0, 64], sizes = [8, 64], strides = [1, 1]} : vector<8x192xf32> to vector<8x64xf32>
    %64 = vector.extract_strided_slice %54 {offsets = [0, 64], sizes = [8, 64], strides = [1, 1]} : vector<8x192xf32> to vector<8x64xf32>
    %65 = arith.addf %63, %64 : vector<8x64xf32>
    %66 = arith.negf %65 : vector<8x64xf32>
    %67 = math.exp %66 : vector<8x64xf32>
    %cst_43 = arith.constant 1.000000e+00 : f32
    %68 = vector.broadcast %cst_43 : f32 to vector<8x64xf32>
    %69 = arith.addf %68, %67 : vector<8x64xf32>
    %70 = arith.divf %68, %69 : vector<8x64xf32>
    %71 = vector.extract_strided_slice %50 {offsets = [0, 128], sizes = [8, 64], strides = [1, 1]} : vector<8x192xf32> to vector<8x64xf32>
    %72 = vector.extract_strided_slice %54 {offsets = [0, 128], sizes = [8, 64], strides = [1, 1]} : vector<8x192xf32> to vector<8x64xf32>
    %73 = arith.mulf %62, %72 : vector<8x64xf32>
    %74 = arith.addf %71, %73 : vector<8x64xf32>
    %75 = math.tanh %74 : vector<8x64xf32>
    %76 = arith.subf %49, %75 : vector<8x64xf32>
    %77 = arith.mulf %70, %76 : vector<8x64xf32>
    %78 = arith.addf %75, %77 : vector<8x64xf32>
    %79 = vector.extract_strided_slice %48 {offsets = [8, 0], sizes = [8, 192], strides = [1, 1]} : vector<64x192xf32> to vector<8x192xf32>
    %80 = arith.truncf %78 : vector<8x64xf32> to vector<8x64xbf16>
    %cst_44 = arith.constant dense<0.000000e+00> : vector<8x192xf32>
    %81 = tpu.matmul %80, %4, %cst_44 {dimension_numbers = #tpu.dot_dimension_numbers<[1], [0], [0], [1], [0, 0, 1, 1], [], []>} : vector<8x64xbf16>, vector<64x192xbf16>, vector<8x192xf32> -> vector<8x192xf32>
    %82 = vector.broadcast %1 : vector<1x192xf32> to vector<8x192xf32>
    %83 = arith.addf %81, %82 : vector<8x192xf32>
    %84 = vector.extract_strided_slice %79 {offsets = [0, 0], sizes = [8, 64], strides = [1, 1]} : vector<8x192xf32> to vector<8x64xf32>
    %85 = vector.extract_strided_slice %83 {offsets = [0, 0], sizes = [8, 64], strides = [1, 1]} : vector<8x192xf32> to vector<8x64xf32>
    %86 = arith.addf %84, %85 : vector<8x64xf32>
    %87 = arith.negf %86 : vector<8x64xf32>
    %88 = math.exp %87 : vector<8x64xf32>
    %cst_45 = arith.constant 1.000000e+00 : f32
    %89 = vector.broadcast %cst_45 : f32 to vector<8x64xf32>
    %90 = arith.addf %89, %88 : vector<8x64xf32>
    %91 = arith.divf %89, %90 : vector<8x64xf32>
    %92 = vector.extract_strided_slice %79 {offsets = [0, 64], sizes = [8, 64], strides = [1, 1]} : vector<8x192xf32> to vector<8x64xf32>
    %93 = vector.extract_strided_slice %83 {offsets = [0, 64], sizes = [8, 64], strides = [1, 1]} : vector<8x192xf32> to vector<8x64xf32>
    %94 = arith.addf %92, %93 : vector<8x64xf32>
    %95 = arith.negf %94 : vector<8x64xf32>
    %96 = math.exp %95 : vector<8x64xf32>
    %cst_46 = arith.constant 1.000000e+00 : f32
    %97 = vector.broadcast %cst_46 : f32 to vector<8x64xf32>
    %98 = arith.addf %97, %96 : vector<8x64xf32>
    %99 = arith.divf %97, %98 : vector<8x64xf32>
    %100 = vector.extract_strided_slice %79 {offsets = [0, 128], sizes = [8, 64], strides = [1, 1]} : vector<8x192xf32> to vector<8x64xf32>
    %101 = vector.extract_strided_slice %83 {offsets = [0, 128], sizes = [8, 64], strides = [1, 1]} : vector<8x192xf32> to vector<8x64xf32>
    %102 = arith.mulf %91, %101 : vector<8x64xf32>
    %103 = arith.addf %100, %102 : vector<8x64xf32>
    %104 = math.tanh %103 : vector<8x64xf32>
    %105 = arith.subf %78, %104 : vector<8x64xf32>
    %106 = arith.mulf %99, %105 : vector<8x64xf32>
    %107 = arith.addf %104, %106 : vector<8x64xf32>
    %108 = vector.extract_strided_slice %48 {offsets = [16, 0], sizes = [8, 192], strides = [1, 1]} : vector<64x192xf32> to vector<8x192xf32>
    %109 = arith.truncf %107 : vector<8x64xf32> to vector<8x64xbf16>
    %cst_47 = arith.constant dense<0.000000e+00> : vector<8x192xf32>
    %110 = tpu.matmul %109, %4, %cst_47 {dimension_numbers = #tpu.dot_dimension_numbers<[1], [0], [0], [1], [0, 0, 1, 1], [], []>} : vector<8x64xbf16>, vector<64x192xbf16>, vector<8x192xf32> -> vector<8x192xf32>
    %111 = vector.broadcast %1 : vector<1x192xf32> to vector<8x192xf32>
    %112 = arith.addf %110, %111 : vector<8x192xf32>
    %113 = vector.extract_strided_slice %108 {offsets = [0, 0], sizes = [8, 64], strides = [1, 1]} : vector<8x192xf32> to vector<8x64xf32>
    %114 = vector.extract_strided_slice %112 {offsets = [0, 0], sizes = [8, 64], strides = [1, 1]} : vector<8x192xf32> to vector<8x64xf32>
    %115 = arith.addf %113, %114 : vector<8x64xf32>
    %116 = arith.negf %115 : vector<8x64xf32>
    %117 = math.exp %116 : vector<8x64xf32>
    %cst_48 = arith.constant 1.000000e+00 : f32
    %118 = vector.broadcast %cst_48 : f32 to vector<8x64xf32>
    %119 = arith.addf %118, %117 : vector<8x64xf32>
    %120 = arith.divf %118, %119 : vector<8x64xf32>
    %121 = vector.extract_strided_slice %108 {offsets = [0, 64], sizes = [8, 64], strides = [1, 1]} : vector<8x192xf32> to vector<8x64xf32>
    %122 = vector.extract_strided_slice %112 {offsets = [0, 64], sizes = [8, 64], strides = [1, 1]} : vector<8x192xf32> to vector<8x64xf32>
    %123 = arith.addf %121, %122 : vector<8x64xf32>
    %124 = arith.negf %123 : vector<8x64xf32>
    %125 = math.exp %124 : vector<8x64xf32>
    %cst_49 = arith.constant 1.000000e+00 : f32
    %126 = vector.broadcast %cst_49 : f32 to vector<8x64xf32>
    %127 = arith.addf %126, %125 : vector<8x64xf32>
    %128 = arith.divf %126, %127 : vector<8x64xf32>
    %129 = vector.extract_strided_slice %108 {offsets = [0, 128], sizes = [8, 64], strides = [1, 1]} : vector<8x192xf32> to vector<8x64xf32>
    %130 = vector.extract_strided_slice %112 {offsets = [0, 128], sizes = [8, 64], strides = [1, 1]} : vector<8x192xf32> to vector<8x64xf32>
    %131 = arith.mulf %120, %130 : vector<8x64xf32>
    %132 = arith.addf %129, %131 : vector<8x64xf32>
    %133 = math.tanh %132 : vector<8x64xf32>
    %134 = arith.subf %107, %133 : vector<8x64xf32>
    %135 = arith.mulf %128, %134 : vector<8x64xf32>
    %136 = arith.addf %133, %135 : vector<8x64xf32>
    %137 = vector.extract_strided_slice %48 {offsets = [24, 0], sizes = [8, 192], strides = [1, 1]} : vector<64x192xf32> to vector<8x192xf32>
    %138 = arith.truncf %136 : vector<8x64xf32> to vector<8x64xbf16>
    %cst_50 = arith.constant dense<0.000000e+00> : vector<8x192xf32>
    %139 = tpu.matmul %138, %4, %cst_50 {dimension_numbers = #tpu.dot_dimension_numbers<[1], [0], [0], [1], [0, 0, 1, 1], [], []>} : vector<8x64xbf16>, vector<64x192xbf16>, vector<8x192xf32> -> vector<8x192xf32>
    %140 = vector.broadcast %1 : vector<1x192xf32> to vector<8x192xf32>
    %141 = arith.addf %139, %140 : vector<8x192xf32>
    %142 = vector.extract_strided_slice %137 {offsets = [0, 0], sizes = [8, 64], strides = [1, 1]} : vector<8x192xf32> to vector<8x64xf32>
    %143 = vector.extract_strided_slice %141 {offsets = [0, 0], sizes = [8, 64], strides = [1, 1]} : vector<8x192xf32> to vector<8x64xf32>
    %144 = arith.addf %142, %143 : vector<8x64xf32>
    %145 = arith.negf %144 : vector<8x64xf32>
    %146 = math.exp %145 : vector<8x64xf32>
    %cst_51 = arith.constant 1.000000e+00 : f32
    %147 = vector.broadcast %cst_51 : f32 to vector<8x64xf32>
    %148 = arith.addf %147, %146 : vector<8x64xf32>
    %149 = arith.divf %147, %148 : vector<8x64xf32>
    %150 = vector.extract_strided_slice %137 {offsets = [0, 64], sizes = [8, 64], strides = [1, 1]} : vector<8x192xf32> to vector<8x64xf32>
    %151 = vector.extract_strided_slice %141 {offsets = [0, 64], sizes = [8, 64], strides = [1, 1]} : vector<8x192xf32> to vector<8x64xf32>
    %152 = arith.addf %150, %151 : vector<8x64xf32>
    %153 = arith.negf %152 : vector<8x64xf32>
    %154 = math.exp %153 : vector<8x64xf32>
    %cst_52 = arith.constant 1.000000e+00 : f32
    %155 = vector.broadcast %cst_52 : f32 to vector<8x64xf32>
    %156 = arith.addf %155, %154 : vector<8x64xf32>
    %157 = arith.divf %155, %156 : vector<8x64xf32>
    %158 = vector.extract_strided_slice %137 {offsets = [0, 128], sizes = [8, 64], strides = [1, 1]} : vector<8x192xf32> to vector<8x64xf32>
    %159 = vector.extract_strided_slice %141 {offsets = [0, 128], sizes = [8, 64], strides = [1, 1]} : vector<8x192xf32> to vector<8x64xf32>
    %160 = arith.mulf %149, %159 : vector<8x64xf32>
    %161 = arith.addf %158, %160 : vector<8x64xf32>
    %162 = math.tanh %161 : vector<8x64xf32>
    %163 = arith.subf %136, %162 : vector<8x64xf32>
    %164 = arith.mulf %157, %163 : vector<8x64xf32>
    %165 = arith.addf %162, %164 : vector<8x64xf32>
    %166 = vector.extract_strided_slice %48 {offsets = [32, 0], sizes = [8, 192], strides = [1, 1]} : vector<64x192xf32> to vector<8x192xf32>
    %167 = arith.truncf %165 : vector<8x64xf32> to vector<8x64xbf16>
    %cst_53 = arith.constant dense<0.000000e+00> : vector<8x192xf32>
    %168 = tpu.matmul %167, %4, %cst_53 {dimension_numbers = #tpu.dot_dimension_numbers<[1], [0], [0], [1], [0, 0, 1, 1], [], []>} : vector<8x64xbf16>, vector<64x192xbf16>, vector<8x192xf32> -> vector<8x192xf32>
    %169 = vector.broadcast %1 : vector<1x192xf32> to vector<8x192xf32>
    %170 = arith.addf %168, %169 : vector<8x192xf32>
    %171 = vector.extract_strided_slice %166 {offsets = [0, 0], sizes = [8, 64], strides = [1, 1]} : vector<8x192xf32> to vector<8x64xf32>
    %172 = vector.extract_strided_slice %170 {offsets = [0, 0], sizes = [8, 64], strides = [1, 1]} : vector<8x192xf32> to vector<8x64xf32>
    %173 = arith.addf %171, %172 : vector<8x64xf32>
    %174 = arith.negf %173 : vector<8x64xf32>
    %175 = math.exp %174 : vector<8x64xf32>
    %cst_54 = arith.constant 1.000000e+00 : f32
    %176 = vector.broadcast %cst_54 : f32 to vector<8x64xf32>
    %177 = arith.addf %176, %175 : vector<8x64xf32>
    %178 = arith.divf %176, %177 : vector<8x64xf32>
    %179 = vector.extract_strided_slice %166 {offsets = [0, 64], sizes = [8, 64], strides = [1, 1]} : vector<8x192xf32> to vector<8x64xf32>
    %180 = vector.extract_strided_slice %170 {offsets = [0, 64], sizes = [8, 64], strides = [1, 1]} : vector<8x192xf32> to vector<8x64xf32>
    %181 = arith.addf %179, %180 : vector<8x64xf32>
    %182 = arith.negf %181 : vector<8x64xf32>
    %183 = math.exp %182 : vector<8x64xf32>
    %cst_55 = arith.constant 1.000000e+00 : f32
    %184 = vector.broadcast %cst_55 : f32 to vector<8x64xf32>
    %185 = arith.addf %184, %183 : vector<8x64xf32>
    %186 = arith.divf %184, %185 : vector<8x64xf32>
    %187 = vector.extract_strided_slice %166 {offsets = [0, 128], sizes = [8, 64], strides = [1, 1]} : vector<8x192xf32> to vector<8x64xf32>
    %188 = vector.extract_strided_slice %170 {offsets = [0, 128], sizes = [8, 64], strides = [1, 1]} : vector<8x192xf32> to vector<8x64xf32>
    %189 = arith.mulf %178, %188 : vector<8x64xf32>
    %190 = arith.addf %187, %189 : vector<8x64xf32>
    %191 = math.tanh %190 : vector<8x64xf32>
    %192 = arith.subf %165, %191 : vector<8x64xf32>
    %193 = arith.mulf %186, %192 : vector<8x64xf32>
    %194 = arith.addf %191, %193 : vector<8x64xf32>
    %195 = vector.extract_strided_slice %48 {offsets = [40, 0], sizes = [8, 192], strides = [1, 1]} : vector<64x192xf32> to vector<8x192xf32>
    %196 = arith.truncf %194 : vector<8x64xf32> to vector<8x64xbf16>
    %cst_56 = arith.constant dense<0.000000e+00> : vector<8x192xf32>
    %197 = tpu.matmul %196, %4, %cst_56 {dimension_numbers = #tpu.dot_dimension_numbers<[1], [0], [0], [1], [0, 0, 1, 1], [], []>} : vector<8x64xbf16>, vector<64x192xbf16>, vector<8x192xf32> -> vector<8x192xf32>
    %198 = vector.broadcast %1 : vector<1x192xf32> to vector<8x192xf32>
    %199 = arith.addf %197, %198 : vector<8x192xf32>
    %200 = vector.extract_strided_slice %195 {offsets = [0, 0], sizes = [8, 64], strides = [1, 1]} : vector<8x192xf32> to vector<8x64xf32>
    %201 = vector.extract_strided_slice %199 {offsets = [0, 0], sizes = [8, 64], strides = [1, 1]} : vector<8x192xf32> to vector<8x64xf32>
    %202 = arith.addf %200, %201 : vector<8x64xf32>
    %203 = arith.negf %202 : vector<8x64xf32>
    %204 = math.exp %203 : vector<8x64xf32>
    %cst_57 = arith.constant 1.000000e+00 : f32
    %205 = vector.broadcast %cst_57 : f32 to vector<8x64xf32>
    %206 = arith.addf %205, %204 : vector<8x64xf32>
    %207 = arith.divf %205, %206 : vector<8x64xf32>
    %208 = vector.extract_strided_slice %195 {offsets = [0, 64], sizes = [8, 64], strides = [1, 1]} : vector<8x192xf32> to vector<8x64xf32>
    %209 = vector.extract_strided_slice %199 {offsets = [0, 64], sizes = [8, 64], strides = [1, 1]} : vector<8x192xf32> to vector<8x64xf32>
    %210 = arith.addf %208, %209 : vector<8x64xf32>
    %211 = arith.negf %210 : vector<8x64xf32>
    %212 = math.exp %211 : vector<8x64xf32>
    %cst_58 = arith.constant 1.000000e+00 : f32
    %213 = vector.broadcast %cst_58 : f32 to vector<8x64xf32>
    %214 = arith.addf %213, %212 : vector<8x64xf32>
    %215 = arith.divf %213, %214 : vector<8x64xf32>
    %216 = vector.extract_strided_slice %195 {offsets = [0, 128], sizes = [8, 64], strides = [1, 1]} : vector<8x192xf32> to vector<8x64xf32>
    %217 = vector.extract_strided_slice %199 {offsets = [0, 128], sizes = [8, 64], strides = [1, 1]} : vector<8x192xf32> to vector<8x64xf32>
    %218 = arith.mulf %207, %217 : vector<8x64xf32>
    %219 = arith.addf %216, %218 : vector<8x64xf32>
    %220 = math.tanh %219 : vector<8x64xf32>
    %221 = arith.subf %194, %220 : vector<8x64xf32>
    %222 = arith.mulf %215, %221 : vector<8x64xf32>
    %223 = arith.addf %220, %222 : vector<8x64xf32>
    %224 = vector.extract_strided_slice %48 {offsets = [48, 0], sizes = [8, 192], strides = [1, 1]} : vector<64x192xf32> to vector<8x192xf32>
    %225 = arith.truncf %223 : vector<8x64xf32> to vector<8x64xbf16>
    %cst_59 = arith.constant dense<0.000000e+00> : vector<8x192xf32>
    %226 = tpu.matmul %225, %4, %cst_59 {dimension_numbers = #tpu.dot_dimension_numbers<[1], [0], [0], [1], [0, 0, 1, 1], [], []>} : vector<8x64xbf16>, vector<64x192xbf16>, vector<8x192xf32> -> vector<8x192xf32>
    %227 = vector.broadcast %1 : vector<1x192xf32> to vector<8x192xf32>
    %228 = arith.addf %226, %227 : vector<8x192xf32>
    %229 = vector.extract_strided_slice %224 {offsets = [0, 0], sizes = [8, 64], strides = [1, 1]} : vector<8x192xf32> to vector<8x64xf32>
    %230 = vector.extract_strided_slice %228 {offsets = [0, 0], sizes = [8, 64], strides = [1, 1]} : vector<8x192xf32> to vector<8x64xf32>
    %231 = arith.addf %229, %230 : vector<8x64xf32>
    %232 = arith.negf %231 : vector<8x64xf32>
    %233 = math.exp %232 : vector<8x64xf32>
    %cst_60 = arith.constant 1.000000e+00 : f32
    %234 = vector.broadcast %cst_60 : f32 to vector<8x64xf32>
    %235 = arith.addf %234, %233 : vector<8x64xf32>
    %236 = arith.divf %234, %235 : vector<8x64xf32>
    %237 = vector.extract_strided_slice %224 {offsets = [0, 64], sizes = [8, 64], strides = [1, 1]} : vector<8x192xf32> to vector<8x64xf32>
    %238 = vector.extract_strided_slice %228 {offsets = [0, 64], sizes = [8, 64], strides = [1, 1]} : vector<8x192xf32> to vector<8x64xf32>
    %239 = arith.addf %237, %238 : vector<8x64xf32>
    %240 = arith.negf %239 : vector<8x64xf32>
    %241 = math.exp %240 : vector<8x64xf32>
    %cst_61 = arith.constant 1.000000e+00 : f32
    %242 = vector.broadcast %cst_61 : f32 to vector<8x64xf32>
    %243 = arith.addf %242, %241 : vector<8x64xf32>
    %244 = arith.divf %242, %243 : vector<8x64xf32>
    %245 = vector.extract_strided_slice %224 {offsets = [0, 128], sizes = [8, 64], strides = [1, 1]} : vector<8x192xf32> to vector<8x64xf32>
    %246 = vector.extract_strided_slice %228 {offsets = [0, 128], sizes = [8, 64], strides = [1, 1]} : vector<8x192xf32> to vector<8x64xf32>
    %247 = arith.mulf %236, %246 : vector<8x64xf32>
    %248 = arith.addf %245, %247 : vector<8x64xf32>
    %249 = math.tanh %248 : vector<8x64xf32>
    %250 = arith.subf %223, %249 : vector<8x64xf32>
    %251 = arith.mulf %244, %250 : vector<8x64xf32>
    %252 = arith.addf %249, %251 : vector<8x64xf32>
    %253 = vector.extract_strided_slice %48 {offsets = [56, 0], sizes = [8, 192], strides = [1, 1]} : vector<64x192xf32> to vector<8x192xf32>
    %254 = arith.truncf %252 : vector<8x64xf32> to vector<8x64xbf16>
    %cst_62 = arith.constant dense<0.000000e+00> : vector<8x192xf32>
    %255 = tpu.matmul %254, %4, %cst_62 {dimension_numbers = #tpu.dot_dimension_numbers<[1], [0], [0], [1], [0, 0, 1, 1], [], []>} : vector<8x64xbf16>, vector<64x192xbf16>, vector<8x192xf32> -> vector<8x192xf32>
    %256 = vector.broadcast %1 : vector<1x192xf32> to vector<8x192xf32>
    %257 = arith.addf %255, %256 : vector<8x192xf32>
    %258 = vector.extract_strided_slice %253 {offsets = [0, 0], sizes = [8, 64], strides = [1, 1]} : vector<8x192xf32> to vector<8x64xf32>
    %259 = vector.extract_strided_slice %257 {offsets = [0, 0], sizes = [8, 64], strides = [1, 1]} : vector<8x192xf32> to vector<8x64xf32>
    %260 = arith.addf %258, %259 : vector<8x64xf32>
    %261 = arith.negf %260 : vector<8x64xf32>
    %262 = math.exp %261 : vector<8x64xf32>
    %cst_63 = arith.constant 1.000000e+00 : f32
    %263 = vector.broadcast %cst_63 : f32 to vector<8x64xf32>
    %264 = arith.addf %263, %262 : vector<8x64xf32>
    %265 = arith.divf %263, %264 : vector<8x64xf32>
    %266 = vector.extract_strided_slice %253 {offsets = [0, 64], sizes = [8, 64], strides = [1, 1]} : vector<8x192xf32> to vector<8x64xf32>
    %267 = vector.extract_strided_slice %257 {offsets = [0, 64], sizes = [8, 64], strides = [1, 1]} : vector<8x192xf32> to vector<8x64xf32>
    %268 = arith.addf %266, %267 : vector<8x64xf32>
    %269 = arith.negf %268 : vector<8x64xf32>
    %270 = math.exp %269 : vector<8x64xf32>
    %cst_64 = arith.constant 1.000000e+00 : f32
    %271 = vector.broadcast %cst_64 : f32 to vector<8x64xf32>
    %272 = arith.addf %271, %270 : vector<8x64xf32>
    %273 = arith.divf %271, %272 : vector<8x64xf32>
    %274 = vector.extract_strided_slice %253 {offsets = [0, 128], sizes = [8, 64], strides = [1, 1]} : vector<8x192xf32> to vector<8x64xf32>
    %275 = vector.extract_strided_slice %257 {offsets = [0, 128], sizes = [8, 64], strides = [1, 1]} : vector<8x192xf32> to vector<8x64xf32>
    %276 = arith.mulf %265, %275 : vector<8x64xf32>
    %277 = arith.addf %274, %276 : vector<8x64xf32>
    %278 = math.tanh %277 : vector<8x64xf32>
    %279 = arith.subf %252, %278 : vector<8x64xf32>
    %280 = arith.mulf %273, %279 : vector<8x64xf32>
    %281 = arith.addf %278, %280 : vector<8x64xf32>
    %c0_65 = arith.constant 0 : index
    %c0_66 = arith.constant 0 : index
    %282 = vector.load %arg2[%c0_65, %c0_66] : memref<64x2xf32, #tpu.memory_space<vmem>>, vector<64x2xf32>
    %c0_67 = arith.constant 0 : index
    %c0_68 = arith.constant 0 : index
    %283 = vector.load %arg3[%c0_67, %c0_68] : memref<64x1xf32, #tpu.memory_space<vmem>>, vector<64x1xf32>
    %284 = arith.truncf %282 : vector<64x2xf32> to vector<64x2xbf16>
    %cst_69 = arith.constant dense<0.000000e+00> : vector<64x64xf32>
    %285 = tpu.matmul %284, %11, %cst_69 {dimension_numbers = #tpu.dot_dimension_numbers<[1], [0], [0], [1], [0, 0, 1, 1], [], []>} : vector<64x2xbf16>, vector<2x64xbf16>, vector<64x64xf32> -> vector<64x64xf32>
    %286 = vector.broadcast %8 : vector<1x64xf32> to vector<64x64xf32>
    %287 = arith.addf %285, %286 : vector<64x64xf32>
    %cst_70 = arith.constant 0.000000e+00 : f32
    %288 = vector.broadcast %cst_70 : f32 to vector<64x64xf32>
    %289 = arith.maximumf %287, %288 : vector<64x64xf32>
    %290 = tpu.concatenate %281, %281, %281, %281, %281, %281, %281, %281 in 0 : vector<8x64xf32>, vector<8x64xf32>, vector<8x64xf32>, vector<8x64xf32>, vector<8x64xf32>, vector<8x64xf32>, vector<8x64xf32>, vector<8x64xf32> -> vector<64x64xf32>
    %291 = tpu.concatenate %289, %290 in 1 : vector<64x64xf32>, vector<64x64xf32> -> vector<64x128xf32>
    %292 = arith.truncf %291 : vector<64x128xf32> to vector<64x128xbf16>
    %cst_71 = arith.constant dense<0.000000e+00> : vector<64x1024xf32>
    %293 = tpu.matmul %292, %9, %cst_71 {dimension_numbers = #tpu.dot_dimension_numbers<[1], [0], [0], [1], [0, 0, 1, 1], [], []>} : vector<64x128xbf16>, vector<128x1024xbf16>, vector<64x1024xf32> -> vector<64x1024xf32>
    %294 = vector.broadcast %6 : vector<1x1024xf32> to vector<64x1024xf32>
    %295 = arith.addf %293, %294 : vector<64x1024xf32>
    %cst_72 = arith.constant 0.000000e+00 : f32
    %296 = vector.broadcast %cst_72 : f32 to vector<64x1024xf32>
    %297 = arith.maximumf %295, %296 : vector<64x1024xf32>
    %298 = arith.truncf %297 : vector<64x1024xf32> to vector<64x1024xbf16>
    %cst_73 = arith.constant dense<0.000000e+00> : vector<64x64xf32>
    %299 = tpu.matmul %298, %10, %cst_73 {dimension_numbers = #tpu.dot_dimension_numbers<[1], [0], [0], [1], [0, 0, 1, 1], [], []>} : vector<64x1024xbf16>, vector<1024x64xbf16>, vector<64x64xf32> -> vector<64x64xf32>
    %300 = vector.broadcast %7 : vector<1x64xf32> to vector<64x64xf32>
    %301 = arith.addf %299, %300 : vector<64x64xf32>
    %cst_74 = arith.constant 0.000000e+00 : f32
    %302 = vector.broadcast %cst_74 : f32 to vector<64x1xf32>
    %303 = arith.cmpf ogt, %283, %302 : vector<64x1xf32>
    %cst_75 = arith.constant -1.000000e+30 : f32
    %304 = vector.shape_cast %303 : vector<64x1xi1> to vector<64x1xi1>
    %305 = vector.broadcast %304 : vector<64x1xi1> to vector<64x64xi1>
    %306 = vector.broadcast %cst_75 : f32 to vector<64x64xf32>
    %307 = arith.select %305, %301, %306 : vector<64x64xi1>, vector<64x64xf32>
    %308 = vector.shape_cast %307 : vector<64x64xf32> to vector<8x8x64xf32>
    %cst_76 = arith.constant dense<0xFF800000> : vector<8x64xf32>
    %309 = vector.multi_reduction <maximumf>, %308, %cst_76 [1] : vector<8x8x64xf32> to vector<8x64xf32>
    %c0_77 = arith.constant 0 : index
    %c0_78 = arith.constant 0 : index
    %310 = vector.load %arg4[%c0_77, %c0_78] : memref<8x2xf32, #tpu.memory_space<vmem>>, vector<8x2xf32>
    %311 = arith.truncf %310 : vector<8x2xf32> to vector<8x2xbf16>
    %cst_79 = arith.constant dense<0.000000e+00> : vector<8x64xf32>
    %312 = tpu.matmul %311, %12, %cst_79 {dimension_numbers = #tpu.dot_dimension_numbers<[1], [0], [0], [1], [0, 0, 1, 1], [], []>} : vector<8x2xbf16>, vector<2x64xbf16>, vector<8x64xf32> -> vector<8x64xf32>
    %313 = vector.broadcast %13 : vector<1x64xf32> to vector<8x64xf32>
    %314 = arith.addf %312, %313 : vector<8x64xf32>
    %cst_80 = arith.constant 0.000000e+00 : f32
    %315 = vector.broadcast %cst_80 : f32 to vector<8x64xf32>
    %316 = arith.maximumf %314, %315 : vector<8x64xf32>
    %317 = arith.truncf %316 : vector<8x64xf32> to vector<8x64xbf16>
    %cst_81 = arith.constant dense<0.000000e+00> : vector<8x128xf32>
    %318 = tpu.matmul %317, %14, %cst_81 {dimension_numbers = #tpu.dot_dimension_numbers<[1], [0], [0], [1], [0, 0, 1, 1], [], []>} : vector<8x64xbf16>, vector<64x128xbf16>, vector<8x128xf32> -> vector<8x128xf32>
    %319 = vector.broadcast %15 : vector<1x128xf32> to vector<8x128xf32>
    %320 = arith.addf %318, %319 : vector<8x128xf32>
    %cst_82 = arith.constant 0.000000e+00 : f32
    %321 = vector.broadcast %cst_82 : f32 to vector<8x128xf32>
    %322 = arith.maximumf %320, %321 : vector<8x128xf32>
    %323 = arith.truncf %322 : vector<8x128xf32> to vector<8x128xbf16>
    %cst_83 = arith.constant dense<0.000000e+00> : vector<8x64xf32>
    %324 = tpu.matmul %323, %16, %cst_83 {dimension_numbers = #tpu.dot_dimension_numbers<[1], [0], [0], [1], [0, 0, 1, 1], [], []>} : vector<8x128xbf16>, vector<128x64xbf16>, vector<8x64xf32> -> vector<8x64xf32>
    %325 = vector.broadcast %17 : vector<1x64xf32> to vector<8x64xf32>
    %326 = arith.addf %324, %325 : vector<8x64xf32>
    %327 = tpu.concatenate %309, %326 in 1 : vector<8x64xf32>, vector<8x64xf32> -> vector<8x128xf32>
    %c0_84 = arith.constant 0 : index
    %c0_85 = arith.constant 0 : index
    %328 = vector.load %arg0[%c0_84, %c0_85] : memref<8x16xf32, #tpu.memory_space<vmem>>, vector<8x16xf32>
    %c0_86 = arith.constant 0 : index
    %c0_87 = arith.constant 0 : index
    %329 = vector.load %arg5[%c0_86, %c0_87] : memref<8x22xf32, #tpu.memory_space<vmem>>, vector<8x22xf32>
    %cst_88 = arith.constant 0.000000e+00 : f32
    %330 = vector.broadcast %cst_88 : f32 to vector<8x16xf32>
    %cst_89 = arith.constant 0.000000e+00 : f32
    %331 = vector.broadcast %cst_89 : f32 to vector<8x22xf32>
    %c0_90 = arith.constant 0 : index
    %c0_91 = arith.constant 0 : index
    %c0_92 = arith.constant 0 : index
    %332 = vector.load %arg19[%c0_90, %c0_91, %c0_92] : memref<2x6x32xbf16, #tpu.memory_space<vmem>>, vector<1x6x32xbf16>
    %333 = vector.shape_cast %332 : vector<1x6x32xbf16> to vector<6x32xbf16>
    %c0_93 = arith.constant 0 : index
    %c0_94 = arith.constant 0 : index
    %c0_95 = arith.constant 0 : index
    %334 = vector.load %arg16[%c0_93, %c0_94, %c0_95] : memref<2x1x32xf32, #tpu.memory_space<vmem>>, vector<1x1x32xf32>
    %335 = vector.shape_cast %334 : vector<1x1x32xf32> to vector<1x32xf32>
    %c0_96 = arith.constant 0 : index
    %c0_97 = arith.constant 0 : index
    %c0_98 = arith.constant 0 : index
    %336 = vector.load %arg21[%c0_96, %c0_97, %c0_98] : memref<2x32x288xbf16, #tpu.memory_space<vmem>>, vector<1x32x288xbf16>
    %337 = vector.shape_cast %336 : vector<1x32x288xbf16> to vector<32x288xbf16>
    %c0_99 = arith.constant 0 : index
    %c0_100 = arith.constant 0 : index
    %c0_101 = arith.constant 0 : index
    %338 = vector.load %arg18[%c0_99, %c0_100, %c0_101] : memref<2x1x288xf32, #tpu.memory_space<vmem>>, vector<1x1x288xf32>
    %339 = vector.shape_cast %338 : vector<1x1x288xf32> to vector<1x288xf32>
    %c0_102 = arith.constant 0 : index
    %c0_103 = arith.constant 0 : index
    %c0_104 = arith.constant 0 : index
    %340 = vector.load %arg20[%c0_102, %c0_103, %c0_104] : memref<2x96x288xbf16, #tpu.memory_space<vmem>>, vector<1x96x288xbf16>
    %341 = vector.shape_cast %340 : vector<1x96x288xbf16> to vector<96x288xbf16>
    %c0_105 = arith.constant 0 : index
    %c0_106 = arith.constant 0 : index
    %c0_107 = arith.constant 0 : index
    %342 = vector.load %arg17[%c0_105, %c0_106, %c0_107] : memref<2x1x288xf32, #tpu.memory_space<vmem>>, vector<1x1x288xf32>
    %343 = vector.shape_cast %342 : vector<1x1x288xf32> to vector<1x288xf32>
    %344 = arith.subf %328, %330 : vector<8x16xf32>
    %cst_108 = arith.constant 0.000000e+00 : f32
    %345 = vector.broadcast %cst_108 : f32 to vector<8x2xf32>
    %346 = tpu.concatenate %345, %344, %345 in 1 : vector<8x2xf32>, vector<8x16xf32>, vector<8x2xf32> -> vector<8x20xf32>
    %347 = vector.extract_strided_slice %346 {offsets = [0, 0], sizes = [8, 6], strides = [1, 1]} : vector<8x20xf32> to vector<8x6xf32>
    %348 = vector.extract_strided_slice %346 {offsets = [0, 2], sizes = [8, 6], strides = [1, 1]} : vector<8x20xf32> to vector<8x6xf32>
    %349 = vector.extract_strided_slice %346 {offsets = [0, 4], sizes = [8, 6], strides = [1, 1]} : vector<8x20xf32> to vector<8x6xf32>
    %350 = vector.extract_strided_slice %346 {offsets = [0, 6], sizes = [8, 6], strides = [1, 1]} : vector<8x20xf32> to vector<8x6xf32>
    %351 = vector.extract_strided_slice %346 {offsets = [0, 8], sizes = [8, 6], strides = [1, 1]} : vector<8x20xf32> to vector<8x6xf32>
    %352 = vector.extract_strided_slice %346 {offsets = [0, 10], sizes = [8, 6], strides = [1, 1]} : vector<8x20xf32> to vector<8x6xf32>
    %353 = vector.extract_strided_slice %346 {offsets = [0, 12], sizes = [8, 6], strides = [1, 1]} : vector<8x20xf32> to vector<8x6xf32>
    %354 = vector.extract_strided_slice %346 {offsets = [0, 14], sizes = [8, 6], strides = [1, 1]} : vector<8x20xf32> to vector<8x6xf32>
    %355 = vector.shape_cast %347 : vector<8x6xf32> to vector<1x8x6xf32>
    %356 = vector.shape_cast %348 : vector<8x6xf32> to vector<1x8x6xf32>
    %357 = vector.shape_cast %349 : vector<8x6xf32> to vector<1x8x6xf32>
    %358 = vector.shape_cast %350 : vector<8x6xf32> to vector<1x8x6xf32>
    %359 = vector.shape_cast %351 : vector<8x6xf32> to vector<1x8x6xf32>
    %360 = vector.shape_cast %352 : vector<8x6xf32> to vector<1x8x6xf32>
    %361 = vector.shape_cast %353 : vector<8x6xf32> to vector<1x8x6xf32>
    %362 = vector.shape_cast %354 : vector<8x6xf32> to vector<1x8x6xf32>
    %363 = tpu.concatenate %355, %356, %357, %358, %359, %360, %361, %362 in 0 : vector<1x8x6xf32>, vector<1x8x6xf32>, vector<1x8x6xf32>, vector<1x8x6xf32>, vector<1x8x6xf32>, vector<1x8x6xf32>, vector<1x8x6xf32>, vector<1x8x6xf32> -> vector<8x8x6xf32>
    %364 = vector.shape_cast %363 : vector<8x8x6xf32> to vector<64x6xf32>
    %365 = arith.truncf %364 : vector<64x6xf32> to vector<64x6xbf16>
    %cst_109 = arith.constant dense<0.000000e+00> : vector<64x32xf32>
    %366 = tpu.matmul %365, %333, %cst_109 {dimension_numbers = #tpu.dot_dimension_numbers<[1], [0], [0], [1], [0, 0, 1, 1], [], []>} : vector<64x6xbf16>, vector<6x32xbf16>, vector<64x32xf32> -> vector<64x32xf32>
    %367 = vector.broadcast %335 : vector<1x32xf32> to vector<64x32xf32>
    %368 = arith.addf %366, %367 : vector<64x32xf32>
    %cst_110 = arith.constant 0.000000e+00 : f32
    %369 = vector.broadcast %cst_110 : f32 to vector<64x32xf32>
    %370 = arith.maximumf %368, %369 : vector<64x32xf32>
    %371 = arith.truncf %370 : vector<64x32xf32> to vector<64x32xbf16>
    %cst_111 = arith.constant dense<0.000000e+00> : vector<64x288xf32>
    %372 = tpu.matmul %371, %337, %cst_111 {dimension_numbers = #tpu.dot_dimension_numbers<[1], [0], [0], [1], [0, 0, 1, 1], [], []>} : vector<64x32xbf16>, vector<32x288xbf16>, vector<64x288xf32> -> vector<64x288xf32>
    %373 = vector.broadcast %339 : vector<1x288xf32> to vector<64x288xf32>
    %374 = arith.addf %372, %373 : vector<64x288xf32>
    %cst_112 = arith.constant 0.000000e+00 : f32
    %375 = vector.broadcast %cst_112 : f32 to vector<8x96xf32>
    %376 = vector.extract_strided_slice %374 {offsets = [0, 0], sizes = [8, 288], strides = [1, 1]} : vector<64x288xf32> to vector<8x288xf32>
    %377 = arith.truncf %375 : vector<8x96xf32> to vector<8x96xbf16>
    %cst_113 = arith.constant dense<0.000000e+00> : vector<8x288xf32>
    %378 = tpu.matmul %377, %341, %cst_113 {dimension_numbers = #tpu.dot_dimension_numbers<[1], [0], [0], [1], [0, 0, 1, 1], [], []>} : vector<8x96xbf16>, vector<96x288xbf16>, vector<8x288xf32> -> vector<8x288xf32>
    %379 = vector.broadcast %343 : vector<1x288xf32> to vector<8x288xf32>
    %380 = arith.addf %378, %379 : vector<8x288xf32>
    %381 = vector.extract_strided_slice %376 {offsets = [0, 0], sizes = [8, 96], strides = [1, 1]} : vector<8x288xf32> to vector<8x96xf32>
    %382 = vector.extract_strided_slice %380 {offsets = [0, 0], sizes = [8, 96], strides = [1, 1]} : vector<8x288xf32> to vector<8x96xf32>
    %383 = arith.addf %381, %382 : vector<8x96xf32>
    %384 = arith.negf %383 : vector<8x96xf32>
    %385 = math.exp %384 : vector<8x96xf32>
    %cst_114 = arith.constant 1.000000e+00 : f32
    %386 = vector.broadcast %cst_114 : f32 to vector<8x96xf32>
    %387 = arith.addf %386, %385 : vector<8x96xf32>
    %388 = arith.divf %386, %387 : vector<8x96xf32>
    %389 = vector.extract_strided_slice %376 {offsets = [0, 96], sizes = [8, 96], strides = [1, 1]} : vector<8x288xf32> to vector<8x96xf32>
    %390 = vector.extract_strided_slice %380 {offsets = [0, 96], sizes = [8, 96], strides = [1, 1]} : vector<8x288xf32> to vector<8x96xf32>
    %391 = arith.addf %389, %390 : vector<8x96xf32>
    %392 = arith.negf %391 : vector<8x96xf32>
    %393 = math.exp %392 : vector<8x96xf32>
    %cst_115 = arith.constant 1.000000e+00 : f32
    %394 = vector.broadcast %cst_115 : f32 to vector<8x96xf32>
    %395 = arith.addf %394, %393 : vector<8x96xf32>
    %396 = arith.divf %394, %395 : vector<8x96xf32>
    %397 = vector.extract_strided_slice %376 {offsets = [0, 192], sizes = [8, 96], strides = [1, 1]} : vector<8x288xf32> to vector<8x96xf32>
    %398 = vector.extract_strided_slice %380 {offsets = [0, 192], sizes = [8, 96], strides = [1, 1]} : vector<8x288xf32> to vector<8x96xf32>
    %399 = arith.mulf %388, %398 : vector<8x96xf32>
    %400 = arith.addf %397, %399 : vector<8x96xf32>
    %401 = math.tanh %400 : vector<8x96xf32>
    %402 = arith.subf %375, %401 : vector<8x96xf32>
    %403 = arith.mulf %396, %402 : vector<8x96xf32>
    %404 = arith.addf %401, %403 : vector<8x96xf32>
    %405 = vector.extract_strided_slice %374 {offsets = [8, 0], sizes = [8, 288], strides = [1, 1]} : vector<64x288xf32> to vector<8x288xf32>
    %406 = arith.truncf %404 : vector<8x96xf32> to vector<8x96xbf16>
    %cst_116 = arith.constant dense<0.000000e+00> : vector<8x288xf32>
    %407 = tpu.matmul %406, %341, %cst_116 {dimension_numbers = #tpu.dot_dimension_numbers<[1], [0], [0], [1], [0, 0, 1, 1], [], []>} : vector<8x96xbf16>, vector<96x288xbf16>, vector<8x288xf32> -> vector<8x288xf32>
    %408 = vector.broadcast %343 : vector<1x288xf32> to vector<8x288xf32>
    %409 = arith.addf %407, %408 : vector<8x288xf32>
    %410 = vector.extract_strided_slice %405 {offsets = [0, 0], sizes = [8, 96], strides = [1, 1]} : vector<8x288xf32> to vector<8x96xf32>
    %411 = vector.extract_strided_slice %409 {offsets = [0, 0], sizes = [8, 96], strides = [1, 1]} : vector<8x288xf32> to vector<8x96xf32>
    %412 = arith.addf %410, %411 : vector<8x96xf32>
    %413 = arith.negf %412 : vector<8x96xf32>
    %414 = math.exp %413 : vector<8x96xf32>
    %cst_117 = arith.constant 1.000000e+00 : f32
    %415 = vector.broadcast %cst_117 : f32 to vector<8x96xf32>
    %416 = arith.addf %415, %414 : vector<8x96xf32>
    %417 = arith.divf %415, %416 : vector<8x96xf32>
    %418 = vector.extract_strided_slice %405 {offsets = [0, 96], sizes = [8, 96], strides = [1, 1]} : vector<8x288xf32> to vector<8x96xf32>
    %419 = vector.extract_strided_slice %409 {offsets = [0, 96], sizes = [8, 96], strides = [1, 1]} : vector<8x288xf32> to vector<8x96xf32>
    %420 = arith.addf %418, %419 : vector<8x96xf32>
    %421 = arith.negf %420 : vector<8x96xf32>
    %422 = math.exp %421 : vector<8x96xf32>
    %cst_118 = arith.constant 1.000000e+00 : f32
    %423 = vector.broadcast %cst_118 : f32 to vector<8x96xf32>
    %424 = arith.addf %423, %422 : vector<8x96xf32>
    %425 = arith.divf %423, %424 : vector<8x96xf32>
    %426 = vector.extract_strided_slice %405 {offsets = [0, 192], sizes = [8, 96], strides = [1, 1]} : vector<8x288xf32> to vector<8x96xf32>
    %427 = vector.extract_strided_slice %409 {offsets = [0, 192], sizes = [8, 96], strides = [1, 1]} : vector<8x288xf32> to vector<8x96xf32>
    %428 = arith.mulf %417, %427 : vector<8x96xf32>
    %429 = arith.addf %426, %428 : vector<8x96xf32>
    %430 = math.tanh %429 : vector<8x96xf32>
    %431 = arith.subf %404, %430 : vector<8x96xf32>
    %432 = arith.mulf %425, %431 : vector<8x96xf32>
    %433 = arith.addf %430, %432 : vector<8x96xf32>
    %434 = vector.extract_strided_slice %374 {offsets = [16, 0], sizes = [8, 288], strides = [1, 1]} : vector<64x288xf32> to vector<8x288xf32>
    %435 = arith.truncf %433 : vector<8x96xf32> to vector<8x96xbf16>
    %cst_119 = arith.constant dense<0.000000e+00> : vector<8x288xf32>
    %436 = tpu.matmul %435, %341, %cst_119 {dimension_numbers = #tpu.dot_dimension_numbers<[1], [0], [0], [1], [0, 0, 1, 1], [], []>} : vector<8x96xbf16>, vector<96x288xbf16>, vector<8x288xf32> -> vector<8x288xf32>
    %437 = vector.broadcast %343 : vector<1x288xf32> to vector<8x288xf32>
    %438 = arith.addf %436, %437 : vector<8x288xf32>
    %439 = vector.extract_strided_slice %434 {offsets = [0, 0], sizes = [8, 96], strides = [1, 1]} : vector<8x288xf32> to vector<8x96xf32>
    %440 = vector.extract_strided_slice %438 {offsets = [0, 0], sizes = [8, 96], strides = [1, 1]} : vector<8x288xf32> to vector<8x96xf32>
    %441 = arith.addf %439, %440 : vector<8x96xf32>
    %442 = arith.negf %441 : vector<8x96xf32>
    %443 = math.exp %442 : vector<8x96xf32>
    %cst_120 = arith.constant 1.000000e+00 : f32
    %444 = vector.broadcast %cst_120 : f32 to vector<8x96xf32>
    %445 = arith.addf %444, %443 : vector<8x96xf32>
    %446 = arith.divf %444, %445 : vector<8x96xf32>
    %447 = vector.extract_strided_slice %434 {offsets = [0, 96], sizes = [8, 96], strides = [1, 1]} : vector<8x288xf32> to vector<8x96xf32>
    %448 = vector.extract_strided_slice %438 {offsets = [0, 96], sizes = [8, 96], strides = [1, 1]} : vector<8x288xf32> to vector<8x96xf32>
    %449 = arith.addf %447, %448 : vector<8x96xf32>
    %450 = arith.negf %449 : vector<8x96xf32>
    %451 = math.exp %450 : vector<8x96xf32>
    %cst_121 = arith.constant 1.000000e+00 : f32
    %452 = vector.broadcast %cst_121 : f32 to vector<8x96xf32>
    %453 = arith.addf %452, %451 : vector<8x96xf32>
    %454 = arith.divf %452, %453 : vector<8x96xf32>
    %455 = vector.extract_strided_slice %434 {offsets = [0, 192], sizes = [8, 96], strides = [1, 1]} : vector<8x288xf32> to vector<8x96xf32>
    %456 = vector.extract_strided_slice %438 {offsets = [0, 192], sizes = [8, 96], strides = [1, 1]} : vector<8x288xf32> to vector<8x96xf32>
    %457 = arith.mulf %446, %456 : vector<8x96xf32>
    %458 = arith.addf %455, %457 : vector<8x96xf32>
    %459 = math.tanh %458 : vector<8x96xf32>
    %460 = arith.subf %433, %459 : vector<8x96xf32>
    %461 = arith.mulf %454, %460 : vector<8x96xf32>
    %462 = arith.addf %459, %461 : vector<8x96xf32>
    %463 = vector.extract_strided_slice %374 {offsets = [24, 0], sizes = [8, 288], strides = [1, 1]} : vector<64x288xf32> to vector<8x288xf32>
    %464 = arith.truncf %462 : vector<8x96xf32> to vector<8x96xbf16>
    %cst_122 = arith.constant dense<0.000000e+00> : vector<8x288xf32>
    %465 = tpu.matmul %464, %341, %cst_122 {dimension_numbers = #tpu.dot_dimension_numbers<[1], [0], [0], [1], [0, 0, 1, 1], [], []>} : vector<8x96xbf16>, vector<96x288xbf16>, vector<8x288xf32> -> vector<8x288xf32>
    %466 = vector.broadcast %343 : vector<1x288xf32> to vector<8x288xf32>
    %467 = arith.addf %465, %466 : vector<8x288xf32>
    %468 = vector.extract_strided_slice %463 {offsets = [0, 0], sizes = [8, 96], strides = [1, 1]} : vector<8x288xf32> to vector<8x96xf32>
    %469 = vector.extract_strided_slice %467 {offsets = [0, 0], sizes = [8, 96], strides = [1, 1]} : vector<8x288xf32> to vector<8x96xf32>
    %470 = arith.addf %468, %469 : vector<8x96xf32>
    %471 = arith.negf %470 : vector<8x96xf32>
    %472 = math.exp %471 : vector<8x96xf32>
    %cst_123 = arith.constant 1.000000e+00 : f32
    %473 = vector.broadcast %cst_123 : f32 to vector<8x96xf32>
    %474 = arith.addf %473, %472 : vector<8x96xf32>
    %475 = arith.divf %473, %474 : vector<8x96xf32>
    %476 = vector.extract_strided_slice %463 {offsets = [0, 96], sizes = [8, 96], strides = [1, 1]} : vector<8x288xf32> to vector<8x96xf32>
    %477 = vector.extract_strided_slice %467 {offsets = [0, 96], sizes = [8, 96], strides = [1, 1]} : vector<8x288xf32> to vector<8x96xf32>
    %478 = arith.addf %476, %477 : vector<8x96xf32>
    %479 = arith.negf %478 : vector<8x96xf32>
    %480 = math.exp %479 : vector<8x96xf32>
    %cst_124 = arith.constant 1.000000e+00 : f32
    %481 = vector.broadcast %cst_124 : f32 to vector<8x96xf32>
    %482 = arith.addf %481, %480 : vector<8x96xf32>
    %483 = arith.divf %481, %482 : vector<8x96xf32>
    %484 = vector.extract_strided_slice %463 {offsets = [0, 192], sizes = [8, 96], strides = [1, 1]} : vector<8x288xf32> to vector<8x96xf32>
    %485 = vector.extract_strided_slice %467 {offsets = [0, 192], sizes = [8, 96], strides = [1, 1]} : vector<8x288xf32> to vector<8x96xf32>
    %486 = arith.mulf %475, %485 : vector<8x96xf32>
    %487 = arith.addf %484, %486 : vector<8x96xf32>
    %488 = math.tanh %487 : vector<8x96xf32>
    %489 = arith.subf %462, %488 : vector<8x96xf32>
    %490 = arith.mulf %483, %489 : vector<8x96xf32>
    %491 = arith.addf %488, %490 : vector<8x96xf32>
    %492 = vector.extract_strided_slice %374 {offsets = [32, 0], sizes = [8, 288], strides = [1, 1]} : vector<64x288xf32> to vector<8x288xf32>
    %493 = arith.truncf %491 : vector<8x96xf32> to vector<8x96xbf16>
    %cst_125 = arith.constant dense<0.000000e+00> : vector<8x288xf32>
    %494 = tpu.matmul %493, %341, %cst_125 {dimension_numbers = #tpu.dot_dimension_numbers<[1], [0], [0], [1], [0, 0, 1, 1], [], []>} : vector<8x96xbf16>, vector<96x288xbf16>, vector<8x288xf32> -> vector<8x288xf32>
    %495 = vector.broadcast %343 : vector<1x288xf32> to vector<8x288xf32>
    %496 = arith.addf %494, %495 : vector<8x288xf32>
    %497 = vector.extract_strided_slice %492 {offsets = [0, 0], sizes = [8, 96], strides = [1, 1]} : vector<8x288xf32> to vector<8x96xf32>
    %498 = vector.extract_strided_slice %496 {offsets = [0, 0], sizes = [8, 96], strides = [1, 1]} : vector<8x288xf32> to vector<8x96xf32>
    %499 = arith.addf %497, %498 : vector<8x96xf32>
    %500 = arith.negf %499 : vector<8x96xf32>
    %501 = math.exp %500 : vector<8x96xf32>
    %cst_126 = arith.constant 1.000000e+00 : f32
    %502 = vector.broadcast %cst_126 : f32 to vector<8x96xf32>
    %503 = arith.addf %502, %501 : vector<8x96xf32>
    %504 = arith.divf %502, %503 : vector<8x96xf32>
    %505 = vector.extract_strided_slice %492 {offsets = [0, 96], sizes = [8, 96], strides = [1, 1]} : vector<8x288xf32> to vector<8x96xf32>
    %506 = vector.extract_strided_slice %496 {offsets = [0, 96], sizes = [8, 96], strides = [1, 1]} : vector<8x288xf32> to vector<8x96xf32>
    %507 = arith.addf %505, %506 : vector<8x96xf32>
    %508 = arith.negf %507 : vector<8x96xf32>
    %509 = math.exp %508 : vector<8x96xf32>
    %cst_127 = arith.constant 1.000000e+00 : f32
    %510 = vector.broadcast %cst_127 : f32 to vector<8x96xf32>
    %511 = arith.addf %510, %509 : vector<8x96xf32>
    %512 = arith.divf %510, %511 : vector<8x96xf32>
    %513 = vector.extract_strided_slice %492 {offsets = [0, 192], sizes = [8, 96], strides = [1, 1]} : vector<8x288xf32> to vector<8x96xf32>
    %514 = vector.extract_strided_slice %496 {offsets = [0, 192], sizes = [8, 96], strides = [1, 1]} : vector<8x288xf32> to vector<8x96xf32>
    %515 = arith.mulf %504, %514 : vector<8x96xf32>
    %516 = arith.addf %513, %515 : vector<8x96xf32>
    %517 = math.tanh %516 : vector<8x96xf32>
    %518 = arith.subf %491, %517 : vector<8x96xf32>
    %519 = arith.mulf %512, %518 : vector<8x96xf32>
    %520 = arith.addf %517, %519 : vector<8x96xf32>
    %521 = vector.extract_strided_slice %374 {offsets = [40, 0], sizes = [8, 288], strides = [1, 1]} : vector<64x288xf32> to vector<8x288xf32>
    %522 = arith.truncf %520 : vector<8x96xf32> to vector<8x96xbf16>
    %cst_128 = arith.constant dense<0.000000e+00> : vector<8x288xf32>
    %523 = tpu.matmul %522, %341, %cst_128 {dimension_numbers = #tpu.dot_dimension_numbers<[1], [0], [0], [1], [0, 0, 1, 1], [], []>} : vector<8x96xbf16>, vector<96x288xbf16>, vector<8x288xf32> -> vector<8x288xf32>
    %524 = vector.broadcast %343 : vector<1x288xf32> to vector<8x288xf32>
    %525 = arith.addf %523, %524 : vector<8x288xf32>
    %526 = vector.extract_strided_slice %521 {offsets = [0, 0], sizes = [8, 96], strides = [1, 1]} : vector<8x288xf32> to vector<8x96xf32>
    %527 = vector.extract_strided_slice %525 {offsets = [0, 0], sizes = [8, 96], strides = [1, 1]} : vector<8x288xf32> to vector<8x96xf32>
    %528 = arith.addf %526, %527 : vector<8x96xf32>
    %529 = arith.negf %528 : vector<8x96xf32>
    %530 = math.exp %529 : vector<8x96xf32>
    %cst_129 = arith.constant 1.000000e+00 : f32
    %531 = vector.broadcast %cst_129 : f32 to vector<8x96xf32>
    %532 = arith.addf %531, %530 : vector<8x96xf32>
    %533 = arith.divf %531, %532 : vector<8x96xf32>
    %534 = vector.extract_strided_slice %521 {offsets = [0, 96], sizes = [8, 96], strides = [1, 1]} : vector<8x288xf32> to vector<8x96xf32>
    %535 = vector.extract_strided_slice %525 {offsets = [0, 96], sizes = [8, 96], strides = [1, 1]} : vector<8x288xf32> to vector<8x96xf32>
    %536 = arith.addf %534, %535 : vector<8x96xf32>
    %537 = arith.negf %536 : vector<8x96xf32>
    %538 = math.exp %537 : vector<8x96xf32>
    %cst_130 = arith.constant 1.000000e+00 : f32
    %539 = vector.broadcast %cst_130 : f32 to vector<8x96xf32>
    %540 = arith.addf %539, %538 : vector<8x96xf32>
    %541 = arith.divf %539, %540 : vector<8x96xf32>
    %542 = vector.extract_strided_slice %521 {offsets = [0, 192], sizes = [8, 96], strides = [1, 1]} : vector<8x288xf32> to vector<8x96xf32>
    %543 = vector.extract_strided_slice %525 {offsets = [0, 192], sizes = [8, 96], strides = [1, 1]} : vector<8x288xf32> to vector<8x96xf32>
    %544 = arith.mulf %533, %543 : vector<8x96xf32>
    %545 = arith.addf %542, %544 : vector<8x96xf32>
    %546 = math.tanh %545 : vector<8x96xf32>
    %547 = arith.subf %520, %546 : vector<8x96xf32>
    %548 = arith.mulf %541, %547 : vector<8x96xf32>
    %549 = arith.addf %546, %548 : vector<8x96xf32>
    %550 = vector.extract_strided_slice %374 {offsets = [48, 0], sizes = [8, 288], strides = [1, 1]} : vector<64x288xf32> to vector<8x288xf32>
    %551 = arith.truncf %549 : vector<8x96xf32> to vector<8x96xbf16>
    %cst_131 = arith.constant dense<0.000000e+00> : vector<8x288xf32>
    %552 = tpu.matmul %551, %341, %cst_131 {dimension_numbers = #tpu.dot_dimension_numbers<[1], [0], [0], [1], [0, 0, 1, 1], [], []>} : vector<8x96xbf16>, vector<96x288xbf16>, vector<8x288xf32> -> vector<8x288xf32>
    %553 = vector.broadcast %343 : vector<1x288xf32> to vector<8x288xf32>
    %554 = arith.addf %552, %553 : vector<8x288xf32>
    %555 = vector.extract_strided_slice %550 {offsets = [0, 0], sizes = [8, 96], strides = [1, 1]} : vector<8x288xf32> to vector<8x96xf32>
    %556 = vector.extract_strided_slice %554 {offsets = [0, 0], sizes = [8, 96], strides = [1, 1]} : vector<8x288xf32> to vector<8x96xf32>
    %557 = arith.addf %555, %556 : vector<8x96xf32>
    %558 = arith.negf %557 : vector<8x96xf32>
    %559 = math.exp %558 : vector<8x96xf32>
    %cst_132 = arith.constant 1.000000e+00 : f32
    %560 = vector.broadcast %cst_132 : f32 to vector<8x96xf32>
    %561 = arith.addf %560, %559 : vector<8x96xf32>
    %562 = arith.divf %560, %561 : vector<8x96xf32>
    %563 = vector.extract_strided_slice %550 {offsets = [0, 96], sizes = [8, 96], strides = [1, 1]} : vector<8x288xf32> to vector<8x96xf32>
    %564 = vector.extract_strided_slice %554 {offsets = [0, 96], sizes = [8, 96], strides = [1, 1]} : vector<8x288xf32> to vector<8x96xf32>
    %565 = arith.addf %563, %564 : vector<8x96xf32>
    %566 = arith.negf %565 : vector<8x96xf32>
    %567 = math.exp %566 : vector<8x96xf32>
    %cst_133 = arith.constant 1.000000e+00 : f32
    %568 = vector.broadcast %cst_133 : f32 to vector<8x96xf32>
    %569 = arith.addf %568, %567 : vector<8x96xf32>
    %570 = arith.divf %568, %569 : vector<8x96xf32>
    %571 = vector.extract_strided_slice %550 {offsets = [0, 192], sizes = [8, 96], strides = [1, 1]} : vector<8x288xf32> to vector<8x96xf32>
    %572 = vector.extract_strided_slice %554 {offsets = [0, 192], sizes = [8, 96], strides = [1, 1]} : vector<8x288xf32> to vector<8x96xf32>
    %573 = arith.mulf %562, %572 : vector<8x96xf32>
    %574 = arith.addf %571, %573 : vector<8x96xf32>
    %575 = math.tanh %574 : vector<8x96xf32>
    %576 = arith.subf %549, %575 : vector<8x96xf32>
    %577 = arith.mulf %570, %576 : vector<8x96xf32>
    %578 = arith.addf %575, %577 : vector<8x96xf32>
    %579 = vector.extract_strided_slice %374 {offsets = [56, 0], sizes = [8, 288], strides = [1, 1]} : vector<64x288xf32> to vector<8x288xf32>
    %580 = arith.truncf %578 : vector<8x96xf32> to vector<8x96xbf16>
    %cst_134 = arith.constant dense<0.000000e+00> : vector<8x288xf32>
    %581 = tpu.matmul %580, %341, %cst_134 {dimension_numbers = #tpu.dot_dimension_numbers<[1], [0], [0], [1], [0, 0, 1, 1], [], []>} : vector<8x96xbf16>, vector<96x288xbf16>, vector<8x288xf32> -> vector<8x288xf32>
    %582 = vector.broadcast %343 : vector<1x288xf32> to vector<8x288xf32>
    %583 = arith.addf %581, %582 : vector<8x288xf32>
    %584 = vector.extract_strided_slice %579 {offsets = [0, 0], sizes = [8, 96], strides = [1, 1]} : vector<8x288xf32> to vector<8x96xf32>
    %585 = vector.extract_strided_slice %583 {offsets = [0, 0], sizes = [8, 96], strides = [1, 1]} : vector<8x288xf32> to vector<8x96xf32>
    %586 = arith.addf %584, %585 : vector<8x96xf32>
    %587 = arith.negf %586 : vector<8x96xf32>
    %588 = math.exp %587 : vector<8x96xf32>
    %cst_135 = arith.constant 1.000000e+00 : f32
    %589 = vector.broadcast %cst_135 : f32 to vector<8x96xf32>
    %590 = arith.addf %589, %588 : vector<8x96xf32>
    %591 = arith.divf %589, %590 : vector<8x96xf32>
    %592 = vector.extract_strided_slice %579 {offsets = [0, 96], sizes = [8, 96], strides = [1, 1]} : vector<8x288xf32> to vector<8x96xf32>
    %593 = vector.extract_strided_slice %583 {offsets = [0, 96], sizes = [8, 96], strides = [1, 1]} : vector<8x288xf32> to vector<8x96xf32>
    %594 = arith.addf %592, %593 : vector<8x96xf32>
    %595 = arith.negf %594 : vector<8x96xf32>
    %596 = math.exp %595 : vector<8x96xf32>
    %cst_136 = arith.constant 1.000000e+00 : f32
    %597 = vector.broadcast %cst_136 : f32 to vector<8x96xf32>
    %598 = arith.addf %597, %596 : vector<8x96xf32>
    %599 = arith.divf %597, %598 : vector<8x96xf32>
    %600 = vector.extract_strided_slice %579 {offsets = [0, 192], sizes = [8, 96], strides = [1, 1]} : vector<8x288xf32> to vector<8x96xf32>
    %601 = vector.extract_strided_slice %583 {offsets = [0, 192], sizes = [8, 96], strides = [1, 1]} : vector<8x288xf32> to vector<8x96xf32>
    %602 = arith.mulf %591, %601 : vector<8x96xf32>
    %603 = arith.addf %600, %602 : vector<8x96xf32>
    %604 = math.tanh %603 : vector<8x96xf32>
    %605 = arith.subf %578, %604 : vector<8x96xf32>
    %606 = arith.mulf %599, %605 : vector<8x96xf32>
    %607 = arith.addf %604, %606 : vector<8x96xf32>
    %608 = tpu.concatenate %327, %607 in 1 : vector<8x128xf32>, vector<8x96xf32> -> vector<8x224xf32>
    %609 = arith.truncf %608 : vector<8x224xf32> to vector<8x224xbf16>
    %c0_137 = arith.constant 0 : index
    %c0_138 = arith.constant 0 : index
    %c0_139 = arith.constant 0 : index
    %610 = vector.load %arg7[%c0_137, %c0_138, %c0_139] : memref<2x224x1024xbf16, #tpu.memory_space<vmem>>, vector<1x224x1024xbf16>
    %611 = vector.shape_cast %610 : vector<1x224x1024xbf16> to vector<224x1024xbf16>
    %cst_140 = arith.constant dense<0.000000e+00> : vector<8x1024xf32>
    %612 = tpu.matmul %609, %611, %cst_140 {dimension_numbers = #tpu.dot_dimension_numbers<[1], [0], [0], [1], [0, 0, 1, 1], [], []>} : vector<8x224xbf16>, vector<224x1024xbf16>, vector<8x1024xf32> -> vector<8x1024xf32>
    %c0_141 = arith.constant 0 : index
    %c0_142 = arith.constant 0 : index
    %c0_143 = arith.constant 0 : index
    %613 = vector.load %arg6[%c0_141, %c0_142, %c0_143] : memref<2x1x1024xf32, #tpu.memory_space<vmem>>, vector<1x1x1024xf32>
    %614 = vector.shape_cast %613 : vector<1x1x1024xf32> to vector<1x1024xf32>
    %615 = vector.broadcast %614 : vector<1x1024xf32> to vector<8x1024xf32>
    %616 = arith.addf %612, %615 : vector<8x1024xf32>
    %cst_144 = arith.constant 0.000000e+00 : f32
    %617 = vector.broadcast %cst_144 : f32 to vector<8x1024xf32>
    %618 = arith.maximumf %616, %617 : vector<8x1024xf32>
    %619 = vector.extract_strided_slice %618 {offsets = [0, 0], sizes = [8, 512], strides = [1, 1]} : vector<8x1024xf32> to vector<8x512xf32>
    %620 = arith.truncf %619 : vector<8x512xf32> to vector<8x512xbf16>
    %c0_145 = arith.constant 0 : index
    %c0_146 = arith.constant 0 : index
    %c0_147 = arith.constant 0 : index
    %621 = vector.load %arg9[%c0_145, %c0_146, %c0_147] : memref<2x512x256xbf16, #tpu.memory_space<vmem>>, vector<1x512x256xbf16>
    %622 = vector.shape_cast %621 : vector<1x512x256xbf16> to vector<512x256xbf16>
    %cst_148 = arith.constant dense<0.000000e+00> : vector<8x256xf32>
    %623 = tpu.matmul %620, %622, %cst_148 {dimension_numbers = #tpu.dot_dimension_numbers<[1], [0], [0], [1], [0, 0, 1, 1], [], []>} : vector<8x512xbf16>, vector<512x256xbf16>, vector<8x256xf32> -> vector<8x256xf32>
    %c0_149 = arith.constant 0 : index
    %c0_150 = arith.constant 0 : index
    %c0_151 = arith.constant 0 : index
    %624 = vector.load %arg8[%c0_149, %c0_150, %c0_151] : memref<2x1x256xf32, #tpu.memory_space<vmem>>, vector<1x1x256xf32>
    %625 = vector.shape_cast %624 : vector<1x1x256xf32> to vector<1x256xf32>
    %626 = vector.broadcast %625 : vector<1x256xf32> to vector<8x256xf32>
    %627 = arith.addf %623, %626 : vector<8x256xf32>
    %cst_152 = arith.constant 0.000000e+00 : f32
    %628 = vector.broadcast %cst_152 : f32 to vector<8x256xf32>
    %629 = arith.maximumf %627, %628 : vector<8x256xf32>
    %630 = vector.extract_strided_slice %618 {offsets = [0, 512], sizes = [8, 512], strides = [1, 1]} : vector<8x1024xf32> to vector<8x512xf32>
    %631 = arith.truncf %630 : vector<8x512xf32> to vector<8x512xbf16>
    %c0_153 = arith.constant 0 : index
    %c0_154 = arith.constant 0 : index
    %c0_155 = arith.constant 0 : index
    %632 = vector.load %arg11[%c0_153, %c0_154, %c0_155] : memref<2x512x256xbf16, #tpu.memory_space<vmem>>, vector<1x512x256xbf16>
    %633 = vector.shape_cast %632 : vector<1x512x256xbf16> to vector<512x256xbf16>
    %cst_156 = arith.constant dense<0.000000e+00> : vector<8x256xf32>
    %634 = tpu.matmul %631, %633, %cst_156 {dimension_numbers = #tpu.dot_dimension_numbers<[1], [0], [0], [1], [0, 0, 1, 1], [], []>} : vector<8x512xbf16>, vector<512x256xbf16>, vector<8x256xf32> -> vector<8x256xf32>
    %c0_157 = arith.constant 0 : index
    %c0_158 = arith.constant 0 : index
    %c0_159 = arith.constant 0 : index
    %635 = vector.load %arg10[%c0_157, %c0_158, %c0_159] : memref<2x1x256xf32, #tpu.memory_space<vmem>>, vector<1x1x256xf32>
    %636 = vector.shape_cast %635 : vector<1x1x256xf32> to vector<1x256xf32>
    %637 = vector.broadcast %636 : vector<1x256xf32> to vector<8x256xf32>
    %638 = arith.addf %634, %637 : vector<8x256xf32>
    %cst_160 = arith.constant 0.000000e+00 : f32
    %639 = vector.broadcast %cst_160 : f32 to vector<8x256xf32>
    %640 = arith.maximumf %638, %639 : vector<8x256xf32>
    %641 = arith.truncf %629 : vector<8x256xf32> to vector<8x256xbf16>
    %c0_161 = arith.constant 0 : index
    %c0_162 = arith.constant 0 : index
    %c0_163 = arith.constant 0 : index
    %642 = vector.load %arg13[%c0_161, %c0_162, %c0_163] : memref<2x256x16xbf16, #tpu.memory_space<vmem>>, vector<1x256x16xbf16>
    %643 = vector.shape_cast %642 : vector<1x256x16xbf16> to vector<256x16xbf16>
    %cst_164 = arith.constant dense<0.000000e+00> : vector<8x16xf32>
    %644 = tpu.matmul %641, %643, %cst_164 {dimension_numbers = #tpu.dot_dimension_numbers<[1], [0], [0], [1], [0, 0, 1, 1], [], []>} : vector<8x256xbf16>, vector<256x16xbf16>, vector<8x16xf32> -> vector<8x16xf32>
    %c0_165 = arith.constant 0 : index
    %c0_166 = arith.constant 0 : index
    %c0_167 = arith.constant 0 : index
    %645 = vector.load %arg12[%c0_165, %c0_166, %c0_167] : memref<2x1x16xf32, #tpu.memory_space<vmem>>, vector<1x1x16xf32>
    %646 = vector.shape_cast %645 : vector<1x1x16xf32> to vector<1x16xf32>
    %647 = vector.broadcast %646 : vector<1x16xf32> to vector<8x16xf32>
    %648 = arith.addf %644, %647 : vector<8x16xf32>
    %649 = arith.truncf %640 : vector<8x256xf32> to vector<8x256xbf16>
    %c0_168 = arith.constant 0 : index
    %c0_169 = arith.constant 0 : index
    %c0_170 = arith.constant 0 : index
    %650 = vector.load %arg15[%c0_168, %c0_169, %c0_170] : memref<2x256x22xbf16, #tpu.memory_space<vmem>>, vector<1x256x22xbf16>
    %651 = vector.shape_cast %650 : vector<1x256x22xbf16> to vector<256x22xbf16>
    %cst_171 = arith.constant dense<0.000000e+00> : vector<8x22xf32>
    %652 = tpu.matmul %649, %651, %cst_171 {dimension_numbers = #tpu.dot_dimension_numbers<[1], [0], [0], [1], [0, 0, 1, 1], [], []>} : vector<8x256xbf16>, vector<256x22xbf16>, vector<8x22xf32> -> vector<8x22xf32>
    %c0_172 = arith.constant 0 : index
    %c0_173 = arith.constant 0 : index
    %c0_174 = arith.constant 0 : index
    %653 = vector.load %arg14[%c0_172, %c0_173, %c0_174] : memref<2x1x22xf32, #tpu.memory_space<vmem>>, vector<1x1x22xf32>
    %654 = vector.shape_cast %653 : vector<1x1x22xf32> to vector<1x22xf32>
    %655 = vector.broadcast %654 : vector<1x22xf32> to vector<8x22xf32>
    %656 = arith.addf %652, %655 : vector<8x22xf32>
    %657 = arith.addf %331, %656 : vector<8x22xf32>
    %c1 = arith.constant 1 : index
    %c0_175 = arith.constant 0 : index
    %c0_176 = arith.constant 0 : index
    %658 = vector.load %arg19[%c1, %c0_175, %c0_176] : memref<2x6x32xbf16, #tpu.memory_space<vmem>>, vector<1x6x32xbf16>
    %659 = vector.shape_cast %658 : vector<1x6x32xbf16> to vector<6x32xbf16>
    %c1_177 = arith.constant 1 : index
    %c0_178 = arith.constant 0 : index
    %c0_179 = arith.constant 0 : index
    %660 = vector.load %arg16[%c1_177, %c0_178, %c0_179] : memref<2x1x32xf32, #tpu.memory_space<vmem>>, vector<1x1x32xf32>
    %661 = vector.shape_cast %660 : vector<1x1x32xf32> to vector<1x32xf32>
    %c1_180 = arith.constant 1 : index
    %c0_181 = arith.constant 0 : index
    %c0_182 = arith.constant 0 : index
    %662 = vector.load %arg21[%c1_180, %c0_181, %c0_182] : memref<2x32x288xbf16, #tpu.memory_space<vmem>>, vector<1x32x288xbf16>
    %663 = vector.shape_cast %662 : vector<1x32x288xbf16> to vector<32x288xbf16>
    %c1_183 = arith.constant 1 : index
    %c0_184 = arith.constant 0 : index
    %c0_185 = arith.constant 0 : index
    %664 = vector.load %arg18[%c1_183, %c0_184, %c0_185] : memref<2x1x288xf32, #tpu.memory_space<vmem>>, vector<1x1x288xf32>
    %665 = vector.shape_cast %664 : vector<1x1x288xf32> to vector<1x288xf32>
    %c1_186 = arith.constant 1 : index
    %c0_187 = arith.constant 0 : index
    %c0_188 = arith.constant 0 : index
    %666 = vector.load %arg20[%c1_186, %c0_187, %c0_188] : memref<2x96x288xbf16, #tpu.memory_space<vmem>>, vector<1x96x288xbf16>
    %667 = vector.shape_cast %666 : vector<1x96x288xbf16> to vector<96x288xbf16>
    %c1_189 = arith.constant 1 : index
    %c0_190 = arith.constant 0 : index
    %c0_191 = arith.constant 0 : index
    %668 = vector.load %arg17[%c1_189, %c0_190, %c0_191] : memref<2x1x288xf32, #tpu.memory_space<vmem>>, vector<1x1x288xf32>
    %669 = vector.shape_cast %668 : vector<1x1x288xf32> to vector<1x288xf32>
    %670 = arith.subf %328, %648 : vector<8x16xf32>
    %cst_192 = arith.constant 0.000000e+00 : f32
    %671 = vector.broadcast %cst_192 : f32 to vector<8x2xf32>
    %672 = tpu.concatenate %671, %670, %671 in 1 : vector<8x2xf32>, vector<8x16xf32>, vector<8x2xf32> -> vector<8x20xf32>
    %673 = vector.extract_strided_slice %672 {offsets = [0, 0], sizes = [8, 6], strides = [1, 1]} : vector<8x20xf32> to vector<8x6xf32>
    %674 = vector.extract_strided_slice %672 {offsets = [0, 2], sizes = [8, 6], strides = [1, 1]} : vector<8x20xf32> to vector<8x6xf32>
    %675 = vector.extract_strided_slice %672 {offsets = [0, 4], sizes = [8, 6], strides = [1, 1]} : vector<8x20xf32> to vector<8x6xf32>
    %676 = vector.extract_strided_slice %672 {offsets = [0, 6], sizes = [8, 6], strides = [1, 1]} : vector<8x20xf32> to vector<8x6xf32>
    %677 = vector.extract_strided_slice %672 {offsets = [0, 8], sizes = [8, 6], strides = [1, 1]} : vector<8x20xf32> to vector<8x6xf32>
    %678 = vector.extract_strided_slice %672 {offsets = [0, 10], sizes = [8, 6], strides = [1, 1]} : vector<8x20xf32> to vector<8x6xf32>
    %679 = vector.extract_strided_slice %672 {offsets = [0, 12], sizes = [8, 6], strides = [1, 1]} : vector<8x20xf32> to vector<8x6xf32>
    %680 = vector.extract_strided_slice %672 {offsets = [0, 14], sizes = [8, 6], strides = [1, 1]} : vector<8x20xf32> to vector<8x6xf32>
    %681 = vector.shape_cast %673 : vector<8x6xf32> to vector<1x8x6xf32>
    %682 = vector.shape_cast %674 : vector<8x6xf32> to vector<1x8x6xf32>
    %683 = vector.shape_cast %675 : vector<8x6xf32> to vector<1x8x6xf32>
    %684 = vector.shape_cast %676 : vector<8x6xf32> to vector<1x8x6xf32>
    %685 = vector.shape_cast %677 : vector<8x6xf32> to vector<1x8x6xf32>
    %686 = vector.shape_cast %678 : vector<8x6xf32> to vector<1x8x6xf32>
    %687 = vector.shape_cast %679 : vector<8x6xf32> to vector<1x8x6xf32>
    %688 = vector.shape_cast %680 : vector<8x6xf32> to vector<1x8x6xf32>
    %689 = tpu.concatenate %681, %682, %683, %684, %685, %686, %687, %688 in 0 : vector<1x8x6xf32>, vector<1x8x6xf32>, vector<1x8x6xf32>, vector<1x8x6xf32>, vector<1x8x6xf32>, vector<1x8x6xf32>, vector<1x8x6xf32>, vector<1x8x6xf32> -> vector<8x8x6xf32>
    %690 = vector.shape_cast %689 : vector<8x8x6xf32> to vector<64x6xf32>
    %691 = arith.truncf %690 : vector<64x6xf32> to vector<64x6xbf16>
    %cst_193 = arith.constant dense<0.000000e+00> : vector<64x32xf32>
    %692 = tpu.matmul %691, %659, %cst_193 {dimension_numbers = #tpu.dot_dimension_numbers<[1], [0], [0], [1], [0, 0, 1, 1], [], []>} : vector<64x6xbf16>, vector<6x32xbf16>, vector<64x32xf32> -> vector<64x32xf32>
    %693 = vector.broadcast %661 : vector<1x32xf32> to vector<64x32xf32>
    %694 = arith.addf %692, %693 : vector<64x32xf32>
    %cst_194 = arith.constant 0.000000e+00 : f32
    %695 = vector.broadcast %cst_194 : f32 to vector<64x32xf32>
    %696 = arith.maximumf %694, %695 : vector<64x32xf32>
    %697 = arith.truncf %696 : vector<64x32xf32> to vector<64x32xbf16>
    %cst_195 = arith.constant dense<0.000000e+00> : vector<64x288xf32>
    %698 = tpu.matmul %697, %663, %cst_195 {dimension_numbers = #tpu.dot_dimension_numbers<[1], [0], [0], [1], [0, 0, 1, 1], [], []>} : vector<64x32xbf16>, vector<32x288xbf16>, vector<64x288xf32> -> vector<64x288xf32>
    %699 = vector.broadcast %665 : vector<1x288xf32> to vector<64x288xf32>
    %700 = arith.addf %698, %699 : vector<64x288xf32>
    %cst_196 = arith.constant 0.000000e+00 : f32
    %701 = vector.broadcast %cst_196 : f32 to vector<8x96xf32>
    %702 = vector.extract_strided_slice %700 {offsets = [0, 0], sizes = [8, 288], strides = [1, 1]} : vector<64x288xf32> to vector<8x288xf32>
    %703 = arith.truncf %701 : vector<8x96xf32> to vector<8x96xbf16>
    %cst_197 = arith.constant dense<0.000000e+00> : vector<8x288xf32>
    %704 = tpu.matmul %703, %667, %cst_197 {dimension_numbers = #tpu.dot_dimension_numbers<[1], [0], [0], [1], [0, 0, 1, 1], [], []>} : vector<8x96xbf16>, vector<96x288xbf16>, vector<8x288xf32> -> vector<8x288xf32>
    %705 = vector.broadcast %669 : vector<1x288xf32> to vector<8x288xf32>
    %706 = arith.addf %704, %705 : vector<8x288xf32>
    %707 = vector.extract_strided_slice %702 {offsets = [0, 0], sizes = [8, 96], strides = [1, 1]} : vector<8x288xf32> to vector<8x96xf32>
    %708 = vector.extract_strided_slice %706 {offsets = [0, 0], sizes = [8, 96], strides = [1, 1]} : vector<8x288xf32> to vector<8x96xf32>
    %709 = arith.addf %707, %708 : vector<8x96xf32>
    %710 = arith.negf %709 : vector<8x96xf32>
    %711 = math.exp %710 : vector<8x96xf32>
    %cst_198 = arith.constant 1.000000e+00 : f32
    %712 = vector.broadcast %cst_198 : f32 to vector<8x96xf32>
    %713 = arith.addf %712, %711 : vector<8x96xf32>
    %714 = arith.divf %712, %713 : vector<8x96xf32>
    %715 = vector.extract_strided_slice %702 {offsets = [0, 96], sizes = [8, 96], strides = [1, 1]} : vector<8x288xf32> to vector<8x96xf32>
    %716 = vector.extract_strided_slice %706 {offsets = [0, 96], sizes = [8, 96], strides = [1, 1]} : vector<8x288xf32> to vector<8x96xf32>
    %717 = arith.addf %715, %716 : vector<8x96xf32>
    %718 = arith.negf %717 : vector<8x96xf32>
    %719 = math.exp %718 : vector<8x96xf32>
    %cst_199 = arith.constant 1.000000e+00 : f32
    %720 = vector.broadcast %cst_199 : f32 to vector<8x96xf32>
    %721 = arith.addf %720, %719 : vector<8x96xf32>
    %722 = arith.divf %720, %721 : vector<8x96xf32>
    %723 = vector.extract_strided_slice %702 {offsets = [0, 192], sizes = [8, 96], strides = [1, 1]} : vector<8x288xf32> to vector<8x96xf32>
    %724 = vector.extract_strided_slice %706 {offsets = [0, 192], sizes = [8, 96], strides = [1, 1]} : vector<8x288xf32> to vector<8x96xf32>
    %725 = arith.mulf %714, %724 : vector<8x96xf32>
    %726 = arith.addf %723, %725 : vector<8x96xf32>
    %727 = math.tanh %726 : vector<8x96xf32>
    %728 = arith.subf %701, %727 : vector<8x96xf32>
    %729 = arith.mulf %722, %728 : vector<8x96xf32>
    %730 = arith.addf %727, %729 : vector<8x96xf32>
    %731 = vector.extract_strided_slice %700 {offsets = [8, 0], sizes = [8, 288], strides = [1, 1]} : vector<64x288xf32> to vector<8x288xf32>
    %732 = arith.truncf %730 : vector<8x96xf32> to vector<8x96xbf16>
    %cst_200 = arith.constant dense<0.000000e+00> : vector<8x288xf32>
    %733 = tpu.matmul %732, %667, %cst_200 {dimension_numbers = #tpu.dot_dimension_numbers<[1], [0], [0], [1], [0, 0, 1, 1], [], []>} : vector<8x96xbf16>, vector<96x288xbf16>, vector<8x288xf32> -> vector<8x288xf32>
    %734 = vector.broadcast %669 : vector<1x288xf32> to vector<8x288xf32>
    %735 = arith.addf %733, %734 : vector<8x288xf32>
    %736 = vector.extract_strided_slice %731 {offsets = [0, 0], sizes = [8, 96], strides = [1, 1]} : vector<8x288xf32> to vector<8x96xf32>
    %737 = vector.extract_strided_slice %735 {offsets = [0, 0], sizes = [8, 96], strides = [1, 1]} : vector<8x288xf32> to vector<8x96xf32>
    %738 = arith.addf %736, %737 : vector<8x96xf32>
    %739 = arith.negf %738 : vector<8x96xf32>
    %740 = math.exp %739 : vector<8x96xf32>
    %cst_201 = arith.constant 1.000000e+00 : f32
    %741 = vector.broadcast %cst_201 : f32 to vector<8x96xf32>
    %742 = arith.addf %741, %740 : vector<8x96xf32>
    %743 = arith.divf %741, %742 : vector<8x96xf32>
    %744 = vector.extract_strided_slice %731 {offsets = [0, 96], sizes = [8, 96], strides = [1, 1]} : vector<8x288xf32> to vector<8x96xf32>
    %745 = vector.extract_strided_slice %735 {offsets = [0, 96], sizes = [8, 96], strides = [1, 1]} : vector<8x288xf32> to vector<8x96xf32>
    %746 = arith.addf %744, %745 : vector<8x96xf32>
    %747 = arith.negf %746 : vector<8x96xf32>
    %748 = math.exp %747 : vector<8x96xf32>
    %cst_202 = arith.constant 1.000000e+00 : f32
    %749 = vector.broadcast %cst_202 : f32 to vector<8x96xf32>
    %750 = arith.addf %749, %748 : vector<8x96xf32>
    %751 = arith.divf %749, %750 : vector<8x96xf32>
    %752 = vector.extract_strided_slice %731 {offsets = [0, 192], sizes = [8, 96], strides = [1, 1]} : vector<8x288xf32> to vector<8x96xf32>
    %753 = vector.extract_strided_slice %735 {offsets = [0, 192], sizes = [8, 96], strides = [1, 1]} : vector<8x288xf32> to vector<8x96xf32>
    %754 = arith.mulf %743, %753 : vector<8x96xf32>
    %755 = arith.addf %752, %754 : vector<8x96xf32>
    %756 = math.tanh %755 : vector<8x96xf32>
    %757 = arith.subf %730, %756 : vector<8x96xf32>
    %758 = arith.mulf %751, %757 : vector<8x96xf32>
    %759 = arith.addf %756, %758 : vector<8x96xf32>
    %760 = vector.extract_strided_slice %700 {offsets = [16, 0], sizes = [8, 288], strides = [1, 1]} : vector<64x288xf32> to vector<8x288xf32>
    %761 = arith.truncf %759 : vector<8x96xf32> to vector<8x96xbf16>
    %cst_203 = arith.constant dense<0.000000e+00> : vector<8x288xf32>
    %762 = tpu.matmul %761, %667, %cst_203 {dimension_numbers = #tpu.dot_dimension_numbers<[1], [0], [0], [1], [0, 0, 1, 1], [], []>} : vector<8x96xbf16>, vector<96x288xbf16>, vector<8x288xf32> -> vector<8x288xf32>
    %763 = vector.broadcast %669 : vector<1x288xf32> to vector<8x288xf32>
    %764 = arith.addf %762, %763 : vector<8x288xf32>
    %765 = vector.extract_strided_slice %760 {offsets = [0, 0], sizes = [8, 96], strides = [1, 1]} : vector<8x288xf32> to vector<8x96xf32>
    %766 = vector.extract_strided_slice %764 {offsets = [0, 0], sizes = [8, 96], strides = [1, 1]} : vector<8x288xf32> to vector<8x96xf32>
    %767 = arith.addf %765, %766 : vector<8x96xf32>
    %768 = arith.negf %767 : vector<8x96xf32>
    %769 = math.exp %768 : vector<8x96xf32>
    %cst_204 = arith.constant 1.000000e+00 : f32
    %770 = vector.broadcast %cst_204 : f32 to vector<8x96xf32>
    %771 = arith.addf %770, %769 : vector<8x96xf32>
    %772 = arith.divf %770, %771 : vector<8x96xf32>
    %773 = vector.extract_strided_slice %760 {offsets = [0, 96], sizes = [8, 96], strides = [1, 1]} : vector<8x288xf32> to vector<8x96xf32>
    %774 = vector.extract_strided_slice %764 {offsets = [0, 96], sizes = [8, 96], strides = [1, 1]} : vector<8x288xf32> to vector<8x96xf32>
    %775 = arith.addf %773, %774 : vector<8x96xf32>
    %776 = arith.negf %775 : vector<8x96xf32>
    %777 = math.exp %776 : vector<8x96xf32>
    %cst_205 = arith.constant 1.000000e+00 : f32
    %778 = vector.broadcast %cst_205 : f32 to vector<8x96xf32>
    %779 = arith.addf %778, %777 : vector<8x96xf32>
    %780 = arith.divf %778, %779 : vector<8x96xf32>
    %781 = vector.extract_strided_slice %760 {offsets = [0, 192], sizes = [8, 96], strides = [1, 1]} : vector<8x288xf32> to vector<8x96xf32>
    %782 = vector.extract_strided_slice %764 {offsets = [0, 192], sizes = [8, 96], strides = [1, 1]} : vector<8x288xf32> to vector<8x96xf32>
    %783 = arith.mulf %772, %782 : vector<8x96xf32>
    %784 = arith.addf %781, %783 : vector<8x96xf32>
    %785 = math.tanh %784 : vector<8x96xf32>
    %786 = arith.subf %759, %785 : vector<8x96xf32>
    %787 = arith.mulf %780, %786 : vector<8x96xf32>
    %788 = arith.addf %785, %787 : vector<8x96xf32>
    %789 = vector.extract_strided_slice %700 {offsets = [24, 0], sizes = [8, 288], strides = [1, 1]} : vector<64x288xf32> to vector<8x288xf32>
    %790 = arith.truncf %788 : vector<8x96xf32> to vector<8x96xbf16>
    %cst_206 = arith.constant dense<0.000000e+00> : vector<8x288xf32>
    %791 = tpu.matmul %790, %667, %cst_206 {dimension_numbers = #tpu.dot_dimension_numbers<[1], [0], [0], [1], [0, 0, 1, 1], [], []>} : vector<8x96xbf16>, vector<96x288xbf16>, vector<8x288xf32> -> vector<8x288xf32>
    %792 = vector.broadcast %669 : vector<1x288xf32> to vector<8x288xf32>
    %793 = arith.addf %791, %792 : vector<8x288xf32>
    %794 = vector.extract_strided_slice %789 {offsets = [0, 0], sizes = [8, 96], strides = [1, 1]} : vector<8x288xf32> to vector<8x96xf32>
    %795 = vector.extract_strided_slice %793 {offsets = [0, 0], sizes = [8, 96], strides = [1, 1]} : vector<8x288xf32> to vector<8x96xf32>
    %796 = arith.addf %794, %795 : vector<8x96xf32>
    %797 = arith.negf %796 : vector<8x96xf32>
    %798 = math.exp %797 : vector<8x96xf32>
    %cst_207 = arith.constant 1.000000e+00 : f32
    %799 = vector.broadcast %cst_207 : f32 to vector<8x96xf32>
    %800 = arith.addf %799, %798 : vector<8x96xf32>
    %801 = arith.divf %799, %800 : vector<8x96xf32>
    %802 = vector.extract_strided_slice %789 {offsets = [0, 96], sizes = [8, 96], strides = [1, 1]} : vector<8x288xf32> to vector<8x96xf32>
    %803 = vector.extract_strided_slice %793 {offsets = [0, 96], sizes = [8, 96], strides = [1, 1]} : vector<8x288xf32> to vector<8x96xf32>
    %804 = arith.addf %802, %803 : vector<8x96xf32>
    %805 = arith.negf %804 : vector<8x96xf32>
    %806 = math.exp %805 : vector<8x96xf32>
    %cst_208 = arith.constant 1.000000e+00 : f32
    %807 = vector.broadcast %cst_208 : f32 to vector<8x96xf32>
    %808 = arith.addf %807, %806 : vector<8x96xf32>
    %809 = arith.divf %807, %808 : vector<8x96xf32>
    %810 = vector.extract_strided_slice %789 {offsets = [0, 192], sizes = [8, 96], strides = [1, 1]} : vector<8x288xf32> to vector<8x96xf32>
    %811 = vector.extract_strided_slice %793 {offsets = [0, 192], sizes = [8, 96], strides = [1, 1]} : vector<8x288xf32> to vector<8x96xf32>
    %812 = arith.mulf %801, %811 : vector<8x96xf32>
    %813 = arith.addf %810, %812 : vector<8x96xf32>
    %814 = math.tanh %813 : vector<8x96xf32>
    %815 = arith.subf %788, %814 : vector<8x96xf32>
    %816 = arith.mulf %809, %815 : vector<8x96xf32>
    %817 = arith.addf %814, %816 : vector<8x96xf32>
    %818 = vector.extract_strided_slice %700 {offsets = [32, 0], sizes = [8, 288], strides = [1, 1]} : vector<64x288xf32> to vector<8x288xf32>
    %819 = arith.truncf %817 : vector<8x96xf32> to vector<8x96xbf16>
    %cst_209 = arith.constant dense<0.000000e+00> : vector<8x288xf32>
    %820 = tpu.matmul %819, %667, %cst_209 {dimension_numbers = #tpu.dot_dimension_numbers<[1], [0], [0], [1], [0, 0, 1, 1], [], []>} : vector<8x96xbf16>, vector<96x288xbf16>, vector<8x288xf32> -> vector<8x288xf32>
    %821 = vector.broadcast %669 : vector<1x288xf32> to vector<8x288xf32>
    %822 = arith.addf %820, %821 : vector<8x288xf32>
    %823 = vector.extract_strided_slice %818 {offsets = [0, 0], sizes = [8, 96], strides = [1, 1]} : vector<8x288xf32> to vector<8x96xf32>
    %824 = vector.extract_strided_slice %822 {offsets = [0, 0], sizes = [8, 96], strides = [1, 1]} : vector<8x288xf32> to vector<8x96xf32>
    %825 = arith.addf %823, %824 : vector<8x96xf32>
    %826 = arith.negf %825 : vector<8x96xf32>
    %827 = math.exp %826 : vector<8x96xf32>
    %cst_210 = arith.constant 1.000000e+00 : f32
    %828 = vector.broadcast %cst_210 : f32 to vector<8x96xf32>
    %829 = arith.addf %828, %827 : vector<8x96xf32>
    %830 = arith.divf %828, %829 : vector<8x96xf32>
    %831 = vector.extract_strided_slice %818 {offsets = [0, 96], sizes = [8, 96], strides = [1, 1]} : vector<8x288xf32> to vector<8x96xf32>
    %832 = vector.extract_strided_slice %822 {offsets = [0, 96], sizes = [8, 96], strides = [1, 1]} : vector<8x288xf32> to vector<8x96xf32>
    %833 = arith.addf %831, %832 : vector<8x96xf32>
    %834 = arith.negf %833 : vector<8x96xf32>
    %835 = math.exp %834 : vector<8x96xf32>
    %cst_211 = arith.constant 1.000000e+00 : f32
    %836 = vector.broadcast %cst_211 : f32 to vector<8x96xf32>
    %837 = arith.addf %836, %835 : vector<8x96xf32>
    %838 = arith.divf %836, %837 : vector<8x96xf32>
    %839 = vector.extract_strided_slice %818 {offsets = [0, 192], sizes = [8, 96], strides = [1, 1]} : vector<8x288xf32> to vector<8x96xf32>
    %840 = vector.extract_strided_slice %822 {offsets = [0, 192], sizes = [8, 96], strides = [1, 1]} : vector<8x288xf32> to vector<8x96xf32>
    %841 = arith.mulf %830, %840 : vector<8x96xf32>
    %842 = arith.addf %839, %841 : vector<8x96xf32>
    %843 = math.tanh %842 : vector<8x96xf32>
    %844 = arith.subf %817, %843 : vector<8x96xf32>
    %845 = arith.mulf %838, %844 : vector<8x96xf32>
    %846 = arith.addf %843, %845 : vector<8x96xf32>
    %847 = vector.extract_strided_slice %700 {offsets = [40, 0], sizes = [8, 288], strides = [1, 1]} : vector<64x288xf32> to vector<8x288xf32>
    %848 = arith.truncf %846 : vector<8x96xf32> to vector<8x96xbf16>
    %cst_212 = arith.constant dense<0.000000e+00> : vector<8x288xf32>
    %849 = tpu.matmul %848, %667, %cst_212 {dimension_numbers = #tpu.dot_dimension_numbers<[1], [0], [0], [1], [0, 0, 1, 1], [], []>} : vector<8x96xbf16>, vector<96x288xbf16>, vector<8x288xf32> -> vector<8x288xf32>
    %850 = vector.broadcast %669 : vector<1x288xf32> to vector<8x288xf32>
    %851 = arith.addf %849, %850 : vector<8x288xf32>
    %852 = vector.extract_strided_slice %847 {offsets = [0, 0], sizes = [8, 96], strides = [1, 1]} : vector<8x288xf32> to vector<8x96xf32>
    %853 = vector.extract_strided_slice %851 {offsets = [0, 0], sizes = [8, 96], strides = [1, 1]} : vector<8x288xf32> to vector<8x96xf32>
    %854 = arith.addf %852, %853 : vector<8x96xf32>
    %855 = arith.negf %854 : vector<8x96xf32>
    %856 = math.exp %855 : vector<8x96xf32>
    %cst_213 = arith.constant 1.000000e+00 : f32
    %857 = vector.broadcast %cst_213 : f32 to vector<8x96xf32>
    %858 = arith.addf %857, %856 : vector<8x96xf32>
    %859 = arith.divf %857, %858 : vector<8x96xf32>
    %860 = vector.extract_strided_slice %847 {offsets = [0, 96], sizes = [8, 96], strides = [1, 1]} : vector<8x288xf32> to vector<8x96xf32>
    %861 = vector.extract_strided_slice %851 {offsets = [0, 96], sizes = [8, 96], strides = [1, 1]} : vector<8x288xf32> to vector<8x96xf32>
    %862 = arith.addf %860, %861 : vector<8x96xf32>
    %863 = arith.negf %862 : vector<8x96xf32>
    %864 = math.exp %863 : vector<8x96xf32>
    %cst_214 = arith.constant 1.000000e+00 : f32
    %865 = vector.broadcast %cst_214 : f32 to vector<8x96xf32>
    %866 = arith.addf %865, %864 : vector<8x96xf32>
    %867 = arith.divf %865, %866 : vector<8x96xf32>
    %868 = vector.extract_strided_slice %847 {offsets = [0, 192], sizes = [8, 96], strides = [1, 1]} : vector<8x288xf32> to vector<8x96xf32>
    %869 = vector.extract_strided_slice %851 {offsets = [0, 192], sizes = [8, 96], strides = [1, 1]} : vector<8x288xf32> to vector<8x96xf32>
    %870 = arith.mulf %859, %869 : vector<8x96xf32>
    %871 = arith.addf %868, %870 : vector<8x96xf32>
    %872 = math.tanh %871 : vector<8x96xf32>
    %873 = arith.subf %846, %872 : vector<8x96xf32>
    %874 = arith.mulf %867, %873 : vector<8x96xf32>
    %875 = arith.addf %872, %874 : vector<8x96xf32>
    %876 = vector.extract_strided_slice %700 {offsets = [48, 0], sizes = [8, 288], strides = [1, 1]} : vector<64x288xf32> to vector<8x288xf32>
    %877 = arith.truncf %875 : vector<8x96xf32> to vector<8x96xbf16>
    %cst_215 = arith.constant dense<0.000000e+00> : vector<8x288xf32>
    %878 = tpu.matmul %877, %667, %cst_215 {dimension_numbers = #tpu.dot_dimension_numbers<[1], [0], [0], [1], [0, 0, 1, 1], [], []>} : vector<8x96xbf16>, vector<96x288xbf16>, vector<8x288xf32> -> vector<8x288xf32>
    %879 = vector.broadcast %669 : vector<1x288xf32> to vector<8x288xf32>
    %880 = arith.addf %878, %879 : vector<8x288xf32>
    %881 = vector.extract_strided_slice %876 {offsets = [0, 0], sizes = [8, 96], strides = [1, 1]} : vector<8x288xf32> to vector<8x96xf32>
    %882 = vector.extract_strided_slice %880 {offsets = [0, 0], sizes = [8, 96], strides = [1, 1]} : vector<8x288xf32> to vector<8x96xf32>
    %883 = arith.addf %881, %882 : vector<8x96xf32>
    %884 = arith.negf %883 : vector<8x96xf32>
    %885 = math.exp %884 : vector<8x96xf32>
    %cst_216 = arith.constant 1.000000e+00 : f32
    %886 = vector.broadcast %cst_216 : f32 to vector<8x96xf32>
    %887 = arith.addf %886, %885 : vector<8x96xf32>
    %888 = arith.divf %886, %887 : vector<8x96xf32>
    %889 = vector.extract_strided_slice %876 {offsets = [0, 96], sizes = [8, 96], strides = [1, 1]} : vector<8x288xf32> to vector<8x96xf32>
    %890 = vector.extract_strided_slice %880 {offsets = [0, 96], sizes = [8, 96], strides = [1, 1]} : vector<8x288xf32> to vector<8x96xf32>
    %891 = arith.addf %889, %890 : vector<8x96xf32>
    %892 = arith.negf %891 : vector<8x96xf32>
    %893 = math.exp %892 : vector<8x96xf32>
    %cst_217 = arith.constant 1.000000e+00 : f32
    %894 = vector.broadcast %cst_217 : f32 to vector<8x96xf32>
    %895 = arith.addf %894, %893 : vector<8x96xf32>
    %896 = arith.divf %894, %895 : vector<8x96xf32>
    %897 = vector.extract_strided_slice %876 {offsets = [0, 192], sizes = [8, 96], strides = [1, 1]} : vector<8x288xf32> to vector<8x96xf32>
    %898 = vector.extract_strided_slice %880 {offsets = [0, 192], sizes = [8, 96], strides = [1, 1]} : vector<8x288xf32> to vector<8x96xf32>
    %899 = arith.mulf %888, %898 : vector<8x96xf32>
    %900 = arith.addf %897, %899 : vector<8x96xf32>
    %901 = math.tanh %900 : vector<8x96xf32>
    %902 = arith.subf %875, %901 : vector<8x96xf32>
    %903 = arith.mulf %896, %902 : vector<8x96xf32>
    %904 = arith.addf %901, %903 : vector<8x96xf32>
    %905 = vector.extract_strided_slice %700 {offsets = [56, 0], sizes = [8, 288], strides = [1, 1]} : vector<64x288xf32> to vector<8x288xf32>
    %906 = arith.truncf %904 : vector<8x96xf32> to vector<8x96xbf16>
    %cst_218 = arith.constant dense<0.000000e+00> : vector<8x288xf32>
    %907 = tpu.matmul %906, %667, %cst_218 {dimension_numbers = #tpu.dot_dimension_numbers<[1], [0], [0], [1], [0, 0, 1, 1], [], []>} : vector<8x96xbf16>, vector<96x288xbf16>, vector<8x288xf32> -> vector<8x288xf32>
    %908 = vector.broadcast %669 : vector<1x288xf32> to vector<8x288xf32>
    %909 = arith.addf %907, %908 : vector<8x288xf32>
    %910 = vector.extract_strided_slice %905 {offsets = [0, 0], sizes = [8, 96], strides = [1, 1]} : vector<8x288xf32> to vector<8x96xf32>
    %911 = vector.extract_strided_slice %909 {offsets = [0, 0], sizes = [8, 96], strides = [1, 1]} : vector<8x288xf32> to vector<8x96xf32>
    %912 = arith.addf %910, %911 : vector<8x96xf32>
    %913 = arith.negf %912 : vector<8x96xf32>
    %914 = math.exp %913 : vector<8x96xf32>
    %cst_219 = arith.constant 1.000000e+00 : f32
    %915 = vector.broadcast %cst_219 : f32 to vector<8x96xf32>
    %916 = arith.addf %915, %914 : vector<8x96xf32>
    %917 = arith.divf %915, %916 : vector<8x96xf32>
    %918 = vector.extract_strided_slice %905 {offsets = [0, 96], sizes = [8, 96], strides = [1, 1]} : vector<8x288xf32> to vector<8x96xf32>
    %919 = vector.extract_strided_slice %909 {offsets = [0, 96], sizes = [8, 96], strides = [1, 1]} : vector<8x288xf32> to vector<8x96xf32>
    %920 = arith.addf %918, %919 : vector<8x96xf32>
    %921 = arith.negf %920 : vector<8x96xf32>
    %922 = math.exp %921 : vector<8x96xf32>
    %cst_220 = arith.constant 1.000000e+00 : f32
    %923 = vector.broadcast %cst_220 : f32 to vector<8x96xf32>
    %924 = arith.addf %923, %922 : vector<8x96xf32>
    %925 = arith.divf %923, %924 : vector<8x96xf32>
    %926 = vector.extract_strided_slice %905 {offsets = [0, 192], sizes = [8, 96], strides = [1, 1]} : vector<8x288xf32> to vector<8x96xf32>
    %927 = vector.extract_strided_slice %909 {offsets = [0, 192], sizes = [8, 96], strides = [1, 1]} : vector<8x288xf32> to vector<8x96xf32>
    %928 = arith.mulf %917, %927 : vector<8x96xf32>
    %929 = arith.addf %926, %928 : vector<8x96xf32>
    %930 = math.tanh %929 : vector<8x96xf32>
    %931 = arith.subf %904, %930 : vector<8x96xf32>
    %932 = arith.mulf %925, %931 : vector<8x96xf32>
    %933 = arith.addf %930, %932 : vector<8x96xf32>
    %934 = tpu.concatenate %327, %933 in 1 : vector<8x128xf32>, vector<8x96xf32> -> vector<8x224xf32>
    %935 = arith.truncf %934 : vector<8x224xf32> to vector<8x224xbf16>
    %c1_221 = arith.constant 1 : index
    %c0_222 = arith.constant 0 : index
    %c0_223 = arith.constant 0 : index
    %936 = vector.load %arg7[%c1_221, %c0_222, %c0_223] : memref<2x224x1024xbf16, #tpu.memory_space<vmem>>, vector<1x224x1024xbf16>
    %937 = vector.shape_cast %936 : vector<1x224x1024xbf16> to vector<224x1024xbf16>
    %cst_224 = arith.constant dense<0.000000e+00> : vector<8x1024xf32>
    %938 = tpu.matmul %935, %937, %cst_224 {dimension_numbers = #tpu.dot_dimension_numbers<[1], [0], [0], [1], [0, 0, 1, 1], [], []>} : vector<8x224xbf16>, vector<224x1024xbf16>, vector<8x1024xf32> -> vector<8x1024xf32>
    %c1_225 = arith.constant 1 : index
    %c0_226 = arith.constant 0 : index
    %c0_227 = arith.constant 0 : index
    %939 = vector.load %arg6[%c1_225, %c0_226, %c0_227] : memref<2x1x1024xf32, #tpu.memory_space<vmem>>, vector<1x1x1024xf32>
    %940 = vector.shape_cast %939 : vector<1x1x1024xf32> to vector<1x1024xf32>
    %941 = vector.broadcast %940 : vector<1x1024xf32> to vector<8x1024xf32>
    %942 = arith.addf %938, %941 : vector<8x1024xf32>
    %cst_228 = arith.constant 0.000000e+00 : f32
    %943 = vector.broadcast %cst_228 : f32 to vector<8x1024xf32>
    %944 = arith.maximumf %942, %943 : vector<8x1024xf32>
    %945 = vector.extract_strided_slice %944 {offsets = [0, 512], sizes = [8, 512], strides = [1, 1]} : vector<8x1024xf32> to vector<8x512xf32>
    %946 = arith.truncf %945 : vector<8x512xf32> to vector<8x512xbf16>
    %c1_229 = arith.constant 1 : index
    %c0_230 = arith.constant 0 : index
    %c0_231 = arith.constant 0 : index
    %947 = vector.load %arg11[%c1_229, %c0_230, %c0_231] : memref<2x512x256xbf16, #tpu.memory_space<vmem>>, vector<1x512x256xbf16>
    %948 = vector.shape_cast %947 : vector<1x512x256xbf16> to vector<512x256xbf16>
    %cst_232 = arith.constant dense<0.000000e+00> : vector<8x256xf32>
    %949 = tpu.matmul %946, %948, %cst_232 {dimension_numbers = #tpu.dot_dimension_numbers<[1], [0], [0], [1], [0, 0, 1, 1], [], []>} : vector<8x512xbf16>, vector<512x256xbf16>, vector<8x256xf32> -> vector<8x256xf32>
    %c1_233 = arith.constant 1 : index
    %c0_234 = arith.constant 0 : index
    %c0_235 = arith.constant 0 : index
    %950 = vector.load %arg10[%c1_233, %c0_234, %c0_235] : memref<2x1x256xf32, #tpu.memory_space<vmem>>, vector<1x1x256xf32>
    %951 = vector.shape_cast %950 : vector<1x1x256xf32> to vector<1x256xf32>
    %952 = vector.broadcast %951 : vector<1x256xf32> to vector<8x256xf32>
    %953 = arith.addf %949, %952 : vector<8x256xf32>
    %cst_236 = arith.constant 0.000000e+00 : f32
    %954 = vector.broadcast %cst_236 : f32 to vector<8x256xf32>
    %955 = arith.maximumf %953, %954 : vector<8x256xf32>
    %956 = arith.truncf %955 : vector<8x256xf32> to vector<8x256xbf16>
    %c1_237 = arith.constant 1 : index
    %c0_238 = arith.constant 0 : index
    %c0_239 = arith.constant 0 : index
    %957 = vector.load %arg15[%c1_237, %c0_238, %c0_239] : memref<2x256x22xbf16, #tpu.memory_space<vmem>>, vector<1x256x22xbf16>
    %958 = vector.shape_cast %957 : vector<1x256x22xbf16> to vector<256x22xbf16>
    %cst_240 = arith.constant dense<0.000000e+00> : vector<8x22xf32>
    %959 = tpu.matmul %956, %958, %cst_240 {dimension_numbers = #tpu.dot_dimension_numbers<[1], [0], [0], [1], [0, 0, 1, 1], [], []>} : vector<8x256xbf16>, vector<256x22xbf16>, vector<8x22xf32> -> vector<8x22xf32>
    %c1_241 = arith.constant 1 : index
    %c0_242 = arith.constant 0 : index
    %c0_243 = arith.constant 0 : index
    %960 = vector.load %arg14[%c1_241, %c0_242, %c0_243] : memref<2x1x22xf32, #tpu.memory_space<vmem>>, vector<1x1x22xf32>
    %961 = vector.shape_cast %960 : vector<1x1x22xf32> to vector<1x22xf32>
    %962 = vector.broadcast %961 : vector<1x22xf32> to vector<8x22xf32>
    %963 = arith.addf %959, %962 : vector<8x22xf32>
    %964 = arith.addf %657, %963 : vector<8x22xf32>
    %965 = arith.addf %964, %329 : vector<8x22xf32>
    %c0_244 = arith.constant 0 : index
    %c0_245 = arith.constant 0 : index
    %966 = vector.load %arg40[%c0_244, %c0_245] : memref<8x22xf32, #tpu.memory_space<vmem>>, vector<8x22xf32>
    tpu.vector_store %arg40[%c0_244, %c0_245], %965 {strides = array<i32>} : memref<8x22xf32, #tpu.memory_space<vmem>>, vector<8x22xf32>,
    return
  }
}

</mosaic_0001>

<bundles_post_ra>
// kernel: tile.9
= control target key start
LH: loop header
LB: loop body
LE: loop exit
PB: predicated region body
PF: predicated region fallthrough
CT: control target
= control target key end

     0   :  { %vm57_vm0 = vcmask 64512   ;;  %s225_s0 = inlined_call_operand.vmem [shape: f32[8,11,2], index: 0, kind: input, shape index: {}]   ;;  %s226_s1 = inlined_call_operand.vmem [shape: f32[8,22], index: 1, kind: output, shape index: {}]  }
   0x1   :  { %v118_v0 = vld [vmem:[%s225_s0 + $0x14] sm:$0x3]  ;;  %v119_v1 = vld [vmem:[%s225_s0 + $0x12] sm:$0x3]  ;;  %v120_v2 = vld [vmem:[%s225_s0 + $0x10] sm:$0x3] }
   0x2   :  { %9 = vst [vmem:[#allocation0 + $0x20] sm:$0x3] %v118_v0  ;;  %14 = vst [vmem:[#allocation0 + $0x50] sm:$0x3] %v119_v1  ;;  %v121_v3 = vld [vmem:[%s225_s0 + $0xe] sm:$0x3] }
   0x3   :  { %19 = vst [vmem:[#allocation0 + $0x40] sm:$0x3] %v120_v2  ;;  %v122_v4 = vld [vmem:[%s225_s0 + $0xc] sm:$0x3]  ;;  %v123_v5 = vld [vmem:[%s225_s0 + $0xa] sm:$0x3] }
   0x4   :  { %24 = vst [vmem:[#allocation0 + $0x8] sm:$0x3] %v121_v3  ;;  %29 = vst [vmem:[#allocation0 + $0x38] sm:$0x3] %v122_v4  ;;  %v124_v6 = vld [vmem:[%s225_s0 + $0x8] sm:$0x3] }
   0x5   :  { %34 = vst [vmem:[#allocation0 + $0x28] sm:$0x3] %v123_v5  ;;  %v125_v7 = vld [vmem:[%s225_s0 + $0x6] sm:$0x3]  ;;  %v126_v8 = vld [vmem:[%s225_s0 + $0x4] sm:$0x3] }
   0x6   :  { %39 = vst [vmem:[#allocation0 + $0x48] sm:$0x3] %v124_v6  ;;  %44 = vst [vmem:[#allocation0 + $0x30] sm:$0x3] %v125_v7  ;;  %v127_v9 = vld [vmem:[%s225_s0 + $0x2] sm:$0x3] }
   0x7   :  { %49 = vst [vmem:[#allocation0 + $0x10] sm:$0x3] %v126_v8  ;;  %v54_v10 = vld [vmem:[%s225_s0] sm:$0x3]  ;;  %53 = vst [vmem:[#allocation0] sm:$0x3] %v127_v9 }
   0x8   :  { %55 = vst [vmem:[#allocation0 + $0x18] sm:$0x3] %v54_v10 }
   0x9   :  { %v100_v12 = vld [vmem:[#allocation0 + $0x50] sm:$0x3]   ;;  %v105_v13 = vld [vmem:[#allocation0 + $0x20] sm:$0x3]  }
   0xa   :  { %v95_v11 = vld [vmem:[#allocation0 + $0x40] sm:$0x3]   ;;  %136 = vst.msk [vmem:[%s226_s1 + $0x12] sm:$0x3] %vm57_vm0, %v100_v12   ;;  %137 = vst.msk [vmem:[%s226_s1 + $0x14] sm:$0x3] %vm57_vm0, %v105_v13  }
   0xb   :  { %v85_v15 = vld [vmem:[#allocation0 + $0x38] sm:$0x3]   ;;  %v90_v16 = vld [vmem:[#allocation0 + $0x8] sm:$0x3]   ;;  %135 = vst.msk [vmem:[%s226_s1 + $0x10] sm:$0x3] %vm57_vm0, %v95_v11  }
   0xc   :  { %v80_v14 = vld [vmem:[#allocation0 + $0x28] sm:$0x3]   ;;  %133 = vst.msk [vmem:[%s226_s1 + $0xc] sm:$0x3] %vm57_vm0, %v85_v15   ;;  %134 = vst.msk [vmem:[%s226_s1 + $0xe] sm:$0x3] %vm57_vm0, %v90_v16  }
   0xd   :  { %v70_v18 = vld [vmem:[#allocation0 + $0x30] sm:$0x3]   ;;  %v75_v19 = vld [vmem:[#allocation0 + $0x48] sm:$0x3]   ;;  %132 = vst.msk [vmem:[%s226_s1 + $0xa] sm:$0x3] %vm57_vm0, %v80_v14  }
   0xe   :  { %v65_v17 = vld [vmem:[#allocation0 + $0x10] sm:$0x3]   ;;  %v60_v21 = vld [vmem:[#allocation0] sm:$0x3]   ;;  %130 = vst.msk [vmem:[%s226_s1 + $0x6] sm:$0x3] %vm57_vm0, %v70_v18  }
   0xf   :  { %v56_v20 = vld [vmem:[#allocation0 + $0x18] sm:$0x3]   ;;  %129 = vst.msk [vmem:[%s226_s1 + $0x4] sm:$0x3] %vm57_vm0, %v65_v17   ;;  %131 = vst.msk [vmem:[%s226_s1 + $0x8] sm:$0x3] %vm57_vm0, %v75_v19  }
  0x10   :  { %58 = vst.msk [vmem:[%s226_s1] sm:$0x3] %vm57_vm0, %v56_v20   ;;  %128 = vst.msk [vmem:[%s226_s1 + $0x2] sm:$0x3] %vm57_vm0, %v60_v21  }

// kernel: model_forward.1
= control target key start
LH: loop header
LB: loop body
LE: loop exit
PB: predicated region body
PF: predicated region fallthrough
CT: control target
= control target key end

     0   :  { %s13131_s6 = smov 1   ;;  %s13132_s10 = smov 2   ;;  %s15661_s0 = inlined_call_operand.smem [shape: u32[41], index: -1, kind: input, shape index: {}] }
   0x1   :  { %s13228_s5 = sld [smem:[%s15661_s0]]   ;;  %s13133_s14 = smov 3  }
   0x2   :  { %s13233_s9 = sld [smem:[%s15661_s0 + %s13131_s6]]   ;;  %s13134_s18 = smov 4  }
   0x3   :  { %s13238_s13 = sld [smem:[%s15661_s0 + %s13132_s10]]   ;;  %s13135_s22 = smov 5  }
   0x4   :  { %s13243_s17 = sld [smem:[%s15661_s0 + %s13133_s14]]   ;;  %s13136_s26 = smov 6  }
   0x5   :  { %s13248_s21 = sld [smem:[%s15661_s0 + %s13134_s18]]   ;;  %s13137_s30 = smov 7  }
   0x6   :  { %s13253_s25 = sld [smem:[%s15661_s0 + %s13135_s22]]   ;;  %s13138_s4 = smov 8  }
   0x7   :  { %15696 = sst [smem:[#allocation53_spill]] %s13228_s5  ;;  %s13139_s10 = smov 9  }
   0x8   :  { %15697 = sst [smem:[#allocation54_spill]] %s13233_s9  ;;  %s13140_s15 = smov 10  }
   0x9   :  { %15698 = sst [smem:[#allocation55_spill]] %s13238_s13  ;;  %s13141_s20 = smov 11  }
   0xa   :  { %15699 = sst [smem:[#allocation56_spill]] %s13243_s17  ;;  %s13143_s1 = smov 13  }
   0xb   :  { %15700 = sst [smem:[#allocation57_spill]] %s13248_s21  ;;  %s13144_s7 = smov 14  }
   0xc   :  { %15701 = sst [smem:[#allocation58_spill]] %s13253_s25  ;;  %s13146_s22 = smov 16  }
   0xd   :  { %s13258_s29 = sld [smem:[%s15661_s0 + %s13136_s26]]   ;;  %s13142_s26 = smov 12  }
   0xe   :  { %s13263_s3 = sld [smem:[%s15661_s0 + %s13137_s30]]   ;;  %s13147_s28 = smov 17  }
   0xf   :  { %s13268_s8 = sld [smem:[%s15661_s0 + %s13138_s4]]  }
  0x10   :  { %s13273_s14 = sld [smem:[%s15661_s0 + %s13139_s10]]  }
  0x11   :  { %s13278_s19 = sld [smem:[%s15661_s0 + %s13140_s15]]   ;;  %s13145_s15 = smov 15  }
  0x12   :  { %s13283_s24 = sld [smem:[%s15661_s0 + %s13141_s20]]  }
  0x13   :  { %s13288_s30 = sld [smem:[%s15661_s0 + %s13142_s26]]  }
  0x14   :  { %15702 = sst [smem:[#allocation59_spill]] %s13263_s3 }
  0x15   :  { %s13293_s6 = sld [smem:[%s15661_s0 + %s13143_s1]]  }
  0x16   :  { %s13298_s12 = sld [smem:[%s15661_s0 + %s13144_s7]]   ;;  %s13148_s7 = smov 18  }
  0x17   :  { %s13303_s20 = sld [smem:[%s15661_s0 + %s13145_s15]]   ;;  %s13149_s15 = smov 19  }
  0x18   :  { %s13308_s27 = sld [smem:[%s15661_s0 + %s13146_s22]]   ;;  %s13150_s22 = smov 20  }
  0x19   :  { %s13313_s4 = sld [smem:[%s15661_s0 + %s13147_s28]]   ;;  %s13151_s28 = smov 21  }
  0x1a   :  { %s13318_s25 = sld [smem:[%s15661_s0 + %s13148_s7]]   ;;  %s13152_s7 = smov 22  }
  0x1b   :  { %15703 = sst [smem:[#allocation60_spill]] %s13293_s6 }
  0x1c   :  { %15704 = sst [smem:[#allocation61_spill]] %s13298_s12 }
  0x1d   :  { %15705 = sst [smem:[#allocation62_spill]] %s13303_s20 }
  0x1e   :  { %s13323_s20 = sld [smem:[%s15661_s0 + %s13149_s15]]   ;;  %s13153_s15 = smov 23  }
  0x1f   :  { %15706 = sst [smem:[#allocation63_spill]] %s13313_s4 }
  0x20   :  { %s13328_s6 = sld [smem:[%s15661_s0 + %s13150_s22]]   ;;  %s13154_s22 = smov 24  }
  0x21   :  { %s13333_s3 = sld [smem:[%s15661_s0 + %s13151_s28]]   ;;  %s13155_s28 = smov 25  }
  0x22   :  { %s13338_s17 = sld [smem:[%s15661_s0 + %s13152_s7]]   ;;  %s13156_s7 = smov 26  }
  0x23   :  { %s13348_s21 = sld [smem:[%s15661_s0 + %s13154_s22]]   ;;  %s13158_s22 = smov 28  }
  0x24   :  { %15707 = sst [smem:[#allocation64_spill]] %s13323_s20 }
  0x25   :  { %s13343_s20 = sld [smem:[%s15661_s0 + %s13153_s15]]   ;;  %s13157_s15 = smov 27  }
  0x26   :  { %15708 = sst [smem:[#allocation65_spill]] %s13328_s6 }
  0x27   :  { %15709 = sst [smem:[#allocation66_spill]] %s13333_s3 }
  0x28   :  { %15710 = sst [smem:[#allocation67_spill]] %s13338_s17 }
  0x29   :  { %15711 = sst [smem:[#allocation68_spill]] %s13348_s21 }
  0x2a   :  { %s13353_s3 = sld [smem:[%s15661_s0 + %s13155_s28]]   ;;  %s13159_s28 = smov 29  }
  0x2b   :  { %s13358_s17 = sld [smem:[%s15661_s0 + %s13156_s7]]   ;;  %s13160_s7 = smov 30  }
  0x2c   :  { %s13363_s5 = sld [smem:[%s15661_s0 + %s13157_s15]]   ;;  %s13161_s15 = smov 31  }
  0x2d   :  { %s13368_s13 = sld [smem:[%s15661_s0 + %s13158_s22]]   ;;  %s13162_s22 = smov 32  }
  0x2e   :  { %s13373_s9 = sld [smem:[%s15661_s0 + %s13159_s28]]   ;;  %s13163_s28 = smov 33  }
  0x2f   :  { %s13388_s21 = sld [smem:[%s15661_s0 + %s13162_s22]]   ;;  %s13166_s22 = smov 36  }
  0x31   :  { %15712 = sst [smem:[#allocation69_spill]] %s13358_s17 }
  0x32   :  { %15713 = sst [smem:[#allocation70_spill]] %s13363_s5 }
  0x33   :  { %s13378_s17 = sld [smem:[%s15661_s0 + %s13160_s7]]   ;;  %s13164_s7 = smov 34  }
  0x34   :  { %15714 = sst [smem:[#allocation71_spill]] %s13373_s9 }
  0x35   :  { %s13383_s5 = sld [smem:[%s15661_s0 + %s13161_s15]]   ;;  %s13165_s15 = smov 35  }
  0x36   :  { %15716 = sst [smem:[#allocation73_spill]] %s13388_s21 }
  0x37   :  { %s13393_s9 = sld [smem:[%s15661_s0 + %s13163_s28]]   ;;  %s13167_s28 = smov 37  }
  0x38   :  { %s13398_s6 = sld [smem:[%s15661_s0 + %s13164_s7]]   ;;  %s13168_s7 = smov 38  }
  0x39   :  { %s13408_s21 = sld [smem:[%s15661_s0 + %s13166_s22]]   ;;  %s13170_s22 = smov 40  }
  0x3a   :  { %s13413_s4 = sld [smem:[%s15661_s0 + %s13167_s28]]  }
  0x3b   :  { %15715 = sst [smem:[#allocation72_spill]] %s13383_s5 }
  0x3c   :  { %s13403_s5 = sld [smem:[%s15661_s0 + %s13165_s15]]   ;;  %s13169_s15 = smov 39  }
  0x3d   :  { %s13423_s12 = sld [smem:[%s15661_s0 + %s13169_s15]]  }
  0x3e   :  { %15717 = sst [smem:[#allocation74_spill]] %s13398_s6 }
  0x3f   :  { %15718 = sst [smem:[#allocation75_spill]] %s13408_s21 }
  0x40   :  { %s13418_s6 = sld [smem:[%s15661_s0 + %s13168_s7]]  }
  0x41   :  { %s13428_s21 = sld [smem:[%s15661_s0 + %s13170_s22]]  }
  0x42   :  { %86 = vsyncpa [#allocation3], 0 }
  0x43   :  { %87 = vsyncpa [#allocation5], 0 }
  0x44   :  { %88 = vsyncpa [#allocation8], 0 }
  0x45   :  { %89 = vsyncpa [#allocation11], 0 }
  0x46   :  { %90 = vsyncpa [#allocation14], 0 }
  0x47   :  { %91 = vsyncpa [#allocation17], 0 }
  0x48   :  { %92 = vsyncpa [#allocation20], 0 }
  0x49   :  { %93 = vsyncpa [#allocation23], 0 }
  0x4a   :  { %94 = vsyncpa [#allocation26], 0 }
  0x4b   :  { %95 = vsyncpa [#allocation29], 0 }
  0x4c   :  { %96 = vsyncpa [#allocation32], 0 }
  0x4d   :  { %97 = vsyncpa [#allocation35], 0 }
  0x4e   :  { %98 = vsyncpa [#allocation38], 0  ;;  %s13171_s28 = smov [#allocation4]  }
  0x4f   :  { %s130_s1 = sshll.u32 %s13171_s28, 4  ;;  %s131_s1 = int_to_ptr.vmem [resolvable:$true] %s130_s1 }
  0x50   :  { %s12613_s2 = scalar_lea.vmem %s131_s1, 64  ;;  %p12618_p1 = scmp.lt.s32.totalorder %s131_s1, %s131_s1 }
  0x51   :  { %p12614_p0 = scmp.ne.s32.totalorder %s131_s1, %s12613_s2  ;;  %p12619_p2 = scmp.lt.s32.totalorder %s12613_s2, %s12613_s2 }
  0x53   :  { %p12620_p3 = por %p12619_p2, %p12618_p1 }
  0x55   :  { %p12621_p4 = pnand %p12620_p3, %p12614_p0 }
  0x57   :  { %12624 = shalt.err (!%p12621_p4)
}
  0x58   :  { %s13172_s0 = smov 32   ;;  %s13173_s7 = smov 2  }
  0x59   :  { %136 = dma.hbm_to_vmem [thread:$0]  %s13268_s8, 64, %s131_s1, [#allocation5], %s13172_s0, %s13172_s0, %s13173_s7  }
  0x5a   :  { %s13174_s10 = smov [#allocation7]   ;;  %s13175_s15 = smov [#allocation10]  }
  0x5b   :  { %s154_s11 = sshll.u32 %s13174_s10, 4  ;;  %s178_s16 = sshll.u32 %s13175_s15, 4  ;;  %s155_s11 = int_to_ptr.vmem [resolvable:$true] %s154_s11  ;;  %s179_s16 = int_to_ptr.vmem [resolvable:$true] %s178_s16 }
  0x5c   :  { %s12633_s18 = scalar_lea.vmem %s155_s11, 64  ;;  %p12638_p6 = scmp.lt.s32.totalorder %s155_s11, %s155_s11 }
  0x5d   :  { %p12634_p5 = scmp.ne.s32.totalorder %s155_s11, %s12633_s18  ;;  %p12639_p7 = scmp.lt.s32.totalorder %s12633_s18, %s12633_s18 }
  0x5f   :  { %p12640_p8 = por %p12639_p7, %p12638_p6 }
  0x61   :  { %p12641_p9 = pnand %p12640_p8, %p12634_p5 }
  0x63   :  { %12644 = shalt.err (!%p12641_p9)
}
  0x64   :  { %160 = dma.hbm_to_vmem [thread:$0]  %s13278_s19, 64, %s155_s11, [#allocation8], %s13172_s0, %s13172_s0, %s13173_s7  }
  0x65   :  { %s12653_s22 = scalar_lea.vmem %s179_s16, 32  ;;  %p12658_p11 = scmp.lt.s32.totalorder %s179_s16, %s179_s16 }
  0x66   :  { %p12654_p10 = scmp.ne.s32.totalorder %s179_s16, %s12653_s22  ;;  %p12659_p12 = scmp.lt.s32.totalorder %s12653_s22, %s12653_s22 }
  0x68   :  { %p12660_p13 = por %p12659_p12, %p12658_p11 }
  0x6a   :  { %p12661_p0 = pnand %p12660_p13, %p12654_p10 }
  0x6c   :  { %12664 = shalt.err (!%p12661_p0)
}
  0x6d   :  { %s13176_s8 = smov 16   ;;  %s13177_s23 = smov 1  }
  0x6e   :  { %184 = dma.hbm_to_vmem [thread:$0]  %s13288_s30, 32, %s179_s16, [#allocation11], %s13176_s8, %s13176_s8, %s13177_s23  }
  0x6f   :  { %s13178_s26 = smov [#allocation13]  }
  0x70   :  { %s206_s28 = sshll.u32 %s13178_s26, 4  ;;  %s207_s28 = int_to_ptr.vmem [resolvable:$true] %s206_s28 }
  0x71   :  { %s12673_s1 = scalar_lea.vmem %s207_s28, 32  ;;  %p12678_p2 = scmp.lt.s32.totalorder %s207_s28, %s207_s28 }
  0x72   :  { %p12674_p1 = scmp.ne.s32.totalorder %s207_s28, %s12673_s1  ;;  %p12679_p3 = scmp.lt.s32.totalorder %s12673_s1, %s12673_s1 }
  0x74   :  { %p12680_p4 = por %p12679_p3, %p12678_p2 }
  0x76   :  { %p12681_p5 = pnand %p12680_p4, %p12674_p1 }
  0x78   :  { %12684 = shalt.err (!%p12681_p5)
}
  0x79   :  { %212 = dma.hbm_to_vmem [thread:$0]  %s13308_s27, 32, %s207_s28, [#allocation14], %s13176_s8, %s13176_s8, %s13177_s23  }
  0x7a   :  { %s13179_s19 = smov [#allocation16]   ;;  %s13180_s10 = smov [#allocation19]  }
  0x7b   :  { %s230_s2 = sshll.u32 %s13179_s19, 4  ;;  %s261_s11 = sshll.u32 %s13180_s10, 4  ;;  %s231_s2 = int_to_ptr.vmem [resolvable:$true] %s230_s2  ;;  %s262_s11 = int_to_ptr.vmem [resolvable:$true] %s261_s11 }
  0x7c   :  { %s12693_s30 = scalar_lea.vmem %s231_s2, 96  ;;  %p12698_p7 = scmp.lt.s32.totalorder %s231_s2, %s231_s2 }
  0x7d   :  { %p12694_p6 = scmp.ne.s32.totalorder %s231_s2, %s12693_s30  ;;  %p12699_p8 = scmp.lt.s32.totalorder %s12693_s30, %s12693_s30 }
  0x7f   :  { %p12700_p9 = por %p12699_p8, %p12698_p7 }
  0x81   :  { %p12701_p10 = pnand %p12700_p9, %p12694_p6 }
  0x83   :  { %12704 = shalt.err (!%p12701_p10)
}
  0x84   :  { %s13181_s15 = smov 48   ;;  %s13182_s16 = smov 3  }
  0x85   :  { %236 = dma.hbm_to_vmem [thread:$0]  %s13318_s25, 96, %s231_s2, [#allocation17], %s13181_s15, %s13181_s15, %s13182_s16  }
  0x86   :  { %s12713_s27 = scalar_lea.vmem %s262_s11, 16  ;;  %s12717_s18 = scalar_lea.vmem %s262_s11, 32 }
  0x87   :  { %p12714_p11 = scmp.ne.s32.totalorder %s262_s11, %s12713_s27  ;;  %p12718_p12 = scmp.lt.s32.totalorder %s262_s11, %s262_s11 }
  0x88   :  { %p12719_p13 = scmp.lt.s32.totalorder %s12717_s18, %s12713_s27 }
  0x8a   :  { %p12720_p0 = por %p12719_p13, %p12718_p12 }
  0x8c   :  { %p12721_p1 = pnand %p12720_p0, %p12714_p11 }
  0x8e   :  { %12724 = shalt.err (!%p12721_p1)
}
  0x8f   :  { %264 = dma.hbm_to_vmem [thread:$0]  %s13343_s20, 16, %s262_s11, [#allocation20]  }
  0x90   :  { %s13183_s22 = smov [#allocation22]   ;;  %s13184_s28 = smov [#allocation25]  }
  0x91   :  { %s283_s26 = sshll.u32 %s13183_s22, 4  ;;  %s305_s1 = sshll.u32 %s13184_s28, 4  ;;  %s284_s26 = int_to_ptr.vmem [resolvable:$true] %s283_s26  ;;  %s306_s1 = int_to_ptr.vmem [resolvable:$true] %s305_s1 }
  0x92   :  { %s12733_s19 = scalar_lea.vmem %s284_s26, 16  ;;  %s12737_s10 = scalar_lea.vmem %s284_s26, 32 }
  0x93   :  { %p12734_p2 = scmp.ne.s32.totalorder %s284_s26, %s12733_s19  ;;  %p12738_p3 = scmp.lt.s32.totalorder %s284_s26, %s284_s26 }
  0x94   :  { %p12739_p4 = scmp.lt.s32.totalorder %s12737_s10, %s12733_s19 }
  0x96   :  { %p12740_p5 = por %p12739_p4, %p12738_p3 }
  0x98   :  { %p12741_p6 = pnand %p12740_p5, %p12734_p2 }
  0x9a   :  { %12744 = shalt.err (!%p12741_p6)
}
  0x9b   :  { %286 = dma.hbm_to_vmem [thread:$0]  %s13353_s3, 16, %s284_s26, [#allocation23]  }
  0x9c   :  { %s12753_s25 = scalar_lea.vmem %s306_s1, 128  ;;  %p12758_p8 = scmp.lt.s32.totalorder %s306_s1, %s306_s1 }
  0x9d   :  { %p12754_p7 = scmp.ne.s32.totalorder %s306_s1, %s12753_s25  ;;  %p12759_p9 = scmp.lt.s32.totalorder %s12753_s25, %s12753_s25 }
  0x9f   :  { %p12760_p10 = por %p12759_p9, %p12758_p8 }
  0xa1   :  { %p12761_p11 = pnand %p12760_p10, %p12754_p7 }
  0xa3   :  { %12764 = shalt.err (!%p12761_p11)
}
  0xa4   :  { %308 = dma.hbm_to_vmem [thread:$0]  %s13368_s13, 128, %s306_s1, [#allocation26]  }
  0xa5   :  { %s13185_s20 = smov [#allocation28]   ;;  %s13186_s11 = smov [#allocation31]  }
  0xa6   :  { %s325_s2 = sshll.u32 %s13185_s20, 4  ;;  %s349_s30 = sshll.u32 %s13186_s11, 4  ;;  %s326_s2 = int_to_ptr.vmem [resolvable:$true] %s325_s2  ;;  %s350_s30 = int_to_ptr.vmem [resolvable:$true] %s349_s30 }
  0xa7   :  { %s12773_s27 = scalar_lea.vmem %s326_s2, 16  ;;  %s12777_s18 = scalar_lea.vmem %s326_s2, 32 }
  0xa8   :  { %p12774_p12 = scmp.ne.s32.totalorder %s326_s2, %s12773_s27  ;;  %p12778_p13 = scmp.lt.s32.totalorder %s326_s2, %s326_s2 }
  0xa9   :  { %p12779_p0 = scmp.lt.s32.totalorder %s12777_s18, %s12773_s27 }
  0xab   :  { %p12780_p1 = por %p12779_p0, %p12778_p13 }
  0xad   :  { %p12781_p2 = pnand %p12780_p1, %p12774_p12 }
  0xaf   :  { %12784 = shalt.err (!%p12781_p2)
}
  0xb0   :  { %328 = dma.hbm_to_vmem [thread:$0]  %s13378_s17, 16, %s326_s2, [#allocation29]  }
  0xb1   :  { %s12793_s3 = scalar_lea.vmem %s350_s30, 16  ;;  %s12797_s22 = scalar_lea.vmem %s350_s30, 32 }
  0xb2   :  { %p12794_p3 = scmp.ne.s32.totalorder %s350_s30, %s12793_s3  ;;  %p12798_p4 = scmp.lt.s32.totalorder %s350_s30, %s350_s30 }
  0xb3   :  { %p12799_p5 = scmp.lt.s32.totalorder %s12797_s22, %s12793_s3 }
  0xb5   :  { %p12800_p6 = por %p12799_p5, %p12798_p4 }
  0xb7   :  { %p12801_p7 = pnand %p12800_p6, %p12794_p3 }
  0xb9   :  { %12804 = shalt.err (!%p12801_p7)
}
  0xba   :  { %352 = dma.hbm_to_vmem [thread:$0]  %s13393_s9, 16, %s350_s30, [#allocation32]  }
  0xbb   :  { %s13187_s13 = smov [#allocation34]   ;;  %s13188_s28 = smov [#allocation37]  }
  0xbc   :  { %s369_s26 = sshll.u32 %s13187_s13, 4  ;;  %s389_s1 = sshll.u32 %s13188_s28, 4  ;;  %s370_s26 = int_to_ptr.vmem [resolvable:$true] %s369_s26  ;;  %s390_s1 = int_to_ptr.vmem [resolvable:$true] %s389_s1 }
  0xbd   :  { %s12813_s19 = scalar_lea.vmem %s370_s26, 32  ;;  %p12818_p9 = scmp.lt.s32.totalorder %s370_s26, %s370_s26 }
  0xbe   :  { %p12814_p8 = scmp.ne.s32.totalorder %s370_s26, %s12813_s19  ;;  %p12819_p10 = scmp.lt.s32.totalorder %s12813_s19, %s12813_s19 }
  0xc0   :  { %p12820_p11 = por %p12819_p10, %p12818_p9 }
  0xc2   :  { %p12821_p12 = pnand %p12820_p11, %p12814_p8 }
  0xc4   :  { %12824 = shalt.err (!%p12821_p12)
}
  0xc5   :  { %372 = dma.hbm_to_vmem [thread:$0]  %s13403_s5, 32, %s370_s26, [#allocation35]  }
  0xc6   :  { %s12833_s17 = scalar_lea.vmem %s390_s1, 64  ;;  %p12838_p0 = scmp.lt.s32.totalorder %s390_s1, %s390_s1 }
  0xc7   :  { %p12834_p13 = scmp.ne.s32.totalorder %s390_s1, %s12833_s17  ;;  %p12839_p1 = scmp.lt.s32.totalorder %s12833_s17, %s12833_s17 }
  0xc9   :  { %p12840_p2 = por %p12839_p1, %p12838_p0 }
  0xcb   :  { %p12841_p3 = pnand %p12840_p2, %p12834_p13 }
  0xcd   :  { %12844 = shalt.err (!%p12841_p3)
}
  0xce   :  { %392 = dma.hbm_to_vmem [thread:$0]  %s13413_s4, 64, %s390_s1, [#allocation38]  }
  0xcf   :  { %s13189_s9 = smov [#allocation2]  }
  0xd0   :  { %s116_s10 = sshll.u32 %s13189_s9, 4  ;;  %s117_s10 = int_to_ptr.vmem [resolvable:$true] %s116_s10 }
  0xd1   :  { %s12853_s25 = scalar_lea.vmem %s117_s10, 256  ;;  %p12858_p5 = scmp.lt.s32.totalorder %s117_s10, %s117_s10 }
  0xd2   :  { %p12854_p4 = scmp.ne.s32.totalorder %s117_s10, %s12853_s25  ;;  %p12859_p6 = scmp.lt.s32.totalorder %s12853_s25, %s12853_s25 }
  0xd4   :  { %p12860_p7 = por %p12859_p6, %p12858_p5 }
  0xd6   :  { %p12861_p8 = pnand %p12860_p7, %p12854_p4 }
  0xd8   :  { %12864 = shalt.err (!%p12861_p8)
}
  0xd9   :  { %s13190_s5 = smov 128   ;;  %s13191_s20 = smov 8  }
  0xda   :  { %122 = dma.hbm_to_vmem [thread:$0]  %s13258_s29, 256, %s117_s10, [#allocation3], %s13190_s5, %s13190_s5, %s13191_s20  }
  0xdb   :  { %s13192_s2 = smov [#allocation6]   ;;  %s13193_s4 = smov [#allocation9]  }
  0xdc   :  { %s142_s11 = sshll.u32 %s13192_s2, 4  ;;  %s166_s30 = sshll.u32 %s13193_s4, 4  ;;  %s143_s11 = int_to_ptr.vmem [resolvable:$true] %s142_s11  ;;  %s167_s30 = int_to_ptr.vmem [resolvable:$true] %s166_s30 }
  0xdd   :  { %s12873_s27 = scalar_lea.vmem %s143_s11, 16384  ;;  %p12878_p10 = scmp.lt.s32.totalorder %s143_s11, %s143_s11 }
  0xde   :  { %p12874_p9 = scmp.ne.s32.totalorder %s143_s11, %s12873_s27  ;;  %p12879_p11 = scmp.lt.s32.totalorder %s12873_s27, %s12873_s27 }
  0xe0   :  { %p12880_p12 = por %p12879_p11, %p12878_p10 }
  0xe2   :  { %p12881_p13 = pnand %p12880_p12, %p12874_p9 }
  0xe4   :  { %12884 = shalt.err (!%p12881_p13)
}
  0xe5   :  { %148 = dma.hbm_to_vmem [thread:$0]  %s13273_s14, 16384, %s143_s11, [#allocation5], %s13190_s5, %s13190_s5, %s13191_s20  }
  0xe6   :  { %s12893_s18 = scalar_lea.vmem %s167_s30, 16384  ;;  %p12898_p1 = scmp.lt.s32.totalorder %s167_s30, %s167_s30 }
  0xe7   :  { %p12894_p0 = scmp.ne.s32.totalorder %s167_s30, %s12893_s18  ;;  %p12899_p2 = scmp.lt.s32.totalorder %s12893_s18, %s12893_s18 }
  0xe9   :  { %p12900_p3 = por %p12899_p2, %p12898_p1 }
  0xeb   :  { %p12901_p4 = pnand %p12900_p3, %p12894_p0 }
  0xed   :  { %12904 = shalt.err (!%p12901_p4)
}
  0xee   :  { %172 = dma.hbm_to_vmem [thread:$0]  %s13283_s24, 16384, %s167_s30, [#allocation8], %s13190_s5, %s13190_s5, %s13191_s20  }
  0xef   :  { %s13194_s29 = smov [#allocation12]   ;;  %s13195_s22 = smov [#allocation15]  }
  0xf0   :  { %s192_s3 = sshll.u32 %s13194_s29, 4  ;;  %s218_s13 = sshll.u32 %s13195_s22, 4  ;;  %s193_s3 = int_to_ptr.vmem [resolvable:$true] %s192_s3  ;;  %s219_s13 = int_to_ptr.vmem [resolvable:$true] %s218_s13 }
  0xf1   :  { %s12913_s26 = scalar_lea.vmem %s193_s3, 32  ;;  %p12918_p6 = scmp.lt.s32.totalorder %s193_s3, %s193_s3 }
  0xf2   :  { %p12914_p5 = scmp.ne.s32.totalorder %s193_s3, %s12913_s26  ;;  %p12919_p7 = scmp.lt.s32.totalorder %s12913_s26, %s12913_s26 }
  0xf4   :  { %p12920_p8 = por %p12919_p7, %p12918_p6 }
  0xf6   :  { %p12921_p9 = pnand %p12920_p8, %p12914_p5 }
  0xf8   :  { %12924 = shalt.err (!%p12921_p9)
}
  0xf9   :  { %s15719_s14 = sld [smem:[#allocation61_spill]]  ;;  %s12933_s28 = scalar_lea.vmem %s219_s13, 96 }
  0xfa   :  { %p12934_p10 = scmp.ne.s32.totalorder %s219_s13, %s12933_s28  ;;  %p12938_p11 = scmp.lt.s32.totalorder %s219_s13, %s219_s13 }
  0xfb   :  { %p12939_p12 = scmp.lt.s32.totalorder %s12933_s28, %s12933_s28 }
  0xfd   :  { %p12940_p13 = por %p12939_p12, %p12938_p11 }
  0xff   :  { %198 = dma.hbm_to_vmem [thread:$0]  %s15719_s14, 32, %s193_s3, [#allocation11], %s13176_s8, %s13176_s8, %s13177_s23  }
 0x100   :  { %p12941_p0 = pnand %p12940_p13, %p12934_p10 }
 0x102   :  { %12944 = shalt.err (!%p12941_p0)
}
 0x103   :  { %s15720_s24 = sld [smem:[#allocation63_spill]]  ;;  %s13196_s1 = smov [#allocation18]  }
 0x104   :  { %s244_s19 = sshll.u32 %s13196_s1, 4  ;;  %s245_s19 = int_to_ptr.vmem [resolvable:$true] %s244_s19 }
 0x105   :  { %s12953_s17 = scalar_lea.vmem %s245_s19, 4608  ;;  %p12958_p2 = scmp.lt.s32.totalorder %s245_s19, %s245_s19 }
 0x106   :  { %p12954_p1 = scmp.ne.s32.totalorder %s245_s19, %s12953_s17  ;;  %p12959_p3 = scmp.lt.s32.totalorder %s12953_s17, %s12953_s17 }
 0x108   :  { %p12960_p4 = por %p12959_p3, %p12958_p2 }
 0x109   :  { %224 = dma.hbm_to_vmem [thread:$0]  %s15720_s24, 96, %s219_s13, [#allocation14], %s13181_s15, %s13181_s15, %s13182_s16  }
 0x10a   :  { %p12961_p5 = pnand %p12960_p4, %p12954_p1 }
 0x10c   :  { %12964 = shalt.err (!%p12961_p5)
}
 0x10d   :  { %s13197_s8 = smov 192   ;;  %s15721_s23 = sld [smem:[#allocation65_spill]] }
 0x10e   :  { %s13198_s9 = smov 12   ;;  %s13199_s10 = smov [#allocation21]  }
 0x10f   :  { %s270_s25 = sshll.u32 %s13199_s10, 4  ;;  %s271_s25 = int_to_ptr.vmem [resolvable:$true] %s270_s25 }
 0x110   :  { %s12973_s2 = scalar_lea.vmem %s271_s25, 512  ;;  %p12978_p7 = scmp.lt.s32.totalorder %s271_s25, %s271_s25 }
 0x111   :  { %p12974_p6 = scmp.ne.s32.totalorder %s271_s25, %s12973_s2  ;;  %p12979_p8 = scmp.lt.s32.totalorder %s12973_s2, %s12973_s2 }
 0x113   :  { %250 = dma.hbm_to_vmem [thread:$0]  %s15721_s23, 4608, %s245_s19, [#allocation17], %s13197_s8, %s13197_s8, %s13198_s9  }
 0x114   :  { %p12980_p9 = por %p12979_p8, %p12978_p7 }
 0x116   :  { %p12981_p10 = pnand %p12980_p9, %p12974_p6 }
 0x118   :  { %12984 = shalt.err (!%p12981_p10)
}
 0x119   :  { %s13200_s15 = smov 64   ;;  %s15722_s16 = sld [smem:[#allocation68_spill]] }
 0x11a   :  { %s13201_s11 = smov 4   ;;  %s13202_s4 = smov [#allocation24]  }
 0x11b   :  { %s295_s30 = sshll.u32 %s13202_s4, 4  ;;  %s13203_s27 = smov [#allocation27]   ;;  %s296_s30 = int_to_ptr.vmem [resolvable:$true] %s295_s30 }
 0x11c   :  { %s315_s18 = sshll.u32 %s13203_s27, 4  ;;  %s12993_s29 = scalar_lea.vmem %s296_s30, 16  ;;  %s316_s18 = int_to_ptr.vmem [resolvable:$true] %s315_s18 }
 0x11d   :  { %p12994_p11 = scmp.ne.s32.totalorder %s296_s30, %s12993_s29  ;;  %s12997_s3 = scalar_lea.vmem %s296_s30, 32 }
 0x11e   :  { %p12998_p12 = scmp.lt.s32.totalorder %s296_s30, %s296_s30  ;;  %p12999_p13 = scmp.lt.s32.totalorder %s12997_s3, %s12993_s29 }
 0x11f   :  { %276 = dma.hbm_to_vmem [thread:$0]  %s15722_s16, 512, %s271_s25, [#allocation20], %s13200_s15, %s13200_s15, %s13201_s11  }
 0x120   :  { %p13000_p0 = por %p12999_p13, %p12998_p12 }
 0x122   :  { %p13001_p1 = pnand %p13000_p0, %p12994_p11 }
 0x124   :  { %13004 = shalt.err (!%p13001_p1)
}
 0x125   :  { %s15723_s22 = sld [smem:[#allocation70_spill]]  ;;  %s13013_s13 = scalar_lea.vmem %s316_s18, 16 }
 0x126   :  { %p13014_p2 = scmp.ne.s32.totalorder %s316_s18, %s13013_s13  ;;  %s13017_s26 = scalar_lea.vmem %s316_s18, 32 }
 0x127   :  { %p13018_p3 = scmp.lt.s32.totalorder %s316_s18, %s316_s18  ;;  %p13019_p4 = scmp.lt.s32.totalorder %s13017_s26, %s13013_s13 }
 0x129   :  { %p13020_p5 = por %p13019_p4, %p13018_p3 }
 0x12b   :  { %298 = dma.hbm_to_vmem [thread:$0]  %s15723_s22, 16, %s296_s30, [#allocation23]  }
 0x12c   :  { %p13021_p6 = pnand %p13020_p5, %p13014_p2 }
 0x12e   :  { %13024 = shalt.err (!%p13021_p6)
}
 0x12f   :  { %s15724_s14 = sld [smem:[#allocation71_spill]]  ;;  %s13204_s28 = smov [#allocation30]  }
 0x130   :  { %s334_s24 = sshll.u32 %s13204_s28, 4  ;;  %s335_s24 = int_to_ptr.vmem [resolvable:$true] %s334_s24 }
 0x131   :  { %s13033_s1 = scalar_lea.vmem %s335_s24, 8192  ;;  %p13038_p8 = scmp.lt.s32.totalorder %s335_s24, %s335_s24 }
 0x132   :  { %p13034_p7 = scmp.ne.s32.totalorder %s335_s24, %s13033_s1  ;;  %p13039_p9 = scmp.lt.s32.totalorder %s13033_s1, %s13033_s1 }
 0x134   :  { %p13040_p10 = por %p13039_p9, %p13038_p8 }
 0x135   :  { %318 = dma.hbm_to_vmem [thread:$0]  %s15724_s14, 16, %s316_s18, [#allocation26]  }
 0x136   :  { %p13041_p11 = pnand %p13040_p10, %p13034_p7 }
 0x138   :  { %13044 = shalt.err (!%p13041_p11)
}
 0x139   :  { %s13205_s19 = smov 512   ;;  %s15725_s17 = sld [smem:[#allocation72_spill]] }
 0x13a   :  { %s13206_s8 = smov [#allocation33]   ;;  %s13207_s9 = smov [#allocation36]  }
 0x13b   :  { %s359_s23 = sshll.u32 %s13206_s8, 4  ;;  %s379_s10 = sshll.u32 %s13207_s9, 4  ;;  %s360_s23 = int_to_ptr.vmem [resolvable:$true] %s359_s23  ;;  %s380_s10 = int_to_ptr.vmem [resolvable:$true] %s379_s10 }
 0x13c   :  { %s13053_s25 = scalar_lea.vmem %s360_s23, 16  ;;  %s13057_s2 = scalar_lea.vmem %s360_s23, 32 }
 0x13d   :  { %p13054_p12 = scmp.ne.s32.totalorder %s360_s23, %s13053_s25  ;;  %p13058_p13 = scmp.lt.s32.totalorder %s360_s23, %s360_s23 }
 0x13e   :  { %p13059_p0 = scmp.lt.s32.totalorder %s13057_s2, %s13053_s25 }
 0x13f   :  { %340 = dma.hbm_to_vmem [thread:$0]  %s15725_s17, 8192, %s335_s24, [#allocation29], %s13205_s19, %s13205_s19, %s13172_s0  }
 0x140   :  { %p13060_p1 = por %p13059_p0, %p13058_p13 }
 0x142   :  { %p13061_p2 = pnand %p13060_p1, %p13054_p12 }
 0x144   :  { %13064 = shalt.err (!%p13061_p2)
}
 0x145   :  { %s15726_s16 = sld [smem:[#allocation74_spill]]  ;;  %s13073_s11 = scalar_lea.vmem %s380_s10, 32 }
 0x146   :  { %p13074_p3 = scmp.ne.s32.totalorder %s380_s10, %s13073_s11  ;;  %p13078_p4 = scmp.lt.s32.totalorder %s380_s10, %s380_s10 }
 0x147   :  { %p13079_p5 = scmp.lt.s32.totalorder %s13073_s11, %s13073_s11 }
 0x149   :  { %p13080_p6 = por %p13079_p5, %p13078_p4 }
 0x14b   :  { %362 = dma.hbm_to_vmem [thread:$0]  %s15726_s16, 16, %s360_s23, [#allocation32]  }
 0x14c   :  { %p13081_p7 = pnand %p13080_p6, %p13074_p3 }
 0x14e   :  { %13084 = shalt.err (!%p13081_p7)
}
 0x14f   :  { %s15727_s4 = sld [smem:[#allocation75_spill]]  ;;  %s13208_s30 = smov [#allocation39]  }
 0x150   :  { %s398_s27 = sshll.u32 %s13208_s30, 4  ;;  %s399_s27 = int_to_ptr.vmem [resolvable:$true] %s398_s27 }
 0x151   :  { %s13093_s18 = scalar_lea.vmem %s399_s27, 1024  ;;  %p13098_p9 = scmp.lt.s32.totalorder %s399_s27, %s399_s27 }
 0x152   :  { %p13094_p8 = scmp.ne.s32.totalorder %s399_s27, %s13093_s18  ;;  %p13099_p10 = scmp.lt.s32.totalorder %s13093_s18, %s13093_s18 }
 0x154   :  { %p13100_p11 = por %p13099_p10, %p13098_p9 }
 0x155   :  { %382 = dma.hbm_to_vmem [thread:$0]  %s15727_s4, 32, %s380_s10, [#allocation35]  }
 0x156   :  { %p13101_p12 = pnand %p13100_p11, %p13094_p8 }
 0x158   :  { %13104 = shalt.err (!%p13101_p12)
}
 0x159   :  { %404 = dma.hbm_to_vmem [thread:$0]  %s13418_s6, 1024, %s399_s27, [#allocation38], %s13190_s5, %s13190_s5, %s13191_s20  }
 0x15a   :  { %13105 = dma.done.wait [#allocation3], 256  }
 0x15b   :  { %13106 = vsyncadd [#allocation3], 4294967040 }
 0x15c   :  { %13107 = dma.done.wait [#allocation5], 16448  }
 0x15d   :  { %13108 = vsyncadd [#allocation5], 4294950848 }
 0x15e   :  { %13109 = dma.done.wait [#allocation8], 16448  }
 0x15f   :  { %13110 = vsyncadd [#allocation8], 4294950848 }
 0x160   :  { %13111 = dma.done.wait [#allocation11], 64  }
 0x161   :  { %13112 = vsyncadd [#allocation11], 4294967232 }
 0x162   :  { %13113 = dma.done.wait [#allocation14], 128  }
 0x163   :  { %13114 = vsyncadd [#allocation14], 4294967168 }
 0x164   :  { %13115 = dma.done.wait [#allocation17], 4704  }
 0x165   :  { %13116 = vsyncadd [#allocation17], 4294962592 }
 0x166   :  { %13117 = dma.done.wait [#allocation20], 528  }
 0x167   :  { %13118 = vsyncadd [#allocation20], 4294966768 }
 0x168   :  { %13119 = dma.done.wait [#allocation23], 32  }
 0x169   :  { %13120 = vsyncadd [#allocation23], 4294967264 }
 0x16a   :  { %13121 = dma.done.wait [#allocation26], 144  }
 0x16b   :  { %13122 = vsyncadd [#allocation26], 4294967152 }
 0x16c   :  { %13123 = dma.done.wait [#allocation29], 8208  }
 0x16d   :  { %13124 = vsyncadd [#allocation29], 4294959088 }
 0x16e   :  { %13125 = dma.done.wait [#allocation32], 32  }
 0x16f   :  { %13126 = vsyncadd [#allocation32], 4294967264 }
 0x170   :  { %13127 = dma.done.wait [#allocation35], 64  }
 0x171   :  { %13128 = vsyncadd [#allocation35], 4294967232 }
 0x172   :  { %13129 = dma.done.wait [#allocation38], 1088  }
 0x173   :  { %13130 = vsyncadd [#allocation38], 4294966208  ;;  %s15728_s6 = sld [smem:[#allocation54_spill]]  ;;  %v486_v1 = vld [vmem:[#allocation37] sm:$0x7]  ;;  %vm775_vm0 = vcmask 1042432   ;;  %v857_v57 = vlaneseq }
 0x174   :  { %vm726_vm1 = vcmask 15360   ;;  %11732 = vmatprep.subr.msk.bf16.mxu0 %vm775_vm0, %v486_v1  ;;  %vm728_vm2 = vcmask 146432   ;;  %v777_v2 = vsel %vm775_vm0, %v486_v1, 0  ;;  %s13209_s5 = smov 124   ;;  %s13210_s20 = smov 126   ;;  %vm762_vm3 = vcmask 48128  }
 0x175   :  { %11373 = vmatpush3.bf16.msra.mxu0 %v777_v2  ;;  %v11837_v6 = vld [vmem:[%s13423_s12] ss:$8 sps:$4 sm:$0xff]   ;;  %v11839_v7 = vld [vmem:[%s13423_s12 + $0x4] ss:$8 sps:$4 sm:$0xff]   ;;  %s13211_s29 = smov 122   ;;  %s13212_s3 = smov 120  }
 0x176   :  { %904 = vmatprep.subr.bf16.mxu0 %v11839_v7  ;;  %11730 = vmatprep.subr.bf16.mxu1 %v11839_v7  ;;  %s13213_s22 = smov 118   ;;  %s13214_s13 = smov 116   ;;  %v13510_v19 = vld [vmem:[#allocation39 + $0x34] ss:$8 sps:$4 sm:$0xff]   ;;  %v15673_v20 = vmov 0   ;;  %vm877_vm4 = vcmask 130048  }
 0x177   :  { %11731 = vmatpush1.bf16.msra.mxu1 %v11837_v6  ;;  %s13215_s26 = smov 114   ;;  %942 = vmatprep.mubr.bf16.mxu1 %v15673_v20  ;;  %v10153_v23 = vld [vmem:[#allocation33] ss:$0 sm:$0xff]  ;;  %v13518_v32 = vld [vmem:[#allocation39 + $0x30] ss:$8 sps:$4 sm:$0xff]   ;;  %v13566_v58 = vshrl.u32 %v857_v57, 7 }
 0x178   :  { %1158 = vmatprep.subr.bf16.mxu1 %v13510_v19  ;;  %11825 = vset.pattern.permute.xlu1 %v15673_v20  ;;  %v13520_v35 = vld [vmem:[#allocation39 + $0x24] ss:$8 sps:$4 sm:$0xff]   ;;  %v13524_v40 = vld [vmem:[#allocation39 + $0x20] ss:$8 sps:$4 sm:$0xff]   ;;  %v13528_v43 = vld [vmem:[#allocation39 + $0x14] ss:$8 sps:$4 sm:$0xff]  }
 0x179   :  { %v721_v0 = vld [vmem:[%s15728_s6] sm:$0xff]  ;;  %11826 = vset.pattern.permute.xlu0 %v15673_v20  ;;  %v13534_v51 = vld [vmem:[#allocation39 + $0x4] ss:$8 sps:$4 sm:$0xff]   ;;  %v13539_v53 = vld [vmem:[#allocation39] ss:$8 sps:$4 sm:$0xff]   ;;  %15729 = vst [vmem:[#allocation76_spill] sm:$0xff] %v13566_v58 }
 0x17a   :  { %723 = vrot.lane.b32.xlu0 %v721_v0, %s13173_s7  ;;  %v13531_v47 = vld [vmem:[#allocation39 + $0x10] ss:$8 sps:$4 sm:$0xff]   ;;  %v13569_v59 = vsub.s32 0, %v13566_v58  ;;  %v13573_v1 = vsub.s32 1, %v13566_v58  ;;  %vm1014_vm5 = vcmask 523264   ;;  %s15732_s12 = sld [smem:[#allocation55_spill]] }
 0x17b   :  { %v485_v60 = vld [vmem:[#allocation36] sm:$0x3]  ;;  %vm1580_vm6 = vcmask 1040384   ;;  %s15733_s14 = sld [smem:[#allocation53_spill]]  ;;  %vm13218_vm7 = vmmov 0   ;;  %vm3653_vm8 = vcmask 261120  }
 0x17c   :  { %15730 = vst [vmem:[#allocation77_spill] sm:$0xff] %v13569_v59  ;;  %v860_v63 = vrot.slane %v485_v60, %v13569_v59  ;;  %15731 = vst [vmem:[#allocation78_spill] sm:$0xff] %v13573_v1  ;;  %s15734_s28 = sld [smem:[#allocation73_spill]]  ;;  %s13219_s23 = smov 96   ;;  %vm3916_vm9 = vcmask 785408  }
 0x17d   :  { %s15740_s24 = sld [smem:[#allocation67_spill]] }
 0x17e   :  { %s15741_s1 = sld [smem:[#allocation57_spill]] }
 0x17f   :  { %s15742_s19 = sld [smem:[#allocation64_spill]] }
 0x180   :  { %s15743_s17 = sld [smem:[#allocation69_spill]] }
 0x181   :  { %s15752_s8 = sld [smem:[#allocation66_spill]] }
 0x182   :  { %s15755_s9 = sld [smem:[#allocation56_spill]] }
 0x183   :  { %s15756_s10 = sld [smem:[#allocation59_spill]] }
 0x184   :  { %s15775_s25 = sld [smem:[#allocation60_spill]] }
 0x185   :  { %s15776_s2 = sld [smem:[#allocation62_spill]] }
 0x1ec   :  { %v724_v3 = vpop.permute.xlu0 %723 }
 0x1ed   :  { %v727_v4 = vsel %vm726_vm1, 0.0, %v724_v3 }
 0x1ee   :  { %v729_v5 = vsel %vm728_vm2, %v727_v4, 0.0 }
 0x1ef   :  { %734 = vrot.lane.b32.xlu1 %v729_v5, %s13209_s5  ;;  %731 = vrot.lane.b32.xlu0 %v729_v5, %s13210_s20 }
 0x1f3   :  { %737 = vrot.lane.b32.xlu1 %v729_v5, %s13211_s29  ;;  %740 = vrot.lane.b32.xlu0 %v729_v5, %s13212_s3 }
 0x1f7   :  { %743 = vrot.lane.b32.xlu1 %v729_v5, %s13213_s22  ;;  %746 = vrot.lane.b32.xlu0 %v729_v5, %s13214_s13 }
 0x1fb   :  { %749 = vrot.lane.b32.xlu1 %v729_v5, %s13215_s26 }
 0x261   :  { %v735_v8 = vpop.permute.xlu1 %734  ;;  %v732_v9 = vpop.permute.xlu0 %731 }
 0x262   :  { %v752_v10 = vpack.c.bf16 %v732_v9, %v729_v5 }
 0x264   :  { %11374 = vmatprep.mubr.msk.bf16.mxu0 %vm762_vm3, %v752_v10 }
 0x265   :  { %v738_v11 = vpop.permute.xlu1 %737  ;;  %v741_v13 = vpop.permute.xlu0 %740 }
 0x266   :  { %v753_v12 = vpack.c.bf16 %v738_v11, %v735_v8  ;;  %v484_v11 = vld [vmem:[#allocation34] sm:$0x3] }
 0x268   :  { %11375 = vmatmul.mubr.msk.bf16.vlgmr.msra.gmra.mxu0 %vm762_vm3, %v753_v12 }
 0x269   :  { %v744_v14 = vpop.permute.xlu1 %743  ;;  %905 = vmatpush1.bf16.msra.mxu0 %v11837_v6  ;;  %v747_v16 = vpop.permute.xlu0 %746  ;;  %v13580_v6 = vrot.slane %v485_v60, %v13573_v1 }
 0x26a   :  { %v754_v15 = vpack.c.bf16 %v744_v14, %v741_v13  ;;  %1026 = vmatprep.subr.bf16.mxu0 %v13510_v19 }
 0x26c   :  { %11378 = vmatprep.mubr.msk.bf16.mxu0 %vm762_vm3, %v754_v15 }
 0x26d   :  { %v750_v17 = vpop.permute.xlu1 %749 }
 0x26e   :  { %v755_v18 = vpack.c.bf16 %v750_v17, %v747_v16 }
 0x270   :  { %11379 = vmatmul.mubr.msk.bf16.gmra.mxu0 %vm762_vm3, %v755_v18  ;;  %v13597_v18 = vrot.slane %v484_v11, %v13569_v59 }
 0x271   :  { %922 = vmatprep.mubr.bf16.mxu0 %v15673_v20 }
 0x328   :  { %v11376_v21 = vpop.f32.mrf.mxu0 }
 0x329   :  { %v822_v37 = vadd.f32 %v11376_v21, %v10153_v23 }
 0x32a   :  { %v813_v22 = vpop.f32.mrf.mxu0 }
 0x32b   :  { %v814_v25 = vadd.f32 %v10153_v23, %v813_v22  ;;  %v846_v44 = vmax.f32 %v822_v37, 0.0 }
 0x32c   :  { %v11377_v24 = vpop.f32.mrf.mxu0 }
 0x32d   :  { %v844_v29 = vmax.f32 %v814_v25, 0.0  ;;  %v825_v33 = vadd.f32 %v11377_v24, %v10153_v23 }
 0x32e   :  { %v816_v26 = vpop.f32.mrf.mxu0 }
 0x32f   :  { %v817_v27 = vadd.f32 %v10153_v23, %v816_v26  ;;  %v847_v41 = vmax.f32 %v825_v33, 0.0 }
 0x330   :  { %v11380_v28 = vpop.f32.mrf.mxu0 }
 0x331   :  { %v845_v30 = vmax.f32 %v817_v27, 0.0  ;;  %v853_v48 = vpack.c.bf16 %v847_v41, %v846_v44  ;;  %v838_v52 = vadd.f32 %v11380_v28, %v10153_v23 }
 0x332   :  { %v829_v31 = vpop.f32.mrf.mxu0 }
 0x333   :  { %v852_v34 = vpack.c.bf16 %v845_v30, %v844_v29  ;;  %v830_v38 = vadd.f32 %v10153_v23, %v829_v31  ;;  %v850_v55 = vmax.f32 %v838_v52, 0.0 }
 0x334   :  { %v11381_v36 = vpop.f32.mrf.mxu0 }
 0x335   :  { %10160 = vmatmul.mubr.msk.bf16.vlgmr.msra.gmra.mxu0 %vm877_vm4, %v852_v34  ;;  %v848_v45 = vmax.f32 %v830_v38, 0.0  ;;  %v841_v49 = vadd.f32 %v11381_v36, %v10153_v23 }
 0x336   :  { %1027 = vmatpush1.bf16.msra.mxu0 %v13518_v32  ;;  %v832_v39 = vpop.f32.mrf.mxu0  ;;  %932 = vmatprep.mubr.bf16.mxu0 %v15673_v20 }
 0x337   :  { %v833_v42 = vadd.f32 %v10153_v23, %v832_v39  ;;  %1028 = vmatprep.subr.bf16.mxu0 %v13520_v35  ;;  %v851_v54 = vmax.f32 %v841_v49, 0.0 }
 0x339   :  { %v849_v46 = vmax.f32 %v833_v42, 0.0  ;;  %v855_v56 = vpack.c.bf16 %v851_v54, %v850_v55  ;;  %v13612_v42 = vrot.slane %v484_v11, %v13573_v1 }
 0x33a   :  { %1029 = vmatpush1.bf16.msra.mxu0 %v13524_v40 }
 0x33b   :  { %v854_v50 = vpack.c.bf16 %v849_v46, %v848_v45  ;;  %1030 = vmatprep.subr.bf16.mxu0 %v13528_v43 }
 0x33d   :  { %10161 = vmatmul.mubr.msk.bf16.gmra.mxu0 %vm877_vm4, %v853_v48  ;;  %10162 = vmatmul.mubr.msk.bf16.vlgmr.msra.gmra.mxu1 %vm877_vm4, %v854_v50 }
 0x33e   :  { %1031 = vmatpush1.bf16.msra.mxu0 %v13531_v47  ;;  %952 = vmatprep.mubr.bf16.mxu1 %v15673_v20 }
 0x33f   :  { %1032 = vmatprep.subr.bf16.mxu0 %v13534_v51  ;;  %1050 = vmatprep.mubr.bf16.mxu0 %v15673_v20 }
 0x340   :  { %1159 = vmatpush1.bf16.msra.mxu1 %v13518_v32 }
 0x341   :  { %1160 = vmatprep.subr.bf16.mxu1 %v13520_v35 }
 0x342   :  { %1033 = vmatpush1.bf16.msra.mxu0 %v13539_v53 }
 0x343   :  { %1092 = vmatprep.subr.bf16.mxu0 %v13510_v19 }
 0x344   :  { %1161 = vmatpush1.bf16.msra.mxu1 %v13524_v40 }
 0x345   :  { %10163 = vmatmul.mubr.msk.bf16.gmra.mxu1 %vm877_vm4, %v855_v56  ;;  %1051 = vmatmul.mubr.bf16.vlgmr.msra.gmra.mxu0 %v15673_v20 }
 0x346   :  { %1093 = vmatpush1.bf16.msra.mxu0 %v13518_v32  ;;  %1116 = vmatprep.mubr.bf16.mxu0 %v15673_v20 }
 0x347   :  { %1094 = vmatprep.subr.bf16.mxu0 %v13520_v35  ;;  %1162 = vmatprep.subr.bf16.mxu1 %v13528_v43 }
 0x348   :  { %1163 = vmatpush1.bf16.msra.mxu1 %v13531_v47  ;;  %1182 = vmatprep.mubr.bf16.mxu1 %v15673_v20 }
 0x349   :  { %1164 = vmatprep.subr.bf16.mxu1 %v13534_v51 }
 0x34a   :  { %1095 = vmatpush1.bf16.msra.mxu0 %v13524_v40 }
 0x34b   :  { %1096 = vmatprep.subr.bf16.mxu0 %v13528_v43 }
 0x34c   :  { %1165 = vmatpush1.bf16.msra.mxu1 %v13539_v53 }
 0x34d   :  { %1290 = vmatprep.subr.bf16.mxu1 %v13510_v19 }
 0x34e   :  { %1097 = vmatpush1.bf16.msra.mxu0 %v13531_v47 }
 0x34f   :  { %1098 = vmatprep.subr.bf16.mxu0 %v13534_v51 }
 0x352   :  { %1099 = vmatpush1.bf16.msra.mxu0 %v13539_v53 }
 0x353   :  { %1224 = vmatprep.subr.bf16.mxu0 %v13510_v19 }
 0x3f5   :  { %v924_v61 = vpop.f32.mrf.mxu0 }
 0x3f6   :  { %v925_v25 = vadd.f32 %v924_v61, %v860_v63 }
 0x3f7   :  { %v926_v62 = vpop.f32.mrf.mxu0 }
 0x3f8   :  { %v927_v46 = vadd.f32 %v926_v62, %v13580_v6 }
 0x3f9   :  { %v928_v0 = vpop.f32.mrf.mxu0 }
 0x3fa   :  { %v13575_v2 = vadd.f32 %v928_v0, %v860_v63 }
 0x3fb   :  { %v13577_v3 = vpop.f32.mrf.mxu0 }
 0x3fd   :  { %v934_v4 = vpop.f32.mrf.mxu0  ;;  %v944_v5 = vpop.f32.mrf.mxu1 }
 0x3fe   :  { %v13582_v7 = vadd.f32 %v934_v4, %v860_v63  ;;  %v13584_v8 = vadd.f32 %v944_v5, %v860_v63 }
 0x3ff   :  { %v936_v9 = vpop.f32.mrf.mxu0  ;;  %v946_v10 = vpop.f32.mrf.mxu1 }
 0x400   :  { %v13587_v12 = vadd.f32 %v936_v9, %v13580_v6  ;;  %v13590_v13 = vadd.f32 %v946_v10, %v13580_v6 }
 0x401   :  { %v938_v14 = vpop.f32.mrf.mxu0  ;;  %v948_v15 = vpop.f32.mrf.mxu1 }
 0x402   :  { %v13592_v16 = vadd.f32 %v938_v14, %v860_v63  ;;  %v13594_v17 = vadd.f32 %v948_v15, %v860_v63 }
 0x403   :  { %v13599_v21 = vpop.f32.mrf.mxu0  ;;  %v13601_v22 = vpop.f32.mrf.mxu1 }
 0x405   :  { %v954_v23 = vpop.f32.mrf.mxu1  ;;  %v1052_v24 = vpop.f32.mrf.mxu0 }
 0x406   :  { %v13603_v26 = vadd.f32 %v954_v23, %v860_v63  ;;  %v1053_v27 = vadd.f32 %v1052_v24, %v13597_v18  ;;  %v931_v23 = vadd.f32 %v13577_v3, %v13580_v6 }
 0x407   :  { %v956_v28 = vpop.f32.mrf.mxu1  ;;  %v1054_v29 = vpop.f32.mrf.mxu0 }
 0x408   :  { %v1059_v30 = vadd.f32 %v1053_v27, %v925_v25  ;;  %v13607_v31 = vadd.f32 %v956_v28, %v13580_v6  ;;  %v1055_v44 = vadd.f32 %v1054_v29, %v13612_v42 }
 0x409   :  { %v958_v33 = vpop.f32.mrf.mxu1  ;;  %v1056_v34 = vpop.f32.mrf.mxu0 }
 0x40a   :  { %v10172_v36 = vmul.f32 -1.442695, %v1059_v30  ;;  %v13609_v37 = vadd.f32 %v958_v33, %v860_v63 }
 0x40b   :  { %v1057_v38 = vpop.f32.mrf.mxu0  ;;  %v13645_v3 = vpop.f32.mrf.mxu1 }
 0x40c   :  { %12328 = vpow2.f32 %v10172_v36 }
 0x419   :  { %v12329_v39 = vpop.eup %12328 }
 0x41a   :  { %v1063_v41 = vadd.f32 1.0, %v12329_v39 }
 0x41c   :  { %12330 = vrcp.f32 %v1063_v41 }
 0x429   :  { %v12331_v45 = vpop.eup %12330 }
 0x42a   :  { %v1066_v48 = vmul.f32 %v12331_v45, %v1055_v44 }
 0x42c   :  { %v1067_v49 = vadd.f32 %v1066_v48, %v927_v46 }
 0x42e   :  { %12332 = vtanh.f32 %v1067_v49 }
 0x43b   :  { %v12333_v50 = vpop.eup %12332 }
 0x43c   :  { %v1069_v52 = vsub.f32 0.0, %v12333_v50 }
 0x43e   :  { %1071 = vrot.lane.b32.xlu0 %v1069_v52, %s13200_s15 }
 0x4b0   :  { %v1072_v54 = vpop.permute.xlu0 %1071 }
 0x4b1   :  { %v1074_v55 = vmul.f32 %v12331_v45, %v1072_v54 }
 0x4b3   :  { %1076 = vrot.lane.b32.xlu1 %v1074_v55, %s13200_s15 }
 0x525   :  { %v1077_v56 = vpop.permute.xlu1 %1076 }
 0x526   :  { %v1079_v57 = vadd.f32 %v12333_v50, %v1077_v56 }
 0x528   :  { %v1080_v60 = vpack.c.bf16 %v1079_v57, %v1079_v57 }
 0x52a   :  { %10173 = vmatmul.mubr.msk.bf16.vlgmr.msra.gmra.mxu0 %vm1014_vm5, %v1080_v60 }
 0x52b   :  { %1225 = vmatpush1.bf16.msra.mxu0 %v13518_v32  ;;  %1248 = vmatprep.mubr.bf16.mxu0 %v15673_v20 }
 0x52c   :  { %1226 = vmatprep.subr.bf16.mxu0 %v13520_v35 }
 0x52f   :  { %1227 = vmatpush1.bf16.msra.mxu0 %v13524_v40 }
 0x530   :  { %1228 = vmatprep.subr.bf16.mxu0 %v13528_v43 }
 0x533   :  { %1229 = vmatpush1.bf16.msra.mxu0 %v13531_v47 }
 0x534   :  { %1230 = vmatprep.subr.bf16.mxu0 %v13534_v51 }
 0x537   :  { %1231 = vmatpush1.bf16.msra.mxu0 %v13539_v53 }
 0x538   :  { %1356 = vmatprep.subr.bf16.mxu0 %v13510_v19 }
 0x5ea   :  { %v1118_v61 = vpop.f32.mrf.mxu0 }
 0x5eb   :  { %v1119_v62 = vadd.f32 %v1118_v61, %v13597_v18 }
 0x5ec   :  { %v1120_v63 = vpop.f32.mrf.mxu0 }
 0x5ed   :  { %v1125_v0 = vadd.f32 %v1119_v62, %v13575_v2  ;;  %v1121_v14 = vadd.f32 %v1120_v63, %v13612_v42 }
 0x5ee   :  { %v1122_v4 = vpop.f32.mrf.mxu0 }
 0x5ef   :  { %v10174_v5 = vmul.f32 -1.442695, %v1125_v0 }
 0x5f0   :  { %v1123_v9 = vpop.f32.mrf.mxu0 }
 0x5f1   :  { %12334 = vpow2.f32 %v10174_v5 }
 0x5fe   :  { %v12335_v10 = vpop.eup %12334 }
 0x5ff   :  { %v1129_v11 = vadd.f32 1.0, %v12335_v10 }
 0x601   :  { %12336 = vrcp.f32 %v1129_v11 }
 0x60e   :  { %v12337_v15 = vpop.eup %12336 }
 0x60f   :  { %v1132_v24 = vmul.f32 %v12337_v15, %v1121_v14 }
 0x611   :  { %v1133_v25 = vadd.f32 %v1132_v24, %v931_v23 }
 0x613   :  { %12338 = vtanh.f32 %v1133_v25  ;;  %v941_v25 = vadd.f32 %v13599_v21, %v13580_v6 }
 0x620   :  { %v12339_v27 = vpop.eup %12338 }
 0x621   :  { %v1135_v28 = vsub.f32 %v1079_v57, %v12339_v27 }
 0x623   :  { %1137 = vrot.lane.b32.xlu0 %v1135_v28, %s13200_s15 }
 0x695   :  { %v1138_v2 = vpop.permute.xlu0 %1137 }
 0x696   :  { %v1140_v29 = vmul.f32 %v12337_v15, %v1138_v2 }
 0x698   :  { %1142 = vrot.lane.b32.xlu1 %v1140_v29, %s13200_s15 }
 0x70a   :  { %v1143_v30 = vpop.permute.xlu1 %1142 }
 0x70b   :  { %v1145_v33 = vadd.f32 %v12339_v27, %v1143_v30 }
 0x70d   :  { %v1146_v34 = vpack.c.bf16 %v1145_v33, %v1145_v33 }
 0x70f   :  { %10175 = vmatmul.mubr.msk.bf16.vlgmr.msra.gmra.mxu1 %vm1014_vm5, %v1146_v34 }
 0x710   :  { %1291 = vmatpush1.bf16.msra.mxu1 %v13518_v32  ;;  %1314 = vmatprep.mubr.bf16.mxu1 %v15673_v20 }
 0x711   :  { %1292 = vmatprep.subr.bf16.mxu1 %v13520_v35 }
 0x714   :  { %1293 = vmatpush1.bf16.msra.mxu1 %v13524_v40 }
 0x715   :  { %1294 = vmatprep.subr.bf16.mxu1 %v13528_v43 }
 0x718   :  { %1295 = vmatpush1.bf16.msra.mxu1 %v13531_v47 }
 0x719   :  { %1296 = vmatprep.subr.bf16.mxu1 %v13534_v51 }
 0x71c   :  { %1297 = vmatpush1.bf16.msra.mxu1 %v13539_v53 }
 0x71d   :  { %1422 = vmatprep.subr.bf16.mxu1 %v13510_v19 }
 0x7cf   :  { %v1184_v36 = vpop.f32.mrf.mxu1 }
 0x7d0   :  { %v1185_v38 = vadd.f32 %v1184_v36, %v13597_v18 }
 0x7d1   :  { %v1186_v39 = vpop.f32.mrf.mxu1 }
 0x7d2   :  { %v1191_v41 = vadd.f32 %v1185_v38, %v13582_v7  ;;  %v1187_v50 = vadd.f32 %v1186_v39, %v13612_v42 }
 0x7d3   :  { %v1188_v44 = vpop.f32.mrf.mxu1 }
 0x7d4   :  { %v10176_v45 = vmul.f32 -1.442695, %v1191_v41 }
 0x7d5   :  { %v1189_v46 = vpop.f32.mrf.mxu1 }
 0x7d6   :  { %12340 = vpow2.f32 %v10176_v45 }
 0x7e3   :  { %v12341_v48 = vpop.eup %12340 }
 0x7e4   :  { %v1195_v49 = vadd.f32 1.0, %v12341_v48 }
 0x7e6   :  { %12342 = vrcp.f32 %v1195_v49 }
 0x7f3   :  { %v12343_v52 = vpop.eup %12342 }
 0x7f4   :  { %v1198_v54 = vmul.f32 %v12343_v52, %v1187_v50 }
 0x7f6   :  { %v1199_v55 = vadd.f32 %v1198_v54, %v13587_v12 }
 0x7f8   :  { %12344 = vtanh.f32 %v1199_v55 }
 0x805   :  { %v12345_v56 = vpop.eup %12344 }
 0x806   :  { %v1201_v57 = vsub.f32 %v1145_v33, %v12345_v56 }
 0x808   :  { %1203 = vrot.lane.b32.xlu0 %v1201_v57, %s13200_s15 }
 0x87a   :  { %v1204_v60 = vpop.permute.xlu0 %1203 }
 0x87b   :  { %v1206_v7 = vmul.f32 %v12343_v52, %v1204_v60 }
 0x87d   :  { %1208 = vrot.lane.b32.xlu1 %v1206_v7, %s13200_s15 }
 0x8ef   :  { %v1209_v61 = vpop.permute.xlu1 %1208 }
 0x8f0   :  { %v1211_v62 = vadd.f32 %v12345_v56, %v1209_v61 }
 0x8f2   :  { %v1212_v63 = vpack.c.bf16 %v1211_v62, %v1211_v62 }
 0x8f4   :  { %10177 = vmatmul.mubr.msk.bf16.vlgmr.msra.gmra.mxu0 %vm1014_vm5, %v1212_v63 }
 0x8f5   :  { %1357 = vmatpush1.bf16.msra.mxu0 %v13518_v32  ;;  %1380 = vmatprep.mubr.bf16.mxu0 %v15673_v20 }
 0x8f6   :  { %1358 = vmatprep.subr.bf16.mxu0 %v13520_v35 }
 0x8f9   :  { %1359 = vmatpush1.bf16.msra.mxu0 %v13524_v40 }
 0x8fa   :  { %1360 = vmatprep.subr.bf16.mxu0 %v13528_v43 }
 0x8fd   :  { %1361 = vmatpush1.bf16.msra.mxu0 %v13531_v47 }
 0x8fe   :  { %1362 = vmatprep.subr.bf16.mxu0 %v13534_v51 }
 0x901   :  { %1363 = vmatpush1.bf16.msra.mxu0 %v13539_v53 }
 0x902   :  { %1488 = vmatprep.subr.bf16.mxu0 %v13510_v19 }
 0x9b4   :  { %v1250_v12 = vpop.f32.mrf.mxu0 }
 0x9b5   :  { %v1251_v0 = vadd.f32 %v1250_v12, %v13597_v18 }
 0x9b6   :  { %v1252_v4 = vpop.f32.mrf.mxu0 }
 0x9b7   :  { %v1257_v5 = vadd.f32 %v1251_v0, %v13592_v16  ;;  %v1253_v23 = vadd.f32 %v1252_v4, %v13612_v42 }
 0x9b8   :  { %v1254_v9 = vpop.f32.mrf.mxu0 }
 0x9b9   :  { %v10178_v10 = vmul.f32 -1.442695, %v1257_v5 }
 0x9ba   :  { %v1255_v11 = vpop.f32.mrf.mxu0 }
 0x9bb   :  { %12346 = vpow2.f32 %v10178_v10 }
 0x9c8   :  { %v12347_v14 = vpop.eup %12346 }
 0x9c9   :  { %v1261_v15 = vadd.f32 1.0, %v12347_v14 }
 0x9cb   :  { %12348 = vrcp.f32 %v1261_v15 }
 0x9d8   :  { %v12349_v24 = vpop.eup %12348 }
 0x9d9   :  { %v1264_v19 = vmul.f32 %v12349_v24, %v1253_v23 }
 0x9db   :  { %v1265_v27 = vadd.f32 %v1264_v19, %v941_v25 }
 0x9dd   :  { %12350 = vtanh.f32 %v1265_v27 }
 0x9ea   :  { %v12351_v28 = vpop.eup %12350 }
 0x9eb   :  { %v1267_v2 = vsub.f32 %v1211_v62, %v12351_v28 }
 0x9ed   :  { %1269 = vrot.lane.b32.xlu0 %v1267_v2, %s13200_s15 }
 0xa5f   :  { %v1270_v16 = vpop.permute.xlu0 %1269 }
 0xa60   :  { %v1272_v29 = vmul.f32 %v12349_v24, %v1270_v16 }
 0xa62   :  { %1274 = vrot.lane.b32.xlu1 %v1272_v29, %s13200_s15 }
 0xad4   :  { %v1275_v30 = vpop.permute.xlu1 %1274 }
 0xad5   :  { %v1277_v33 = vadd.f32 %v12351_v28, %v1275_v30 }
 0xad7   :  { %v1278_v34 = vpack.c.bf16 %v1277_v33, %v1277_v33 }
 0xad9   :  { %10179 = vmatmul.mubr.msk.bf16.vlgmr.msra.gmra.mxu1 %vm1014_vm5, %v1278_v34 }
 0xada   :  { %1423 = vmatpush1.bf16.msra.mxu1 %v13518_v32  ;;  %1446 = vmatprep.mubr.bf16.mxu1 %v15673_v20 }
 0xadb   :  { %1424 = vmatprep.subr.bf16.mxu1 %v13520_v35 }
 0xade   :  { %1425 = vmatpush1.bf16.msra.mxu1 %v13524_v40 }
 0xadf   :  { %1426 = vmatprep.subr.bf16.mxu1 %v13528_v43 }
 0xae2   :  { %1427 = vmatpush1.bf16.msra.mxu1 %v13531_v47 }
 0xae3   :  { %1428 = vmatprep.subr.bf16.mxu1 %v13534_v51 }
 0xae6   :  { %1429 = vmatpush1.bf16.msra.mxu1 %v13539_v53 }
 0xb99   :  { %v1316_v21 = vpop.f32.mrf.mxu1 }
 0xb9a   :  { %v1317_v36 = vadd.f32 %v1316_v21, %v13597_v18 }
 0xb9b   :  { %v1318_v38 = vpop.f32.mrf.mxu1 }
 0xb9c   :  { %v1323_v39 = vadd.f32 %v1317_v36, %v13584_v8  ;;  %v1319_v49 = vadd.f32 %v1318_v38, %v13612_v42 }
 0xb9d   :  { %v1320_v41 = vpop.f32.mrf.mxu1 }
 0xb9e   :  { %v10180_v44 = vmul.f32 -1.442695, %v1323_v39 }
 0xb9f   :  { %v1321_v45 = vpop.f32.mrf.mxu1 }
 0xba0   :  { %12352 = vpow2.f32 %v10180_v44 }
 0xbad   :  { %v12353_v46 = vpop.eup %12352 }
 0xbae   :  { %v1327_v48 = vadd.f32 1.0, %v12353_v46 }
 0xbb0   :  { %12354 = vrcp.f32 %v1327_v48 }
 0xbbd   :  { %v12355_v50 = vpop.eup %12354 }
 0xbbe   :  { %v1330_v52 = vmul.f32 %v12355_v50, %v1319_v49 }
 0xbc0   :  { %v1331_v54 = vadd.f32 %v1330_v52, %v13590_v13 }
 0xbc2   :  { %12356 = vtanh.f32 %v1331_v54 }
 0xbcf   :  { %v12357_v55 = vpop.eup %12356 }
 0xbd0   :  { %v1333_v56 = vsub.f32 %v1277_v33, %v12357_v55 }
 0xbd2   :  { %1335 = vrot.lane.b32.xlu0 %v1333_v56, %s13200_s15 }
 0xc44   :  { %v1336_v57 = vpop.permute.xlu0 %1335 }
 0xc45   :  { %v1338_v8 = vmul.f32 %v12355_v50, %v1336_v57 }
 0xc47   :  { %1340 = vrot.lane.b32.xlu1 %v1338_v8, %s13200_s15 }
 0xcb9   :  { %v1341_v60 = vpop.permute.xlu1 %1340 }
 0xcba   :  { %v1343_v7 = vadd.f32 %v12357_v55, %v1341_v60 }
 0xcbc   :  { %v1344_v61 = vpack.c.bf16 %v1343_v7, %v1343_v7 }
 0xcbe   :  { %10181 = vmatmul.mubr.msk.bf16.vlgmr.msra.gmra.mxu0 %vm1014_vm5, %v1344_v61  ;;  %v1542_v61 = vld [vmem:[%s15732_s12] sm:$0xff] }
 0xcbf   :  { %1489 = vmatpush1.bf16.msra.mxu0 %v13518_v32  ;;  %1512 = vmatprep.mubr.bf16.mxu0 %v15673_v20 }
 0xcc0   :  { %1490 = vmatprep.subr.bf16.mxu0 %v13520_v35 }
 0xcc3   :  { %1491 = vmatpush1.bf16.msra.mxu0 %v13524_v40 }
 0xcc4   :  { %1492 = vmatprep.subr.bf16.mxu0 %v13528_v43 }
 0xcc7   :  { %1493 = vmatpush1.bf16.msra.mxu0 %v13531_v47 }
 0xcc8   :  { %1494 = vmatprep.subr.bf16.mxu0 %v13534_v51  ;;  %v951_v51 = vadd.f32 %v13601_v22, %v13580_v6 }
 0xccb   :  { %1495 = vmatpush1.bf16.msra.mxu0 %v13539_v53 }
 0xd7e   :  { %v1382_v13 = vpop.f32.mrf.mxu0 }
 0xd7f   :  { %v1383_v62 = vadd.f32 %v1382_v13, %v13597_v18  ;;  %v1543_v13 = vld [vmem:[%s15732_s12 + $0x8] sm:$0xff] }
 0xd80   :  { %v1384_v63 = vpop.f32.mrf.mxu0 }
 0xd81   :  { %v1389_v32 = vadd.f32 %v1383_v62, %v13594_v17  ;;  %v1385_v43 = vadd.f32 %v1384_v63, %v13612_v42  ;;  %v1558_v62 = vpack.c.bf16 %v1543_v13, %v1542_v61  ;;  %v1544_v63 = vld [vmem:[%s15732_s12 + $0x10] sm:$0xff] }
 0xd82   :  { %v1386_v12 = vpop.f32.mrf.mxu0 }
 0xd83   :  { %v10182_v0 = vmul.f32 -1.442695, %v1389_v32  ;;  %v1545_v32 = vld [vmem:[%s15732_s12 + $0x18] sm:$0xff]  ;;  %v1546_v12 = vld [vmem:[%s15732_s12 + $0x20] sm:$0xff] }
 0xd84   :  { %v1387_v4 = vpop.f32.mrf.mxu0 }
 0xd85   :  { %12358 = vpow2.f32 %v10182_v0  ;;  %v1548_v4 = vld [vmem:[%s15732_s12 + $0x30] sm:$0xff] }
 0xd92   :  { %v12359_v35 = vpop.eup %12358 }
 0xd93   :  { %v1393_v40 = vadd.f32 1.0, %v12359_v35  ;;  %v1549_v35 = vld [vmem:[%s15732_s12 + $0x38] sm:$0xff] }
 0xd95   :  { %12360 = vrcp.f32 %v1393_v40 }
 0xda2   :  { %v12361_v47 = vpop.eup %12360 }
 0xda3   :  { %v1396_v53 = vmul.f32 %v12361_v47, %v1385_v43 }
 0xda5   :  { %v1397_v5 = vadd.f32 %v1396_v53, %v951_v51  ;;  %v556_v51 = vld [vmem:[#allocation30 + $0x1c0] sm:$0xff] }
 0xda6   :  { %v560_v53 = vld [vmem:[#allocation30 + $0x1e0] sm:$0xff] }
 0xda7   :  { %12362 = vtanh.f32 %v1397_v5  ;;  %v557_v5 = vld [vmem:[#allocation30 + $0x1c8] sm:$0xff] }
 0xdb4   :  { %v12363_v9 = vpop.eup %12362 }
 0xdb5   :  { %v1399_v10 = vsub.f32 %v1343_v7, %v12363_v9  ;;  %v692_v7 = vld [vmem:[#allocation31] sm:$0x1] }
 0xdb6   :  { %11733 = vmatprep.subr.msk.bf16.mxu1 %vm1580_vm6, %v692_v7 }
 0xdb7   :  { %1401 = vrot.lane.b32.xlu0 %v1399_v10, %s13200_s15  ;;  %v10249_v10 = vcombine.high %v556_v51, %v560_v53 }
 0xe29   :  { %v1402_v17 = vpop.permute.xlu0 %1401 }
 0xe2a   :  { %v1404_v11 = vmul.f32 %v12361_v47, %v1402_v17  ;;  %v1561_v47 = vpack.c.bf16 %v1549_v35, %v1548_v4  ;;  %v561_v17 = vld [vmem:[#allocation30 + $0x1e8] sm:$0xff]  ;;  %v500_v35 = vld [vmem:[#allocation30] sm:$0xff] }
 0xe2c   :  { %1406 = vrot.lane.b32.xlu1 %v1404_v11, %s13200_s15  ;;  %v548_v11 = vld [vmem:[#allocation30 + $0x180] sm:$0xff] }
 0xe9e   :  { %v1407_v14 = vpop.permute.xlu1 %1406 }
 0xe9f   :  { %v1409_v15 = vadd.f32 %v12363_v9, %v1407_v14  ;;  %v10248_v9 = vcombine.low %v556_v51, %v560_v53  ;;  %v552_v14 = vld [vmem:[#allocation30 + $0x1a0] sm:$0xff]  ;;  %v505_v51 = vld [vmem:[#allocation30 + $0x28] sm:$0xff] }
 0xea1   :  { %v1410_v23 = vpack.c.bf16 %v1409_v15, %v1409_v15 }
 0xea3   :  { %10183 = vmatmul.mubr.msk.bf16.vlgmr.msra.gmra.mxu1 %vm1014_vm5, %v1410_v23  ;;  %v10251_v23 = vcombine.high %v557_v5, %v561_v17 }
 0xea4   :  { %11384 = vmatprep.mubr.msk.bf16.mxu1 %vm726_vm1, %v1558_v62  ;;  %v508_v62 = vld [vmem:[#allocation30 + $0x40] sm:$0xff] }
 0xea5   :  { %2107 = vmatprep.subr.bf16.mxu0 %v10251_v23 }
 0xf63   :  { %v1448_v24 = vpop.f32.mrf.mxu1 }
 0xf64   :  { %v1449_v25 = vadd.f32 %v1448_v24, %v13597_v18  ;;  %v10241_v24 = vcombine.high %v548_v11, %v552_v14 }
 0xf65   :  { %v1450_v22 = vpop.f32.mrf.mxu1 }
 0xf66   :  { %v1455_v19 = vadd.f32 %v1449_v25, %v13603_v26  ;;  %v1451_v30 = vadd.f32 %v1450_v22, %v13612_v42  ;;  %v549_v25 = vld [vmem:[#allocation30 + $0x188] sm:$0xff] }
 0xf67   :  { %v1452_v27 = vpop.f32.mrf.mxu1  ;;  %v553_v22 = vld [vmem:[#allocation30 + $0x1a8] sm:$0xff] }
 0xf68   :  { %v10184_v28 = vmul.f32 -1.442695, %v1455_v19  ;;  %v540_v19 = vld [vmem:[#allocation30 + $0x140] sm:$0xff]  ;;  %v10243_v27 = vcombine.high %v549_v25, %v553_v22 }
 0xf69   :  { %v1453_v2 = vpop.f32.mrf.mxu1 }
 0xf6a   :  { %12364 = vpow2.f32 %v10184_v28  ;;  %v544_v28 = vld [vmem:[#allocation30 + $0x160] sm:$0xff]  ;;  %v541_v2 = vld [vmem:[#allocation30 + $0x148] sm:$0xff] }
 0xf77   :  { %v12365_v16 = vpop.eup %12364 }
 0xf78   :  { %v1459_v29 = vadd.f32 1.0, %v12365_v16  ;;  %v545_v16 = vld [vmem:[#allocation30 + $0x168] sm:$0xff] }
 0xf7a   :  { %12366 = vrcp.f32 %v1459_v29  ;;  %v10240_v29 = vcombine.low %v548_v11, %v552_v14  ;;  %v558_v14 = vld [vmem:[#allocation30 + $0x1d0] sm:$0xff] }
 0xf87   :  { %v12367_v33 = vpop.eup %12366 }
 0xf88   :  { %v1462_v34 = vmul.f32 %v12367_v33, %v1451_v30  ;;  %v10242_v30 = vcombine.low %v549_v25, %v553_v22  ;;  %v559_v25 = vld [vmem:[#allocation30 + $0x1d8] sm:$0xff] }
 0xf89   :  { %v563_v22 = vld [vmem:[#allocation30 + $0x1f8] sm:$0xff] }
 0xf8a   :  { %v1463_v21 = vadd.f32 %v1462_v34, %v13607_v31  ;;  %v10235_v34 = vcombine.high %v541_v2, %v545_v16 }
 0xf8c   :  { %12368 = vtanh.f32 %v1463_v21  ;;  %v532_v21 = vld [vmem:[#allocation30 + $0x100] sm:$0xff] }
 0xf99   :  { %v12369_v36 = vpop.eup %12368 }
 0xf9a   :  { %v1465_v38 = vsub.f32 %v1409_v15, %v12369_v36  ;;  %v10250_v15 = vcombine.low %v557_v5, %v561_v17 }
 0xf9c   :  { %1467 = vrot.lane.b32.xlu0 %v1465_v38, %s13200_s15  ;;  %v533_v38 = vld [vmem:[#allocation30 + $0x108] sm:$0xff] }
0x100e   :  { %v1468_v39 = vpop.permute.xlu0 %1467 }
0x100f   :  { %v1470_v26 = vmul.f32 %v12367_v33, %v1468_v39  ;;  %v10233_v33 = vcombine.high %v540_v19, %v544_v28  ;;  %v537_v39 = vld [vmem:[#allocation30 + $0x128] sm:$0xff] }
0x1011   :  { %1472 = vrot.lane.b32.xlu1 %v1470_v26, %s13200_s15 }
0x1083   :  { %v1473_v41 = vpop.permute.xlu1 %1472 }
0x1084   :  { %v1475_v44 = vadd.f32 %v12369_v36, %v1473_v41  ;;  %v536_v36 = vld [vmem:[#allocation30 + $0x120] sm:$0xff]  ;;  %v10232_v41 = vcombine.low %v540_v19, %v544_v28  ;;  %v10255_v19 = vcombine.high %v559_v25, %v563_v22 }
0x1086   :  { %v1476_v45 = vpack.c.bf16 %v1475_v44, %v1475_v44 }
0x1088   :  { %10185 = vmatmul.mubr.msk.bf16.vlgmr.msra.gmra.mxu0 %vm1014_vm5, %v1476_v45  ;;  %v10234_v45 = vcombine.low %v541_v2, %v545_v16  ;;  %v3437_v16 = vld [vmem:[%s15733_s14] sm:$0xff] }
0x1089   :  { %2139 = vmatprep.mubr.bf16.mxu0 %v15673_v20  ;;  %2108 = vmatpush1.bf16.msra.mxu0 %v10250_v15  ;;  %v562_v15 = vld [vmem:[#allocation30 + $0x1f0] sm:$0xff] }
0x108a   :  { %2109 = vmatprep.subr.bf16.mxu0 %v10243_v27  ;;  %v10252_v23 = vcombine.low %v558_v14, %v562_v15  ;;  %v10254_v27 = vcombine.low %v559_v25, %v563_v22  ;;  %v531_v25 = vld [vmem:[#allocation30 + $0xf8] sm:$0xff] }
0x108d   :  { %2110 = vmatpush1.bf16.msra.mxu0 %v10242_v30 }
0x108e   :  { %2111 = vmatprep.subr.bf16.mxu0 %v10235_v34 }
0x1091   :  { %2112 = vmatpush1.bf16.msra.mxu0 %v10234_v45  ;;  %v554_v45 = vld [vmem:[#allocation30 + $0x1b0] sm:$0xff] }
0x1148   :  { %v1514_v46 = vpop.f32.mrf.mxu0 }
0x1149   :  { %v1515_v48 = vadd.f32 %v1514_v46, %v13597_v18  ;;  %v961_v18 = vadd.f32 %v13645_v3, %v13580_v6  ;;  %v1559_v6 = vpack.c.bf16 %v1545_v32, %v1544_v63  ;;  %v1547_v3 = vld [vmem:[%s15732_s12 + $0x28] sm:$0xff]  ;;  %v10225_v46 = vcombine.high %v532_v21, %v536_v36  ;;  %v512_v63 = vld [vmem:[#allocation30 + $0x60] sm:$0xff] }
0x114a   :  { %v1516_v31 = vpop.f32.mrf.mxu0  ;;  %v1560_v0 = vpack.c.bf16 %v1547_v3, %v1546_v12  ;;  %v509_v32 = vld [vmem:[#allocation30 + $0x48] sm:$0xff]  ;;  %v10200_v53 = vcombine.low %v508_v62, %v512_v63 }
0x114b   :  { %v1521_v49 = vadd.f32 %v1515_v48, %v13609_v37  ;;  %v1517_v57 = vadd.f32 %v1516_v31, %v13612_v42  ;;  %v1582_v42 = vsel %vm1580_vm6, %v692_v7, 0  ;;  %v10227_v48 = vcombine.high %v533_v38, %v537_v39  ;;  %v524_v31 = vld [vmem:[#allocation30 + $0xc0] sm:$0xff]  ;;  %v513_v12 = vld [vmem:[#allocation30 + $0x68] sm:$0xff] }
0x114c   :  { %v1518_v50 = vpop.f32.mrf.mxu0  ;;  %11383 = vmatpush3.bf16.msra.mxu1 %v1582_v42  ;;  %v10203_v4 = vcombine.high %v509_v32, %v513_v12  ;;  %v10202_v5 = vcombine.low %v509_v32, %v513_v12 }
0x114d   :  { %v10186_v52 = vmul.f32 -1.442695, %v1521_v49  ;;  %2034 = vmatprep.subr.bf16.mxu1 %v10249_v10  ;;  %v528_v49 = vld [vmem:[#allocation30 + $0xe0] sm:$0xff]  ;;  %v525_v50 = vld [vmem:[#allocation30 + $0xc8] sm:$0xff]  ;;  %2113 = vmatprep.subr.bf16.mxu0 %v10227_v48  ;;  %v555_v48 = vld [vmem:[#allocation30 + $0x1b8] sm:$0xff] }
0x114e   :  { %v1519_v54 = vpop.f32.mrf.mxu0  ;;  %v10216_v7 = vcombine.low %v524_v31, %v528_v49 }
0x114f   :  { %12370 = vpow2.f32 %v10186_v52  ;;  %11385 = vmatmul.mubr.msk.bf16.vlgmr.msra.gmra.mxu1 %vm726_vm1, %v1559_v6  ;;  %v529_v52 = vld [vmem:[#allocation30 + $0xe8] sm:$0xff]  ;;  %v10224_v54 = vcombine.low %v532_v21, %v536_v36  ;;  %v13743_v21 = vld [vmem:[#allocation28] ss:$0 sm:$0xff] }
0x1150   :  { %11388 = vmatprep.mubr.msk.bf16.mxu1 %vm726_vm1, %v1560_v0  ;;  %2035 = vmatpush1.bf16.msra.mxu1 %v10248_v9  ;;  %v10218_v61 = vcombine.low %v525_v50, %v529_v52  ;;  %v10201_v0 = vcombine.high %v508_v62, %v512_v63 }
0x1151   :  { %2036 = vmatprep.subr.bf16.mxu1 %v10241_v24  ;;  %v10253_v24 = vcombine.high %v558_v14, %v562_v15 }
0x1154   :  { %2037 = vmatpush1.bf16.msra.mxu1 %v10240_v29 }
0x1155   :  { %2038 = vmatprep.subr.bf16.mxu1 %v10233_v33 }
0x1157   :  { %11389 = vmatmul.mubr.msk.bf16.gmra.mxu1 %vm726_vm1, %v1561_v47  ;;  %v501_v47 = vld [vmem:[#allocation30 + $0x8] sm:$0xff] }
0x1158   :  { %2066 = vmatprep.mubr.bf16.mxu1 %v15673_v20  ;;  %2039 = vmatpush1.bf16.msra.mxu1 %v10232_v41  ;;  %v10195_v10 = vcombine.high %v501_v47, %v505_v51  ;;  %v10194_v11 = vcombine.low %v501_v47, %v505_v51  ;;  %v550_v41 = vld [vmem:[#allocation30 + $0x190] sm:$0xff]  ;;  %v535_v47 = vld [vmem:[#allocation30 + $0x118] sm:$0xff] }
0x1159   :  { %2040 = vmatprep.subr.bf16.mxu1 %v10225_v46  ;;  %v551_v46 = vld [vmem:[#allocation30 + $0x198] sm:$0xff]  ;;  %v10244_v62 = vcombine.low %v550_v41, %v554_v45 }
0x115a   :  { %v10246_v63 = vcombine.low %v551_v46, %v555_v48  ;;  %v539_v51 = vld [vmem:[#allocation30 + $0x138] sm:$0xff] }
0x115c   :  { %v12371_v55 = vpop.eup %12370  ;;  %2041 = vmatpush1.bf16.msra.mxu1 %v10224_v54 }
0x115d   :  { %v1525_v56 = vadd.f32 1.0, %v12371_v55  ;;  %v10226_v55 = vcombine.low %v533_v38, %v537_v39 }
0x115f   :  { %12372 = vrcp.f32 %v1525_v56  ;;  %v10217_v56 = vcombine.high %v524_v31, %v528_v49  ;;  %2114 = vmatpush1.bf16.msra.mxu0 %v10226_v55 }
0x1161   :  { %2042 = vmatprep.subr.bf16.mxu1 %v10217_v56 }
0x1162   :  { %2043 = vmatpush1.bf16.msra.mxu1 %v10216_v7  ;;  %v547_v7 = vld [vmem:[#allocation30 + $0x178] sm:$0xff] }
0x116c   :  { %v13713_v8 = vpop.eup %12372 }
0x116d   :  { %v1528_v37 = vmul.f32 %v13713_v8, %v1517_v57  ;;  %v10219_v57 = vcombine.high %v525_v50, %v529_v52 }
0x116f   :  { %v1529_v60 = vadd.f32 %v1528_v37, %v961_v18  ;;  %v520_v18 = vld [vmem:[#allocation30 + $0xa0] sm:$0xff]  ;;  %v517_v37 = vld [vmem:[#allocation30 + $0x88] sm:$0xff]  ;;  %2115 = vmatprep.subr.bf16.mxu0 %v10219_v57  ;;  %v10245_v57 = vcombine.high %v550_v41, %v554_v45 }
0x1170   :  { %2116 = vmatpush1.bf16.msra.mxu0 %v10218_v61 }
0x1171   :  { %12374 = vtanh.f32 %v1529_v60  ;;  %v521_v60 = vld [vmem:[#allocation30 + $0xa8] sm:$0xff] }
0x1172   :  { %v10211_v42 = vcombine.high %v517_v37, %v521_v60  ;;  %v10210_v3 = vcombine.low %v517_v37, %v521_v60  ;;  %v546_v37 = vld [vmem:[#allocation30 + $0x170] sm:$0xff]  ;;  %v543_v60 = vld [vmem:[#allocation30 + $0x158] sm:$0xff] }
0x1174   :  { %2117 = vmatprep.subr.bf16.mxu0 %v10211_v42 }
0x1175   :  { %2118 = vmatpush1.bf16.msra.mxu0 %v10210_v3  ;;  %v534_v3 = vld [vmem:[#allocation30 + $0x110] sm:$0xff] }
0x1176   :  { %2119 = vmatprep.subr.bf16.mxu0 %v10203_v4 }
0x1179   :  { %2120 = vmatpush1.bf16.msra.mxu0 %v10202_v5  ;;  %v10238_v5 = vcombine.low %v543_v60, %v547_v7 }
0x117a   :  { %2121 = vmatprep.subr.bf16.mxu0 %v10195_v10 }
0x117d   :  { %2122 = vmatpush1.bf16.msra.mxu0 %v10194_v11  ;;  %v526_v11 = vld [vmem:[#allocation30 + $0xd0] sm:$0xff] }
0x117e   :  { %v13731_v40 = vpop.eup %12374  ;;  %2253 = vmatprep.subr.bf16.mxu0 %v10255_v19  ;;  %v10230_v19 = vcombine.low %v535_v47, %v539_v51 }
0x117f   :  { %v1531_v43 = vsub.f32 %v1475_v44, %v13731_v40 }
0x1181   :  { %1533 = vrot.lane.b32.xlu0 %v1531_v43, %s13200_s15  ;;  %v504_v43 = vld [vmem:[#allocation30 + $0x20] sm:$0xff] }
0x1182   :  { %v10193_v9 = vcombine.high %v500_v35, %v504_v43  ;;  %v10192_v17 = vcombine.low %v500_v35, %v504_v43  ;;  %v538_v43 = vld [vmem:[#allocation30 + $0x130] sm:$0xff] }
0x1183   :  { %v10229_v10 = vcombine.high %v534_v3, %v538_v43  ;;  %v10228_v22 = vcombine.low %v534_v3, %v538_v43  ;;  %v11854_v3 = vld [vmem:[%s15734_s28 + $0xf8] sm:$0xff]   ;;  %v11858_v43 = vld [vmem:[%s15734_s28 + $0xf0] sm:$0xff]  }
0x11f3   :  { %v1534_v26 = vpop.permute.xlu0 %1533 }
0x11f4   :  { %v1536_v44 = vmul.f32 %v13713_v8, %v1534_v26  ;;  %v516_v8 = vld [vmem:[#allocation30 + $0x80] sm:$0xff] }
0x11f5   :  { %v10209_v13 = vcombine.high %v516_v8, %v520_v18  ;;  %v10208_v6 = vcombine.low %v516_v8, %v520_v18  ;;  %v10247_v8 = vcombine.high %v551_v46, %v555_v48  ;;  %v542_v18 = vld [vmem:[#allocation30 + $0x150] sm:$0xff] }
0x11f6   :  { %1538 = vrot.lane.b32.xlu1 %v1536_v44, %s13200_s15  ;;  %v10237_v12 = vcombine.high %v542_v18, %v546_v37  ;;  %v514_v48 = vld [vmem:[#allocation30 + $0x70] sm:$0xff] }
0x11f7   :  { %2044 = vmatprep.subr.bf16.mxu1 %v10209_v13 }
0x11f8   :  { %2045 = vmatpush1.bf16.msra.mxu1 %v10208_v6  ;;  %v10239_v6 = vcombine.high %v543_v60, %v547_v7  ;;  %v506_v60 = vld [vmem:[#allocation30 + $0x30] sm:$0xff]  ;;  %v503_v7 = vld [vmem:[#allocation30 + $0x18] sm:$0xff] }
0x11f9   :  { %2046 = vmatprep.subr.bf16.mxu1 %v10201_v0 }
0x11fa   :  { %3476 = vrot.lane.b32.xlu1 %v3437_v16, %s13173_s7  ;;  %v518_v16 = vld [vmem:[#allocation30 + $0x90] sm:$0xff] }
0x11fc   :  { %2047 = vmatpush1.bf16.msra.mxu1 %v10200_v53  ;;  %v10236_v53 = vcombine.low %v542_v18, %v546_v37 }
0x11fd   :  { %2048 = vmatprep.subr.bf16.mxu1 %v10193_v9 }
0x1200   :  { %2049 = vmatpush1.bf16.msra.mxu1 %v10192_v17  ;;  %v10231_v17 = vcombine.high %v535_v47, %v539_v51  ;;  %v11857_v47 = vld [vmem:[%s15734_s28 + $0x30] sm:$0xff]  }
0x1201   :  { %2180 = vmatprep.subr.bf16.mxu1 %v10253_v24  ;;  %v527_v24 = vld [vmem:[#allocation30 + $0xd8] sm:$0xff] }
0x1202   :  { %v11859_v51 = vld [vmem:[%s15734_s28 + $0xb0] sm:$0xff]  }
0x120f   :  { %v11386_v29 = vpop.f32.mrf.mxu1 }
0x1210   :  { %v1627_v50 = vadd.f32 %v11386_v29, %v13743_v21 }
0x1211   :  { %v1618_v30 = vpop.f32.mrf.mxu1 }
0x1212   :  { %v1619_v38 = vadd.f32 %v13743_v21, %v1618_v30  ;;  %v1651_v13 = vmax.f32 %v1627_v50, 0.0  ;;  %v515_v50 = vld [vmem:[#allocation30 + $0x78] sm:$0xff] }
0x1213   :  { %v11387_v33 = vpop.f32.mrf.mxu1 }
0x1214   :  { %v1630_v52 = vadd.f32 %v11387_v33, %v13743_v21 }
0x1215   :  { %v1621_v34 = vpop.f32.mrf.mxu1 }
0x1216   :  { %v1622_v39 = vadd.f32 %v13743_v21, %v1621_v34  ;;  %v1652_v42 = vmax.f32 %v1630_v52, 0.0  ;;  %v522_v34 = vld [vmem:[#allocation30 + $0xb0] sm:$0xff] }
0x1217   :  { %v13745_v36 = vpop.f32.mrf.mxu1  ;;  %v10212_v52 = vcombine.low %v518_v16, %v522_v34 }
0x1218   :  { %v1650_v44 = vmax.f32 %v1622_v39, 0.0 }
0x1219   :  { %v1634_v26 = vpop.f32.mrf.mxu1 }
0x121a   :  { %v1635_v32 = vadd.f32 %v13743_v21, %v1634_v26  ;;  %v10222_v26 = vcombine.low %v527_v24, %v531_v25 }
0x121b   :  { %v13749_v31 = vpop.f32.mrf.mxu1 }
0x121c   :  { %v1653_v14 = vmax.f32 %v1635_v32, 0.0  ;;  %v1646_v29 = vadd.f32 %v13749_v31, %v13743_v21  ;;  %v511_v31 = vld [vmem:[#allocation30 + $0x58] sm:$0xff] }
0x121d   :  { %v1637_v61 = vpop.f32.mrf.mxu1 }
0x121e   :  { %v1638_v0 = vadd.f32 %v13743_v21, %v1637_v61  ;;  %v1656_v46 = vmax.f32 %v1646_v29, 0.0  ;;  %v507_v61 = vld [vmem:[#allocation30 + $0x38] sm:$0xff]  ;;  %v11877_v29 = vld [vmem:[%s15734_s28 + $0x8] sm:$0xff]  }
0x121f   :  { %v10199_v32 = vcombine.high %v503_v7, %v507_v61 }
0x1220   :  { %v1654_v15 = vmax.f32 %v1638_v0, 0.0  ;;  %v11853_v0 = vld [vmem:[%s15734_s28 + $0x38] sm:$0xff]  }
0x1268   :  { %v1539_v28 = vpop.permute.xlu1 %1538 }
0x1269   :  { %v1541_v2 = vadd.f32 %v13731_v40, %v1539_v28  ;;  %v1649_v40 = vmax.f32 %v1619_v38, 0.0  ;;  %v523_v38 = vld [vmem:[#allocation30 + $0xb8] sm:$0xff] }
0x126b   :  { %1658 = vrot.lane.b32.xlu0 %v1541_v2, %s13200_s15  ;;  %v10223_v2 = vcombine.high %v527_v24, %v531_v25  ;;  %v11870_v24 = vld [vmem:[%s15734_s28 + $0xd8] sm:$0xff]  }
0x126c   :  { %v11869_v25 = vld [vmem:[%s15734_s28 + $0x18] sm:$0xff]  }
0x12dd   :  { %v13751_v49 = vpop.permute.xlu0 %1658 }
0x12de   :  { %v1661_v54 = vsel %vm1014_vm5, %v1649_v40, %v13751_v49  ;;  %v1662_v55 = vsel %vm1014_vm5, %v1650_v44, %v13751_v49  ;;  %v1663_v4 = vsel %vm1014_vm5, %v1651_v13, %v13751_v49  ;;  %v1664_v35 = vsel %vm1014_vm5, %v1652_v42, %v13751_v49  ;;  %v510_v44 = vld [vmem:[#allocation30 + $0x50] sm:$0xff] }
0x12df   :  { %v13759_v56 = vpack.c.bf16 %v1662_v55, %v1661_v54  ;;  %v13771_v9 = vpack.c.bf16 %v1664_v35, %v1663_v4  ;;  %v1665_v30 = vsel %vm1014_vm5, %v1653_v14, %v13751_v49  ;;  %v1666_v33 = vsel %vm1014_vm5, %v1654_v15, %v13751_v49  ;;  %v11855_v4 = vld [vmem:[%s15734_s28 + $0xb8] sm:$0xff]   ;;  %v11856_v35 = vld [vmem:[%s15734_s28 + $0x70] sm:$0xff]   ;;  %v11865_v14 = vld [vmem:[%s15734_s28 + $0x20] sm:$0xff]  }
0x12e0   :  { %v13785_v41 = vpack.c.bf16 %v1666_v33, %v1665_v30  ;;  %v10205_v55 = vcombine.high %v510_v44, %v514_v48  ;;  %v1668_v37 = vsel %vm1014_vm5, %v1656_v46, %v13751_v49  ;;  %v10204_v13 = vcombine.low %v510_v44, %v514_v48  ;;  %v11867_v15 = vld [vmem:[%s15734_s28 + $0xa0] sm:$0xff]   ;;  %v11879_v30 = vld [vmem:[%s15734_s28 + $0x88] sm:$0xff]   ;;  %v13871_v46 = vld [vmem:[#allocation25] sm:$0xff] }
0x12e1   :  { %2067 = vmatmul.mubr.bf16.vlgmr.msra.gmra.mxu1 %v13759_v56  ;;  %2140 = vmatmul.mubr.bf16.vlgmr.msra.gmra.mxu0 %v13759_v56  ;;  %v10206_v42 = vcombine.low %v511_v31, %v515_v50  ;;  %v11880_v33 = vld [vmem:[%s15734_s28 + $0x40] sm:$0xff]   ;;  %v15672_v44 = vsub.s32 3, %v13566_v58 }
0x12e2   :  { %2181 = vmatpush1.bf16.msra.mxu1 %v10252_v23  ;;  %2254 = vmatpush1.bf16.msra.mxu0 %v10254_v27  ;;  %v530_v23 = vld [vmem:[#allocation30 + $0xf0] sm:$0xff]  ;;  %v1643_v27 = vadd.f32 %v13745_v36, %v13743_v21  ;;  %v519_v36 = vld [vmem:[#allocation30 + $0x98] sm:$0xff]  ;;  %v10213_v21 = vcombine.high %v518_v16, %v522_v34  ;;  %v11882_v34 = vld [vmem:[%s15734_s28 + $0xc0] sm:$0xff]  }
0x12e3   :  { %2182 = vmatprep.subr.bf16.mxu1 %v10245_v57  ;;  %2255 = vmatprep.subr.bf16.mxu0 %v10247_v8  ;;  %v10221_v28 = vcombine.high %v526_v11, %v530_v23  ;;  %v10220_v39 = vcombine.low %v526_v11, %v530_v23  ;;  %v10215_v40 = vcombine.high %v519_v36, %v523_v38  ;;  %v502_v8 = vld [vmem:[#allocation30 + $0x10] sm:$0xff]  ;;  %v11866_v11 = vld [vmem:[%s15734_s28 + $0xe0] sm:$0xff]   ;;  %v11868_v23 = vld [vmem:[%s15734_s28 + $0x58] sm:$0xff]  }
0x12e4   :  { %2076 = vmatprep.mubr.bf16.mxu1 %v15673_v20  ;;  %2149 = vmatprep.mubr.bf16.mxu0 %v15673_v20  ;;  %v1655_v45 = vmax.f32 %v1643_v27, 0.0  ;;  %v10214_v54 = vcombine.low %v519_v36, %v523_v38  ;;  %v10207_v57 = vcombine.high %v511_v31, %v515_v50  ;;  %v11873_v27 = vld [vmem:[%s15734_s28 + $0x10] sm:$0xff]   ;;  %v11878_v16 = vld [vmem:[%s15734_s28 + $0xc8] sm:$0xff]   ;;  %v11881_v36 = vld [vmem:[%s15734_s28] sm:$0xff]   ;;  %v13875_v50 = vrot.slane %v13871_v46, %v13573_v1 }
0x12e5   :  { %v11883_v38 = vld [vmem:[%s15734_s28 + $0x80] sm:$0xff]  }
0x12e6   :  { %2183 = vmatpush1.bf16.msra.mxu1 %v10244_v62  ;;  %2256 = vmatpush1.bf16.msra.mxu0 %v10246_v63  ;;  %v1667_v18 = vsel %vm1014_vm5, %v1655_v45, %v13751_v49  ;;  %v10197_v63 = vcombine.high %v502_v8, %v506_v60  ;;  %v10196_v49 = vcombine.low %v502_v8, %v506_v60  ;;  %v13869_v45 = vsub.s32 2, %v13566_v58 }
0x12e7   :  { %2184 = vmatprep.subr.bf16.mxu1 %v10237_v12  ;;  %2257 = vmatprep.subr.bf16.mxu0 %v10239_v6  ;;  %v13795_v62 = vpack.c.bf16 %v1668_v37, %v1667_v18  ;;  %v10198_v12 = vcombine.low %v503_v7, %v507_v61  ;;  %v11852_v6 = vld [vmem:[%s15734_s28 + $0x78] sm:$0xff]  }
0x12e8   :  { %15735 = vst [vmem:[#allocation79_spill] sm:$0xff] %v13869_v45 }
0x12e9   :  { %2077 = vmatmul.mubr.bf16.gmra.mxu1 %v13771_v9  ;;  %2150 = vmatmul.mubr.bf16.gmra.mxu0 %v13771_v9 }
0x12ea   :  { %2185 = vmatpush1.bf16.msra.mxu1 %v10236_v53  ;;  %2258 = vmatpush1.bf16.msra.mxu0 %v10238_v5  ;;  %v11860_v53 = vld [vmem:[%s15734_s28 + $0x68] sm:$0xff]  }
0x12eb   :  { %2186 = vmatprep.subr.bf16.mxu1 %v10229_v10  ;;  %2259 = vmatprep.subr.bf16.mxu0 %v10231_v17  ;;  %v11862_v5 = vld [vmem:[%s15734_s28 + $0xe8] sm:$0xff]   ;;  %v11864_v17 = vld [vmem:[%s15734_s28 + $0x60] sm:$0xff]  }
0x12ec   :  { %2086 = vmatprep.mubr.bf16.mxu1 %v15673_v20  ;;  %2159 = vmatprep.mubr.bf16.mxu0 %v15673_v20  ;;  %v11861_v10 = vld [vmem:[%s15734_s28 + $0x28] sm:$0xff]  }
0x12ee   :  { %2187 = vmatpush1.bf16.msra.mxu1 %v10228_v22  ;;  %2260 = vmatpush1.bf16.msra.mxu0 %v10230_v19  ;;  %v11872_v22 = vld [vmem:[%s15734_s28 + $0x50] sm:$0xff]  }
0x12ef   :  { %2188 = vmatprep.subr.bf16.mxu1 %v10221_v28  ;;  %2261 = vmatprep.subr.bf16.mxu0 %v10223_v2  ;;  %v11874_v19 = vld [vmem:[%s15734_s28 + $0xd0] sm:$0xff]   ;;  %v11876_v2 = vld [vmem:[%s15734_s28 + $0x48] sm:$0xff]  }
0x12f0   :  { %v11875_v28 = vld [vmem:[%s15734_s28 + $0x90] sm:$0xff]  }
0x12f1   :  { %2087 = vmatmul.mubr.bf16.gmra.mxu1 %v13785_v41  ;;  %2160 = vmatmul.mubr.bf16.gmra.mxu0 %v13785_v41 }
0x12f2   :  { %2189 = vmatpush1.bf16.msra.mxu1 %v10220_v39  ;;  %2262 = vmatpush1.bf16.msra.mxu0 %v10222_v26  ;;  %v11884_v39 = vld [vmem:[%s15734_s28 + $0x178] sm:$0xff]  }
0x12f3   :  { %2190 = vmatprep.subr.bf16.mxu1 %v10213_v21  ;;  %2263 = vmatprep.subr.bf16.mxu0 %v10215_v40  ;;  %v11886_v26 = vld [vmem:[%s15734_s28 + $0x1f8] sm:$0xff]  }
0x12f4   :  { %2096 = vmatprep.mubr.bf16.mxu1 %v15673_v20  ;;  %2169 = vmatprep.mubr.bf16.mxu0 %v15673_v20 }
0x12f6   :  { %2191 = vmatpush1.bf16.msra.mxu1 %v10212_v52  ;;  %2264 = vmatpush1.bf16.msra.mxu0 %v10214_v54  ;;  %v13880_v52 = vrot.slane %v13871_v46, %v15672_v44  ;;  %v13884_v54 = vrot.slane %v13871_v46, %v13569_v59 }
0x12f7   :  { %2192 = vmatprep.subr.bf16.mxu1 %v10205_v55  ;;  %2265 = vmatprep.subr.bf16.mxu0 %v10207_v57  ;;  %v13888_v55 = vrot.slane %v13871_v46, %v13869_v45 }
0x12f9   :  { %2097 = vmatmul.mubr.bf16.gmra.mxu1 %v13795_v62  ;;  %2170 = vmatmul.mubr.bf16.gmra.mxu0 %v13795_v62 }
0x12fa   :  { %2193 = vmatpush1.bf16.msra.mxu1 %v10204_v13  ;;  %2266 = vmatpush1.bf16.msra.mxu0 %v10206_v42 }
0x12fb   :  { %2194 = vmatprep.subr.bf16.mxu1 %v10197_v63  ;;  %2267 = vmatprep.subr.bf16.mxu0 %v10199_v32 }
0x12fc   :  { %2212 = vmatprep.mubr.bf16.mxu1 %v15673_v20  ;;  %2285 = vmatprep.mubr.bf16.mxu0 %v15673_v20 }
0x12fe   :  { %2195 = vmatpush1.bf16.msra.mxu1 %v10196_v49  ;;  %2268 = vmatpush1.bf16.msra.mxu0 %v10198_v12 }
0x12ff   :  { %10996 = vmatprep.subr.bf16.mxu1 %v11852_v6  ;;  %11036 = vmatprep.subr.bf16.mxu0 %v11854_v3 }
0x1301   :  { %2213 = vmatmul.mubr.bf16.vlgmr.msra.gmra.mxu1 %v13759_v56  ;;  %2286 = vmatmul.mubr.bf16.vlgmr.msra.gmra.mxu0 %v13759_v56  ;;  %v11863_v56 = vld [vmem:[%s15734_s28 + $0xa8] sm:$0xff]  }
0x1302   :  { %2222 = vmatprep.mubr.bf16.mxu1 %v15673_v20  ;;  %2295 = vmatprep.mubr.bf16.mxu0 %v15673_v20 }
0x1303   :  { %10997 = vmatpush3.bf16.msra.mxu1 %v11853_v0  ;;  %11037 = vmatpush3.bf16.msra.mxu0 %v11855_v4 }
0x1304   :  { %10998 = vmatprep.subr.bf16.mxu1 %v11856_v35  ;;  %11038 = vmatprep.subr.bf16.mxu0 %v11858_v43 }
0x1307   :  { %10999 = vmatpush3.bf16.msra.mxu1 %v11857_v47  ;;  %11039 = vmatpush3.bf16.msra.mxu0 %v11859_v51 }
0x1308   :  { %11000 = vmatprep.subr.bf16.mxu1 %v11860_v53  ;;  %11040 = vmatprep.subr.bf16.mxu0 %v11862_v5 }
0x1309   :  { %2223 = vmatmul.mubr.bf16.gmra.mxu1 %v13771_v9  ;;  %2296 = vmatmul.mubr.bf16.gmra.mxu0 %v13771_v9  ;;  %v11871_v9 = vld [vmem:[%s15734_s28 + $0x98] sm:$0xff]  }
0x130a   :  { %2232 = vmatprep.mubr.bf16.mxu1 %v15673_v20  ;;  %2305 = vmatprep.mubr.bf16.mxu0 %v15673_v20 }
0x130b   :  { %11001 = vmatpush3.bf16.msra.mxu1 %v11861_v10  ;;  %11041 = vmatpush3.bf16.msra.mxu0 %v11863_v56 }
0x130c   :  { %11002 = vmatprep.subr.bf16.mxu1 %v11864_v17  ;;  %11042 = vmatprep.subr.bf16.mxu0 %v11866_v11 }
0x130f   :  { %11003 = vmatpush3.bf16.msra.mxu1 %v11865_v14  ;;  %11043 = vmatpush3.bf16.msra.mxu0 %v11867_v15  ;;  %v11885_v14 = vld [vmem:[%s15734_s28 + $0x138] sm:$0xff]  }
0x1310   :  { %11004 = vmatprep.subr.bf16.mxu1 %v11868_v23  ;;  %11044 = vmatprep.subr.bf16.mxu0 %v11870_v24  ;;  %v11887_v15 = vld [vmem:[%s15734_s28 + $0x1b8] sm:$0xff]  }
0x1311   :  { %2233 = vmatmul.mubr.bf16.gmra.mxu1 %v13785_v41  ;;  %2306 = vmatmul.mubr.bf16.gmra.mxu0 %v13785_v41  ;;  %v3477_v41 = vpop.permute.xlu1 %3476 }
0x1312   :  { %2242 = vmatprep.mubr.bf16.mxu1 %v15673_v20  ;;  %2315 = vmatprep.mubr.bf16.mxu0 %v15673_v20  ;;  %v3479_v21 = vsel %vm726_vm1, 0.0, %v3477_v41 }
0x1313   :  { %11005 = vmatpush3.bf16.msra.mxu1 %v11869_v25  ;;  %11045 = vmatpush3.bf16.msra.mxu0 %v11871_v9  ;;  %v13851_v40 = vsel %vm728_vm2, %v3479_v21, 0.0 }
0x1314   :  { %11006 = vmatprep.subr.bf16.mxu1 %v11872_v22  ;;  %11046 = vmatprep.subr.bf16.mxu0 %v11874_v19  ;;  %v11888_v22 = vld [vmem:[%s15734_s28 + $0x170] sm:$0xff]  }
0x1315   :  { %3482 = vrot.lane.b32.xlu0 %v13851_v40, %s13210_s20  ;;  %3485 = vrot.lane.b32.xlu1 %v13851_v40, %s13209_s5  ;;  %v11890_v19 = vld [vmem:[%s15734_s28 + $0x1f0] sm:$0xff]  }
0x1317   :  { %11007 = vmatpush3.bf16.msra.mxu1 %v11873_v27  ;;  %11047 = vmatpush3.bf16.msra.mxu0 %v11875_v28 }
0x1318   :  { %11008 = vmatprep.subr.bf16.mxu1 %v11876_v2  ;;  %11048 = vmatprep.subr.bf16.mxu0 %v11878_v16 }
0x1319   :  { %2243 = vmatmul.mubr.bf16.gmra.mxu1 %v13795_v62  ;;  %2316 = vmatmul.mubr.bf16.gmra.mxu0 %v13795_v62 }
0x131a   :  { %3488 = vrot.lane.b32.xlu0 %v13851_v40, %s13211_s29  ;;  %3491 = vrot.lane.b32.xlu1 %v13851_v40, %s13212_s3 }
0x131b   :  { %11009 = vmatpush3.bf16.msra.mxu1 %v11877_v29  ;;  %11049 = vmatpush3.bf16.msra.mxu0 %v11879_v30 }
0x131c   :  { %11010 = vmatprep.subr.bf16.mxu1 %v11880_v33  ;;  %11050 = vmatprep.subr.bf16.mxu0 %v11882_v34 }
0x131e   :  { %3494 = vrot.lane.b32.xlu0 %v13851_v40, %s13213_s22  ;;  %3497 = vrot.lane.b32.xlu1 %v13851_v40, %s13214_s13 }
0x131f   :  { %11011 = vmatpush3.bf16.msra.mxu1 %v11881_v36  ;;  %11051 = vmatpush3.bf16.msra.mxu0 %v11883_v38 }
0x1320   :  { %11076 = vmatprep.subr.bf16.mxu1 %v11884_v39  ;;  %11116 = vmatprep.subr.bf16.mxu0 %v11886_v26  ;;  %v11889_v39 = vld [vmem:[%s15734_s28 + $0x130] sm:$0xff]  }
0x1321   :  { %v11891_v26 = vld [vmem:[%s15734_s28 + $0x1b0] sm:$0xff]  }
0x1322   :  { %3500 = vrot.lane.b32.xlu0 %v13851_v40, %s13215_s26 }
0x13a1   :  { %v2068_v48 = vpop.f32.mrf.mxu1  ;;  %v2141_v31 = vpop.f32.mrf.mxu0 }
0x13a2   :  { %v2069_v42 = vadd.f32 %v2068_v48, %v13884_v54  ;;  %v2142_v62 = vadd.f32 %v2141_v31, %v13888_v55 }
0x13a3   :  { %v2070_v57 = vpop.f32.mrf.mxu1  ;;  %v2143_v8 = vpop.f32.mrf.mxu0 }
0x13a4   :  { %v2071_v60 = vadd.f32 %v2070_v57, %v13875_v50  ;;  %v2144_v7 = vadd.f32 %v2143_v8, %v13880_v52  ;;  %v2326_v53 = vmax.f32 %v2069_v42, 0.0  ;;  %v2328_v5 = vmax.f32 %v2142_v62, 0.0  ;;  %v11892_v57 = vld [vmem:[%s15734_s28 + $0x168] sm:$0xff]  }
0x13a5   :  { %v2072_v18 = vpop.f32.mrf.mxu1  ;;  %v2145_v37 = vpop.f32.mrf.mxu0  ;;  %v11894_v8 = vld [vmem:[%s15734_s28 + $0x1e8] sm:$0xff]  }
0x13a6   :  { %v2073_v61 = vadd.f32 %v2072_v18, %v13884_v54  ;;  %v2146_v13 = vadd.f32 %v2145_v37, %v13888_v55  ;;  %v2327_v35 = vmax.f32 %v2071_v60, 0.0  ;;  %v2329_v43 = vmax.f32 %v2144_v7, 0.0 }
0x13a7   :  { %v2074_v63 = vpop.f32.mrf.mxu1  ;;  %v2147_v32 = vpop.f32.mrf.mxu0 }
0x13a8   :  { %v2075_v49 = vadd.f32 %v2074_v63, %v13875_v50  ;;  %v2148_v12 = vadd.f32 %v2147_v32, %v13880_v52  ;;  %v2334_v6 = vmax.f32 %v2073_v61, 0.0  ;;  %v2336_v3 = vmax.f32 %v2146_v13, 0.0  ;;  %v11893_v32 = vld [vmem:[%s15734_s28 + $0x128] sm:$0xff]  }
0x13a9   :  { %v2078_v0 = vpop.f32.mrf.mxu1  ;;  %v2151_v4 = vpop.f32.mrf.mxu0 }
0x13aa   :  { %v2335_v47 = vmax.f32 %v2075_v49, 0.0  ;;  %v2337_v51 = vmax.f32 %v2148_v12, 0.0  ;;  %v2390_v23 = vpack.c.bf16 %v2334_v6, %v2326_v53  ;;  %v2392_v24 = vpack.c.bf16 %v2336_v3, %v2328_v5  ;;  %v11898_v5 = vld [vmem:[%s15734_s28 + $0x1e0] sm:$0xff]  }
0x13ab   :  { %v2080_v10 = vpop.f32.mrf.mxu1  ;;  %v2153_v56 = vpop.f32.mrf.mxu0  ;;  %v2079_v16 = vadd.f32 %v2078_v0, %v13884_v54  ;;  %v2152_v29 = vadd.f32 %v2151_v4, %v13888_v55  ;;  %v11895_v4 = vld [vmem:[%s15734_s28 + $0x1a8] sm:$0xff]  }
0x13ac   :  { %v2391_v17 = vpack.c.bf16 %v2335_v47, %v2327_v35  ;;  %v2393_v11 = vpack.c.bf16 %v2337_v51, %v2329_v43  ;;  %v2081_v27 = vadd.f32 %v2080_v10, %v13875_v50  ;;  %v2154_v30 = vadd.f32 %v2153_v56, %v13880_v52  ;;  %v11896_v35 = vld [vmem:[%s15734_s28 + $0x160] sm:$0xff]  }
0x13ad   :  { %v2082_v25 = vpop.f32.mrf.mxu1  ;;  %v2155_v9 = vpop.f32.mrf.mxu0  ;;  %v2342_v7 = vmax.f32 %v2079_v16, 0.0  ;;  %v2344_v61 = vmax.f32 %v2152_v29, 0.0 }
0x13ae   :  { %v2083_v28 = vadd.f32 %v2082_v25, %v13884_v54  ;;  %v2156_v2 = vadd.f32 %v2155_v9, %v13888_v55  ;;  %2844 = vmatprep.mubr.bf16.mxu1 %v2391_v17  ;;  %2909 = vmatprep.mubr.bf16.mxu0 %v2393_v11  ;;  %v2343_v18 = vmax.f32 %v2081_v27, 0.0  ;;  %v2345_v13 = vmax.f32 %v2154_v30, 0.0  ;;  %v11900_v27 = vld [vmem:[%s15734_s28 + $0x158] sm:$0xff]  }
0x13af   :  { %v2084_v33 = vpop.f32.mrf.mxu1  ;;  %v2157_v34 = vpop.f32.mrf.mxu0  ;;  %2845 = vmatmul.mubr.bf16.vlgmr.msra.gmra.mxu1 %v2390_v23  ;;  %2910 = vmatmul.mubr.bf16.vlgmr.msra.gmra.mxu0 %v2392_v24  ;;  %v11897_v23 = vld [vmem:[%s15734_s28 + $0x120] sm:$0xff]  }
0x13b0   :  { %v2085_v36 = vadd.f32 %v2084_v33, %v13875_v50  ;;  %v2158_v38 = vadd.f32 %v2157_v34, %v13880_v52  ;;  %11077 = vmatpush3.bf16.msra.mxu1 %v11885_v14  ;;  %11117 = vmatpush3.bf16.msra.mxu0 %v11887_v15  ;;  %v2350_v41 = vmax.f32 %v2083_v28, 0.0  ;;  %v2352_v21 = vmax.f32 %v2156_v2, 0.0 }
0x13b1   :  { %v2088_v48 = vpop.f32.mrf.mxu1  ;;  %v2161_v31 = vpop.f32.mrf.mxu0  ;;  %11078 = vmatprep.subr.bf16.mxu1 %v11888_v22  ;;  %11118 = vmatprep.subr.bf16.mxu0 %v11890_v19  ;;  %v11899_v19 = vld [vmem:[%s15734_s28 + $0x1a0] sm:$0xff]  }
0x13b2   :  { %v2351_v37 = vmax.f32 %v2085_v36, 0.0  ;;  %v2353_v60 = vmax.f32 %v2158_v38, 0.0  ;;  %v2398_v49 = vpack.c.bf16 %v2350_v41, %v2342_v7  ;;  %v2400_v12 = vpack.c.bf16 %v2352_v21, %v2344_v61  ;;  %v11902_v38 = vld [vmem:[%s15734_s28 + $0x1d8] sm:$0xff]  }
0x13b3   :  { %v2090_v42 = vpop.f32.mrf.mxu1  ;;  %v2163_v62 = vpop.f32.mrf.mxu0  ;;  %v2089_v10 = vadd.f32 %v2088_v48, %v13884_v54  ;;  %v2162_v56 = vadd.f32 %v2161_v31, %v13888_v55  ;;  %v11901_v41 = vld [vmem:[%s15734_s28 + $0x118] sm:$0xff]   ;;  %v13932_v21 = vsub.s32 5, %v13566_v58  ;;  %v13938_v7 = vsub.s32 7, %v13566_v58 }
0x13b4   :  { %11079 = vmatpush3.bf16.msra.mxu1 %v11889_v39  ;;  %11119 = vmatpush3.bf16.msra.mxu0 %v11891_v26  ;;  %v2399_v63 = vpack.c.bf16 %v2351_v37, %v2343_v18  ;;  %v2401_v0 = vpack.c.bf16 %v2353_v60, %v2345_v13  ;;  %v2091_v43 = vadd.f32 %v2090_v42, %v13875_v50  ;;  %v11903_v37 = vld [vmem:[%s15734_s28 + $0x198] sm:$0xff]   ;;  %v11904_v60 = vld [vmem:[%s15734_s28 + $0x150] sm:$0xff]  }
0x13b5   :  { %v2092_v6 = vpop.f32.mrf.mxu1  ;;  %v2165_v3 = vpop.f32.mrf.mxu0  ;;  %11080 = vmatprep.subr.bf16.mxu1 %v11892_v57  ;;  %11120 = vmatprep.subr.bf16.mxu0 %v11894_v8  ;;  %v2164_v47 = vadd.f32 %v2163_v62, %v13880_v52  ;;  %v2358_v30 = vmax.f32 %v2089_v10, 0.0  ;;  %v2360_v33 = vmax.f32 %v2162_v56, 0.0  ;;  %15736 = vst [vmem:[#allocation80_spill] sm:$0xff] %v13932_v21  ;;  %15737 = vst [vmem:[#allocation81_spill] sm:$0xff] %v13938_v7  ;;  %v11906_v62 = vld [vmem:[%s15734_s28 + $0x1d0] sm:$0xff]  }
0x13b6   :  { %v2093_v51 = vadd.f32 %v2092_v6, %v13884_v54  ;;  %v2166_v53 = vadd.f32 %v2165_v3, %v13888_v55  ;;  %2852 = vmatprep.mubr.bf16.mxu1 %v2399_v63  ;;  %2917 = vmatprep.mubr.bf16.mxu0 %v2401_v0  ;;  %v2359_v28 = vmax.f32 %v2091_v43, 0.0  ;;  %v13947_v6 = vsub.s32 4, %v13566_v58 }
0x13b7   :  { %v2094_v17 = vpop.f32.mrf.mxu1  ;;  %v2167_v11 = vpop.f32.mrf.mxu0  ;;  %2853 = vmatmul.mubr.bf16.gmra.mxu1 %v2398_v49  ;;  %2918 = vmatmul.mubr.bf16.gmra.mxu0 %v2400_v12  ;;  %v2361_v2 = vmax.f32 %v2164_v47, 0.0  ;;  %v13950_v3 = vsub.s32 6, %v13566_v58 }
0x13b8   :  { %v2095_v14 = vadd.f32 %v2094_v17, %v13875_v50  ;;  %v2168_v15 = vadd.f32 %v2167_v11, %v13880_v52  ;;  %11081 = vmatpush3.bf16.msra.mxu1 %v11893_v32  ;;  %v2366_v24 = vmax.f32 %v2093_v51, 0.0  ;;  %v2368_v25 = vmax.f32 %v2166_v53, 0.0  ;;  %11121 = vmatpush3.bf16.msra.mxu0 %v11895_v4  ;;  %15738 = vst [vmem:[#allocation82_spill] sm:$0xff] %v13947_v6 }
0x13b9   :  { %v2098_v9 = vpop.f32.mrf.mxu1  ;;  %v2171_v22 = vpop.f32.mrf.mxu0  ;;  %11082 = vmatprep.subr.bf16.mxu1 %v11896_v35  ;;  %11122 = vmatprep.subr.bf16.mxu0 %v11898_v5  ;;  %15739 = vst [vmem:[#allocation83_spill] sm:$0xff] %v13950_v3  ;;  %v13957_v51 = vrot.slane %v13871_v46, %v13932_v21  ;;  %v13961_v53 = vrot.slane %v13871_v46, %v13938_v7 }
0x13ba   :  { %v2367_v16 = vmax.f32 %v2095_v14, 0.0  ;;  %v2369_v29 = vmax.f32 %v2168_v15, 0.0  ;;  %v2406_v48 = vpack.c.bf16 %v2366_v24, %v2358_v30  ;;  %v2408_v31 = vpack.c.bf16 %v2368_v25, %v2360_v33  ;;  %v11911_v33 = vld [vmem:[%s15734_s28 + $0x188] sm:$0xff]  }
0x13bb   :  { %v2100_v34 = vpop.f32.mrf.mxu1  ;;  %v2173_v36 = vpop.f32.mrf.mxu0  ;;  %v2099_v63 = vadd.f32 %v2098_v9, %v13884_v54  ;;  %v2172_v32 = vadd.f32 %v2171_v22, %v13888_v55  ;;  %v13967_v15 = vrot.slane %v13871_v46, %v13947_v6  ;;  %v11910_v9 = vld [vmem:[%s15734_s28 + $0x1c8] sm:$0xff]  }
0x13bc   :  { %11083 = vmatpush3.bf16.msra.mxu1 %v11897_v23  ;;  %v2407_v39 = vpack.c.bf16 %v2367_v16, %v2359_v28  ;;  %v2409_v26 = vpack.c.bf16 %v2369_v29, %v2361_v2  ;;  %v2101_v57 = vadd.f32 %v2100_v34, %v13875_v50  ;;  %11123 = vmatpush3.bf16.msra.mxu0 %v11899_v19 }
0x13bd   :  { %v2102_v8 = vpop.f32.mrf.mxu1  ;;  %v2175_v18 = vpop.f32.mrf.mxu0  ;;  %11084 = vmatprep.subr.bf16.mxu1 %v11900_v27  ;;  %v2174_v61 = vadd.f32 %v2173_v36, %v13880_v52  ;;  %11124 = vmatprep.subr.bf16.mxu0 %v11902_v38  ;;  %v2374_v11 = vmax.f32 %v2099_v63, 0.0  ;;  %v2376_v14 = vmax.f32 %v2172_v32, 0.0  ;;  %v13971_v23 = vrot.slane %v13871_v46, %v13950_v3  ;;  %v11909_v27 = vld [vmem:[%s15734_s28 + $0x108] sm:$0xff]   ;;  %v11912_v46 = vld [vmem:[%s15734_s28 + $0x140] sm:$0xff]  }
0x13be   :  { %v2103_v13 = vadd.f32 %v2102_v8, %v13884_v54  ;;  %v2176_v42 = vadd.f32 %v2175_v18, %v13888_v55  ;;  %2860 = vmatprep.mubr.bf16.mxu1 %v2407_v39  ;;  %2925 = vmatprep.mubr.bf16.mxu0 %v2409_v26  ;;  %v11905_v54 = vld [vmem:[%s15734_s28 + $0x110] sm:$0xff]   ;;  %v2375_v5 = vmax.f32 %v2101_v57, 0.0  ;;  %v11914_v39 = vld [vmem:[%s15734_s28 + $0x1c0] sm:$0xff]  }
0x13bf   :  { %v2104_v49 = vpop.f32.mrf.mxu1  ;;  %v2177_v12 = vpop.f32.mrf.mxu0  ;;  %2861 = vmatmul.mubr.bf16.gmra.mxu1 %v2406_v48  ;;  %2926 = vmatmul.mubr.bf16.gmra.mxu0 %v2408_v31  ;;  %v2377_v10 = vmax.f32 %v2174_v61, 0.0  ;;  %v11913_v18 = vld [vmem:[%s15734_s28 + $0x100] sm:$0xff]  }
0x13c0   :  { %v2105_v0 = vadd.f32 %v2104_v49, %v13875_v50  ;;  %v2178_v4 = vadd.f32 %v2177_v12, %v13880_v52  ;;  %11085 = vmatpush3.bf16.msra.mxu1 %v11901_v41  ;;  %v2382_v55 = vmax.f32 %v2103_v13, 0.0  ;;  %v2384_v35 = vmax.f32 %v2176_v42, 0.0  ;;  %11125 = vmatpush3.bf16.msra.mxu0 %v11903_v37  ;;  %v11907_v50 = vld [vmem:[%s15734_s28 + $0x190] sm:$0xff]   ;;  %v11908_v52 = vld [vmem:[%s15734_s28 + $0x148] sm:$0xff]   ;;  %v11915_v42 = vld [vmem:[%s15734_s28 + $0x180] sm:$0xff]  }
0x13c1   :  { %v2214_v43 = vpop.f32.mrf.mxu1  ;;  %v2287_v47 = vpop.f32.mrf.mxu0  ;;  %11086 = vmatprep.subr.bf16.mxu1 %v11904_v60  ;;  %11126 = vmatprep.subr.bf16.mxu0 %v11906_v62  ;;  %v693_v12 = vld [vmem:[%s15740_s24] sm:$0x1] }
0x13c2   :  { %v2383_v56 = vmax.f32 %v2105_v0, 0.0  ;;  %v2385_v17 = vmax.f32 %v2178_v4, 0.0  ;;  %v2414_v28 = vpack.c.bf16 %v2382_v55, %v2374_v11  ;;  %v2416_v2 = vpack.c.bf16 %v2384_v35, %v2376_v14 }
0x13c3   :  { %v2216_v24 = vpop.f32.mrf.mxu1  ;;  %v2289_v25 = vpop.f32.mrf.mxu0  ;;  %v2215_v26 = vadd.f32 %v2214_v43, %v13967_v15  ;;  %v2288_v41 = vadd.f32 %v2287_v47, %v13971_v23 }
0x13c4   :  { %11087 = vmatpush3.bf16.msra.mxu1 %v11905_v54  ;;  %v2415_v22 = vpack.c.bf16 %v2383_v56, %v2375_v5  ;;  %v2417_v19 = vpack.c.bf16 %v2385_v17, %v2377_v10  ;;  %v2217_v16 = vadd.f32 %v2216_v24, %v13957_v51  ;;  %11127 = vmatpush3.bf16.msra.mxu0 %v11907_v50  ;;  %v15675_v56 = vmov 0.0  }
0x13c5   :  { %v2218_v29 = vpop.f32.mrf.mxu1  ;;  %v2291_v30 = vpop.f32.mrf.mxu0  ;;  %11088 = vmatprep.subr.bf16.mxu1 %v11908_v52  ;;  %v2290_v34 = vadd.f32 %v2289_v25, %v13961_v53  ;;  %11128 = vmatprep.subr.bf16.mxu0 %v11910_v9  ;;  %v2330_v0 = vmax.f32 %v2215_v26, 0.0  ;;  %v2332_v4 = vmax.f32 %v2288_v41, 0.0  ;;  %v3196_v17 = vsel %vm1580_vm6, %v693_v12, 0 }
0x13c6   :  { %v2219_v36 = vadd.f32 %v2218_v29, %v13967_v15  ;;  %v2292_v38 = vadd.f32 %v2291_v30, %v13971_v23  ;;  %2868 = vmatprep.mubr.bf16.mxu1 %v2415_v22  ;;  %2933 = vmatprep.mubr.bf16.mxu0 %v2417_v19  ;;  %v2331_v62 = vmax.f32 %v2217_v16, 0.0 }
0x13c7   :  { %v2220_v48 = vpop.f32.mrf.mxu1  ;;  %v2293_v31 = vpop.f32.mrf.mxu0  ;;  %2869 = vmatmul.mubr.bf16.gmra.mxu1 %v2414_v28  ;;  %2934 = vmatmul.mubr.bf16.gmra.mxu0 %v2416_v2  ;;  %v2333_v63 = vmax.f32 %v2290_v34, 0.0 }
0x13c8   :  { %v2221_v57 = vadd.f32 %v2220_v48, %v13957_v51  ;;  %v2294_v8 = vadd.f32 %v2293_v31, %v13961_v53  ;;  %11089 = vmatpush3.bf16.msra.mxu1 %v11909_v27  ;;  %v2338_v37 = vmax.f32 %v2219_v36, 0.0  ;;  %v2340_v60 = vmax.f32 %v2292_v38, 0.0  ;;  %11129 = vmatpush3.bf16.msra.mxu0 %v11911_v33 }
0x13c9   :  { %v2224_v61 = vpop.f32.mrf.mxu1  ;;  %v2297_v13 = vpop.f32.mrf.mxu0  ;;  %11090 = vmatprep.subr.bf16.mxu1 %v11912_v46  ;;  %11130 = vmatprep.subr.bf16.mxu0 %v11914_v39 }
0x13ca   :  { %v2339_v32 = vmax.f32 %v2221_v57, 0.0  ;;  %v2341_v49 = vmax.f32 %v2294_v8, 0.0  ;;  %v2394_v47 = vpack.c.bf16 %v2338_v37, %v2330_v0  ;;  %v2396_v50 = vpack.c.bf16 %v2340_v60, %v2332_v4 }
0x13cb   :  { %v2226_v54 = vpop.f32.mrf.mxu1  ;;  %v2299_v55 = vpop.f32.mrf.mxu0  ;;  %v2225_v25 = vadd.f32 %v2224_v61, %v13967_v15  ;;  %v2298_v9 = vadd.f32 %v2297_v13, %v13971_v23 }
0x13cc   :  { %11091 = vmatpush3.bf16.msra.mxu1 %v11913_v18  ;;  %v2395_v35 = vpack.c.bf16 %v2339_v32, %v2331_v62  ;;  %v2397_v43 = vpack.c.bf16 %v2341_v49, %v2333_v63  ;;  %v2227_v52 = vadd.f32 %v2226_v54, %v13957_v51  ;;  %11131 = vmatpush3.bf16.msra.mxu0 %v11915_v42 }
0x13cd   :  { %v2228_v5 = vpop.f32.mrf.mxu1  ;;  %v2301_v10 = vpop.f32.mrf.mxu0  ;;  %11392 = vmatprep.subr.bf16.mxu1 %v15675_v56  ;;  %v2300_v11 = vadd.f32 %v2299_v55, %v13961_v53  ;;  %11398 = vmatprep.subr.bf16.mxu0 %v15675_v56  ;;  %v2346_v38 = vmax.f32 %v2225_v25, 0.0  ;;  %v2348_v39 = vmax.f32 %v2298_v9, 0.0 }
0x13ce   :  { %v2229_v14 = vadd.f32 %v2228_v5, %v13967_v15  ;;  %v2302_v24 = vadd.f32 %v2301_v10, %v13971_v23  ;;  %2974 = vmatprep.mubr.bf16.mxu1 %v2395_v35  ;;  %3039 = vmatprep.mubr.bf16.mxu0 %v2397_v43  ;;  %v2347_v33 = vmax.f32 %v2227_v52, 0.0 }
0x13cf   :  { %v2230_v22 = vpop.f32.mrf.mxu1  ;;  %v2303_v19 = vpop.f32.mrf.mxu0  ;;  %2975 = vmatmul.mubr.bf16.vlgmr.msra.gmra.mxu1 %v2394_v47  ;;  %3040 = vmatmul.mubr.bf16.vlgmr.msra.gmra.mxu0 %v2396_v50  ;;  %v2349_v46 = vmax.f32 %v2300_v11, 0.0 }
0x13d0   :  { %v2231_v27 = vadd.f32 %v2230_v22, %v13957_v51  ;;  %v2304_v28 = vadd.f32 %v2303_v19, %v13961_v53  ;;  %11393 = vmatpush3.bf16.msra.mxu1 %v3196_v17  ;;  %v2354_v2 = vmax.f32 %v2229_v14, 0.0  ;;  %v2356_v16 = vmax.f32 %v2302_v24, 0.0 }
0x13d1   :  { %v2234_v29 = vpop.f32.mrf.mxu1  ;;  %v2307_v30 = vpop.f32.mrf.mxu0  ;;  %11410 = vmatprep.subr.bf16.mxu1 %v15675_v56 }
0x13d2   :  { %v2355_v34 = vmax.f32 %v2231_v27, 0.0  ;;  %v2357_v36 = vmax.f32 %v2304_v28, 0.0  ;;  %v2402_v57 = vpack.c.bf16 %v2354_v2, %v2346_v38  ;;  %v2404_v8 = vpack.c.bf16 %v2356_v16, %v2348_v39 }
0x13d3   :  { %v2236_v26 = vpop.f32.mrf.mxu1  ;;  %v2309_v41 = vpop.f32.mrf.mxu0  ;;  %v2235_v62 = vadd.f32 %v2234_v29, %v13967_v15  ;;  %v2308_v63 = vadd.f32 %v2307_v30, %v13971_v23 }
0x13d4   :  { %v2403_v48 = vpack.c.bf16 %v2355_v34, %v2347_v33  ;;  %v2405_v31 = vpack.c.bf16 %v2357_v36, %v2349_v46  ;;  %v2237_v18 = vadd.f32 %v2236_v26, %v13957_v51  ;;  %v2310_v61 = vadd.f32 %v2309_v41, %v13961_v53 }
0x13d5   :  { %v2238_v37 = vpop.f32.mrf.mxu1  ;;  %v2311_v60 = vpop.f32.mrf.mxu0  ;;  %v2362_v5 = vmax.f32 %v2235_v62, 0.0  ;;  %v2364_v10 = vmax.f32 %v2308_v63, 0.0  ;;  %v14029_v62 = vld [vmem:[%s15742_s19] sm:$0x7]  ;;  %v11920_v63 = vld [vmem:[%s15743_s17 + $0x38] sm:$0xff]  }
0x13d6   :  { %v2239_v13 = vadd.f32 %v2238_v37, %v13967_v15  ;;  %v2312_v42 = vadd.f32 %v2311_v60, %v13971_v23  ;;  %2982 = vmatprep.mubr.bf16.mxu1 %v2403_v48  ;;  %3047 = vmatprep.mubr.bf16.mxu0 %v2405_v31  ;;  %v2363_v43 = vmax.f32 %v2237_v18, 0.0  ;;  %v2365_v47 = vmax.f32 %v2310_v61, 0.0  ;;  %v11917_v61 = vld [vmem:[#allocation21 + $0x10] sm:$0xff]  }
0x13d7   :  { %v2240_v32 = vpop.f32.mrf.mxu1  ;;  %v2313_v49 = vpop.f32.mrf.mxu0  ;;  %2983 = vmatmul.mubr.bf16.gmra.mxu1 %v2402_v57  ;;  %3048 = vmatmul.mubr.bf16.gmra.mxu0 %v2404_v8 }
0x13d8   :  { %v2241_v12 = vadd.f32 %v2240_v32, %v13957_v51  ;;  %v2314_v0 = vadd.f32 %v2313_v49, %v13961_v53  ;;  %v2370_v4 = vmax.f32 %v2239_v13, 0.0  ;;  %v2372_v54 = vmax.f32 %v2312_v42, 0.0  ;;  %v11918_v13 = vld [vmem:[#allocation21 + $0x8] sm:$0xff]   ;;  %v11919_v42 = vld [vmem:[#allocation21] sm:$0xff]  }
0x13d9   :  { %v2244_v55 = vpop.f32.mrf.mxu1  ;;  %v2317_v35 = vpop.f32.mrf.mxu0  ;;  %v11921_v32 = vld [vmem:[%s15743_s17 + $0x30] sm:$0xff]   ;;  %v11922_v49 = vld [vmem:[%s15743_s17 + $0x28] sm:$0xff]  }
0x13da   :  { %v2371_v50 = vmax.f32 %v2241_v12, 0.0  ;;  %v2373_v52 = vmax.f32 %v2314_v0, 0.0  ;;  %v2410_v25 = vpack.c.bf16 %v2370_v4, %v2362_v5  ;;  %v2412_v9 = vpack.c.bf16 %v2372_v54, %v2364_v10  ;;  %v11923_v12 = vld [vmem:[%s15743_s17 + $0x20] sm:$0xff]   ;;  %v11924_v0 = vld [vmem:[%s15743_s17 + $0x18] sm:$0xff]   ;;  %v11925_v4 = vld [vmem:[%s15743_s17 + $0x10] sm:$0xff]  }
0x13db   :  { %v2246_v17 = vpop.f32.mrf.mxu1  ;;  %v2319_v11 = vpop.f32.mrf.mxu0  ;;  %v2245_v29 = vadd.f32 %v2244_v55, %v13967_v15  ;;  %v2318_v46 = vadd.f32 %v2317_v35, %v13971_v23  ;;  %v10256_v35 = vld [vmem:[#allocation27] ss:$0 sm:$0xff] }
0x13dc   :  { %v2411_v14 = vpack.c.bf16 %v2371_v50, %v2363_v43  ;;  %v2413_v24 = vpack.c.bf16 %v2373_v52, %v2365_v47  ;;  %v2247_v22 = vadd.f32 %v2246_v17, %v13957_v51  ;;  %v2320_v28 = vadd.f32 %v2319_v11, %v13961_v53 }
0x13dd   :  { %v2248_v19 = vpop.f32.mrf.mxu1  ;;  %v2321_v27 = vpop.f32.mrf.mxu0  ;;  %v2378_v57 = vmax.f32 %v2245_v29, 0.0  ;;  %v2380_v8 = vmax.f32 %v2318_v46, 0.0 }
0x13de   :  { %v2249_v2 = vadd.f32 %v2248_v19, %v13967_v15  ;;  %v2322_v16 = vadd.f32 %v2321_v27, %v13971_v23  ;;  %2990 = vmatprep.mubr.bf16.mxu1 %v2411_v14  ;;  %3055 = vmatprep.mubr.bf16.mxu0 %v2413_v24  ;;  %v2379_v38 = vmax.f32 %v2247_v22, 0.0  ;;  %v2381_v26 = vmax.f32 %v2320_v28, 0.0  ;;  %v11916_v23 = vld [vmem:[#allocation21 + $0x18] sm:$0xff]  }
0x13df   :  { %v2250_v30 = vpop.f32.mrf.mxu1  ;;  %v2323_v33 = vpop.f32.mrf.mxu0  ;;  %2991 = vmatmul.mubr.bf16.gmra.mxu1 %v2410_v25  ;;  %3056 = vmatmul.mubr.bf16.gmra.mxu0 %v2412_v9 }
0x13e0   :  { %v2251_v34 = vadd.f32 %v2250_v30, %v13957_v51  ;;  %v2324_v36 = vadd.f32 %v2323_v33, %v13961_v53  ;;  %v2386_v39 = vmax.f32 %v2249_v2, 0.0  ;;  %v2388_v41 = vmax.f32 %v2322_v16, 0.0  ;;  %v3184_v51 = vld [vmem:[%s15741_s1] sm:$0xff]  ;;  %11399 = vmatpush3.bf16.msra.mxu0 %v11916_v23 }
0x13e1   :  { %v3185_v53 = vpack.c.bf16 %v3184_v51, %v3184_v51  ;;  %11400 = vmatprep.subr.bf16.mxu0 %v15675_v56 }
0x13e2   :  { %v2387_v48 = vmax.f32 %v2251_v34, 0.0  ;;  %v2389_v31 = vmax.f32 %v2324_v36, 0.0  ;;  %v2418_v37 = vpack.c.bf16 %v2386_v39, %v2378_v57  ;;  %v2420_v60 = vpack.c.bf16 %v2388_v41, %v2380_v8 }
0x13e4   :  { %v2419_v15 = vpack.c.bf16 %v2387_v48, %v2379_v38  ;;  %v2421_v18 = vpack.c.bf16 %v2389_v31, %v2381_v26  ;;  %11401 = vmatpush3.bf16.msra.mxu0 %v11917_v61 }
0x13e5   :  { %11402 = vmatprep.subr.bf16.mxu0 %v15675_v56 }
0x13e6   :  { %2998 = vmatprep.mubr.bf16.mxu1 %v2419_v15  ;;  %3063 = vmatprep.mubr.bf16.mxu0 %v2421_v18 }
0x13e7   :  { %2999 = vmatmul.mubr.bf16.gmra.mxu1 %v2418_v37  ;;  %3064 = vmatmul.mubr.bf16.gmra.mxu0 %v2420_v60 }
0x13e8   :  { %11394 = vmatprep.mubr.msk.bf16.mxu1 %vm13218_vm7, %v15675_v56  ;;  %11406 = vmatprep.mubr.msk.bf16.mxu0 %vm13218_vm7, %v15675_v56 }
0x13e9   :  { %11403 = vmatpush3.bf16.msra.mxu0 %v11918_v13 }
0x13ea   :  { %11404 = vmatprep.subr.bf16.mxu0 %v15675_v56 }
0x13ed   :  { %11405 = vmatpush3.bf16.msra.mxu0 %v11919_v42 }
0x13ee   :  { %11734 = vmatprep.subr.msk.bf16.mxu0 %vm775_vm0, %v14029_v62 }
0x13ef   :  { %11395 = vmatmul.mubr.msk.bf16.vlgmr.msra.gmra.mxu1 %vm726_vm1, %v3185_v53 }
0x13f0   :  { %11426 = vmatprep.mubr.msk.bf16.mxu1 %vm13218_vm7, %v15675_v56  ;;  %11411 = vmatpush3.bf16.msra.mxu1 %v11920_v63 }
0x13f1   :  { %11412 = vmatprep.subr.bf16.mxu1 %v15675_v56 }
0x13f4   :  { %11413 = vmatpush3.bf16.msra.mxu1 %v11921_v32 }
0x13f5   :  { %11414 = vmatprep.subr.bf16.mxu1 %v15675_v56 }
0x13f8   :  { %11415 = vmatpush3.bf16.msra.mxu1 %v11922_v49 }
0x13f9   :  { %11416 = vmatprep.subr.bf16.mxu1 %v15675_v56 }
0x13fc   :  { %11417 = vmatpush3.bf16.msra.mxu1 %v11923_v12 }
0x13fd   :  { %11418 = vmatprep.subr.bf16.mxu1 %v15675_v56 }
0x1400   :  { %11419 = vmatpush3.bf16.msra.mxu1 %v11924_v0 }
0x1401   :  { %11420 = vmatprep.subr.bf16.mxu1 %v15675_v56 }
0x1404   :  { %11421 = vmatpush3.bf16.msra.mxu1 %v11925_v4 }
0x1405   :  { %11422 = vmatprep.subr.bf16.mxu1 %v15675_v56 }
0x146f   :  { %v11012_v54 = vpop.f32.mrf.mxu1  ;;  %v11052_v55 = vpop.f32.mrf.mxu0 }
0x1471   :  { %v11013_v43 = vpop.f32.mrf.mxu1  ;;  %v11053_v47 = vpop.f32.mrf.mxu0 }
0x1472   :  { %v11014_v50 = vadd.f32 %v11013_v43, %v11012_v54  ;;  %v11054_v52 = vadd.f32 %v11053_v47, %v11052_v55 }
0x1473   :  { %v11015_v5 = vpop.f32.mrf.mxu1  ;;  %v11055_v10 = vpop.f32.mrf.mxu0 }
0x1474   :  { %v2847_v17 = vadd.f32 %v11014_v50, %v10256_v35 }
0x1475   :  { %v11016_v11 = vpop.f32.mrf.mxu1  ;;  %v11056_v14 = vpop.f32.mrf.mxu0 }
0x1476   :  { %v2912_v24 = vadd.f32 %v11054_v52, %v2847_v17  ;;  %v11017_v25 = vadd.f32 %v11016_v11, %v11015_v5  ;;  %v11057_v19 = vadd.f32 %v11056_v14, %v11055_v10 }
0x1477   :  { %v11018_v9 = vpop.f32.mrf.mxu1  ;;  %v11058_v27 = vpop.f32.mrf.mxu0 }
0x1478   :  { %v2850_v22 = vadd.f32 %v11017_v25, %v10256_v35 }
0x1479   :  { %v11019_v28 = vpop.f32.mrf.mxu1  ;;  %v11059_v29 = vpop.f32.mrf.mxu0 }
0x147a   :  { %v2915_v2 = vadd.f32 %v11057_v19, %v2850_v22  ;;  %v11020_v16 = vadd.f32 %v11019_v28, %v11018_v9  ;;  %v11060_v30 = vadd.f32 %v11059_v29, %v11058_v27 }
0x147b   :  { %v11021_v33 = vpop.f32.mrf.mxu1  ;;  %v11061_v34 = vpop.f32.mrf.mxu0 }
0x147c   :  { %v2855_v46 = vadd.f32 %v11020_v16, %v10256_v35 }
0x147d   :  { %v11022_v36 = vpop.f32.mrf.mxu1  ;;  %v11062_v26 = vpop.f32.mrf.mxu0 }
0x147e   :  { %v2920_v38 = vadd.f32 %v11060_v30, %v2855_v46  ;;  %v11023_v39 = vadd.f32 %v11022_v36, %v11021_v33  ;;  %v11063_v31 = vadd.f32 %v11062_v26, %v11061_v34 }
0x147f   :  { %v11024_v41 = vpop.f32.mrf.mxu1  ;;  %v11064_v57 = vpop.f32.mrf.mxu0 }
0x1480   :  { %v2858_v48 = vadd.f32 %v11023_v39, %v10256_v35 }
0x1481   :  { %v11025_v8 = vpop.f32.mrf.mxu1  ;;  %v11065_v37 = vpop.f32.mrf.mxu0 }
0x1482   :  { %v2923_v15 = vadd.f32 %v11063_v31, %v2858_v48  ;;  %v11026_v18 = vadd.f32 %v11025_v8, %v11024_v41  ;;  %v11066_v60 = vadd.f32 %v11065_v37, %v11064_v57 }
0x1483   :  { %v11027_v51 = vpop.f32.mrf.mxu1  ;;  %v11067_v23 = vpop.f32.mrf.mxu0 }
0x1484   :  { %v2863_v53 = vadd.f32 %v11026_v18, %v10256_v35 }
0x1485   :  { %v11028_v61 = vpop.f32.mrf.mxu1  ;;  %v11068_v63 = vpop.f32.mrf.mxu0 }
0x1486   :  { %v2928_v13 = vadd.f32 %v11066_v60, %v2863_v53  ;;  %v11029_v42 = vadd.f32 %v11028_v61, %v11027_v51  ;;  %v11069_v12 = vadd.f32 %v11068_v63, %v11067_v23 }
0x1487   :  { %v11030_v32 = vpop.f32.mrf.mxu1  ;;  %v11070_v0 = vpop.f32.mrf.mxu0 }
0x1488   :  { %v2866_v49 = vadd.f32 %v11029_v42, %v10256_v35 }
0x1489   :  { %v11031_v4 = vpop.f32.mrf.mxu1  ;;  %v11071_v43 = vpop.f32.mrf.mxu0 }
0x148a   :  { %v2931_v54 = vadd.f32 %v11069_v12, %v2866_v49  ;;  %v11032_v55 = vadd.f32 %v11031_v4, %v11030_v32  ;;  %v11072_v47 = vadd.f32 %v11071_v43, %v11070_v0 }
0x148b   :  { %v11033_v50 = vpop.f32.mrf.mxu1  ;;  %v11073_v5 = vpop.f32.mrf.mxu0 }
0x148c   :  { %v2871_v52 = vadd.f32 %v11032_v55, %v10256_v35 }
0x148d   :  { %v11034_v10 = vpop.f32.mrf.mxu1  ;;  %v11074_v14 = vpop.f32.mrf.mxu0 }
0x148e   :  { %v2936_v17 = vadd.f32 %v11072_v47, %v2871_v52  ;;  %v11035_v11 = vadd.f32 %v11034_v10, %v11033_v50  ;;  %v11075_v22 = vadd.f32 %v11074_v14, %v11073_v5 }
0x148f   :  { %v11092_v25 = vpop.f32.mrf.mxu1  ;;  %v11132_v19 = vpop.f32.mrf.mxu0 }
0x1490   :  { %v2874_v9 = vadd.f32 %v11035_v11, %v10256_v35 }
0x1491   :  { %v11093_v27 = vpop.f32.mrf.mxu1  ;;  %v11133_v29 = vpop.f32.mrf.mxu0 }
0x1492   :  { %v2939_v28 = vadd.f32 %v11075_v22, %v2874_v9  ;;  %v11094_v16 = vadd.f32 %v11093_v27, %v11092_v25  ;;  %v11134_v30 = vadd.f32 %v11133_v29, %v11132_v19 }
0x1493   :  { %v11095_v33 = vpop.f32.mrf.mxu1  ;;  %v11135_v34 = vpop.f32.mrf.mxu0 }
0x1494   :  { %v2977_v46 = vadd.f32 %v11094_v16, %v2912_v24 }
0x1495   :  { %v11096_v36 = vpop.f32.mrf.mxu1  ;;  %v11136_v41 = vpop.f32.mrf.mxu0 }
0x1496   :  { %v14045_v39 = vadd.f32 %v11134_v30, %v2977_v46  ;;  %v11097_v26 = vadd.f32 %v11096_v36, %v11095_v33  ;;  %v11137_v57 = vadd.f32 %v11136_v41, %v11135_v34 }
0x1497   :  { %v11098_v48 = vpop.f32.mrf.mxu1  ;;  %v11138_v8 = vpop.f32.mrf.mxu0 }
0x1498   :  { %15744 = vst [vmem:[#allocation84_spill] sm:$0xff] %v14045_v39  ;;  %v2980_v31 = vadd.f32 %v11097_v26, %v2915_v2  ;;  %v10321_v26 = vld [vmem:[#allocation19] ss:$0 sm:$0xff] }
0x1499   :  { %v11099_v35 = vpop.f32.mrf.mxu1  ;;  %v11139_v37 = vpop.f32.mrf.mxu0 }
0x149a   :  { %v11100_v18 = vadd.f32 %v11099_v35, %v11098_v48  ;;  %v14047_v60 = vadd.f32 %v11137_v57, %v2980_v31  ;;  %v11140_v51 = vadd.f32 %v11139_v37, %v11138_v8 }
0x149b   :  { %v11101_v53 = vpop.f32.mrf.mxu1  ;;  %v11141_v61 = vpop.f32.mrf.mxu0 }
0x149c   :  { %15745 = vst [vmem:[#allocation85_spill] sm:$0xff] %v14047_v60  ;;  %v2985_v23 = vadd.f32 %v11100_v18, %v2920_v38  ;;  %v3483_v18 = vpop.permute.xlu0 %3482 }
0x149d   :  { %v11102_v24 = vpop.f32.mrf.mxu1  ;;  %v11142_v32 = vpop.f32.mrf.mxu0 }
0x149e   :  { %v14049_v42 = vadd.f32 %v11140_v51, %v2985_v23  ;;  %v11103_v63 = vadd.f32 %v11102_v24, %v11101_v53  ;;  %v11143_v0 = vadd.f32 %v11142_v32, %v11141_v61  ;;  %v3486_v24 = vpop.permute.xlu1 %3485 }
0x149f   :  { %v11104_v49 = vpop.f32.mrf.mxu1  ;;  %v11144_v2 = vpop.f32.mrf.mxu0 }
0x14a0   :  { %15746 = vst [vmem:[#allocation86_spill] sm:$0xff] %v14049_v42  ;;  %v2988_v12 = vadd.f32 %v11103_v63, %v2923_v15  ;;  %v3503_v63 = vpack.c.bf16 %v3483_v18, %v13851_v40  ;;  %v3489_v32 = vpop.permute.xlu0 %3488 }
0x14a1   :  { %v11105_v4 = vpop.f32.mrf.mxu1  ;;  %v11145_v43 = vpop.f32.mrf.mxu0 }
0x14a2   :  { %v11106_v55 = vadd.f32 %v11105_v4, %v11104_v49  ;;  %v14051_v47 = vadd.f32 %v11143_v0, %v2988_v12  ;;  %v11146_v50 = vadd.f32 %v11145_v43, %v11144_v2  ;;  %v3504_v0 = vpack.c.bf16 %v3489_v32, %v3486_v24  ;;  %v11927_v43 = vld [vmem:[%s15743_s17] sm:$0xff]  }
0x14a3   :  { %v11107_v52 = vpop.f32.mrf.mxu1  ;;  %v11147_v10 = vpop.f32.mrf.mxu0 }
0x14a4   :  { %15747 = vst [vmem:[#allocation87_spill] sm:$0xff] %v14051_v47  ;;  %v2993_v5 = vadd.f32 %v11106_v55, %v2928_v13  ;;  %v3495_v12 = vpop.permute.xlu0 %3494  ;;  %v11926_v55 = vld [vmem:[%s15743_s17 + $0x8] sm:$0xff]  }
0x14a5   :  { %v11108_v38 = vpop.f32.mrf.mxu1  ;;  %v11148_v25 = vpop.f32.mrf.mxu0  ;;  %11423 = vmatpush3.bf16.msra.mxu1 %v11926_v55  ;;  %v14099_v55 = vld [vmem:[#allocation18 + $0x4c] ss:$12 sps:$4 sm:$0xff]  }
0x14a6   :  { %v14053_v11 = vadd.f32 %v11146_v50, %v2993_v5  ;;  %v11109_v14 = vadd.f32 %v11108_v38, %v11107_v52  ;;  %v11149_v19 = vadd.f32 %v11148_v25, %v11147_v10  ;;  %11424 = vmatprep.subr.bf16.mxu1 %v15675_v56  ;;  %v11928_v50 = vld [vmem:[%s15752_s8 + $0x18] ss:$12 sps:$4 sm:$0xff]   ;;  %v11930_v52 = vld [vmem:[%s15752_s8 + $0x1c] ss:$12 sps:$4 sm:$0xff]   ;;  %v11934_v5 = vld [vmem:[%s15752_s8 + $0x20] ss:$12 sps:$4 sm:$0xff]  }
0x14a7   :  { %v11110_v9 = vpop.f32.mrf.mxu1  ;;  %v11150_v15 = vpop.f32.mrf.mxu0  ;;  %v11931_v10 = vld [vmem:[%s15752_s8] ss:$12 sps:$4 sm:$0xff]   ;;  %v11933_v38 = vld [vmem:[%s15752_s8 + $0x4] ss:$12 sps:$4 sm:$0xff]  }
0x14a8   :  { %15748 = vst [vmem:[#allocation88_spill] sm:$0xff] %v14053_v11  ;;  %v2996_v22 = vadd.f32 %v11109_v14, %v2931_v54  ;;  %v14078_v14 = vld [vmem:[#allocation18 + $0x7c] ss:$12 sps:$4 sm:$0xff]   ;;  %v10323_v25 = vld [vmem:[#allocation22] ss:$0 sm:$0xff] }
0x14a9   :  { %v11111_v27 = vpop.f32.mrf.mxu1  ;;  %v11151_v29 = vpop.f32.mrf.mxu0  ;;  %11425 = vmatpush3.bf16.msra.mxu1 %v11927_v43 }
0x14aa   :  { %v11112_v16 = vadd.f32 %v11111_v27, %v11110_v9  ;;  %v14055_v30 = vadd.f32 %v11149_v19, %v2996_v22  ;;  %v11152_v33 = vadd.f32 %v11151_v29, %v11150_v15  ;;  %11440 = vmatprep.subr.bf16.mxu1 %v11934_v5  ;;  %v11935_v29 = vld [vmem:[%s15752_s8 + $0x8] ss:$12 sps:$4 sm:$0xff]  }
0x14ab   :  { %v11113_v46 = vpop.f32.mrf.mxu1  ;;  %v11153_v36 = vpop.f32.mrf.mxu0 }
0x14ac   :  { %15749 = vst [vmem:[#allocation89_spill] sm:$0xff] %v14055_v30  ;;  %v3001_v34 = vadd.f32 %v11112_v16, %v2936_v17  ;;  %v3526_v17 = vsel %vm775_vm0, %v14029_v62, 0  ;;  %v3501_v62 = vpop.permute.xlu0 %3500 }
0x14ad   :  { %v11114_v13 = vpop.f32.mrf.mxu1  ;;  %v11154_v31 = vpop.f32.mrf.mxu0 }
0x14ae   :  { %v14057_v41 = vadd.f32 %v11152_v33, %v3001_v34  ;;  %v11115_v48 = vadd.f32 %v11114_v13, %v11113_v46  ;;  %v11155_v54 = vadd.f32 %v11154_v31, %v11153_v36  ;;  %v10338_v36 = vld [vmem:[#allocation13] ss:$0 sm:$0xff] }
0x14af   :  { %v3232_v57 = vpop.f32.mrf.mxu1 }
0x14b0   :  { %15750 = vst [vmem:[#allocation90_spill] sm:$0xff] %v14057_v41  ;;  %v3004_v8 = vadd.f32 %v11115_v48, %v2939_v28  ;;  %v3233_v35 = vadd.f32 %v10321_v26, %v3232_v57  ;;  %v3492_v28 = vpop.permute.xlu1 %3491 }
0x14b1   :  { %v11396_v37 = vpop.f32.mrf.mxu1  ;;  %v3505_v2 = vpack.c.bf16 %v3495_v12, %v3492_v28 }
0x14b2   :  { %v3238_v51 = vmax.f32 %v3233_v35, 0.0  ;;  %v14059_v53 = vadd.f32 %v11155_v54, %v3004_v8 }
0x14b3   :  { %v3235_v23 = vpop.f32.mrf.mxu1 }
0x14b4   :  { %15751 = vst [vmem:[#allocation91_spill] sm:$0xff] %v14059_v53  ;;  %v3239_v61 = vpack.c.bf16 %v3238_v51, %v3238_v51  ;;  %v3498_v40 = vpop.permute.xlu1 %3497 }
0x14b5   :  { %v11397_v49 = vpop.f32.mrf.mxu1  ;;  %v3506_v4 = vpack.c.bf16 %v3501_v62, %v3498_v40  ;;  %v14093_v40 = vld [vmem:[#allocation18 + $0x60] ss:$12 sps:$4 sm:$0xff]  }
0x14b6   :  { %11407 = vmatmul.mubr.msk.bf16.vlgmr.msra.gmra.mxu0 %vm1014_vm5, %v3239_v61  ;;  %v14083_v61 = vld [vmem:[#allocation18 + $0x78] ss:$12 sps:$4 sm:$0xff]  }
0x14b7   :  { %11431 = vmatpush3.bf16.msra.mxu0 %v3526_v17  ;;  %11432 = vmatprep.mubr.msk.bf16.mxu0 %vm762_vm3, %v3503_v63  ;;  %v14085_v17 = vld [vmem:[#allocation18 + $0x64] ss:$12 sps:$4 sm:$0xff]   ;;  %v14087_v63 = vld [vmem:[#allocation18 + $0x80] ss:$12 sps:$4 sm:$0xff]  }
0x14b8   :  { %3678 = vmatprep.subr.bf16.mxu0 %v11930_v52 }
0x14be   :  { %11433 = vmatmul.mubr.msk.bf16.vlgmr.msra.gmra.mxu0 %vm762_vm3, %v3504_v0 }
0x14bf   :  { %11436 = vmatprep.mubr.msk.bf16.mxu0 %vm762_vm3, %v3505_v2  ;;  %3679 = vmatpush1.bf16.msra.mxu0 %v11928_v50 }
0x14c0   :  { %3680 = vmatprep.subr.bf16.mxu0 %v11933_v38 }
0x14c3   :  { %3681 = vmatpush1.bf16.msra.mxu0 %v11931_v10  ;;  %v14104_v10 = vld [vmem:[#allocation18 + $0x48] ss:$12 sps:$4 sm:$0xff]  }
0x14c4   :  { %3923 = vmatprep.subr.bf16.mxu0 %v14078_v14 }
0x14c6   :  { %11437 = vmatmul.mubr.msk.bf16.gmra.mxu0 %vm762_vm3, %v3506_v4  ;;  %v14097_v4 = vld [vmem:[#allocation18 + $0x68] ss:$12 sps:$4 sm:$0xff]  }
0x14c7   :  { %3698 = vmatprep.mubr.bf16.mxu0 %v15673_v20 }
0x1576   :  { %v3307_v9 = vpop.f32.mrf.mxu0 }
0x1577   :  { %v3308_v22 = vadd.f32 %v10323_v25, %v3307_v9  ;;  %v14108_v25 = vld [vmem:[#allocation18 + $0x50] ss:$12 sps:$4 sm:$0xff]  }
0x1578   :  { %v11408_v19 = vpop.f32.mrf.mxu0 }
0x1579   :  { %v3313_v15 = vmax.f32 %v3308_v22, 0.0  ;;  %v14111_v22 = vld [vmem:[#allocation18 + $0x34] ss:$12 sps:$4 sm:$0xff]   ;;  %v14117_v19 = vld [vmem:[#allocation18 + $0x30] ss:$12 sps:$4 sm:$0xff]  }
0x157a   :  { %v3310_v27 = vpop.f32.mrf.mxu0 }
0x157b   :  { %v3314_v16 = vpack.c.bf16 %v3313_v15, %v3313_v15  ;;  %v14121_v15 = vld [vmem:[#allocation18 + $0x38] ss:$12 sps:$4 sm:$0xff]   ;;  %v14123_v27 = vld [vmem:[#allocation18 + $0x1c] ss:$12 sps:$4 sm:$0xff]  }
0x157c   :  { %v11409_v33 = vpop.f32.mrf.mxu0 }
0x157d   :  { %11427 = vmatmul.mubr.bf16.vlgmr.msra.gmra.mxu1 %v3314_v16  ;;  %v14130_v16 = vld [vmem:[#allocation18 + $0x18] ss:$12 sps:$4 sm:$0xff]  }
0x157e   :  { %v11434_v46 = vpop.f32.mrf.mxu0  ;;  %11441 = vmatpush3.bf16.msra.mxu1 %v11934_v5  ;;  %v14136_v33 = vld [vmem:[#allocation18 + $0x4] ss:$12 sps:$4 sm:$0xff]  }
0x157f   :  { %11442 = vmatprep.subr.bf16.mxu1 %v11935_v29  ;;  %v3571_v31 = vadd.f32 %v11434_v46, %v10338_v36  ;;  %v14142_v46 = vld [vmem:[#allocation18] ss:$12 sps:$4 sm:$0xff]  }
0x1580   :  { %v3562_v34 = vpop.f32.mrf.mxu0 }
0x1581   :  { %v3563_v26 = vadd.f32 %v10338_v36, %v3562_v34  ;;  %v3595_v51 = vmax.f32 %v3571_v31, 0.0  ;;  %v14145_v34 = vld [vmem:[#allocation18 + $0x8] ss:$12 sps:$4 sm:$0xff]   ;;  %v3449_v31 = vld [vmem:[#allocation16] sm:$0x7] }
0x1582   :  { %v11435_v13 = vpop.f32.mrf.mxu0  ;;  %11443 = vmatpush3.bf16.msra.mxu1 %v11935_v29  ;;  %v14134_v29 = vld [vmem:[#allocation18 + $0x20] ss:$12 sps:$4 sm:$0xff]  }
0x1583   :  { %v3574_v48 = vadd.f32 %v11435_v13, %v10338_v36  ;;  %11452 = vmatprep.subr.bf16.mxu1 %v15675_v56  ;;  %v3593_v18 = vmax.f32 %v3563_v26, 0.0 }
0x1584   :  { %v3565_v57 = vpop.f32.mrf.mxu0 }
0x1585   :  { %v3566_v8 = vadd.f32 %v10338_v36, %v3565_v57  ;;  %v3596_v54 = vmax.f32 %v3574_v48, 0.0  ;;  %v14187_v57 = vrot.slane %v3449_v31, %v13869_v45 }
0x1586   :  { %v11438_v35 = vpop.f32.mrf.mxu0 }
0x1587   :  { %v3594_v37 = vmax.f32 %v3566_v8, 0.0  ;;  %v3602_v32 = vpack.c.bf16 %v3596_v54, %v3595_v51  ;;  %v3587_v0 = vadd.f32 %v11438_v35, %v10338_v36  ;;  %v14190_v8 = vrot.slane %v3449_v31, %v13573_v1 }
0x1588   :  { %v3578_v23 = vpop.f32.mrf.mxu0  ;;  %v3609_v51 = vrot.slane %v3449_v31, %v13569_v59 }
0x1589   :  { %v3601_v24 = vpack.c.bf16 %v3594_v37, %v3593_v18  ;;  %v3579_v28 = vadd.f32 %v10338_v36, %v3578_v23  ;;  %v3599_v5 = vmax.f32 %v3587_v0, 0.0 }
0x158a   :  { %v11439_v49 = vpop.f32.mrf.mxu0 }
0x158b   :  { %v3590_v12 = vadd.f32 %v11439_v49, %v10338_v36  ;;  %10349 = vmatmul.mubr.msk.bf16.vlgmr.msra.gmra.mxu0 %vm3653_vm8, %v3601_v24  ;;  %11444 = vmatprep.mubr.msk.bf16.mxu1 %vm3653_vm8, %v3601_v24  ;;  %v3597_v50 = vmax.f32 %v3579_v28, 0.0 }
0x158c   :  { %3924 = vmatpush1.bf16.msra.mxu0 %v14083_v61  ;;  %v3581_v2 = vpop.f32.mrf.mxu0  ;;  %11445 = vmatmul.mubr.msk.bf16.vlgmr.msra.gmra.mxu1 %vm3653_vm8, %v3602_v32 }
0x158d   :  { %v3582_v62 = vadd.f32 %v10338_v36, %v3581_v2  ;;  %3925 = vmatprep.subr.bf16.mxu0 %v14085_v17  ;;  %11453 = vmatpush3.bf16.msra.mxu1 %v14087_v63  ;;  %v3600_v43 = vmax.f32 %v3590_v12, 0.0 }
0x158e   :  { %3708 = vmatprep.mubr.bf16.mxu0 %v15673_v20  ;;  %11454 = vmatprep.subr.bf16.mxu1 %v15675_v56 }
0x158f   :  { %v3598_v52 = vmax.f32 %v3582_v62, 0.0  ;;  %v3604_v9 = vpack.c.bf16 %v3600_v43, %v3599_v5 }
0x1590   :  { %3926 = vmatpush1.bf16.msra.mxu0 %v14093_v40 }
0x1591   :  { %v3603_v38 = vpack.c.bf16 %v3598_v52, %v3597_v50  ;;  %11455 = vmatpush3.bf16.msra.mxu1 %v14097_v4  ;;  %3927 = vmatprep.subr.bf16.mxu0 %v14099_v55 }
0x1592   :  { %11456 = vmatprep.subr.bf16.mxu1 %v15675_v56 }
0x1593   :  { %10350 = vmatmul.mubr.msk.bf16.gmra.mxu0 %vm3653_vm8, %v3602_v32  ;;  %11448 = vmatprep.mubr.msk.bf16.mxu1 %vm3653_vm8, %v3603_v38 }
0x1594   :  { %11449 = vmatmul.mubr.msk.bf16.gmra.mxu1 %vm3653_vm8, %v3604_v9  ;;  %3928 = vmatpush1.bf16.msra.mxu0 %v14104_v10 }
0x1595   :  { %11457 = vmatpush3.bf16.msra.mxu1 %v14108_v25  ;;  %3718 = vmatprep.mubr.bf16.mxu0 %v15673_v20 }
0x1596   :  { %3929 = vmatprep.subr.bf16.mxu0 %v14111_v22  ;;  %11458 = vmatprep.subr.bf16.mxu1 %v15675_v56 }
0x1597   :  { %11464 = vmatprep.mubr.msk.bf16.mxu1 %vm13218_vm7, %v15675_v56 }
0x1598   :  { %3930 = vmatpush1.bf16.msra.mxu0 %v14117_v19 }
0x1599   :  { %11459 = vmatpush3.bf16.msra.mxu1 %v14121_v15  ;;  %3931 = vmatprep.subr.bf16.mxu0 %v14123_v27 }
0x159a   :  { %11460 = vmatprep.subr.bf16.mxu1 %v15675_v56 }
0x159b   :  { %10351 = vmatmul.mubr.msk.bf16.gmra.mxu0 %vm3653_vm8, %v3603_v38 }
0x159c   :  { %3932 = vmatpush1.bf16.msra.mxu0 %v14130_v16  ;;  %3728 = vmatprep.mubr.bf16.mxu0 %v15673_v20 }
0x159d   :  { %11461 = vmatpush3.bf16.msra.mxu1 %v14134_v29  ;;  %3933 = vmatprep.subr.bf16.mxu0 %v14136_v33 }
0x159e   :  { %11462 = vmatprep.subr.bf16.mxu1 %v15675_v56 }
0x15a0   :  { %3934 = vmatpush1.bf16.msra.mxu0 %v14142_v46 }
0x15a1   :  { %11463 = vmatpush3.bf16.msra.mxu1 %v14145_v34  ;;  %4072 = vmatprep.subr.bf16.mxu0 %v14078_v14 }
0x15a2   :  { %11468 = vmatprep.subr.bf16.mxu1 %v15675_v56 }
0x15a3   :  { %10352 = vmatmul.mubr.msk.bf16.gmra.mxu0 %vm3653_vm8, %v3604_v9 }
0x15a4   :  { %11465 = vmatmul.mubr.bf16.vlgmr.msra.gmra.mxu1 %v15673_v20  ;;  %3951 = vmatprep.mubr.bf16.mxu0 %v15673_v20 }
0x15a5   :  { %11469 = vmatpush3.bf16.msra.mxu1 %v14087_v63  ;;  %11480 = vmatprep.mubr.msk.bf16.mxu1 %vm13218_vm7, %v15675_v56 }
0x15a6   :  { %11470 = vmatprep.subr.bf16.mxu1 %v15675_v56 }
0x15a9   :  { %11471 = vmatpush3.bf16.msra.mxu1 %v14097_v4 }
0x15aa   :  { %11472 = vmatprep.subr.bf16.mxu1 %v15675_v56 }
0x15ab   :  { %3952 = vmatmul.mubr.bf16.vlgmr.msra.gmra.mxu0 %v15673_v20 }
0x15ac   :  { %4073 = vmatpush1.bf16.msra.mxu0 %v14083_v61  ;;  %4100 = vmatprep.mubr.bf16.mxu0 %v15673_v20 }
0x15ad   :  { %4074 = vmatprep.subr.bf16.mxu0 %v14085_v17  ;;  %11473 = vmatpush3.bf16.msra.mxu1 %v14108_v25 }
0x15ae   :  { %11474 = vmatprep.subr.bf16.mxu1 %v15675_v56 }
0x15b0   :  { %4075 = vmatpush1.bf16.msra.mxu0 %v14093_v40 }
0x15b1   :  { %4076 = vmatprep.subr.bf16.mxu0 %v14099_v55  ;;  %11475 = vmatpush3.bf16.msra.mxu1 %v14121_v15 }
0x15b2   :  { %11476 = vmatprep.subr.bf16.mxu1 %v15675_v56 }
0x15b4   :  { %4077 = vmatpush1.bf16.msra.mxu0 %v14104_v10 }
0x15b5   :  { %4078 = vmatprep.subr.bf16.mxu0 %v14111_v22  ;;  %11477 = vmatpush3.bf16.msra.mxu1 %v14134_v29 }
0x15b6   :  { %11478 = vmatprep.subr.bf16.mxu1 %v15675_v56 }
0x15b8   :  { %4079 = vmatpush1.bf16.msra.mxu0 %v14117_v19 }
0x15b9   :  { %4080 = vmatprep.subr.bf16.mxu0 %v14123_v27  ;;  %11479 = vmatpush3.bf16.msra.mxu1 %v14145_v34 }
0x15ba   :  { %11484 = vmatprep.subr.bf16.mxu1 %v15675_v56 }
0x15bc   :  { %4081 = vmatpush1.bf16.msra.mxu0 %v14130_v16 }
0x15bd   :  { %4082 = vmatprep.subr.bf16.mxu0 %v14136_v33 }
0x15c0   :  { %4083 = vmatpush1.bf16.msra.mxu0 %v14142_v46 }
0x15c1   :  { %4220 = vmatprep.subr.bf16.mxu0 %v14078_v14 }
0x163d   :  { %v14184_v36 = vpop.f32.mrf.mxu1 }
0x163f   :  { %v11428_v13 = vpop.f32.mrf.mxu1 }
0x1641   :  { %v3406_v26 = vpop.f32.mrf.mxu1 }
0x1643   :  { %v11429_v48 = vpop.f32.mrf.mxu1 }
0x164b   :  { %v3700_v54 = vpop.f32.mrf.mxu0 }
0x164c   :  { %v11446_v35 = vpop.f32.mrf.mxu1  ;;  %v3701_v47 = vadd.f32 %v3700_v54, %v3609_v51 }
0x164d   :  { %v14193_v18 = vadd.f32 %v11446_v35, %v14187_v57  ;;  %v3702_v37 = vpop.f32.mrf.mxu0 }
0x164e   :  { %v14197_v23 = vadd.f32 %v3702_v37, %v14190_v8  ;;  %v3773_v24 = vpop.f32.mrf.mxu1 }
0x164f   :  { %v14200_v32 = vadd.f32 %v3773_v24, %v14187_v57  ;;  %v3704_v49 = vpop.f32.mrf.mxu0 }
0x1650   :  { %v14202_v28 = vadd.f32 %v3704_v49, %v3609_v51  ;;  %v11447_v12 = vpop.f32.mrf.mxu1 }
0x1651   :  { %v14205_v0 = vadd.f32 %v11447_v12, %v14187_v57  ;;  %v14207_v2 = vpop.f32.mrf.mxu0 }
0x1652   :  { %v14209_v62 = vpop.f32.mrf.mxu1 }
0x1653   :  { %v3710_v43 = vpop.f32.mrf.mxu0 }
0x1654   :  { %v14211_v50 = vadd.f32 %v3710_v43, %v3609_v51  ;;  %v11450_v52 = vpop.f32.mrf.mxu1 }
0x1655   :  { %v14214_v5 = vadd.f32 %v11450_v52, %v14187_v57  ;;  %v3712_v38 = vpop.f32.mrf.mxu0 }
0x1656   :  { %v14217_v9 = vadd.f32 %v3712_v38, %v14190_v8  ;;  %v3789_v13 = vpop.f32.mrf.mxu1 }
0x1657   :  { %v14220_v26 = vadd.f32 %v3789_v13, %v14187_v57  ;;  %v3714_v48 = vpop.f32.mrf.mxu0  ;;  %v3474_v13 = vld [vmem:[#allocation15] sm:$0x7] }
0x1658   :  { %v14222_v31 = vadd.f32 %v3714_v48, %v3609_v51  ;;  %v11451_v35 = vpop.f32.mrf.mxu1  ;;  %v14239_v48 = vrot.slane %v3474_v13, %v13869_v45  ;;  %v14253_v45 = vrot.slane %v3474_v13, %v13569_v59  ;;  %v14259_v41 = vrot.slane %v3474_v13, %v13573_v1 }
0x1659   :  { %v14225_v37 = vadd.f32 %v11451_v35, %v14187_v57  ;;  %v14227_v24 = vpop.f32.mrf.mxu0 }
0x165a   :  { %v14241_v35 = vpop.f32.mrf.mxu1 }
0x165b   :  { %v3720_v49 = vpop.f32.mrf.mxu0 }
0x165c   :  { %v14229_v12 = vadd.f32 %v3720_v49, %v3609_v51 }
0x165d   :  { %v3722_v43 = vpop.f32.mrf.mxu0 }
0x165e   :  { %v14232_v52 = vadd.f32 %v3722_v43, %v14190_v8 }
0x165f   :  { %v3724_v38 = vpop.f32.mrf.mxu0 }
0x1660   :  { %v14234_v44 = vadd.f32 %v3724_v38, %v3609_v51 }
0x1661   :  { %v14236_v20 = vpop.f32.mrf.mxu0 }
0x1663   :  { %v3730_v56 = vpop.f32.mrf.mxu0 }
0x1664   :  { %v14243_v3 = vadd.f32 %v3730_v56, %v3609_v51  ;;  %v3994_v49 = vpop.f32.mrf.mxu1 }
0x1665   :  { %v3732_v6 = vpop.f32.mrf.mxu0  ;;  %v3995_v7 = vadd.f32 %v3994_v49, %v14239_v48 }
0x1666   :  { %v14247_v43 = vadd.f32 %v3732_v6, %v14190_v8  ;;  %v11466_v38 = vpop.f32.mrf.mxu1 }
0x1667   :  { %v3734_v21 = vpop.f32.mrf.mxu0  ;;  %4018 = vrot.lane.b32.xlu0 %v3995_v7, %s13200_s15 }
0x1668   :  { %v14250_v58 = vadd.f32 %v3734_v21, %v3609_v51  ;;  %v3997_v53 = vpop.f32.mrf.mxu1 }
0x1669   :  { %v3736_v30 = vpop.f32.mrf.mxu0 }
0x166a   :  { %v14256_v56 = vadd.f32 %v3736_v30, %v14190_v8  ;;  %v11467_v49 = vpop.f32.mrf.mxu1 }
0x166b   :  { %v3953_v6 = vpop.f32.mrf.mxu0 }
0x166c   :  { %v3954_v38 = vadd.f32 %v3953_v6, %v14253_v45 }
0x166d   :  { %v3955_v11 = vpop.f32.mrf.mxu0 }
0x166e   :  { %v4000_v7 = vadd.f32 %v3954_v38, %v3701_v47  ;;  %v3956_v21 = vadd.f32 %v3955_v11, %v14259_v41 }
0x166f   :  { %v3957_v42 = vpop.f32.mrf.mxu0 }
0x1670   :  { %4016 = vrot.lane.b32.xlu1 %v3956_v21, %s13200_s15  ;;  %v10375_v59 = vmul.f32 -1.442695, %v4000_v7 }
0x1671   :  { %v3958_v53 = vpop.f32.mrf.mxu0 }
0x1672   :  { %12376 = vpow2.f32 %v10375_v59 }
0x167f   :  { %v12377_v30 = vpop.eup %12376 }
0x1680   :  { %v4004_v60 = vadd.f32 1.0, %v12377_v30 }
0x1682   :  { %12378 = vrcp.f32 %v4004_v60 }
0x168f   :  { %v12379_v49 = vpop.eup %12378 }
0x16d9   :  { %v4019_v13 = vpop.permute.xlu0 %4018 }
0x16e2   :  { %v4017_v1 = vpop.permute.xlu1 %4016 }
0x16e3   :  { %v4020_v54 = vsel %vm1014_vm5, %v4017_v1, %v4019_v13  ;;  %v4007_v1 = vadd.f32 %v3956_v21, %v14197_v23 }
0x16e4   :  { %v4022_v51 = vmul.f32 %v12379_v49, %v4020_v54 }
0x16e5   :  { %v10376_v60 = vmul.f32 -1.442695, %v4007_v1 }
0x16e6   :  { %4024 = vrot.lane.b32.xlu1 %v4022_v51, %s13200_s15 }
0x1758   :  { %v4025_v47 = vpop.permute.xlu1 %4024 }
0x1759   :  { %v4027_v11 = vadd.f32 %v4025_v47, %v14197_v23  ;;  %v4028_v42 = vadd.f32 %v4025_v47, %v14200_v32 }
0x175b   :  { %12380 = vtanh.f32 %v4027_v11 }
0x175c   :  { %12382 = vtanh.f32 %v4028_v42 }
0x175d   :  { %12384 = vpow2.f32 %v10376_v60 }
0x1768   :  { %v12381_v6 = vpop.eup %12380 }
0x1769   :  { %v12383_v59 = vpop.eup %12382  ;;  %v4031_v38 = vsub.f32 0.0, %v12381_v6 }
0x176a   :  { %v4032_v7 = vsub.f32 0.0, %v12383_v59  ;;  %v12385_v53 = vpop.eup %12384 }
0x176b   :  { %4035 = vrot.lane.b32.xlu0 %v4031_v38, %s13172_s0  ;;  %v4011_v30 = vadd.f32 1.0, %v12385_v53 }
0x176c   :  { %4037 = vrot.lane.b32.xlu1 %v4032_v7, %s13172_s0 }
0x176d   :  { %12386 = vrcp.f32 %v4011_v30 }
0x177a   :  { %v12387_v51 = vpop.eup %12386 }
0x17dd   :  { %v4036_v13 = vpop.permute.xlu0 %4035 }
0x17de   :  { %v4038_v54 = vpop.permute.xlu1 %4037  ;;  %v4042_v32 = vmul.f32 %v12379_v49, %v4036_v13 }
0x17df   :  { %v4039_v47 = vsel %vm3653_vm8, %v4036_v13, %v4038_v54 }
0x17e0   :  { %4046 = vrot.lane.b32.xlu0 %v4042_v32, %s13219_s23  ;;  %v4043_v11 = vmul.f32 %v12387_v51, %v4039_v47 }
0x17e2   :  { %4048 = vrot.lane.b32.xlu1 %v4043_v11, %s13219_s23 }
0x1852   :  { %v4047_v42 = vpop.permute.xlu0 %4046 }
0x1854   :  { %v4049_v23 = vpop.permute.xlu1 %4048 }
0x1855   :  { %v4050_v21 = vsel %vm3916_vm9, %v4047_v42, %v4049_v23  ;;  %v14275_v38 = vadd.f32 %v12383_v59, %v4049_v23  ;;  %v15754_v59 = vmov 0  }
0x1856   :  { %v14277_v7 = vadd.f32 %v12381_v6, %v4050_v21  ;;  %v15753_v6 = vmov 0.0  }
0x1857   :  { %v4056_v49 = vpack.c.bf16 %v14275_v38, %v14275_v38 }
0x1858   :  { %v4055_v1 = vpack.c.bf16 %v14277_v7, %v14277_v7 }
0x1859   :  { %4061 = vrot.lane.b32.xlu1 %v4056_v49, %s13200_s15 }
0x185a   :  { %4059 = vrot.lane.b32.xlu0 %v4055_v1, %s13200_s15 }
0x18cb   :  { %v4062_v60 = vpop.permute.xlu1 %4061 }
0x18cc   :  { %v4060_v53 = vpop.permute.xlu0 %4059 }
0x18cd   :  { %v4064_v30 = vsel %vm1014_vm5, %v4060_v53, %v4062_v60 }
0x18ce   :  { %10377 = vmatmul.mubr.msk.bf16.vlgmr.msra.gmra.mxu0 %vm3916_vm9, %v4064_v30  ;;  %11481 = vmatmul.mubr.msk.bf16.vlgmr.msra.gmra.mxu1 %vm3916_vm9, %v4064_v30 }
0x18cf   :  { %4221 = vmatpush1.bf16.msra.mxu0 %v14083_v61  ;;  %11485 = vmatpush3.bf16.msra.mxu1 %v14087_v63 }
0x18d0   :  { %4222 = vmatprep.subr.bf16.mxu0 %v14085_v17  ;;  %11486 = vmatprep.subr.bf16.mxu1 %v15753_v6 }
0x18d1   :  { %4248 = vmatprep.mubr.bf16.mxu0 %v15754_v59  ;;  %11496 = vmatprep.mubr.msk.bf16.mxu1 %vm13218_vm7, %v15753_v6 }
0x18d3   :  { %4223 = vmatpush1.bf16.msra.mxu0 %v14093_v40  ;;  %11487 = vmatpush3.bf16.msra.mxu1 %v14097_v4 }
0x18d4   :  { %4224 = vmatprep.subr.bf16.mxu0 %v14099_v55  ;;  %11488 = vmatprep.subr.bf16.mxu1 %v15753_v6 }
0x18d7   :  { %4225 = vmatpush1.bf16.msra.mxu0 %v14104_v10  ;;  %11489 = vmatpush3.bf16.msra.mxu1 %v14108_v25 }
0x18d8   :  { %4226 = vmatprep.subr.bf16.mxu0 %v14111_v22  ;;  %11490 = vmatprep.subr.bf16.mxu1 %v15753_v6 }
0x18db   :  { %4227 = vmatpush1.bf16.msra.mxu0 %v14117_v19  ;;  %11491 = vmatpush3.bf16.msra.mxu1 %v14121_v15 }
0x18dc   :  { %4228 = vmatprep.subr.bf16.mxu0 %v14123_v27  ;;  %11492 = vmatprep.subr.bf16.mxu1 %v15753_v6 }
0x18df   :  { %4229 = vmatpush1.bf16.msra.mxu0 %v14130_v16  ;;  %11493 = vmatpush3.bf16.msra.mxu1 %v14134_v29 }
0x18e0   :  { %4230 = vmatprep.subr.bf16.mxu0 %v14136_v33  ;;  %11494 = vmatprep.subr.bf16.mxu1 %v15753_v6 }
0x18e3   :  { %4231 = vmatpush1.bf16.msra.mxu0 %v14142_v46  ;;  %11495 = vmatpush3.bf16.msra.mxu1 %v14145_v34 }
0x18e4   :  { %4368 = vmatprep.subr.bf16.mxu0 %v14078_v14  ;;  %11500 = vmatprep.subr.bf16.mxu1 %v15753_v6 }
0x198e   :  { %v4102_v13 = vpop.f32.mrf.mxu0  ;;  %v4143_v54 = vpop.f32.mrf.mxu1 }
0x198f   :  { %v4103_v32 = vadd.f32 %v4102_v13, %v14253_v45  ;;  %v4144_v51 = vadd.f32 %v4143_v54, %v14239_v48 }
0x1990   :  { %v4104_v47 = vpop.f32.mrf.mxu0  ;;  %v11482_v11 = vpop.f32.mrf.mxu1 }
0x1991   :  { %v4149_v42 = vadd.f32 %v4103_v32, %v14202_v28  ;;  %v4105_v23 = vadd.f32 %v4104_v47, %v14259_v41  ;;  %4167 = vrot.lane.b32.xlu1 %v4144_v51, %s13200_s15  ;;  %v3707_v51 = vadd.f32 %v14207_v2, %v14190_v8  ;;  %v3777_v47 = vadd.f32 %v14209_v62, %v14187_v57 }
0x1992   :  { %v4106_v21 = vpop.f32.mrf.mxu0  ;;  %v4146_v49 = vpop.f32.mrf.mxu1 }
0x1993   :  { %4165 = vrot.lane.b32.xlu0 %v4105_v23, %s13200_s15  ;;  %v10379_v53 = vmul.f32 -1.442695, %v4149_v42 }
0x1994   :  { %v4107_v1 = vpop.f32.mrf.mxu0  ;;  %v11483_v60 = vpop.f32.mrf.mxu1 }
0x1995   :  { %12388 = vpow2.f32 %v10379_v53 }
0x19a2   :  { %v12389_v30 = vpop.eup %12388 }
0x19a3   :  { %v4153_v13 = vadd.f32 1.0, %v12389_v30  ;;  %v4156_v30 = vadd.f32 %v4105_v23, %v3707_v51 }
0x19a5   :  { %12390 = vrcp.f32 %v4153_v13  ;;  %v10380_v2 = vmul.f32 -1.442695, %v4156_v30 }
0x19b2   :  { %v12391_v11 = vpop.eup %12390 }
0x1a03   :  { %v4168_v54 = vpop.permute.xlu1 %4167 }
0x1a05   :  { %v4166_v39 = vpop.permute.xlu0 %4165 }
0x1a06   :  { %v4169_v28 = vsel %vm1014_vm5, %v4166_v39, %v4168_v54 }
0x1a07   :  { %v4171_v32 = vmul.f32 %v12391_v11, %v4169_v28 }
0x1a09   :  { %4173 = vrot.lane.b32.xlu0 %v4171_v32, %s13200_s15 }
0x1a7b   :  { %v4174_v21 = vpop.permute.xlu0 %4173 }
0x1a7c   :  { %v4176_v42 = vadd.f32 %v4174_v21, %v3707_v51  ;;  %v4177_v49 = vadd.f32 %v4174_v21, %v3777_v47 }
0x1a7e   :  { %12392 = vtanh.f32 %v4176_v42 }
0x1a7f   :  { %12394 = vtanh.f32 %v4177_v49 }
0x1a80   :  { %12396 = vpow2.f32 %v10380_v2 }
0x1a8b   :  { %v12393_v1 = vpop.eup %12392 }
0x1a8c   :  { %v12395_v60 = vpop.eup %12394  ;;  %v4180_v53 = vsub.f32 %v14277_v7, %v12393_v1 }
0x1a8d   :  { %v4181_v39 = vsub.f32 %v14275_v38, %v12395_v60  ;;  %v12397_v13 = vpop.eup %12396 }
0x1a8e   :  { %4184 = vrot.lane.b32.xlu1 %v4180_v53, %s13172_s0  ;;  %v4160_v62 = vadd.f32 1.0, %v12397_v13 }
0x1a8f   :  { %4186 = vrot.lane.b32.xlu0 %v4181_v39, %s13172_s0 }
0x1a90   :  { %12398 = vrcp.f32 %v4160_v62 }
0x1a9d   :  { %v12399_v47 = vpop.eup %12398 }
0x1b00   :  { %v4185_v54 = vpop.permute.xlu1 %4184 }
0x1b01   :  { %v4187_v28 = vpop.permute.xlu0 %4186  ;;  %v4191_v32 = vmul.f32 %v12391_v11, %v4185_v54 }
0x1b02   :  { %v4188_v21 = vsel %vm3653_vm8, %v4185_v54, %v4187_v28 }
0x1b03   :  { %4195 = vrot.lane.b32.xlu1 %v4191_v32, %s13219_s23  ;;  %v4192_v7 = vmul.f32 %v12399_v47, %v4188_v21 }
0x1b05   :  { %4197 = vrot.lane.b32.xlu0 %v4192_v7, %s13219_s23 }
0x1b75   :  { %v4196_v38 = vpop.permute.xlu1 %4195 }
0x1b77   :  { %v4198_v42 = vpop.permute.xlu0 %4197 }
0x1b78   :  { %v4199_v23 = vsel %vm3916_vm9, %v4196_v38, %v4198_v42  ;;  %v14335_v51 = vadd.f32 %v12395_v60, %v4198_v42 }
0x1b79   :  { %v14337_v49 = vadd.f32 %v12393_v1, %v4199_v23 }
0x1b7a   :  { %v4205_v53 = vpack.c.bf16 %v14335_v51, %v14335_v51 }
0x1b7b   :  { %v4204_v11 = vpack.c.bf16 %v14337_v49, %v14337_v49 }
0x1b7c   :  { %4210 = vrot.lane.b32.xlu0 %v4205_v53, %s13200_s15 }
0x1b7d   :  { %4208 = vrot.lane.b32.xlu1 %v4204_v11, %s13200_s15 }
0x1bee   :  { %v4211_v39 = vpop.permute.xlu0 %4210 }
0x1bef   :  { %v4209_v30 = vpop.permute.xlu1 %4208 }
0x1bf0   :  { %v4212_v2 = vsel %vm1014_vm5, %v4209_v30, %v4211_v39 }
0x1bf1   :  { %10381 = vmatmul.mubr.msk.bf16.vlgmr.msra.gmra.mxu0 %vm3916_vm9, %v4212_v2  ;;  %11497 = vmatmul.mubr.msk.bf16.vlgmr.msra.gmra.mxu1 %vm3916_vm9, %v4212_v2 }
0x1bf2   :  { %4369 = vmatpush1.bf16.msra.mxu0 %v14083_v61  ;;  %11501 = vmatpush3.bf16.msra.mxu1 %v14087_v63 }
0x1bf3   :  { %4370 = vmatprep.subr.bf16.mxu0 %v14085_v17  ;;  %11502 = vmatprep.subr.bf16.mxu1 %v15753_v6 }
0x1bf4   :  { %4396 = vmatprep.mubr.bf16.mxu0 %v15754_v59  ;;  %11512 = vmatprep.mubr.msk.bf16.mxu1 %vm13218_vm7, %v15753_v6 }
0x1bf6   :  { %4371 = vmatpush1.bf16.msra.mxu0 %v14093_v40  ;;  %11503 = vmatpush3.bf16.msra.mxu1 %v14097_v4 }
0x1bf7   :  { %4372 = vmatprep.subr.bf16.mxu0 %v14099_v55  ;;  %11504 = vmatprep.subr.bf16.mxu1 %v15753_v6 }
0x1bfa   :  { %4373 = vmatpush1.bf16.msra.mxu0 %v14104_v10  ;;  %11505 = vmatpush3.bf16.msra.mxu1 %v14108_v25 }
0x1bfb   :  { %4374 = vmatprep.subr.bf16.mxu0 %v14111_v22  ;;  %11506 = vmatprep.subr.bf16.mxu1 %v15753_v6 }
0x1bfe   :  { %4375 = vmatpush1.bf16.msra.mxu0 %v14117_v19  ;;  %11507 = vmatpush3.bf16.msra.mxu1 %v14121_v15 }
0x1bff   :  { %4376 = vmatprep.subr.bf16.mxu0 %v14123_v27  ;;  %11508 = vmatprep.subr.bf16.mxu1 %v15753_v6 }
0x1c02   :  { %4377 = vmatpush1.bf16.msra.mxu0 %v14130_v16  ;;  %11509 = vmatpush3.bf16.msra.mxu1 %v14134_v29 }
0x1c03   :  { %4378 = vmatprep.subr.bf16.mxu0 %v14136_v33  ;;  %11510 = vmatprep.subr.bf16.mxu1 %v15753_v6 }
0x1c06   :  { %4379 = vmatpush1.bf16.msra.mxu0 %v14142_v46  ;;  %11511 = vmatpush3.bf16.msra.mxu1 %v14145_v34 }
0x1c07   :  { %4516 = vmatprep.subr.bf16.mxu0 %v14078_v14  ;;  %11516 = vmatprep.subr.bf16.mxu1 %v15753_v6 }
0x1cb1   :  { %v4250_v1 = vpop.f32.mrf.mxu0  ;;  %v4291_v60 = vpop.f32.mrf.mxu1 }
0x1cb2   :  { %v4251_v13 = vadd.f32 %v4250_v1, %v14253_v45  ;;  %v4292_v62 = vadd.f32 %v4291_v60, %v14239_v48 }
0x1cb3   :  { %v4252_v54 = vpop.f32.mrf.mxu0  ;;  %v11498_v28 = vpop.f32.mrf.mxu1 }
0x1cb4   :  { %v4297_v32 = vadd.f32 %v4251_v13, %v14211_v50  ;;  %v4253_v47 = vadd.f32 %v4252_v54, %v14259_v41  ;;  %4315 = vrot.lane.b32.xlu0 %v4292_v62, %s13200_s15 }
0x1cb5   :  { %v4254_v21 = vpop.f32.mrf.mxu0  ;;  %v4294_v7 = vpop.f32.mrf.mxu1 }
0x1cb6   :  { %4313 = vrot.lane.b32.xlu1 %v4253_v47, %s13200_s15  ;;  %v10383_v23 = vmul.f32 -1.442695, %v4297_v32  ;;  %v4304_v7 = vadd.f32 %v4253_v47, %v14217_v9 }
0x1cb7   :  { %v4255_v38 = vpop.f32.mrf.mxu0  ;;  %v11499_v42 = vpop.f32.mrf.mxu1 }
0x1cb8   :  { %12400 = vpow2.f32 %v10383_v23  ;;  %v10384_v38 = vmul.f32 -1.442695, %v4304_v7 }
0x1cc5   :  { %v12401_v53 = vpop.eup %12400 }
0x1cc6   :  { %v4301_v11 = vadd.f32 1.0, %v12401_v53 }
0x1cc8   :  { %12402 = vrcp.f32 %v4301_v11 }
0x1cd5   :  { %v12403_v2 = vpop.eup %12402 }
0x1d26   :  { %v4316_v39 = vpop.permute.xlu0 %4315 }
0x1d28   :  { %v4314_v30 = vpop.permute.xlu1 %4313 }
0x1d29   :  { %v4317_v50 = vsel %vm1014_vm5, %v4314_v30, %v4316_v39 }
0x1d2a   :  { %v4319_v1 = vmul.f32 %v12403_v2, %v4317_v50 }
0x1d2c   :  { %4321 = vrot.lane.b32.xlu1 %v4319_v1, %s13200_s15 }
0x1d9e   :  { %v4322_v60 = vpop.permute.xlu1 %4321 }
0x1d9f   :  { %v4324_v13 = vadd.f32 %v4322_v60, %v14217_v9  ;;  %v4325_v62 = vadd.f32 %v4322_v60, %v14193_v18 }
0x1da1   :  { %12404 = vtanh.f32 %v4324_v13 }
0x1da2   :  { %12406 = vtanh.f32 %v4325_v62 }
0x1da3   :  { %12408 = vpow2.f32 %v10384_v38 }
0x1dae   :  { %v12405_v54 = vpop.eup %12404 }
0x1daf   :  { %v12407_v28 = vpop.eup %12406  ;;  %v4328_v32 = vsub.f32 %v14337_v49, %v12405_v54 }
0x1db0   :  { %v4329_v21 = vsub.f32 %v14335_v51, %v12407_v28  ;;  %v12409_v42 = vpop.eup %12408 }
0x1db1   :  { %4332 = vrot.lane.b32.xlu0 %v4328_v32, %s13172_s0  ;;  %v4308_v23 = vadd.f32 1.0, %v12409_v42 }
0x1db2   :  { %4334 = vrot.lane.b32.xlu1 %v4329_v21, %s13172_s0 }
0x1db3   :  { %12410 = vrcp.f32 %v4308_v23 }
0x1dc0   :  { %v12411_v39 = vpop.eup %12410 }
0x1e23   :  { %v4333_v18 = vpop.permute.xlu0 %4332 }
0x1e24   :  { %v4335_v53 = vpop.permute.xlu1 %4334  ;;  %v4339_v11 = vmul.f32 %v12403_v2, %v4333_v18 }
0x1e25   :  { %v4336_v30 = vsel %vm3653_vm8, %v4333_v18, %v4335_v53 }
0x1e26   :  { %4343 = vrot.lane.b32.xlu0 %v4339_v11, %s13219_s23  ;;  %v4340_v51 = vmul.f32 %v12411_v39, %v4336_v30 }
0x1e28   :  { %4345 = vrot.lane.b32.xlu1 %v4340_v51, %s13219_s23 }
0x1e98   :  { %v4344_v49 = vpop.permute.xlu0 %4343 }
0x1e9a   :  { %v4346_v50 = vpop.permute.xlu1 %4345 }
0x1e9b   :  { %v4347_v9 = vsel %vm3916_vm9, %v4344_v49, %v4346_v50  ;;  %v14394_v47 = vadd.f32 %v12407_v28, %v4346_v50 }
0x1e9c   :  { %v14396_v1 = vadd.f32 %v12405_v54, %v4347_v9 }
0x1e9d   :  { %v4353_v60 = vpack.c.bf16 %v14394_v47, %v14394_v47 }
0x1e9e   :  { %v4352_v2 = vpack.c.bf16 %v14396_v1, %v14396_v1 }
0x1e9f   :  { %4358 = vrot.lane.b32.xlu1 %v4353_v60, %s13200_s15 }
0x1ea0   :  { %4356 = vrot.lane.b32.xlu0 %v4352_v2, %s13200_s15 }
0x1f11   :  { %v4359_v13 = vpop.permute.xlu1 %4358 }
0x1f12   :  { %v4357_v62 = vpop.permute.xlu0 %4356 }
0x1f13   :  { %v4360_v32 = vsel %vm1014_vm5, %v4357_v62, %v4359_v13  ;;  %v3717_v13 = vadd.f32 %v14227_v24, %v14190_v8 }
0x1f14   :  { %10385 = vmatmul.mubr.msk.bf16.vlgmr.msra.gmra.mxu0 %vm3916_vm9, %v4360_v32  ;;  %11513 = vmatmul.mubr.msk.bf16.vlgmr.msra.gmra.mxu1 %vm3916_vm9, %v4360_v32 }
0x1f15   :  { %4517 = vmatpush1.bf16.msra.mxu0 %v14083_v61  ;;  %11517 = vmatpush3.bf16.msra.mxu1 %v14087_v63 }
0x1f16   :  { %4518 = vmatprep.subr.bf16.mxu0 %v14085_v17  ;;  %11518 = vmatprep.subr.bf16.mxu1 %v15753_v6 }
0x1f17   :  { %4544 = vmatprep.mubr.bf16.mxu0 %v15754_v59  ;;  %11528 = vmatprep.mubr.msk.bf16.mxu1 %vm13218_vm7, %v15753_v6 }
0x1f19   :  { %4519 = vmatpush1.bf16.msra.mxu0 %v14093_v40  ;;  %11519 = vmatpush3.bf16.msra.mxu1 %v14097_v4 }
0x1f1a   :  { %4520 = vmatprep.subr.bf16.mxu0 %v14099_v55  ;;  %11520 = vmatprep.subr.bf16.mxu1 %v15753_v6 }
0x1f1d   :  { %4521 = vmatpush1.bf16.msra.mxu0 %v14104_v10  ;;  %11521 = vmatpush3.bf16.msra.mxu1 %v14108_v25 }
0x1f1e   :  { %4522 = vmatprep.subr.bf16.mxu0 %v14111_v22  ;;  %11522 = vmatprep.subr.bf16.mxu1 %v15753_v6 }
0x1f21   :  { %4523 = vmatpush1.bf16.msra.mxu0 %v14117_v19  ;;  %11523 = vmatpush3.bf16.msra.mxu1 %v14121_v15 }
0x1f22   :  { %4524 = vmatprep.subr.bf16.mxu0 %v14123_v27  ;;  %11524 = vmatprep.subr.bf16.mxu1 %v15753_v6 }
0x1f25   :  { %4525 = vmatpush1.bf16.msra.mxu0 %v14130_v16  ;;  %11525 = vmatpush3.bf16.msra.mxu1 %v14134_v29 }
0x1f26   :  { %4526 = vmatprep.subr.bf16.mxu0 %v14136_v33  ;;  %11526 = vmatprep.subr.bf16.mxu1 %v15753_v6 }
0x1f29   :  { %4527 = vmatpush1.bf16.msra.mxu0 %v14142_v46  ;;  %11527 = vmatpush3.bf16.msra.mxu1 %v14145_v34 }
0x1f2a   :  { %4664 = vmatprep.subr.bf16.mxu0 %v14078_v14  ;;  %11532 = vmatprep.subr.bf16.mxu1 %v15753_v6 }
0x1fd4   :  { %v4398_v54 = vpop.f32.mrf.mxu0  ;;  %v4439_v28 = vpop.f32.mrf.mxu1 }
0x1fd5   :  { %v4399_v21 = vadd.f32 %v4398_v54, %v14253_v45  ;;  %v4440_v7 = vadd.f32 %v4439_v28, %v14239_v48 }
0x1fd6   :  { %v4400_v38 = vpop.f32.mrf.mxu0  ;;  %v11514_v42 = vpop.f32.mrf.mxu1 }
0x1fd7   :  { %v4445_v23 = vadd.f32 %v4399_v21, %v14222_v31  ;;  %v4401_v18 = vadd.f32 %v4400_v38, %v14259_v41  ;;  %4463 = vrot.lane.b32.xlu1 %v4440_v7, %s13200_s15 }
0x1fd8   :  { %v4402_v53 = vpop.f32.mrf.mxu0  ;;  %v4442_v11 = vpop.f32.mrf.mxu1 }
0x1fd9   :  { %4461 = vrot.lane.b32.xlu0 %v4401_v18, %s13200_s15  ;;  %v10387_v30 = vmul.f32 -1.442695, %v4445_v23  ;;  %v4452_v42 = vadd.f32 %v4401_v18, %v3717_v13 }
0x1fda   :  { %v4403_v14 = vpop.f32.mrf.mxu0  ;;  %v11515_v39 = vpop.f32.mrf.mxu1 }
0x1fdb   :  { %12412 = vpow2.f32 %v10387_v30  ;;  %v10388_v23 = vmul.f32 -1.442695, %v4452_v42 }
0x1fe8   :  { %v12413_v51 = vpop.eup %12412 }
0x1fe9   :  { %v4449_v49 = vadd.f32 1.0, %v12413_v51 }
0x1feb   :  { %12414 = vrcp.f32 %v4449_v49 }
0x1ff8   :  { %v12415_v60 = vpop.eup %12414 }
0x2049   :  { %v4464_v50 = vpop.permute.xlu1 %4463 }
0x204b   :  { %v4462_v9 = vpop.permute.xlu0 %4461 }
0x204c   :  { %v4465_v31 = vsel %vm1014_vm5, %v4462_v9, %v4464_v50 }
0x204d   :  { %v4467_v2 = vmul.f32 %v12415_v60, %v4465_v31 }
0x204f   :  { %4469 = vrot.lane.b32.xlu0 %v4467_v2, %s13200_s15 }
0x20c1   :  { %v4470_v62 = vpop.permute.xlu0 %4469 }
0x20c2   :  { %v4472_v32 = vadd.f32 %v4470_v62, %v3717_v13  ;;  %v4473_v54 = vadd.f32 %v4470_v62, %v14205_v0 }
0x20c4   :  { %12416 = vtanh.f32 %v4472_v32 }
0x20c5   :  { %12418 = vtanh.f32 %v4473_v54 }
0x20c6   :  { %12420 = vpow2.f32 %v10388_v23 }
0x20d1   :  { %v12417_v28 = vpop.eup %12416 }
0x20d2   :  { %v12419_v21 = vpop.eup %12418  ;;  %v4476_v7 = vsub.f32 %v14396_v1, %v12417_v28 }
0x20d3   :  { %v4477_v38 = vsub.f32 %v14394_v47, %v12419_v21  ;;  %v12421_v24 = vpop.eup %12420 }
0x20d4   :  { %4480 = vrot.lane.b32.xlu1 %v4476_v7, %s13172_s0  ;;  %v4456_v53 = vadd.f32 1.0, %v12421_v24 }
0x20d5   :  { %4482 = vrot.lane.b32.xlu0 %v4477_v38, %s13172_s0 }
0x20d6   :  { %12422 = vrcp.f32 %v4456_v53 }
0x20e3   :  { %v12423_v39 = vpop.eup %12422 }
0x2146   :  { %v4481_v11 = vpop.permute.xlu1 %4480 }
0x2147   :  { %v4483_v0 = vpop.permute.xlu0 %4482  ;;  %v4487_v14 = vmul.f32 %v12415_v60, %v4481_v11 }
0x2148   :  { %v4484_v30 = vsel %vm3653_vm8, %v4481_v11, %v4483_v0 }
0x2149   :  { %4491 = vrot.lane.b32.xlu1 %v4487_v14, %s13219_s23  ;;  %v4488_v1 = vmul.f32 %v12423_v39, %v4484_v30 }
0x214b   :  { %4493 = vrot.lane.b32.xlu0 %v4488_v1, %s13219_s23 }
0x21bb   :  { %v4492_v47 = vpop.permute.xlu1 %4491 }
0x21bd   :  { %v4494_v51 = vpop.permute.xlu0 %4493 }
0x21be   :  { %v4495_v18 = vsel %vm3916_vm9, %v4492_v47, %v4494_v51  ;;  %v14453_v49 = vadd.f32 %v12419_v21, %v4494_v51 }
0x21bf   :  { %v14455_v50 = vadd.f32 %v12417_v28, %v4495_v18 }
0x21c0   :  { %v4501_v9 = vpack.c.bf16 %v14453_v49, %v14453_v49 }
0x21c1   :  { %v4500_v60 = vpack.c.bf16 %v14455_v50, %v14455_v50 }
0x21c2   :  { %4506 = vrot.lane.b32.xlu0 %v4501_v9, %s13200_s15 }
0x21c3   :  { %4504 = vrot.lane.b32.xlu1 %v4500_v60, %s13200_s15 }
0x2234   :  { %v4507_v31 = vpop.permute.xlu0 %4506 }
0x2235   :  { %v4505_v2 = vpop.permute.xlu1 %4504 }
0x2236   :  { %v4508_v13 = vsel %vm1014_vm5, %v4505_v2, %v4507_v31 }
0x2237   :  { %10389 = vmatmul.mubr.msk.bf16.vlgmr.msra.gmra.mxu0 %vm3916_vm9, %v4508_v13  ;;  %11529 = vmatmul.mubr.msk.bf16.vlgmr.msra.gmra.mxu1 %vm3916_vm9, %v4508_v13 }
0x2238   :  { %4665 = vmatpush1.bf16.msra.mxu0 %v14083_v61  ;;  %11533 = vmatpush3.bf16.msra.mxu1 %v14087_v63  ;;  %v14491_v61 = vld [vmem:[#allocation18 + $0x7c] ss:$12 sps:$4 sm:$0xff]  }
0x2239   :  { %4666 = vmatprep.subr.bf16.mxu0 %v14085_v17  ;;  %11534 = vmatprep.subr.bf16.mxu1 %v15753_v6 }
0x223a   :  { %4692 = vmatprep.mubr.bf16.mxu0 %v15754_v59  ;;  %11544 = vmatprep.mubr.msk.bf16.mxu1 %vm13218_vm7, %v15753_v6 }
0x223c   :  { %4667 = vmatpush1.bf16.msra.mxu0 %v14093_v40  ;;  %11535 = vmatpush3.bf16.msra.mxu1 %v14097_v4 }
0x223d   :  { %4668 = vmatprep.subr.bf16.mxu0 %v14099_v55  ;;  %11536 = vmatprep.subr.bf16.mxu1 %v15753_v6 }
0x2240   :  { %4669 = vmatpush1.bf16.msra.mxu0 %v14104_v10  ;;  %11537 = vmatpush3.bf16.msra.mxu1 %v14108_v25 }
0x2241   :  { %4670 = vmatprep.subr.bf16.mxu0 %v14111_v22  ;;  %11538 = vmatprep.subr.bf16.mxu1 %v15753_v6 }
0x2244   :  { %4671 = vmatpush1.bf16.msra.mxu0 %v14117_v19  ;;  %11539 = vmatpush3.bf16.msra.mxu1 %v14121_v15 }
0x2245   :  { %4672 = vmatprep.subr.bf16.mxu0 %v14123_v27  ;;  %11540 = vmatprep.subr.bf16.mxu1 %v15753_v6 }
0x2248   :  { %4673 = vmatpush1.bf16.msra.mxu0 %v14130_v16  ;;  %11541 = vmatpush3.bf16.msra.mxu1 %v14134_v29 }
0x2249   :  { %4674 = vmatprep.subr.bf16.mxu0 %v14136_v33  ;;  %11542 = vmatprep.subr.bf16.mxu1 %v15753_v6 }
0x224c   :  { %4675 = vmatpush1.bf16.msra.mxu0 %v14142_v46  ;;  %11543 = vmatpush3.bf16.msra.mxu1 %v14145_v34 }
0x224d   :  { %4812 = vmatprep.subr.bf16.mxu0 %v14491_v61  ;;  %11548 = vmatprep.subr.bf16.mxu1 %v15753_v6 }
0x22f7   :  { %v4546_v17 = vpop.f32.mrf.mxu0  ;;  %v4587_v63 = vpop.f32.mrf.mxu1 }
0x22f8   :  { %v4547_v40 = vadd.f32 %v4546_v17, %v14253_v45  ;;  %v4588_v4 = vadd.f32 %v4587_v63, %v14239_v48  ;;  %v14527_v63 = vld [vmem:[#allocation18 + $0x78] ss:$12 sps:$4 sm:$0xff]  }
0x22f9   :  { %v4548_v55 = vpop.f32.mrf.mxu0  ;;  %v11530_v10 = vpop.f32.mrf.mxu1 }
0x22fa   :  { %v4593_v25 = vadd.f32 %v4547_v40, %v14229_v12  ;;  %v4549_v22 = vadd.f32 %v4548_v55, %v14259_v41  ;;  %4611 = vrot.lane.b32.xlu0 %v4588_v4, %s13200_s15  ;;  %v14530_v40 = vld [vmem:[#allocation18 + $0x80] ss:$12 sps:$4 sm:$0xff]   ;;  %v14533_v4 = vld [vmem:[#allocation18 + $0x64] ss:$12 sps:$4 sm:$0xff]   ;;  %v14543_v10 = vld [vmem:[#allocation18 + $0x68] ss:$12 sps:$4 sm:$0xff]  }
0x22fb   :  { %v4550_v19 = vpop.f32.mrf.mxu0  ;;  %v4590_v15 = vpop.f32.mrf.mxu1  ;;  %v14540_v55 = vld [vmem:[#allocation18 + $0x60] ss:$12 sps:$4 sm:$0xff]  }
0x22fc   :  { %4609 = vrot.lane.b32.xlu1 %v4549_v22, %s13200_s15  ;;  %v10391_v29 = vmul.f32 -1.442695, %v4593_v25  ;;  %v4600_v53 = vadd.f32 %v4549_v22, %v14232_v52  ;;  %v14546_v25 = vld [vmem:[#allocation18 + $0x4c] ss:$12 sps:$4 sm:$0xff]   ;;  %v14550_v22 = vld [vmem:[#allocation18 + $0x48] ss:$12 sps:$4 sm:$0xff]  }
0x22fd   :  { %v4551_v27 = vpop.f32.mrf.mxu0  ;;  %v11531_v16 = vpop.f32.mrf.mxu1  ;;  %v14553_v19 = vld [vmem:[#allocation18 + $0x50] ss:$12 sps:$4 sm:$0xff]   ;;  %v14556_v15 = vld [vmem:[#allocation18 + $0x34] ss:$12 sps:$4 sm:$0xff]  }
0x22fe   :  { %12424 = vpow2.f32 %v10391_v29  ;;  %v10392_v11 = vmul.f32 -1.442695, %v4600_v53  ;;  %v14560_v27 = vld [vmem:[#allocation18 + $0x30] ss:$12 sps:$4 sm:$0xff]   ;;  %v14563_v16 = vld [vmem:[#allocation18 + $0x38] ss:$12 sps:$4 sm:$0xff]  }
0x22ff   :  { %v14566_v29 = vld [vmem:[#allocation18 + $0x1c] ss:$12 sps:$4 sm:$0xff]  }
0x230b   :  { %v12425_v33 = vpop.eup %12424 }
0x230c   :  { %v4597_v46 = vadd.f32 1.0, %v12425_v33  ;;  %v14570_v33 = vld [vmem:[#allocation18 + $0x18] ss:$12 sps:$4 sm:$0xff]  }
0x230e   :  { %12426 = vrcp.f32 %v4597_v46  ;;  %v14573_v46 = vld [vmem:[#allocation18 + $0x20] ss:$12 sps:$4 sm:$0xff]  }
0x231b   :  { %v12427_v32 = vpop.eup %12426 }
0x236c   :  { %v4612_v34 = vpop.permute.xlu0 %4611 }
0x236e   :  { %v4610_v62 = vpop.permute.xlu1 %4609 }
0x236f   :  { %v4613_v12 = vsel %vm1014_vm5, %v4610_v62, %v4612_v34  ;;  %v14576_v34 = vld [vmem:[#allocation18 + $0x4] ss:$12 sps:$4 sm:$0xff]   ;;  %v14580_v62 = vld [vmem:[#allocation18] ss:$12 sps:$4 sm:$0xff]  }
0x2370   :  { %v4615_v54 = vmul.f32 %v12427_v32, %v4613_v12 }
0x2372   :  { %4617 = vrot.lane.b32.xlu1 %v4615_v54, %s13200_s15 }
0x23e4   :  { %v4618_v28 = vpop.permute.xlu1 %4617 }
0x23e5   :  { %v4620_v21 = vadd.f32 %v4618_v28, %v14232_v52  ;;  %v4621_v7 = vadd.f32 %v4618_v28, %v14220_v26 }
0x23e7   :  { %12428 = vtanh.f32 %v4620_v21 }
0x23e8   :  { %12430 = vtanh.f32 %v4621_v7 }
0x23e9   :  { %12432 = vpow2.f32 %v10392_v11 }
0x23f4   :  { %v12429_v38 = vpop.eup %12428 }
0x23f5   :  { %v12431_v42 = vpop.eup %12430  ;;  %v4624_v23 = vsub.f32 %v14455_v50, %v12429_v38 }
0x23f6   :  { %v4625_v24 = vsub.f32 %v14453_v49, %v12431_v42  ;;  %v12433_v0 = vpop.eup %12432 }
0x23f7   :  { %4628 = vrot.lane.b32.xlu0 %v4624_v23, %s13172_s0  ;;  %v4604_v14 = vadd.f32 1.0, %v12433_v0 }
0x23f8   :  { %4630 = vrot.lane.b32.xlu1 %v4625_v24, %s13172_s0 }
0x23f9   :  { %12434 = vrcp.f32 %v4604_v14 }
0x2406   :  { %v12435_v1 = vpop.eup %12434 }
0x2469   :  { %v4629_v26 = vpop.permute.xlu0 %4628 }
0x246a   :  { %v4631_v39 = vpop.permute.xlu1 %4630  ;;  %v4635_v30 = vmul.f32 %v12427_v32, %v4629_v26  ;;  %v14583_v32 = vld [vmem:[#allocation18 + $0x8] ss:$12 sps:$4 sm:$0xff]  }
0x246b   :  { %v4632_v47 = vsel %vm3653_vm8, %v4629_v26, %v4631_v39 }
0x246c   :  { %4639 = vrot.lane.b32.xlu0 %v4635_v30, %s13219_s23  ;;  %v4636_v51 = vmul.f32 %v12435_v1, %v4632_v47 }
0x246e   :  { %4641 = vrot.lane.b32.xlu1 %v4636_v51, %s13219_s23  ;;  %v3793_v51 = vadd.f32 %v14241_v35, %v14187_v57 }
0x24de   :  { %v4640_v18 = vpop.permute.xlu0 %4639 }
0x24e0   :  { %v4642_v49 = vpop.permute.xlu1 %4641 }
0x24e1   :  { %v4643_v52 = vsel %vm3916_vm9, %v4640_v18, %v4642_v49  ;;  %v14514_v50 = vadd.f32 %v12431_v42, %v4642_v49  ;;  %v3727_v18 = vadd.f32 %v14236_v20, %v14190_v8 }
0x24e2   :  { %v14516_v9 = vadd.f32 %v12429_v38, %v4643_v52 }
0x24e3   :  { %v4649_v60 = vpack.c.bf16 %v14514_v50, %v14514_v50 }
0x24e4   :  { %v4648_v31 = vpack.c.bf16 %v14516_v9, %v14516_v9 }
0x24e5   :  { %4654 = vrot.lane.b32.xlu1 %v4649_v60, %s13200_s15 }
0x24e6   :  { %4652 = vrot.lane.b32.xlu0 %v4648_v31, %s13200_s15 }
0x2557   :  { %v4655_v2 = vpop.permute.xlu1 %4654 }
0x2558   :  { %v4653_v13 = vpop.permute.xlu0 %4652 }
0x2559   :  { %v4656_v17 = vsel %vm1014_vm5, %v4653_v13, %v4655_v2 }
0x255a   :  { %10393 = vmatmul.mubr.msk.bf16.vlgmr.msra.gmra.mxu0 %vm3916_vm9, %v4656_v17  ;;  %11545 = vmatmul.mubr.msk.bf16.vlgmr.msra.gmra.mxu1 %vm3916_vm9, %v4656_v17 }
0x255b   :  { %4813 = vmatpush1.bf16.msra.mxu0 %v14527_v63  ;;  %11549 = vmatpush3.bf16.msra.mxu1 %v14530_v40 }
0x255c   :  { %4814 = vmatprep.subr.bf16.mxu0 %v14533_v4  ;;  %11550 = vmatprep.subr.bf16.mxu1 %v15753_v6 }
0x255d   :  { %4840 = vmatprep.mubr.bf16.mxu0 %v15754_v59  ;;  %11560 = vmatprep.mubr.msk.bf16.mxu1 %vm13218_vm7, %v15753_v6 }
0x255f   :  { %4815 = vmatpush1.bf16.msra.mxu0 %v14540_v55  ;;  %11551 = vmatpush3.bf16.msra.mxu1 %v14543_v10 }
0x2560   :  { %4816 = vmatprep.subr.bf16.mxu0 %v14546_v25  ;;  %11552 = vmatprep.subr.bf16.mxu1 %v15753_v6 }
0x2563   :  { %4817 = vmatpush1.bf16.msra.mxu0 %v14550_v22  ;;  %11553 = vmatpush3.bf16.msra.mxu1 %v14553_v19 }
0x2564   :  { %4818 = vmatprep.subr.bf16.mxu0 %v14556_v15  ;;  %11554 = vmatprep.subr.bf16.mxu1 %v15753_v6 }
0x2567   :  { %4819 = vmatpush1.bf16.msra.mxu0 %v14560_v27  ;;  %11555 = vmatpush3.bf16.msra.mxu1 %v14563_v16 }
0x2568   :  { %4820 = vmatprep.subr.bf16.mxu0 %v14566_v29  ;;  %11556 = vmatprep.subr.bf16.mxu1 %v15753_v6 }
0x256b   :  { %4821 = vmatpush1.bf16.msra.mxu0 %v14570_v33  ;;  %11557 = vmatpush3.bf16.msra.mxu1 %v14573_v46 }
0x256c   :  { %4822 = vmatprep.subr.bf16.mxu0 %v14576_v34  ;;  %11558 = vmatprep.subr.bf16.mxu1 %v15753_v6 }
0x256f   :  { %4823 = vmatpush1.bf16.msra.mxu0 %v14580_v62  ;;  %11559 = vmatpush3.bf16.msra.mxu1 %v14583_v32 }
0x2570   :  { %4960 = vmatprep.subr.bf16.mxu0 %v14491_v61  ;;  %11564 = vmatprep.subr.bf16.mxu1 %v15753_v6 }
0x261a   :  { %v4694_v12 = vpop.f32.mrf.mxu0  ;;  %v4735_v54 = vpop.f32.mrf.mxu1 }
0x261b   :  { %v4695_v28 = vadd.f32 %v4694_v12, %v14253_v45  ;;  %v4736_v21 = vadd.f32 %v4735_v54, %v14239_v48 }
0x261c   :  { %v4696_v7 = vpop.f32.mrf.mxu0  ;;  %v11546_v38 = vpop.f32.mrf.mxu1 }
0x261d   :  { %v4741_v42 = vadd.f32 %v4695_v28, %v14234_v44  ;;  %v4697_v23 = vadd.f32 %v4696_v7, %v14259_v41  ;;  %4759 = vrot.lane.b32.xlu1 %v4736_v21, %s13200_s15 }
0x261e   :  { %v4698_v24 = vpop.f32.mrf.mxu0  ;;  %v4738_v53 = vpop.f32.mrf.mxu1 }
0x261f   :  { %4757 = vrot.lane.b32.xlu0 %v4697_v23, %s13200_s15  ;;  %v10395_v0 = vmul.f32 -1.442695, %v4741_v42  ;;  %v4748_v12 = vadd.f32 %v4697_v23, %v3727_v18 }
0x2620   :  { %v4699_v61 = vpop.f32.mrf.mxu0  ;;  %v11547_v11 = vpop.f32.mrf.mxu1 }
0x2621   :  { %12436 = vpow2.f32 %v10395_v0  ;;  %v10396_v57 = vmul.f32 -1.442695, %v4748_v12 }
0x262e   :  { %v12437_v14 = vpop.eup %12436 }
0x262f   :  { %v4745_v26 = vadd.f32 1.0, %v12437_v14 }
0x2631   :  { %12438 = vrcp.f32 %v4745_v26 }
0x263e   :  { %v12439_v1 = vpop.eup %12438 }
0x268f   :  { %v4760_v39 = vpop.permute.xlu1 %4759 }
0x2691   :  { %v4758_v30 = vpop.permute.xlu0 %4757 }
0x2692   :  { %v4761_v44 = vsel %vm1014_vm5, %v4758_v30, %v4760_v39 }
0x2693   :  { %v4763_v47 = vmul.f32 %v12439_v1, %v4761_v44 }
0x2695   :  { %4765 = vrot.lane.b32.xlu0 %v4763_v47, %s13200_s15 }
0x2707   :  { %v4766_v49 = vpop.permute.xlu0 %4765 }
0x2708   :  { %v4768_v52 = vadd.f32 %v4766_v49, %v3727_v18  ;;  %v4769_v60 = vadd.f32 %v4766_v49, %v3793_v51 }
0x270a   :  { %12440 = vtanh.f32 %v4768_v52 }
0x270b   :  { %12442 = vtanh.f32 %v4769_v60 }
0x270c   :  { %12444 = vpow2.f32 %v10396_v57 }
0x2717   :  { %v12441_v31 = vpop.eup %12440 }
0x2718   :  { %v12443_v2 = vpop.eup %12442  ;;  %v4772_v13 = vsub.f32 %v14516_v9, %v12441_v31 }
0x2719   :  { %v4773_v17 = vsub.f32 %v14514_v50, %v12443_v2  ;;  %v12445_v35 = vpop.eup %12444 }
0x271a   :  { %4776 = vrot.lane.b32.xlu1 %v4772_v13, %s13172_s0  ;;  %v4752_v20 = vadd.f32 1.0, %v12445_v35 }
0x271b   :  { %4778 = vrot.lane.b32.xlu0 %v4773_v17, %s13172_s0 }
0x271c   :  { %12446 = vrcp.f32 %v4752_v20 }
0x2729   :  { %v12447_v21 = vpop.eup %12446 }
0x278c   :  { %v4777_v8 = vpop.permute.xlu1 %4776 }
0x278d   :  { %v4779_v54 = vpop.permute.xlu0 %4778  ;;  %v4783_v28 = vmul.f32 %v12439_v1, %v4777_v8 }
0x278e   :  { %v4780_v7 = vsel %vm3653_vm8, %v4777_v8, %v4779_v54 }
0x278f   :  { %4787 = vrot.lane.b32.xlu1 %v4783_v28, %s13219_s23  ;;  %v4784_v9 = vmul.f32 %v12447_v21, %v4780_v7 }
0x2791   :  { %4789 = vrot.lane.b32.xlu0 %v4784_v9, %s13219_s23 }
0x2801   :  { %v4788_v50 = vpop.permute.xlu1 %4787 }
0x2803   :  { %v4790_v38 = vpop.permute.xlu0 %4789 }
0x2804   :  { %v4791_v42 = vsel %vm3916_vm9, %v4788_v50, %v4790_v38  ;;  %v14608_v23 = vadd.f32 %v12443_v2, %v4790_v38 }
0x2805   :  { %v14610_v24 = vadd.f32 %v12441_v31, %v4791_v42 }
0x2806   :  { %v4797_v53 = vpack.c.bf16 %v14608_v23, %v14608_v23 }
0x2807   :  { %v4796_v61 = vpack.c.bf16 %v14610_v24, %v14610_v24 }
0x2808   :  { %4802 = vrot.lane.b32.xlu0 %v4797_v53, %s13200_s15 }
0x2809   :  { %4800 = vrot.lane.b32.xlu1 %v4796_v61, %s13200_s15 }
0x287a   :  { %v4803_v11 = vpop.permute.xlu0 %4802 }
0x287b   :  { %v4801_v0 = vpop.permute.xlu1 %4800 }
0x287c   :  { %v4804_v14 = vsel %vm1014_vm5, %v4801_v0, %v4803_v11 }
0x287d   :  { %10397 = vmatmul.mubr.msk.bf16.vlgmr.msra.gmra.mxu0 %vm3916_vm9, %v4804_v14  ;;  %11561 = vmatmul.mubr.msk.bf16.vlgmr.msra.gmra.mxu1 %vm3916_vm9, %v4804_v14 }
0x287e   :  { %4961 = vmatpush1.bf16.msra.mxu0 %v14527_v63  ;;  %11565 = vmatpush3.bf16.msra.mxu1 %v14530_v40 }
0x287f   :  { %4962 = vmatprep.subr.bf16.mxu0 %v14533_v4  ;;  %11566 = vmatprep.subr.bf16.mxu1 %v15753_v6 }
0x2880   :  { %4988 = vmatprep.mubr.bf16.mxu0 %v15754_v59  ;;  %11576 = vmatprep.mubr.msk.bf16.mxu1 %vm13218_vm7, %v15753_v6 }
0x2882   :  { %4963 = vmatpush1.bf16.msra.mxu0 %v14540_v55  ;;  %11567 = vmatpush3.bf16.msra.mxu1 %v14543_v10 }
0x2883   :  { %4964 = vmatprep.subr.bf16.mxu0 %v14546_v25  ;;  %11568 = vmatprep.subr.bf16.mxu1 %v15753_v6 }
0x2886   :  { %4965 = vmatpush1.bf16.msra.mxu0 %v14550_v22  ;;  %11569 = vmatpush3.bf16.msra.mxu1 %v14553_v19 }
0x2887   :  { %4966 = vmatprep.subr.bf16.mxu0 %v14556_v15  ;;  %11570 = vmatprep.subr.bf16.mxu1 %v15753_v6 }
0x288a   :  { %4967 = vmatpush1.bf16.msra.mxu0 %v14560_v27  ;;  %11571 = vmatpush3.bf16.msra.mxu1 %v14563_v16 }
0x288b   :  { %4968 = vmatprep.subr.bf16.mxu0 %v14566_v29  ;;  %11572 = vmatprep.subr.bf16.mxu1 %v15753_v6 }
0x288e   :  { %4969 = vmatpush1.bf16.msra.mxu0 %v14570_v33  ;;  %11573 = vmatpush3.bf16.msra.mxu1 %v14573_v46 }
0x288f   :  { %4970 = vmatprep.subr.bf16.mxu0 %v14576_v34  ;;  %11574 = vmatprep.subr.bf16.mxu1 %v15753_v6 }
0x2892   :  { %4971 = vmatpush1.bf16.msra.mxu0 %v14580_v62  ;;  %11575 = vmatpush3.bf16.msra.mxu1 %v14583_v32 }
0x293d   :  { %v4842_v63 = vpop.f32.mrf.mxu0  ;;  %v4883_v40 = vpop.f32.mrf.mxu1 }
0x293e   :  { %v4843_v4 = vadd.f32 %v4842_v63, %v14253_v45  ;;  %v4884_v55 = vadd.f32 %v4883_v40, %v14239_v48 }
0x293f   :  { %v4844_v10 = vpop.f32.mrf.mxu0  ;;  %v11562_v25 = vpop.f32.mrf.mxu1 }
0x2940   :  { %v4889_v22 = vadd.f32 %v4843_v4, %v14243_v3  ;;  %v4845_v19 = vadd.f32 %v4844_v10, %v14259_v41  ;;  %4907 = vrot.lane.b32.xlu0 %v4884_v55, %s13200_s15 }
0x2941   :  { %v4846_v15 = vpop.f32.mrf.mxu0  ;;  %v4886_v27 = vpop.f32.mrf.mxu1 }
0x2942   :  { %4905 = vrot.lane.b32.xlu1 %v4845_v19, %s13200_s15  ;;  %v10399_v33 = vmul.f32 -1.442695, %v4889_v22  ;;  %v4896_v52 = vadd.f32 %v4845_v19, %v14247_v43 }
0x2943   :  { %v4847_v16 = vpop.f32.mrf.mxu0  ;;  %v11563_v29 = vpop.f32.mrf.mxu1 }
0x2944   :  { %12448 = vpow2.f32 %v10399_v33  ;;  %v10400_v60 = vmul.f32 -1.442695, %v4896_v52  ;;  %v1554_v52 = vld [vmem:[%s15755_s9 + $0x20] sm:$0xff] }
0x2945   :  { %vm3076_vm13 = vcmp.gt.f32.partialorder %v1554_v52, 0.0  ;;  %v5110_v52 = vld [vmem:[%s15756_s10 + $0x40] sm:$0xff] }
0x2951   :  { %v12449_v46 = vpop.eup %12448 }
0x2952   :  { %v4893_v34 = vadd.f32 1.0, %v12449_v46 }
0x2954   :  { %12450 = vrcp.f32 %v4893_v34 }
0x2961   :  { %v12451_v26 = vpop.eup %12450 }
0x29b2   :  { %v4908_v62 = vpop.permute.xlu0 %4907 }
0x29b4   :  { %v4906_v32 = vpop.permute.xlu1 %4905 }
0x29b5   :  { %v4909_v3 = vsel %vm1014_vm5, %v4906_v32, %v4908_v62 }
0x29b6   :  { %v4911_v39 = vmul.f32 %v12451_v26, %v4909_v3  ;;  %v1550_v3 = vld [vmem:[%s15755_s9] sm:$0xff] }
0x29b7   :  { %vm3072_vm10 = vcmp.gt.f32.partialorder %v1550_v3, 0.0 }
0x29b8   :  { %4913 = vrot.lane.b32.xlu1 %v4911_v39, %s13200_s15 }
0x2a2a   :  { %v4914_v30 = vpop.permute.xlu1 %4913 }
0x2a2b   :  { %v4916_v1 = vadd.f32 %v4914_v30, %v14247_v43  ;;  %v4917_v44 = vadd.f32 %v4914_v30, %v14214_v5  ;;  %v1551_v30 = vld [vmem:[%s15755_s9 + $0x8] sm:$0xff] }
0x2a2c   :  { %vm3073_vm11 = vcmp.gt.f32.partialorder %v1551_v30, 0.0  ;;  %v5118_v30 = vld [vmem:[%s15756_s10 + $0x80] sm:$0xff] }
0x2a2d   :  { %12452 = vtanh.f32 %v4916_v1 }
0x2a2e   :  { %12454 = vtanh.f32 %v4917_v44 }
0x2a2f   :  { %12456 = vpow2.f32 %v10400_v60  ;;  %v3081_v60 = vsel %vm3073_vm11, 1, %v15754_v59 }
0x2a3a   :  { %v12453_v47 = vpop.eup %12452 }
0x2a3b   :  { %v12455_v51 = vpop.eup %12454  ;;  %v4920_v18 = vsub.f32 %v14610_v24, %v12453_v47 }
0x2a3c   :  { %v4921_v49 = vsub.f32 %v14608_v23, %v12455_v51  ;;  %v12457_v31 = vpop.eup %12456 }
0x2a3d   :  { %4924 = vrot.lane.b32.xlu0 %v4920_v18, %s13172_s0  ;;  %v4900_v2 = vadd.f32 1.0, %v12457_v31  ;;  %v1552_v18 = vld [vmem:[%s15755_s9 + $0x10] sm:$0xff]  ;;  %v1553_v31 = vld [vmem:[%s15755_s9 + $0x18] sm:$0xff] }
0x2a3e   :  { %4926 = vrot.lane.b32.xlu1 %v4921_v49, %s13172_s0  ;;  %vm3074_vm12 = vcmp.gt.f32.partialorder %v1552_v18, 0.0  ;;  %vm3075_vm14 = vcmp.gt.f32.partialorder %v1553_v31, 0.0  ;;  %v5111_v31 = vld [vmem:[%s15756_s10 + $0x48] sm:$0xff] }
0x2a3f   :  { %12458 = vrcp.f32 %v4900_v2  ;;  %v3082_v2 = vsel %vm3074_vm12, 1, %v15754_v59 }
0x2a4c   :  { %v12459_v12 = vpop.eup %12458 }
0x2aaf   :  { %v4925_v5 = vpop.permute.xlu0 %4924 }
0x2ab0   :  { %v4927_v13 = vpop.permute.xlu1 %4926  ;;  %v4931_v17 = vmul.f32 %v12451_v26, %v4925_v5 }
0x2ab1   :  { %v4928_v57 = vsel %vm3653_vm8, %v4925_v5, %v4927_v13  ;;  %v1556_v5 = vld [vmem:[%s15755_s9 + $0x30] sm:$0xff]  ;;  %v3084_v13 = vsel %vm3076_vm13, 1, %v15754_v59 }
0x2ab2   :  { %4935 = vrot.lane.b32.xlu0 %v4931_v17, %s13219_s23  ;;  %v4932_v35 = vmul.f32 %v12459_v12, %v4928_v57  ;;  %v1555_v17 = vld [vmem:[%s15755_s9 + $0x28] sm:$0xff]  ;;  %vm3078_vm15 = vcmp.gt.f32.partialorder %v1556_v5, 0.0  ;;  %v3083_v12 = vsel %vm3075_vm14, 1, %v15754_v59 }
0x2ab3   :  { %vm3077_vm4 = vcmp.gt.f32.partialorder %v1555_v17, 0.0  ;;  %v3086_v57 = vsel %vm3078_vm15, 1, %v15754_v59 }
0x2ab4   :  { %4937 = vrot.lane.b32.xlu1 %v4932_v35, %s13219_s23  ;;  %v1557_v35 = vld [vmem:[%s15755_s9 + $0x38] sm:$0xff] }
0x2ab5   :  { %vm3079_vm6 = vcmp.gt.f32.partialorder %v1557_v35, 0.0  ;;  %v5106_v35 = vld [vmem:[%s15756_s10 + $0x20] sm:$0xff] }
0x2b24   :  { %v4936_v20 = vpop.permute.xlu0 %4935 }
0x2b26   :  { %v4938_v8 = vpop.permute.xlu1 %4937 }
0x2b27   :  { %v4939_v43 = vsel %vm3916_vm9, %v4936_v20, %v4938_v8  ;;  %v4943_v54 = vadd.f32 %v12455_v51, %v4938_v8  ;;  %v3085_v20 = vsel %vm3077_vm4, 1, %v15754_v59  ;;  %v3087_v8 = vsel %vm3079_vm6, 1, %v15754_v59 }
0x2b28   :  { %v4942_v28 = vadd.f32 %v12453_v47, %v4939_v43  ;;  %v10329_v43 = vld [vmem:[#allocation24] ss:$0 sm:$0xff]  ;;  %vm3417_vm6 = vcmask 1041409  }
0x2b29   :  { %v4945_v21 = vpack.c.bf16 %v4943_v54, %v4943_v54 }
0x2b2a   :  { %v4944_v7 = vpack.c.bf16 %v4942_v28, %v4942_v28 }
0x2b2b   :  { %4950 = vrot.lane.b32.xlu1 %v4945_v21, %s13200_s15  ;;  %v5162_v21 = vld [vmem:[%s15756_s10 + $0x1e0] sm:$0xff] }
0x2b2c   :  { %4948 = vrot.lane.b32.xlu0 %v4944_v7, %s13200_s15  ;;  %v5159_v7 = vld [vmem:[%s15756_s10 + $0x1c8] sm:$0xff] }
0x2b9d   :  { %v4951_v9 = vpop.permute.xlu1 %4950 }
0x2b9e   :  { %v4949_v50 = vpop.permute.xlu0 %4948 }
0x2b9f   :  { %v4952_v38 = vsel %vm1014_vm5, %v4949_v50, %v4951_v9 }
0x2ba0   :  { %10401 = vmatmul.mubr.msk.bf16.vlgmr.msra.gmra.mxu0 %vm3916_vm9, %v4952_v38  ;;  %11577 = vmatmul.mubr.msk.bf16.vlgmr.msra.gmra.mxu1 %vm3916_vm9, %v4952_v38  ;;  %v5163_v38 = vld [vmem:[%s15756_s10 + $0x1e8] sm:$0xff] }
0x2c60   :  { %v4990_v42 = vpop.f32.mrf.mxu0  ;;  %v5031_v23 = vpop.f32.mrf.mxu1 }
0x2c61   :  { %v4991_v24 = vadd.f32 %v4990_v42, %v14253_v45  ;;  %v5032_v53 = vadd.f32 %v5031_v23, %v14239_v48  ;;  %v5150_v42 = vld [vmem:[%s15756_s10 + $0x180] sm:$0xff] }
0x2c62   :  { %v4992_v61 = vpop.f32.mrf.mxu0  ;;  %v11578_v11 = vpop.f32.mrf.mxu1  ;;  %v5154_v23 = vld [vmem:[%s15756_s10 + $0x1a0] sm:$0xff] }
0x2c63   :  { %v5037_v0 = vadd.f32 %v4991_v24, %v14250_v58  ;;  %v4993_v14 = vadd.f32 %v4992_v61, %v14259_v41  ;;  %5055 = vrot.lane.b32.xlu1 %v5032_v53, %s13200_s15  ;;  %v10463_v24 = vcombine.low %v5159_v7, %v5163_v38  ;;  %v10464_v53 = vcombine.high %v5159_v7, %v5163_v38  ;;  %v5151_v11 = vld [vmem:[%s15756_s10 + $0x188] sm:$0xff]  ;;  %v5206_v7 = vld [vmem:[%s15756_s10 + $0x340] sm:$0xff] }
0x2c64   :  { %v4994_v63 = vpop.f32.mrf.mxu0  ;;  %v5034_v40 = vpop.f32.mrf.mxu1  ;;  %v10454_v61 = vcombine.high %v5150_v42, %v5154_v23  ;;  %v5211_v38 = vld [vmem:[%s15756_s10 + $0x368] sm:$0xff] }
0x2c65   :  { %5053 = vrot.lane.b32.xlu0 %v4993_v14, %s13200_s15  ;;  %v10403_v10 = vmul.f32 -1.442695, %v5037_v0  ;;  %v5044_v62 = vadd.f32 %v4993_v14, %v14256_v56  ;;  %v5155_v0 = vld [vmem:[%s15756_s10 + $0x1a8] sm:$0xff]  ;;  %v5146_v63 = vld [vmem:[%s15756_s10 + $0x160] sm:$0xff]  ;;  %5860 = vmatprep.subr.bf16.mxu1 %v10464_v53 }
0x2c66   :  { %v4995_v4 = vpop.f32.mrf.mxu0  ;;  %v11579_v55 = vpop.f32.mrf.mxu1  ;;  %v10456_v14 = vcombine.high %v5151_v11, %v5155_v0  ;;  %v5143_v40 = vld [vmem:[%s15756_s10 + $0x148] sm:$0xff]  ;;  %5861 = vmatpush1.bf16.msra.mxu1 %v10463_v24 }
0x2c67   :  { %12460 = vpow2.f32 %v10403_v10  ;;  %v10404_v32 = vmul.f32 -1.442695, %v5044_v62  ;;  %v5147_v4 = vld [vmem:[%s15756_s10 + $0x168] sm:$0xff]  ;;  %v10453_v55 = vcombine.low %v5150_v42, %v5154_v23  ;;  %v10455_v10 = vcombine.low %v5151_v11, %v5155_v0  ;;  %v5202_v11 = vld [vmem:[%s15756_s10 + $0x320] sm:$0xff] }
0x2c68   :  { %5862 = vmatprep.subr.bf16.mxu1 %v10456_v14  ;;  %v5127_v62 = vld [vmem:[%s15756_s10 + $0xc8] sm:$0xff] }
0x2c69   :  { %v5199_v0 = vld [vmem:[%s15756_s10 + $0x308] sm:$0xff] }
0x2c6a   :  { %5863 = vmatpush1.bf16.msra.mxu1 %v10455_v10  ;;  %v5194_v10 = vld [vmem:[%s15756_s10 + $0x2e0] sm:$0xff] }
0x2c74   :  { %v12461_v25 = vpop.eup %12460 }
0x2c75   :  { %v5041_v45 = vadd.f32 1.0, %v12461_v25 }
0x2c77   :  { %12462 = vrcp.f32 %v5041_v45  ;;  %v10448_v45 = vcombine.high %v5143_v40, %v5147_v4 }
0x2c79   :  { %5864 = vmatprep.subr.bf16.mxu1 %v10448_v45  ;;  %v5195_v45 = vld [vmem:[%s15756_s10 + $0x2e8] sm:$0xff] }
0x2c84   :  { %v12463_v19 = vpop.eup %12462 }
0x2cd5   :  { %v5056_v48 = vpop.permute.xlu1 %5055 }
0x2cd7   :  { %v5054_v22 = vpop.permute.xlu0 %5053 }
0x2cd8   :  { %v5057_v58 = vsel %vm1014_vm5, %v5054_v22, %v5056_v48  ;;  %v5134_v48 = vld [vmem:[%s15756_s10 + $0x100] sm:$0xff] }
0x2cd9   :  { %v5059_v15 = vmul.f32 %v12463_v19, %v5057_v58  ;;  %v5138_v22 = vld [vmem:[%s15756_s10 + $0x120] sm:$0xff]  ;;  %v5139_v58 = vld [vmem:[%s15756_s10 + $0x128] sm:$0xff] }
0x2cdb   :  { %5061 = vrot.lane.b32.xlu0 %v5059_v15, %s13200_s15 }
0x2d4d   :  { %v5062_v41 = vpop.permute.xlu0 %5061 }
0x2d4e   :  { %v5064_v27 = vadd.f32 %v5062_v41, %v14256_v56  ;;  %v5065_v16 = vadd.f32 %v5062_v41, %v14225_v37  ;;  %v3080_v56 = vsel %vm3072_vm10, 1, %v15754_v59  ;;  %v10447_v41 = vcombine.low %v5143_v40, %v5147_v4 }
0x2d50   :  { %12464 = vtanh.f32 %v5064_v27  ;;  %v10438_v27 = vcombine.high %v5134_v48, %v5138_v22  ;;  %5865 = vmatpush1.bf16.msra.mxu1 %v10447_v41  ;;  %v5186_v41 = vld [vmem:[%s15756_s10 + $0x2a0] sm:$0xff] }
0x2d51   :  { %12466 = vtanh.f32 %v5065_v16 }
0x2d52   :  { %12468 = vpow2.f32 %v10404_v32  ;;  %v5131_v32 = vld [vmem:[%s15756_s10 + $0xe8] sm:$0xff] }
0x2d53   :  { %v10431_v18 = vcombine.low %v5127_v62, %v5131_v32 }
0x2d5d   :  { %v14680_v29 = vpop.eup %12464 }
0x2d5e   :  { %v14682_v33 = vpop.eup %12466  ;;  %v5068_v46 = vsub.f32 %v4942_v28, %v14680_v29  ;;  %v5158_v28 = vld [vmem:[%s15756_s10 + $0x1c0] sm:$0xff] }
0x2d5f   :  { %v5069_v34 = vsub.f32 %v4943_v54, %v14682_v33  ;;  %v12469_v37 = vpop.eup %12468  ;;  %v3404_v54 = vadd.f32 %v10329_v43, %v14184_v36  ;;  %v10461_v9 = vcombine.low %v5158_v28, %v5162_v21  ;;  %v10462_v50 = vcombine.high %v5158_v28, %v5162_v21  ;;  %v5142_v36 = vld [vmem:[%s15756_s10 + $0x140] sm:$0xff] }
0x2d60   :  { %5072 = vrot.lane.b32.xlu1 %v5068_v46, %s13172_s0  ;;  %v5048_v26 = vadd.f32 1.0, %v12469_v37  ;;  %v10446_v25 = vcombine.high %v5142_v36, %v5146_v63  ;;  %v10445_v15 = vcombine.low %v5142_v36, %v5146_v63  ;;  %v5126_v46 = vld [vmem:[%s15756_s10 + $0xc0] sm:$0xff]  ;;  %v10437_v37 = vcombine.low %v5134_v48, %v5138_v22  ;;  %v5203_v36 = vld [vmem:[%s15756_s10 + $0x328] sm:$0xff] }
0x2d61   :  { %5074 = vrot.lane.b32.xlu0 %v5069_v34, %s13172_s0  ;;  %5819 = vmatprep.subr.bf16.mxu0 %v10462_v50  ;;  %v5130_v34 = vld [vmem:[%s15756_s10 + $0xe0] sm:$0xff]  ;;  %v5207_v50 = vld [vmem:[%s15756_s10 + $0x348] sm:$0xff]  ;;  %v10504_v4 = vcombine.high %v5199_v0, %v5203_v36  ;;  %v10503_v22 = vcombine.low %v5199_v0, %v5203_v36  ;;  %v15758_v0 = vld [vmem:[#allocation85_spill] sm:$0xff] }
0x2d62   :  { %12470 = vrcp.f32 %v5048_v26  ;;  %5820 = vmatpush1.bf16.msra.mxu0 %v10461_v9  ;;  %v10430_v3 = vcombine.high %v5126_v46, %v5130_v34  ;;  %v5210_v9 = vld [vmem:[%s15756_s10 + $0x360] sm:$0xff]  ;;  %v10512_v53 = vcombine.high %v5207_v50, %v5211_v38  ;;  %v10511_v63 = vcombine.low %v5207_v50, %v5211_v38 }
0x2d63   :  { %5821 = vmatprep.subr.bf16.mxu0 %v10454_v61  ;;  %v10510_v24 = vcombine.high %v5206_v7, %v5210_v9  ;;  %v5198_v61 = vld [vmem:[%s15756_s10 + $0x300] sm:$0xff]  ;;  %v10509_v14 = vcombine.low %v5206_v7, %v5210_v9 }
0x2d64   :  { %v10502_v40 = vcombine.high %v5198_v61, %v5202_v11  ;;  %v10501_v48 = vcombine.low %v5198_v61, %v5202_v11 }
0x2d66   :  { %5822 = vmatpush1.bf16.msra.mxu0 %v10453_v55  ;;  %v5190_v55 = vld [vmem:[%s15756_s10 + $0x2c0] sm:$0xff] }
0x2d67   :  { %5823 = vmatprep.subr.bf16.mxu0 %v10446_v25  ;;  %v5191_v25 = vld [vmem:[%s15756_s10 + $0x2c8] sm:$0xff] }
0x2d6a   :  { %5824 = vmatpush1.bf16.msra.mxu0 %v10445_v15  ;;  %v5182_v15 = vld [vmem:[%s15756_s10 + $0x280] sm:$0xff] }
0x2d6b   :  { %5825 = vmatprep.subr.bf16.mxu0 %v10438_v27  ;;  %v5183_v27 = vld [vmem:[%s15756_s10 + $0x288] sm:$0xff] }
0x2d6e   :  { %5826 = vmatpush1.bf16.msra.mxu0 %v10437_v37  ;;  %v5174_v37 = vld [vmem:[%s15756_s10 + $0x240] sm:$0xff] }
0x2d6f   :  { %v12471_v47 = vpop.eup %12470  ;;  %5827 = vmatprep.subr.bf16.mxu0 %v10430_v3  ;;  %v5175_v3 = vld [vmem:[%s15756_s10 + $0x248] sm:$0xff] }
0x2dd2   :  { %v5073_v39 = vpop.permute.xlu1 %5072 }
0x2dd3   :  { %v5075_v1 = vpop.permute.xlu0 %5074  ;;  %v5079_v44 = vmul.f32 %v12463_v19, %v5073_v39  ;;  %v5135_v19 = vld [vmem:[%s15756_s10 + $0x108] sm:$0xff] }
0x2dd4   :  { %v5076_v51 = vsel %vm3653_vm8, %v5073_v39, %v5075_v1  ;;  %v10440_v16 = vcombine.high %v5135_v19, %v5139_v58  ;;  %v10439_v26 = vcombine.low %v5135_v19, %v5139_v58  ;;  %v10432_v39 = vcombine.high %v5127_v62, %v5131_v32  ;;  %v5122_v1 = vld [vmem:[%s15756_s10 + $0xa0] sm:$0xff] }
0x2dd5   :  { %v5080_v49 = vmul.f32 %v12471_v47, %v5076_v51  ;;  %5083 = vrot.lane.b32.xlu1 %v5079_v44, %s13219_s23  ;;  %v5119_v44 = vld [vmem:[%s15756_s10 + $0x88] sm:$0xff]  ;;  %v10429_v51 = vcombine.low %v5126_v46, %v5130_v34  ;;  %v10421_v5 = vcombine.low %v5118_v30, %v5122_v1  ;;  %v10494_v19 = vcombine.high %v5190_v55, %v5194_v10 }
0x2dd6   :  { %5866 = vmatprep.subr.bf16.mxu1 %v10440_v16  ;;  %v5123_v47 = vld [vmem:[%s15756_s10 + $0xa8] sm:$0xff]  ;;  %v10496_v58 = vcombine.high %v5191_v25, %v5195_v45  ;;  %v10493_v46 = vcombine.low %v5190_v55, %v5194_v10  ;;  %v10495_v34 = vcombine.low %v5191_v25, %v5195_v45  ;;  %v10486_v62 = vcombine.high %v5182_v15, %v5186_v41 }
0x2dd7   :  { %5085 = vrot.lane.b32.xlu0 %v5080_v49, %s13219_s23  ;;  %5867 = vmatpush1.bf16.msra.mxu1 %v10439_v26  ;;  %v10422_v49 = vcombine.high %v5118_v30, %v5122_v1  ;;  %v5187_v16 = vld [vmem:[%s15756_s10 + $0x2a8] sm:$0xff]  ;;  %v5178_v26 = vld [vmem:[%s15756_s10 + $0x260] sm:$0xff]  ;;  %v10485_v30 = vcombine.low %v5182_v15, %v5186_v41 }
0x2dd8   :  { %5868 = vmatprep.subr.bf16.mxu1 %v10432_v39  ;;  %5828 = vmatpush1.bf16.msra.mxu0 %v10429_v51  ;;  %v10488_v32 = vcombine.high %v5183_v27, %v5187_v16  ;;  %v5179_v39 = vld [vmem:[%s15756_s10 + $0x268] sm:$0xff]  ;;  %v10487_v1 = vcombine.low %v5183_v27, %v5187_v16  ;;  %v10477_v51 = vcombine.low %v5174_v37, %v5178_v26 }
0x2dd9   :  { %3089 = vperm.xlu1 %11825, %v3080_v56   ;;  %v10424_v56 = vcombine.high %v5119_v44, %v5123_v47  ;;  %5829 = vmatprep.subr.bf16.mxu0 %v10422_v49  ;;  %v5166_v49 = vld [vmem:[%s15756_s10 + $0x200] sm:$0xff] }
0x2ddb   :  { %3092 = vperm.xlu0 %11826, %v3081_v60   ;;  %v5114_v60 = vld [vmem:[%s15756_s10 + $0x60] sm:$0xff]  ;;  %5869 = vmatpush1.bf16.msra.mxu1 %v10431_v18  ;;  %v10479_v18 = vcombine.low %v5175_v3, %v5179_v39 }
0x2ddc   :  { %v10414_v17 = vcombine.high %v5110_v52, %v5114_v60  ;;  %5870 = vmatprep.subr.bf16.mxu1 %v10424_v56  ;;  %5830 = vmatpush1.bf16.msra.mxu0 %v10421_v5  ;;  %v10413_v43 = vcombine.low %v5110_v52, %v5114_v60  ;;  %v5170_v56 = vld [vmem:[%s15756_s10 + $0x220] sm:$0xff]  ;;  %v5167_v52 = vld [vmem:[%s15756_s10 + $0x208] sm:$0xff] }
0x2ddd   :  { %3095 = vperm.xlu1 %11825, %v3082_v2   ;;  %v5115_v2 = vld [vmem:[%s15756_s10 + $0x68] sm:$0xff]  ;;  %v10470_v60 = vcombine.high %v5166_v49, %v5170_v56 }
0x2dde   :  { %5831 = vmatprep.subr.bf16.mxu0 %v10414_v17  ;;  %v14767_v17 = vld [vmem:[%s15756_s10 + $0x1d0] sm:$0xff] }
0x2ddf   :  { %3101 = vperm.xlu0 %11826, %v3084_v13   ;;  %v10423_v13 = vcombine.low %v5119_v44, %v5123_v47  ;;  %v10478_v44 = vcombine.high %v5174_v37, %v5178_v26  ;;  %v10480_v47 = vcombine.high %v5175_v3, %v5179_v39 }
0x2de0   :  { %5832 = vmatpush1.bf16.msra.mxu0 %v10413_v43  ;;  %v14780_v43 = vld [vmem:[%s15756_s10 + $0x1f8] sm:$0xff] }
0x2de1   :  { %3098 = vperm.xlu1 %11825, %v3083_v12   ;;  %v10416_v12 = vcombine.high %v5111_v31, %v5115_v2  ;;  %5871 = vmatpush1.bf16.msra.mxu1 %v10423_v13 }
0x2de3   :  { %3107 = vperm.xlu0 %11826, %v3086_v57   ;;  %v5102_v57 = vld [vmem:[%s15756_s10] sm:$0xff]  ;;  %5872 = vmatprep.subr.bf16.mxu1 %v10416_v12  ;;  %v14770_v12 = vld [vmem:[%s15756_s10 + $0x1f0] sm:$0xff] }
0x2de4   :  { %v10406_v28 = vcombine.high %v5102_v57, %v5106_v35  ;;  %v10405_v42 = vcombine.low %v5102_v57, %v5106_v35  ;;  %v14773_v57 = vld [vmem:[%s15756_s10 + $0x1d8] sm:$0xff] }
0x2de5   :  { %3104 = vperm.xlu1 %11825, %v3085_v20   ;;  %v5103_v20 = vld [vmem:[%s15756_s10 + $0x8] sm:$0xff] }
0x2de6   :  { %5833 = vmatprep.subr.bf16.mxu0 %v10406_v28  ;;  %v10468_v28 = vcombine.high %v14773_v57, %v14780_v43 }
0x2de7   :  { %5834 = vmatpush1.bf16.msra.mxu0 %v10405_v42 }
0x2de8   :  { %5839 = vmatprep.subr.bf16.mxu0 %v10510_v24 }
0x2de9   :  { %3110 = vperm.xlu1 %11825, %v3087_v8   ;;  %v5107_v8 = vld [vmem:[%s15756_s10 + $0x28] sm:$0xff] }
0x2dea   :  { %v10408_v21 = vcombine.high %v5103_v20, %v5107_v8  ;;  %v10407_v23 = vcombine.low %v5103_v20, %v5107_v8  ;;  %v10465_v20 = vcombine.low %v14767_v17, %v14770_v12  ;;  %v10466_v8 = vcombine.high %v14767_v17, %v14770_v12  ;;  %v5140_v17 = vld [vmem:[%s15756_s10 + $0x130] sm:$0xff]  ;;  %v5137_v12 = vld [vmem:[%s15756_s10 + $0x118] sm:$0xff] }
0x2deb   :  { %5840 = vmatpush2.bf16.msra.mxu0 %v10509_v14 }
0x2dec   :  { %5841 = vmatprep.subr.bf16.mxu0 %v10502_v40  ;;  %v15759_v40 = vld [vmem:[#allocation86_spill] sm:$0xff] }
0x2ded   :  { %3433 = vrot.lane.b32.xlu1 %v3404_v54, %s13200_s15  ;;  %v10415_v54 = vcombine.low %v5111_v31, %v5115_v2  ;;  %v5171_v31 = vld [vmem:[%s15756_s10 + $0x228] sm:$0xff]  ;;  %v10469_v2 = vcombine.low %v5166_v49, %v5170_v56 }
0x2dee   :  { %v10471_v5 = vcombine.low %v5167_v52, %v5171_v31  ;;  %v10472_v13 = vcombine.high %v5167_v52, %v5171_v31  ;;  %v15763_v31 = vld [vmem:[#allocation89_spill] sm:$0xff] }
0x2def   :  { %5873 = vmatpush1.bf16.msra.mxu1 %v10415_v54  ;;  %5842 = vmatpush2.bf16.msra.mxu0 %v10501_v48  ;;  %v10467_v54 = vcombine.low %v14773_v57, %v14780_v43 }
0x2df0   :  { %5874 = vmatprep.subr.bf16.mxu1 %v10408_v21  ;;  %5843 = vmatprep.subr.bf16.mxu0 %v10494_v19 }
0x2df3   :  { %5875 = vmatpush1.bf16.msra.mxu1 %v10407_v23  ;;  %5844 = vmatpush2.bf16.msra.mxu0 %v10493_v46  ;;  %v15757_v23 = vld [vmem:[#allocation84_spill] sm:$0xff] }
0x2df4   :  { %5880 = vmatprep.subr.bf16.mxu1 %v10512_v53  ;;  %5845 = vmatprep.subr.bf16.mxu0 %v10486_v62  ;;  %v15761_v62 = vld [vmem:[#allocation87_spill] sm:$0xff] }
0x2df7   :  { %5881 = vmatpush2.bf16.msra.mxu1 %v10511_v63  ;;  %5846 = vmatpush2.bf16.msra.mxu0 %v10485_v30 }
0x2df8   :  { %5882 = vmatprep.subr.bf16.mxu1 %v10504_v4  ;;  %5847 = vmatprep.subr.bf16.mxu0 %v10478_v44  ;;  %v15762_v44 = vld [vmem:[#allocation90_spill] sm:$0xff] }
0x2dfb   :  { %5883 = vmatpush2.bf16.msra.mxu1 %v10503_v22  ;;  %5848 = vmatpush2.bf16.msra.mxu0 %v10477_v51  ;;  %v15760_v22 = vld [vmem:[#allocation88_spill] sm:$0xff] }
0x2dfc   :  { %5884 = vmatprep.subr.bf16.mxu1 %v10496_v58  ;;  %5849 = vmatprep.subr.bf16.mxu0 %v10470_v60 }
0x2dff   :  { %5885 = vmatpush2.bf16.msra.mxu1 %v10495_v34  ;;  %5850 = vmatpush2.bf16.msra.mxu0 %v10469_v2 }
0x2e00   :  { %5886 = vmatprep.subr.bf16.mxu1 %v10488_v32  ;;  %5901 = vmatprep.subr.bf16.mxu0 %v10466_v8 }
0x2e03   :  { %5887 = vmatpush2.bf16.msra.mxu1 %v10487_v1 }
0x2e04   :  { %5888 = vmatprep.subr.bf16.mxu1 %v10480_v47 }
0x2e07   :  { %5889 = vmatpush2.bf16.msra.mxu1 %v10479_v18 }
0x2e08   :  { %5890 = vmatprep.subr.bf16.mxu1 %v10472_v13 }
0x2e0b   :  { %5891 = vmatpush2.bf16.msra.mxu1 %v10471_v5 }
0x2e0c   :  { %5942 = vmatprep.subr.bf16.mxu1 %v10468_v28 }
0x2e47   :  { %v5084_v35 = vpop.permute.xlu1 %5083 }
0x2e49   :  { %v5086_v21 = vpop.permute.xlu0 %5085 }
0x2e4a   :  { %v5087_v7 = vsel %vm3916_vm9, %v5084_v35, %v5086_v21  ;;  %v5091_v9 = vadd.f32 %v14682_v33, %v5086_v21 }
0x2e4b   :  { %v5090_v50 = vadd.f32 %v14680_v29, %v5087_v7 }
0x2e4d   :  { %v11827_v38 = vpack.i.bf16 %v5091_v9, %v5090_v50 }
0x2e4f   :  { %11828 = vrot.lane.b32.xlu0 %v11827_v38, %s13200_s15 }
0x2e54   :  { %v3090_v42 = vpop.permute.xlu1 %3089 }
0x2e55   :  { %vm3112_vm10 = vcmp.eq.s32.totalorder %v3090_v42, 1 }
0x2e56   :  { %v3120_v24 = vsel %vm3112_vm10, %v15757_v23, -1e+30  ;;  %v3093_v53 = vpop.permute.xlu0 %3092  ;;  %vm3419_vm10 = vcmask 1042434  }
0x2e57   :  { %v3128_v61 = vsel %vm1014_vm5, %v3120_v24, -inf  ;;  %vm3113_vm11 = vcmp.eq.s32.totalorder %v3093_v53, 1  ;;  %v15764_v24 = vld [vmem:[#allocation91_spill] sm:$0xff] }
0x2e58   :  { %v3129_v11 = vrot.slane %v3128_v61, 4  ;;  %v3121_v36 = vsel %vm3113_vm11, %v15758_v0, -1e+30  ;;  %v3096_v14 = vpop.permute.xlu1 %3095 }
0x2e59   :  { %v3135_v33 = vsel %vm1014_vm5, %v3121_v36, -inf  ;;  %vm3114_vm12 = vcmp.eq.s32.totalorder %v3096_v14, 1 }
0x2e5a   :  { %v3130_v63 = vmax.f32 %v3128_v61, %v3129_v11  ;;  %v3136_v29 = vrot.slane %v3135_v33, 4  ;;  %v3122_v4 = vsel %vm3114_vm12, %v15759_v40, -1e+30  ;;  %v3102_v55 = vpop.permute.xlu0 %3101  ;;  %vm3421_vm12 = vcmask 1043459  }
0x2e5b   :  { %v3142_v10 = vsel %vm1014_vm5, %v3122_v4, -inf  ;;  %vm3116_vm13 = vcmp.eq.s32.totalorder %v3102_v55, 1 }
0x2e5c   :  { %v3131_v25 = vrot.slane %v3130_v63, 2  ;;  %v3137_v45 = vmax.f32 %v3135_v33, %v3136_v29  ;;  %v3143_v48 = vrot.slane %v3142_v10, 4  ;;  %v3124_v19 = vsel %vm3116_vm13, %v15760_v22, -1e+30  ;;  %v3099_v58 = vpop.permute.xlu1 %3098 }
0x2e5d   :  { %v3156_v15 = vsel %vm1014_vm5, %v3124_v19, -inf  ;;  %vm3115_vm14 = vcmp.eq.s32.totalorder %v3099_v58, 1  ;;  %vm3423_vm13 = vcmask 1044484  }
0x2e5e   :  { %v3132_v41 = vmax.f32 %v3130_v63, %v3131_v25  ;;  %v3138_v27 = vrot.slane %v3137_v45, 2  ;;  %v3144_v16 = vmax.f32 %v3142_v10, %v3143_v48  ;;  %v3157_v46 = vrot.slane %v3156_v15, 4  ;;  %v3108_v34 = vpop.permute.xlu0 %3107 }
0x2e5f   :  { %v3123_v32 = vsel %vm3115_vm14, %v15761_v62, -1e+30  ;;  %vm3118_vm15 = vcmp.eq.s32.totalorder %v3108_v34, 1  ;;  %vm3425_vm14 = vcmask 1045509  }
0x2e60   :  { %v3133_v37 = vrot.slane %v3132_v41, 1  ;;  %v3139_v26 = vmax.f32 %v3137_v45, %v3138_v27  ;;  %v3145_v3 = vrot.slane %v3144_v16, 2  ;;  %v3158_v39 = vmax.f32 %v3156_v15, %v3157_v46  ;;  %v3105_v30 = vpop.permute.xlu1 %3104 }
0x2e61   :  { %v3149_v1 = vsel %vm1014_vm5, %v3123_v32, -inf  ;;  %v3126_v47 = vsel %vm3118_vm15, %v15762_v44, -1e+30  ;;  %vm3117_vm4 = vcmp.eq.s32.totalorder %v3105_v30, 1  ;;  %vm3427_vm15 = vcmask 1046534   ;;  %v5152_v44 = vld [vmem:[%s15756_s10 + $0x190] sm:$0xff] }
0x2e62   :  { %v3134_v51 = vmax.f32 %v3132_v41, %v3133_v37  ;;  %v3140_v18 = vrot.slane %v3139_v26, 1  ;;  %v3146_v49 = vmax.f32 %v3144_v16, %v3145_v3  ;;  %v3159_v56 = vrot.slane %v3158_v39, 2 }
0x2e63   :  { %v3150_v52 = vrot.slane %v3149_v1, 4  ;;  %v3170_v60 = vsel %vm1014_vm5, %v3126_v47, -inf  ;;  %v3125_v2 = vsel %vm3117_vm4, %v15763_v31, -1e+30  ;;  %vm3429_vm4 = vcmask 1047559  }
0x2e64   :  { %v3141_v5 = vmax.f32 %v3139_v26, %v3140_v18  ;;  %v3147_v13 = vrot.slane %v3146_v49, 1  ;;  %v3171_v35 = vrot.slane %v3170_v60, 4  ;;  %v3111_v8 = vpop.permute.xlu1 %3110  ;;  %v3163_v21 = vsel %vm1014_vm5, %v3125_v2, -inf  ;;  %v5153_v18 = vld [vmem:[%s15756_s10 + $0x198] sm:$0xff] }
0x2e65   :  { %v3151_v28 = vmax.f32 %v3149_v1, %v3150_v52  ;;  %vm3119_vm11 = vcmp.eq.s32.totalorder %v3111_v8, 1  ;;  %v3160_v50 = vmax.f32 %v3158_v39, %v3159_v56  ;;  %v3164_v23 = vrot.slane %v3163_v21, 4 }
0x2e66   :  { %v3418_v7 = vsel %vm3417_vm6, %v3141_v5, %v3134_v51  ;;  %v3148_v9 = vmax.f32 %v3146_v49, %v3147_v13  ;;  %v3172_v38 = vmax.f32 %v3170_v60, %v3171_v35  ;;  %v3127_v53 = vsel %vm3119_vm11, %v15764_v24, -1e+30  ;;  %v5156_v51 = vld [vmem:[%s15756_s10 + $0x1b0] sm:$0xff]  ;;  %v5157_v49 = vld [vmem:[%s15756_s10 + $0x1b8] sm:$0xff] }
0x2e67   :  { %v3152_v42 = vrot.slane %v3151_v28, 2  ;;  %v3177_v0 = vsel %vm1014_vm5, %v3127_v53, -inf  ;;  %v3165_v14 = vmax.f32 %v3163_v21, %v3164_v23  ;;  %v3161_v63 = vrot.slane %v3160_v50, 1  ;;  %v5144_v60 = vld [vmem:[%s15756_s10 + $0x150] sm:$0xff]  ;;  %v5145_v13 = vld [vmem:[%s15756_s10 + $0x158] sm:$0xff] }
0x2e68   :  { %v3420_v61 = vsel %vm3419_vm10, %v3148_v9, %v3418_v7  ;;  %v3173_v11 = vrot.slane %v3172_v38, 2  ;;  %v3178_v33 = vrot.slane %v3177_v0, 4  ;;  %v3434_v3 = vpop.permute.xlu1 %3433  ;;  %v10458_v31 = vcombine.high %v5152_v44, %v5156_v51  ;;  %v5148_v5 = vld [vmem:[%s15756_s10 + $0x170] sm:$0xff]  ;;  %v5149_v35 = vld [vmem:[%s15756_s10 + $0x178] sm:$0xff] }
0x2e69   :  { %v3153_v36 = vmax.f32 %v3151_v28, %v3152_v42  ;;  %v3166_v4 = vrot.slane %v3165_v14, 2  ;;  %v3162_v48 = vmax.f32 %v3160_v50, %v3161_v63  ;;  %v10460_v2 = vcombine.high %v5153_v18, %v5157_v49  ;;  %v5136_v9 = vld [vmem:[%s15756_s10 + $0x110] sm:$0xff]  ;;  %v5129_v23 = vld [vmem:[%s15756_s10 + $0xd8] sm:$0xff] }
0x2e6a   :  { %v3174_v29 = vmax.f32 %v3172_v38, %v3173_v11  ;;  %v3179_v55 = vmax.f32 %v3177_v0, %v3178_v33  ;;  %v10457_v8 = vcombine.low %v5152_v44, %v5156_v51  ;;  %v10459_v28 = vcombine.low %v5153_v18, %v5157_v49  ;;  %v5128_v38 = vld [vmem:[%s15756_s10 + $0xd0] sm:$0xff]  ;;  %v5133_v24 = vld [vmem:[%s15756_s10 + $0xf8] sm:$0xff] }
0x2e6b   :  { %v3154_v40 = vrot.slane %v3153_v36, 1  ;;  %v3167_v25 = vmax.f32 %v3165_v14, %v3166_v4  ;;  %v10450_v21 = vcombine.high %v5144_v60, %v5148_v5  ;;  %v10452_v7 = vcombine.high %v5145_v13, %v5149_v35  ;;  %v5132_v42 = vld [vmem:[%s15756_s10 + $0xf0] sm:$0xff]  ;;  %v5121_v33 = vld [vmem:[%s15756_s10 + $0x98] sm:$0xff] }
0x2e6c   :  { %v3180_v45 = vrot.slane %v3179_v55, 2  ;;  %v3175_v22 = vrot.slane %v3174_v29, 1  ;;  %v10449_v57 = vcombine.low %v5144_v60, %v5148_v5  ;;  %v10451_v43 = vcombine.low %v5145_v13, %v5149_v35  ;;  %v5124_v14 = vld [vmem:[%s15756_s10 + $0xb0] sm:$0xff]  ;;  %v5125_v63 = vld [vmem:[%s15756_s10 + $0xb8] sm:$0xff] }
0x2e6d   :  { %v3155_v10 = vmax.f32 %v3153_v36, %v3154_v40  ;;  %v3168_v58 = vrot.slane %v3167_v25, 1  ;;  %v10441_v53 = vcombine.low %v5136_v9, %v5140_v17  ;;  %v10434_v11 = vcombine.high %v5128_v38, %v5132_v42  ;;  %v5120_v36 = vld [vmem:[%s15756_s10 + $0x90] sm:$0xff]  ;;  %v5205_v60 = vld [vmem:[%s15756_s10 + $0x338] sm:$0xff] }
0x2e6e   :  { %v3181_v15 = vmax.f32 %v3179_v55, %v3180_v45  ;;  %v3176_v46 = vmax.f32 %v3174_v29, %v3175_v22  ;;  %v10436_v0 = vcombine.high %v5129_v23, %v5133_v24  ;;  %v10433_v29 = vcombine.low %v5128_v38, %v5132_v42  ;;  %v5113_v45 = vld [vmem:[%s15756_s10 + $0x58] sm:$0xff]  ;;  %v5200_v18 = vld [vmem:[%s15756_s10 + $0x310] sm:$0xff] }
0x2e6f   :  { %v3422_v19 = vsel %vm3421_vm12, %v3155_v10, %v3420_v61  ;;  %v3169_v27 = vmax.f32 %v3167_v25, %v3168_v58  ;;  %v10435_v40 = vcombine.low %v5129_v23, %v5133_v24  ;;  %v10426_v4 = vcombine.high %v5120_v36, %v5124_v14  ;;  %v5112_v10 = vld [vmem:[%s15756_s10 + $0x50] sm:$0xff] }
0x2e70   :  { %v3424_v41 = vsel %vm3423_vm13, %v3162_v48, %v3422_v19  ;;  %v3182_v16 = vrot.slane %v3181_v15, 1  ;;  %v10428_v55 = vcombine.high %v5121_v33, %v5125_v63  ;;  %v5116_v25 = vld [vmem:[%s15756_s10 + $0x70] sm:$0xff]  ;;  %v5117_v48 = vld [vmem:[%s15756_s10 + $0x78] sm:$0xff]  ;;  %v10425_v22 = vcombine.low %v5120_v36, %v5124_v14 }
0x2e71   :  { %v3426_v62 = vsel %vm3425_vm14, %v3169_v27, %v3424_v41  ;;  %v10427_v19 = vcombine.low %v5121_v33, %v5125_v63  ;;  %v10418_v58 = vcombine.high %v5112_v10, %v5116_v25  ;;  %v5104_v41 = vld [vmem:[%s15756_s10 + $0x10] sm:$0xff] }
0x2e72   :  { %v3183_v34 = vmax.f32 %v3181_v15, %v3182_v16  ;;  %v3428_v32 = vsel %vm3427_vm15, %v3176_v46, %v3426_v62  ;;  %v10420_v15 = vcombine.high %v5113_v45, %v5117_v48  ;;  %v5108_v27 = vld [vmem:[%s15756_s10 + $0x30] sm:$0xff]  ;;  %v5105_v16 = vld [vmem:[%s15756_s10 + $0x18] sm:$0xff]  ;;  %v10419_v62 = vcombine.low %v5113_v45, %v5117_v48 }
0x2e73   :  { %v5109_v46 = vld [vmem:[%s15756_s10 + $0x38] sm:$0xff]  ;;  %v5204_v49 = vld [vmem:[%s15756_s10 + $0x330] sm:$0xff] }
0x2e74   :  { %v3430_v37 = vsel %vm3429_vm4, %v3183_v34, %v3428_v32  ;;  %v10417_v34 = vcombine.low %v5112_v10, %v5116_v25  ;;  %v10410_v32 = vcombine.high %v5104_v41, %v5108_v27  ;;  %v10411_v44 = vcombine.low %v5105_v16, %v5109_v46  ;;  %v5192_v35 = vld [vmem:[%s15756_s10 + $0x2d0] sm:$0xff] }
0x2e75   :  { %v3436_v1 = vsel %vm1014_vm5, %v3430_v37, %v3434_v3  ;;  %v10412_v37 = vcombine.high %v5105_v16, %v5109_v46  ;;  %v5212_v3 = vld [vmem:[%s15756_s10 + $0x370] sm:$0xff]  ;;  %v10506_v5 = vcombine.high %v5200_v18, %v5204_v49  ;;  %v11971_v16 = vld [vmem:[#allocation6 + $0x164] ss:$8 sps:$4 sm:$0xff]  }
0x2e76   :  { %v14812_v52 = vpack.c.bf16 %v3436_v1, %v3436_v1  ;;  %v10409_v1 = vcombine.low %v5104_v41, %v5108_v27  ;;  %v5176_v24 = vld [vmem:[%s15756_s10 + $0x250] sm:$0xff]  ;;  %v11963_v41 = vld [vmem:[#allocation6 + $0x170] ss:$8 sps:$4 sm:$0xff]   ;;  %v11968_v27 = vld [vmem:[#allocation6 + $0x64] ss:$8 sps:$4 sm:$0xff]  }
0x2e77   :  { %v5168_v63 = vld [vmem:[%s15756_s10 + $0x210] sm:$0xff] }
0x2e78   :  { %15765 = vst [vmem:[#allocation84_spill] sm:$0xff] %v14812_v52  ;;  %v11966_v46 = vld [vmem:[#allocation6 + $0x60] ss:$8 sps:$4 sm:$0xff]  }
0x2ec1   :  { %v11829_v26 = vpop.permute.xlu0 %11828 }
0x2ec2   :  { %v11831_v39 = vunpack.i.h.bf16 %v11829_v26  ;;  %v11830_v30 = vunpack.i.l.bf16 %v11829_v26  ;;  %v5208_v26 = vld [vmem:[%s15756_s10 + $0x350] sm:$0xff] }
0x2ec4   :  { %v5098_v47 = vsel %vm1014_vm5, %v11830_v30, %v11831_v39  ;;  %v5209_v39 = vld [vmem:[%s15756_s10 + $0x358] sm:$0xff] }
0x2ec5   :  { %v5101_v56 = vpack.c.bf16 %v5098_v47, %v5098_v47  ;;  %v5213_v30 = vld [vmem:[%s15756_s10 + $0x378] sm:$0xff]  ;;  %v10514_v47 = vcombine.high %v5208_v26, %v5212_v3 }
0x2ec6   :  { %v10516_v51 = vcombine.high %v5209_v39, %v5213_v30 }
0x2ec7   :  { %10517 = vmatprep.mubr.msk.bf16.mxu0 %vm3916_vm9, %v5101_v56  ;;  %10518 = vmatprep.mubr.msk.bf16.mxu1 %vm3916_vm9, %v5101_v56 }
0x2ec8   :  { %5852 = vmatmul.mubr.bf16.vlgmr.msra.gmra.mxu0 %v14812_v52  ;;  %5893 = vmatmul.mubr.bf16.vlgmr.msra.gmra.mxu1 %v14812_v52 }
0x2ec9   :  { %5902 = vmatpush1.bf16.msra.mxu0 %v10465_v20  ;;  %5943 = vmatpush1.bf16.msra.mxu1 %v10467_v54  ;;  %v5141_v20 = vld [vmem:[%s15756_s10 + $0x138] sm:$0xff]  ;;  %v10442_v54 = vcombine.high %v5136_v9, %v5140_v17 }
0x2eca   :  { %10519 = vmatprep.mubr.msk.bf16.mxu0 %vm3916_vm9, %v5101_v56  ;;  %10520 = vmatprep.mubr.msk.bf16.mxu1 %vm3916_vm9, %v5101_v56  ;;  %v10444_v50 = vcombine.high %v5137_v12, %v5141_v20  ;;  %v10443_v61 = vcombine.low %v5137_v12, %v5141_v20  ;;  %v5201_v56 = vld [vmem:[%s15756_s10 + $0x318] sm:$0xff]  ;;  %v5184_v20 = vld [vmem:[%s15756_s10 + $0x290] sm:$0xff] }
0x2ecb   :  { %5903 = vmatprep.subr.bf16.mxu0 %v10458_v31  ;;  %5944 = vmatprep.subr.bf16.mxu1 %v10460_v2  ;;  %v10513_v31 = vcombine.low %v5208_v26, %v5212_v3  ;;  %v10515_v2 = vcombine.low %v5209_v39, %v5213_v30  ;;  %v10508_v13 = vcombine.high %v5201_v56, %v5205_v60  ;;  %v11975_v26 = vld [vmem:[#allocation6 + $0x150] ss:$8 sps:$4 sm:$0xff]   ;;  %v11980_v3 = vld [vmem:[#allocation6 + $0x44] ss:$8 sps:$4 sm:$0xff]   ;;  %v11978_v30 = vld [vmem:[#allocation6 + $0x40] ss:$8 sps:$4 sm:$0xff]  }
0x2ecc   :  { %v10507_v9 = vcombine.low %v5201_v56, %v5205_v60  ;;  %v11983_v39 = vld [vmem:[#allocation6 + $0x144] ss:$8 sps:$4 sm:$0xff]   ;;  %v11990_v60 = vld [vmem:[#allocation6 + $0x20] ss:$8 sps:$4 sm:$0xff]  }
0x2ecd   :  { %5904 = vmatpush1.bf16.msra.mxu0 %v10457_v8  ;;  %5945 = vmatpush1.bf16.msra.mxu1 %v10459_v28  ;;  %v5196_v8 = vld [vmem:[%s15756_s10 + $0x2f0] sm:$0xff]  ;;  %v5193_v28 = vld [vmem:[%s15756_s10 + $0x2d8] sm:$0xff] }
0x2ece   :  { %5905 = vmatprep.subr.bf16.mxu0 %v10450_v21  ;;  %5946 = vmatprep.subr.bf16.mxu1 %v10452_v7  ;;  %v5197_v21 = vld [vmem:[%s15756_s10 + $0x2f8] sm:$0xff]  ;;  %v10505_v7 = vcombine.low %v5200_v18, %v5204_v49  ;;  %v10498_v17 = vcombine.high %v5192_v35, %v5196_v8  ;;  %v11987_v18 = vld [vmem:[#allocation6 + $0x130] ss:$8 sps:$4 sm:$0xff]  }
0x2ecf   :  { %v10500_v12 = vcombine.high %v5193_v28, %v5197_v21  ;;  %v10499_v38 = vcombine.low %v5193_v28, %v5197_v21  ;;  %v11992_v49 = vld [vmem:[#allocation6 + $0x24] ss:$8 sps:$4 sm:$0xff]   ;;  %v12002_v21 = vld [vmem:[#allocation6] ss:$8 sps:$4 sm:$0xff]  }
0x2ed0   :  { %v11995_v56 = vld [vmem:[#allocation6 + $0x124] ss:$8 sps:$4 sm:$0xff]  }
0x2ed1   :  { %5906 = vmatpush1.bf16.msra.mxu0 %v10449_v57  ;;  %5947 = vmatpush1.bf16.msra.mxu1 %v10451_v43  ;;  %v5188_v57 = vld [vmem:[%s15756_s10 + $0x2b0] sm:$0xff]  ;;  %v5185_v43 = vld [vmem:[%s15756_s10 + $0x298] sm:$0xff] }
0x2ed2   :  { %5907 = vmatprep.subr.bf16.mxu0 %v10442_v54  ;;  %5948 = vmatprep.subr.bf16.mxu1 %v10444_v50  ;;  %v5189_v54 = vld [vmem:[%s15756_s10 + $0x2b8] sm:$0xff]  ;;  %v10497_v50 = vcombine.low %v5192_v35, %v5196_v8  ;;  %v10490_v42 = vcombine.high %v5184_v20, %v5188_v57  ;;  %v11999_v35 = vld [vmem:[#allocation6 + $0x110] ss:$8 sps:$4 sm:$0xff]  }
0x2ed3   :  { %v10492_v23 = vcombine.high %v5185_v43, %v5189_v54  ;;  %v10491_v36 = vcombine.low %v5185_v43, %v5189_v54  ;;  %v12004_v8 = vld [vmem:[#allocation6 + $0x4] ss:$8 sps:$4 sm:$0xff]   ;;  %v12014_v54 = vld [vmem:[#allocation6 + $0xe0] ss:$8 sps:$4 sm:$0xff]  }
0x2ed4   :  { %v12007_v28 = vld [vmem:[#allocation6 + $0x104] ss:$8 sps:$4 sm:$0xff]  }
0x2ed5   :  { %5908 = vmatpush1.bf16.msra.mxu0 %v10441_v53  ;;  %5949 = vmatpush1.bf16.msra.mxu1 %v10443_v61  ;;  %v5180_v53 = vld [vmem:[%s15756_s10 + $0x270] sm:$0xff]  ;;  %v5177_v61 = vld [vmem:[%s15756_s10 + $0x258] sm:$0xff] }
0x2ed6   :  { %5909 = vmatprep.subr.bf16.mxu0 %v10434_v11  ;;  %5950 = vmatprep.subr.bf16.mxu1 %v10436_v0  ;;  %v5181_v11 = vld [vmem:[%s15756_s10 + $0x278] sm:$0xff]  ;;  %v10489_v0 = vcombine.low %v5184_v20, %v5188_v57  ;;  %v10482_v14 = vcombine.high %v5176_v24, %v5180_v53  ;;  %v12011_v20 = vld [vmem:[#allocation6 + $0x1f0] ss:$8 sps:$4 sm:$0xff]  }
0x2ed7   :  { %v10484_v33 = vcombine.high %v5177_v61, %v5181_v11  ;;  %v10483_v10 = vcombine.low %v5177_v61, %v5181_v11  ;;  %v12016_v57 = vld [vmem:[#allocation6 + $0xe4] ss:$8 sps:$4 sm:$0xff]   ;;  %v12026_v11 = vld [vmem:[#allocation6 + $0xc0] ss:$8 sps:$4 sm:$0xff]  }
0x2ed8   :  { %v12019_v43 = vld [vmem:[#allocation6 + $0x1e4] ss:$8 sps:$4 sm:$0xff]  }
0x2ed9   :  { %5910 = vmatpush1.bf16.msra.mxu0 %v10433_v29  ;;  %5951 = vmatpush1.bf16.msra.mxu1 %v10435_v40  ;;  %v5172_v29 = vld [vmem:[%s15756_s10 + $0x230] sm:$0xff]  ;;  %v5169_v40 = vld [vmem:[%s15756_s10 + $0x218] sm:$0xff] }
0x2eda   :  { %5911 = vmatprep.subr.bf16.mxu0 %v10426_v4  ;;  %5952 = vmatprep.subr.bf16.mxu1 %v10428_v55  ;;  %v5173_v4 = vld [vmem:[%s15756_s10 + $0x238] sm:$0xff]  ;;  %v10481_v55 = vcombine.low %v5176_v24, %v5180_v53  ;;  %v10474_v25 = vcombine.high %v5168_v63, %v5172_v29  ;;  %v10473_v48 = vcombine.low %v5168_v63, %v5172_v29  ;;  %v12023_v24 = vld [vmem:[#allocation6 + $0x1d0] ss:$8 sps:$4 sm:$0xff]  }
0x2edb   :  { %v10476_v45 = vcombine.high %v5169_v40, %v5173_v4  ;;  %v12028_v53 = vld [vmem:[#allocation6 + $0xc4] ss:$8 sps:$4 sm:$0xff]   ;;  %v12035_v63 = vld [vmem:[#allocation6 + $0x1b0] ss:$8 sps:$4 sm:$0xff]  }
0x2edc   :  { %v12031_v61 = vld [vmem:[#allocation6 + $0x1c4] ss:$8 sps:$4 sm:$0xff]  }
0x2edd   :  { %5912 = vmatpush1.bf16.msra.mxu0 %v10425_v22  ;;  %5953 = vmatpush1.bf16.msra.mxu1 %v10427_v19  ;;  %v10475_v22 = vcombine.low %v5169_v40, %v5173_v4  ;;  %v11962_v19 = vld [vmem:[#allocation6 + $0x74] ss:$8 sps:$4 sm:$0xff]   ;;  %v12040_v29 = vld [vmem:[#allocation6 + $0xa4] ss:$8 sps:$4 sm:$0xff]   ;;  %v12038_v4 = vld [vmem:[#allocation6 + $0xa0] ss:$8 sps:$4 sm:$0xff]  }
0x2ede   :  { %5913 = vmatprep.subr.bf16.mxu0 %v10418_v58  ;;  %5954 = vmatprep.subr.bf16.mxu1 %v10420_v15  ;;  %v11965_v58 = vld [vmem:[#allocation6 + $0x174] ss:$8 sps:$4 sm:$0xff]   ;;  %v11960_v15 = vld [vmem:[#allocation6 + $0x70] ss:$8 sps:$4 sm:$0xff]   ;;  %v12043_v40 = vld [vmem:[#allocation6 + $0x1a4] ss:$8 sps:$4 sm:$0xff]  }
0x2ee1   :  { %5914 = vmatpush1.bf16.msra.mxu0 %v10417_v34  ;;  %5955 = vmatpush1.bf16.msra.mxu1 %v10419_v62  ;;  %v11969_v34 = vld [vmem:[#allocation6 + $0x160] ss:$8 sps:$4 sm:$0xff]   ;;  %v11974_v62 = vld [vmem:[#allocation6 + $0x54] ss:$8 sps:$4 sm:$0xff]  }
0x2ee2   :  { %5915 = vmatprep.subr.bf16.mxu0 %v10410_v32  ;;  %5956 = vmatprep.subr.bf16.mxu1 %v10412_v37  ;;  %v11977_v32 = vld [vmem:[#allocation6 + $0x154] ss:$8 sps:$4 sm:$0xff]   ;;  %v11972_v37 = vld [vmem:[#allocation6 + $0x50] ss:$8 sps:$4 sm:$0xff]  }
0x2ee5   :  { %5916 = vmatpush1.bf16.msra.mxu0 %v10409_v1  ;;  %5957 = vmatpush1.bf16.msra.mxu1 %v10411_v44  ;;  %v11981_v1 = vld [vmem:[#allocation6 + $0x140] ss:$8 sps:$4 sm:$0xff]   ;;  %v11986_v44 = vld [vmem:[#allocation6 + $0x34] ss:$8 sps:$4 sm:$0xff]  }
0x2ee6   :  { %5921 = vmatprep.subr.bf16.mxu0 %v10514_v47  ;;  %5962 = vmatprep.subr.bf16.mxu1 %v10516_v51  ;;  %v11989_v47 = vld [vmem:[#allocation6 + $0x134] ss:$8 sps:$4 sm:$0xff]   ;;  %v11984_v51 = vld [vmem:[#allocation6 + $0x30] ss:$8 sps:$4 sm:$0xff]  }
0x2ee9   :  { %5922 = vmatpush2.bf16.msra.mxu0 %v10513_v31  ;;  %5963 = vmatpush2.bf16.msra.mxu1 %v10515_v2  ;;  %v11993_v31 = vld [vmem:[#allocation6 + $0x120] ss:$8 sps:$4 sm:$0xff]   ;;  %v11998_v2 = vld [vmem:[#allocation6 + $0x14] ss:$8 sps:$4 sm:$0xff]  }
0x2eea   :  { %5923 = vmatprep.subr.bf16.mxu0 %v10506_v5  ;;  %5964 = vmatprep.subr.bf16.mxu1 %v10508_v13  ;;  %v12001_v5 = vld [vmem:[#allocation6 + $0x114] ss:$8 sps:$4 sm:$0xff]   ;;  %v11996_v13 = vld [vmem:[#allocation6 + $0x10] ss:$8 sps:$4 sm:$0xff]  }
0x2eed   :  { %5924 = vmatpush2.bf16.msra.mxu0 %v10505_v7  ;;  %5965 = vmatpush2.bf16.msra.mxu1 %v10507_v9  ;;  %v12005_v7 = vld [vmem:[#allocation6 + $0x100] ss:$8 sps:$4 sm:$0xff]   ;;  %v12010_v9 = vld [vmem:[#allocation6 + $0xf4] ss:$8 sps:$4 sm:$0xff]  }
0x2eee   :  { %5925 = vmatprep.subr.bf16.mxu0 %v10498_v17  ;;  %5966 = vmatprep.subr.bf16.mxu1 %v10500_v12  ;;  %v12013_v17 = vld [vmem:[#allocation6 + $0x1f4] ss:$8 sps:$4 sm:$0xff]   ;;  %v12008_v12 = vld [vmem:[#allocation6 + $0xf0] ss:$8 sps:$4 sm:$0xff]  }
0x2ef1   :  { %5926 = vmatpush2.bf16.msra.mxu0 %v10497_v50  ;;  %5967 = vmatpush2.bf16.msra.mxu1 %v10499_v38  ;;  %v12017_v50 = vld [vmem:[#allocation6 + $0x1e0] ss:$8 sps:$4 sm:$0xff]   ;;  %v12022_v38 = vld [vmem:[#allocation6 + $0xd4] ss:$8 sps:$4 sm:$0xff]  }
0x2ef2   :  { %5927 = vmatprep.subr.bf16.mxu0 %v10490_v42  ;;  %5968 = vmatprep.subr.bf16.mxu1 %v10492_v23  ;;  %v12025_v42 = vld [vmem:[#allocation6 + $0x1d4] ss:$8 sps:$4 sm:$0xff]   ;;  %v12020_v23 = vld [vmem:[#allocation6 + $0xd0] ss:$8 sps:$4 sm:$0xff]  }
0x2ef5   :  { %5928 = vmatpush2.bf16.msra.mxu0 %v10489_v0  ;;  %5969 = vmatpush2.bf16.msra.mxu1 %v10491_v36  ;;  %v12029_v0 = vld [vmem:[#allocation6 + $0x1c0] ss:$8 sps:$4 sm:$0xff]   ;;  %v12034_v36 = vld [vmem:[#allocation6 + $0xb4] ss:$8 sps:$4 sm:$0xff]  }
0x2ef6   :  { %5929 = vmatprep.subr.bf16.mxu0 %v10482_v14  ;;  %5970 = vmatprep.subr.bf16.mxu1 %v10484_v33  ;;  %v12037_v14 = vld [vmem:[#allocation6 + $0x1b4] ss:$8 sps:$4 sm:$0xff]   ;;  %v12032_v33 = vld [vmem:[#allocation6 + $0xb0] ss:$8 sps:$4 sm:$0xff]  }
0x2ef9   :  { %5930 = vmatpush2.bf16.msra.mxu0 %v10481_v55  ;;  %5971 = vmatpush2.bf16.msra.mxu1 %v10483_v10  ;;  %v12041_v55 = vld [vmem:[#allocation6 + $0x1a0] ss:$8 sps:$4 sm:$0xff]   ;;  %v12046_v10 = vld [vmem:[#allocation6 + $0x94] ss:$8 sps:$4 sm:$0xff]  }
0x2efa   :  { %5931 = vmatprep.subr.bf16.mxu0 %v10474_v25  ;;  %5972 = vmatprep.subr.bf16.mxu1 %v10476_v45  ;;  %v12049_v25 = vld [vmem:[#allocation6 + $0x194] ss:$8 sps:$4 sm:$0xff]   ;;  %v12044_v45 = vld [vmem:[#allocation6 + $0x90] ss:$8 sps:$4 sm:$0xff]  }
0x2efd   :  { %5932 = vmatpush2.bf16.msra.mxu0 %v10473_v48  ;;  %5973 = vmatpush2.bf16.msra.mxu1 %v10475_v22  ;;  %v12047_v48 = vld [vmem:[#allocation6 + $0x190] ss:$8 sps:$4 sm:$0xff]   ;;  %v12052_v22 = vld [vmem:[#allocation6 + $0x84] ss:$8 sps:$4 sm:$0xff]  }
0x2efe   :  { %6391 = vmatprep.subr.bf16.mxu0 %v11962_v19  ;;  %6432 = vmatprep.subr.bf16.mxu1 %v11965_v58  ;;  %v12055_v19 = vld [vmem:[#allocation6 + $0x184] ss:$8 sps:$4 sm:$0xff]   ;;  %v12050_v58 = vld [vmem:[#allocation6 + $0x80] ss:$8 sps:$4 sm:$0xff]  }
0x2f00   :  { %5934 = vmatmul.mubr.bf16.vlgmr.msra.gmra.mxu0 %v14812_v52  ;;  %5975 = vmatmul.mubr.bf16.vlgmr.msra.gmra.mxu1 %v14812_v52 }
0x2f01   :  { %6392 = vmatpush1.bf16.msra.mxu0 %v11960_v15  ;;  %6433 = vmatpush1.bf16.msra.mxu1 %v11963_v41  ;;  %v12053_v15 = vld [vmem:[#allocation6 + $0x180] ss:$8 sps:$4 sm:$0xff]  }
0x2f02   :  { %6393 = vmatprep.subr.bf16.mxu0 %v11968_v27  ;;  %6434 = vmatprep.subr.bf16.mxu1 %v11971_v16  ;;  %v12058_v41 = vld [vmem:[#allocation9 + $0x74] ss:$8 sps:$4 sm:$0xff]   ;;  %v14876_v16 = vld [vmem:[#allocation2] sm:$0xff] }
0x2f03   :  { %v12061_v27 = vld [vmem:[#allocation9 + $0x174] ss:$8 sps:$4 sm:$0xff]  }
0x2f05   :  { %6394 = vmatpush1.bf16.msra.mxu0 %v11966_v46  ;;  %6435 = vmatpush1.bf16.msra.mxu1 %v11969_v34  ;;  %v15766_v46 = vld [vmem:[#allocation77_spill] sm:$0xff] }
0x2f06   :  { %6395 = vmatprep.subr.bf16.mxu0 %v11974_v62  ;;  %6436 = vmatprep.subr.bf16.mxu1 %v11977_v32  ;;  %v5219_v34 = vrot.slane %v14876_v16, %v15766_v46  ;;  %v15767_v62 = vld [vmem:[#allocation79_spill] sm:$0xff] }
0x2f07   :  { %v5227_v32 = vrot.slane %v14876_v16, %v15767_v62 }
0x2f09   :  { %6396 = vmatpush1.bf16.msra.mxu0 %v11972_v37  ;;  %6437 = vmatpush1.bf16.msra.mxu1 %v11975_v26  ;;  %v15768_v37 = vld [vmem:[#allocation78_spill] sm:$0xff] }
0x2f0a   :  { %6397 = vmatprep.subr.bf16.mxu0 %v11980_v3  ;;  %6438 = vmatprep.subr.bf16.mxu1 %v11983_v39  ;;  %v5223_v26 = vrot.slane %v14876_v16, %v15768_v37  ;;  %v15769_v3 = vld [vmem:[#allocation76_spill] sm:$0xff] }
0x2f0b   :  { %v15770_v39 = vsub.s32 3, %v15769_v3  ;;  %v12112_v3 = vld [vmem:[#allocation9 + $0xe4] ss:$8 sps:$4 sm:$0xff]  }
0x2f0d   :  { %6398 = vmatpush1.bf16.msra.mxu0 %v11978_v30  ;;  %6439 = vmatpush1.bf16.msra.mxu1 %v11981_v1  ;;  %v5231_v30 = vrot.slane %v14876_v16, %v15770_v39  ;;  %v12115_v39 = vld [vmem:[#allocation9 + $0x1e4] ss:$8 sps:$4 sm:$0xff]  }
0x2f0e   :  { %6399 = vmatprep.subr.bf16.mxu0 %v11986_v44  ;;  %6440 = vmatprep.subr.bf16.mxu1 %v11989_v47 }
0x2f11   :  { %6400 = vmatpush1.bf16.msra.mxu0 %v11984_v51  ;;  %6441 = vmatpush1.bf16.msra.mxu1 %v11987_v18 }
0x2f12   :  { %6401 = vmatprep.subr.bf16.mxu0 %v11992_v49  ;;  %6442 = vmatprep.subr.bf16.mxu1 %v11995_v56 }
0x2f15   :  { %6402 = vmatpush1.bf16.msra.mxu0 %v11990_v60  ;;  %6443 = vmatpush1.bf16.msra.mxu1 %v11993_v31 }
0x2f16   :  { %6403 = vmatprep.subr.bf16.mxu0 %v11998_v2  ;;  %6444 = vmatprep.subr.bf16.mxu1 %v12001_v5 }
0x2f19   :  { %6404 = vmatpush1.bf16.msra.mxu0 %v11996_v13  ;;  %6445 = vmatpush1.bf16.msra.mxu1 %v11999_v35 }
0x2f1a   :  { %6405 = vmatprep.subr.bf16.mxu0 %v12004_v8  ;;  %6446 = vmatprep.subr.bf16.mxu1 %v12007_v28 }
0x2f1d   :  { %6406 = vmatpush1.bf16.msra.mxu0 %v12002_v21  ;;  %6447 = vmatpush1.bf16.msra.mxu1 %v12005_v7 }
0x2f1e   :  { %6407 = vmatprep.subr.bf16.mxu0 %v12010_v9  ;;  %6448 = vmatprep.subr.bf16.mxu1 %v12013_v17  ;;  %v12056_v17 = vld [vmem:[#allocation9 + $0x70] ss:$8 sps:$4 sm:$0xff]  }
0x2f21   :  { %6408 = vmatpush2.bf16.msra.mxu0 %v12008_v12  ;;  %6449 = vmatpush2.bf16.msra.mxu1 %v12011_v20  ;;  %v12059_v12 = vld [vmem:[#allocation9 + $0x170] ss:$8 sps:$4 sm:$0xff]  }
0x2f22   :  { %6409 = vmatprep.subr.bf16.mxu0 %v12016_v57  ;;  %6450 = vmatprep.subr.bf16.mxu1 %v12019_v43  ;;  %v12064_v43 = vld [vmem:[#allocation9 + $0x64] ss:$8 sps:$4 sm:$0xff]  }
0x2f25   :  { %6410 = vmatpush2.bf16.msra.mxu0 %v12014_v54  ;;  %6451 = vmatpush2.bf16.msra.mxu1 %v12017_v50  ;;  %v12067_v54 = vld [vmem:[#allocation9 + $0x164] ss:$8 sps:$4 sm:$0xff]   ;;  %v12062_v50 = vld [vmem:[#allocation9 + $0x60] ss:$8 sps:$4 sm:$0xff]  }
0x2f26   :  { %6411 = vmatprep.subr.bf16.mxu0 %v12022_v38  ;;  %6452 = vmatprep.subr.bf16.mxu1 %v12025_v42  ;;  %v12065_v38 = vld [vmem:[#allocation9 + $0x160] ss:$8 sps:$4 sm:$0xff]   ;;  %v12070_v42 = vld [vmem:[#allocation9 + $0x54] ss:$8 sps:$4 sm:$0xff]  }
0x2f29   :  { %6412 = vmatpush2.bf16.msra.mxu0 %v12020_v23  ;;  %6453 = vmatpush2.bf16.msra.mxu1 %v12023_v24  ;;  %v12073_v23 = vld [vmem:[#allocation9 + $0x154] ss:$8 sps:$4 sm:$0xff]   ;;  %v12068_v24 = vld [vmem:[#allocation9 + $0x50] ss:$8 sps:$4 sm:$0xff]  }
0x2f2a   :  { %6413 = vmatprep.subr.bf16.mxu0 %v12028_v53  ;;  %6454 = vmatprep.subr.bf16.mxu1 %v12031_v61  ;;  %v12071_v53 = vld [vmem:[#allocation9 + $0x150] ss:$8 sps:$4 sm:$0xff]   ;;  %v12076_v61 = vld [vmem:[#allocation9 + $0x44] ss:$8 sps:$4 sm:$0xff]  }
0x2f2d   :  { %6414 = vmatpush2.bf16.msra.mxu0 %v12026_v11  ;;  %6455 = vmatpush2.bf16.msra.mxu1 %v12029_v0  ;;  %v12079_v11 = vld [vmem:[#allocation9 + $0x144] ss:$8 sps:$4 sm:$0xff]   ;;  %v12074_v0 = vld [vmem:[#allocation9 + $0x40] ss:$8 sps:$4 sm:$0xff]  }
0x2f2e   :  { %6415 = vmatprep.subr.bf16.mxu0 %v12034_v36  ;;  %6456 = vmatprep.subr.bf16.mxu1 %v12037_v14  ;;  %v12077_v36 = vld [vmem:[#allocation9 + $0x140] ss:$8 sps:$4 sm:$0xff]   ;;  %v12082_v14 = vld [vmem:[#allocation9 + $0x34] ss:$8 sps:$4 sm:$0xff]  }
0x2f31   :  { %6416 = vmatpush2.bf16.msra.mxu0 %v12032_v33  ;;  %6457 = vmatpush2.bf16.msra.mxu1 %v12035_v63  ;;  %v12085_v33 = vld [vmem:[#allocation9 + $0x134] ss:$8 sps:$4 sm:$0xff]   ;;  %v12080_v63 = vld [vmem:[#allocation9 + $0x30] ss:$8 sps:$4 sm:$0xff]  }
0x2f32   :  { %6417 = vmatprep.subr.bf16.mxu0 %v12040_v29  ;;  %6458 = vmatprep.subr.bf16.mxu1 %v12043_v40  ;;  %v12083_v29 = vld [vmem:[#allocation9 + $0x130] ss:$8 sps:$4 sm:$0xff]   ;;  %v12088_v40 = vld [vmem:[#allocation9 + $0x24] ss:$8 sps:$4 sm:$0xff]  }
0x2f35   :  { %6418 = vmatpush2.bf16.msra.mxu0 %v12038_v4  ;;  %6459 = vmatpush2.bf16.msra.mxu1 %v12041_v55  ;;  %v12091_v4 = vld [vmem:[#allocation9 + $0x124] ss:$8 sps:$4 sm:$0xff]   ;;  %v12086_v55 = vld [vmem:[#allocation9 + $0x20] ss:$8 sps:$4 sm:$0xff]  }
0x2f36   :  { %6419 = vmatprep.subr.bf16.mxu0 %v12046_v10  ;;  %6460 = vmatprep.subr.bf16.mxu1 %v12049_v25  ;;  %v12089_v10 = vld [vmem:[#allocation9 + $0x120] ss:$8 sps:$4 sm:$0xff]   ;;  %v12094_v25 = vld [vmem:[#allocation9 + $0x14] ss:$8 sps:$4 sm:$0xff]  }
0x2f39   :  { %6420 = vmatpush2.bf16.msra.mxu0 %v12044_v45  ;;  %6461 = vmatpush2.bf16.msra.mxu1 %v12047_v48  ;;  %v12097_v45 = vld [vmem:[#allocation9 + $0x114] ss:$8 sps:$4 sm:$0xff]   ;;  %v12092_v48 = vld [vmem:[#allocation9 + $0x10] ss:$8 sps:$4 sm:$0xff]  }
0x2f3a   :  { %6421 = vmatprep.subr.bf16.mxu0 %v12052_v22  ;;  %6462 = vmatprep.subr.bf16.mxu1 %v12055_v19  ;;  %v12095_v22 = vld [vmem:[#allocation9 + $0x110] ss:$8 sps:$4 sm:$0xff]   ;;  %v12100_v19 = vld [vmem:[#allocation9 + $0x4] ss:$8 sps:$4 sm:$0xff]  }
0x2f3d   :  { %6422 = vmatpush2.bf16.msra.mxu0 %v12050_v58  ;;  %6463 = vmatpush2.bf16.msra.mxu1 %v12053_v15  ;;  %v12103_v58 = vld [vmem:[#allocation9 + $0x104] ss:$8 sps:$4 sm:$0xff]   ;;  %v12098_v15 = vld [vmem:[#allocation9] ss:$8 sps:$4 sm:$0xff]  }
0x2f3e   :  { %6875 = vmatprep.subr.bf16.mxu0 %v12058_v41  ;;  %6916 = vmatprep.subr.bf16.mxu1 %v12061_v27  ;;  %v12101_v41 = vld [vmem:[#allocation9 + $0x100] ss:$8 sps:$4 sm:$0xff]   ;;  %v12106_v27 = vld [vmem:[#allocation9 + $0xf4] ss:$8 sps:$4 sm:$0xff]  }
0x2f88   :  { %v5853_v1 = vpop.f32.mrf.mxu0  ;;  %v5894_v44 = vpop.f32.mrf.mxu1 }
0x2f89   :  { %v5854_v47 = vadd.f32 %v5853_v1, %v5219_v34  ;;  %v5895_v51 = vadd.f32 %v5894_v44, %v5227_v32  ;;  %v12109_v34 = vld [vmem:[#allocation9 + $0x1f4] ss:$8 sps:$4 sm:$0xff]   ;;  %v12104_v32 = vld [vmem:[#allocation9 + $0xf0] ss:$8 sps:$4 sm:$0xff]   ;;  %v12113_v1 = vld [vmem:[#allocation9 + $0x1e0] ss:$8 sps:$4 sm:$0xff]  }
0x2f8a   :  { %v5855_v18 = vpop.f32.mrf.mxu0  ;;  %v5896_v49 = vpop.f32.mrf.mxu1  ;;  %v12118_v44 = vld [vmem:[#allocation9 + $0xd4] ss:$8 sps:$4 sm:$0xff]  }
0x2f8b   :  { %v5856_v56 = vadd.f32 %v5855_v18, %v5223_v26  ;;  %v5897_v60 = vadd.f32 %v5896_v49, %v5231_v30  ;;  %v5983_v31 = vmax.f32 %v5854_v47, 0.0  ;;  %v5985_v2 = vmax.f32 %v5895_v51, 0.0  ;;  %v12107_v26 = vld [vmem:[#allocation9 + $0x1f0] ss:$8 sps:$4 sm:$0xff]   ;;  %v12110_v30 = vld [vmem:[#allocation9 + $0xe0] ss:$8 sps:$4 sm:$0xff]  }
0x2f8c   :  { %v5857_v5 = vpop.f32.mrf.mxu0  ;;  %v5898_v13 = vpop.f32.mrf.mxu1  ;;  %v12121_v47 = vld [vmem:[#allocation9 + $0x1d4] ss:$8 sps:$4 sm:$0xff]   ;;  %v12116_v51 = vld [vmem:[#allocation9 + $0xd0] ss:$8 sps:$4 sm:$0xff]   ;;  %v12124_v49 = vld [vmem:[#allocation9 + $0xc4] ss:$8 sps:$4 sm:$0xff]  }
0x2f8d   :  { %v5984_v35 = vmax.f32 %v5856_v56, 0.0  ;;  %v5986_v8 = vmax.f32 %v5897_v60, 0.0  ;;  %v5991_v20 = vpack.c.bf16 %v5983_v31, %v5983_v31  ;;  %v5993_v57 = vpack.c.bf16 %v5985_v2, %v5985_v2  ;;  %v12119_v18 = vld [vmem:[#allocation9 + $0x1d0] ss:$8 sps:$4 sm:$0xff]   ;;  %v12127_v56 = vld [vmem:[#allocation9 + $0x1c4] ss:$8 sps:$4 sm:$0xff]  }
0x2f8e   :  { %v5858_v28 = vpop.f32.mrf.mxu0  ;;  %v5899_v21 = vpop.f32.mrf.mxu1  ;;  %v12122_v60 = vld [vmem:[#allocation9 + $0xc0] ss:$8 sps:$4 sm:$0xff]   ;;  %v12130_v2 = vld [vmem:[#allocation9 + $0xb4] ss:$8 sps:$4 sm:$0xff]  }
0x2f8f   :  { %v5992_v7 = vpack.c.bf16 %v5984_v35, %v5984_v35  ;;  %v5994_v9 = vpack.c.bf16 %v5986_v8, %v5986_v8  ;;  %v12125_v31 = vld [vmem:[#allocation9 + $0x1c0] ss:$8 sps:$4 sm:$0xff]   ;;  %v12133_v5 = vld [vmem:[#allocation9 + $0x1b4] ss:$8 sps:$4 sm:$0xff]   ;;  %v12128_v21 = vld [vmem:[#allocation9 + $0xb0] ss:$8 sps:$4 sm:$0xff]  }
0x2f90   :  { %v15771_v13 = vld [vmem:[#allocation80_spill] sm:$0xff]  ;;  %v15772_v8 = vld [vmem:[#allocation81_spill] sm:$0xff] }
0x2f91   :  { %6423 = vmatprep.mubr.bf16.mxu0 %v5992_v7  ;;  %6464 = vmatprep.mubr.bf16.mxu1 %v5994_v9  ;;  %v5239_v35 = vrot.slane %v14876_v16, %v15771_v13  ;;  %v5247_v28 = vrot.slane %v14876_v16, %v15772_v8  ;;  %v12131_v7 = vld [vmem:[#allocation9 + $0x1b0] ss:$8 sps:$4 sm:$0xff]  }
0x2f92   :  { %6424 = vmatmul.mubr.bf16.vlgmr.msra.gmra.mxu0 %v5991_v20  ;;  %6465 = vmatmul.mubr.bf16.vlgmr.msra.gmra.mxu1 %v5993_v57  ;;  %v12139_v20 = vld [vmem:[#allocation9 + $0x1a4] ss:$8 sps:$4 sm:$0xff]  }
0x2f93   :  { %6876 = vmatpush1.bf16.msra.mxu0 %v12056_v17  ;;  %6917 = vmatpush1.bf16.msra.mxu1 %v12059_v12  ;;  %v12136_v12 = vld [vmem:[#allocation9 + $0xa4] ss:$8 sps:$4 sm:$0xff]  }
0x2f94   :  { %6877 = vmatprep.subr.bf16.mxu0 %v12064_v43  ;;  %6918 = vmatprep.subr.bf16.mxu1 %v12067_v54 }
0x2f97   :  { %6878 = vmatpush1.bf16.msra.mxu0 %v12062_v50  ;;  %6919 = vmatpush1.bf16.msra.mxu1 %v12065_v38  ;;  %v12134_v38 = vld [vmem:[#allocation9 + $0xa0] ss:$8 sps:$4 sm:$0xff]  }
0x2f98   :  { %6879 = vmatprep.subr.bf16.mxu0 %v12070_v42  ;;  %6920 = vmatprep.subr.bf16.mxu1 %v12073_v23  ;;  %v12137_v42 = vld [vmem:[#allocation9 + $0x1a0] ss:$8 sps:$4 sm:$0xff]  }
0x2f99   :  { %v15773_v23 = vld [vmem:[#allocation82_spill] sm:$0xff] }
0x2f9b   :  { %6880 = vmatpush1.bf16.msra.mxu0 %v12068_v24  ;;  %6921 = vmatpush1.bf16.msra.mxu1 %v12071_v53  ;;  %v5235_v24 = vrot.slane %v14876_v16, %v15773_v23  ;;  %v15774_v53 = vld [vmem:[#allocation83_spill] sm:$0xff] }
0x2f9c   :  { %6881 = vmatprep.subr.bf16.mxu0 %v12076_v61  ;;  %6922 = vmatprep.subr.bf16.mxu1 %v12079_v11  ;;  %v5243_v61 = vrot.slane %v14876_v16, %v15774_v53  ;;  %v12148_v16 = vld [vmem:[#allocation9 + $0x84] ss:$8 sps:$4 sm:$0xff]  }
0x2f9f   :  { %6882 = vmatpush1.bf16.msra.mxu0 %v12074_v0  ;;  %6923 = vmatpush1.bf16.msra.mxu1 %v12077_v36  ;;  %v12142_v36 = vld [vmem:[#allocation9 + $0x94] ss:$8 sps:$4 sm:$0xff]  }
0x2fa0   :  { %6883 = vmatprep.subr.bf16.mxu0 %v12082_v14  ;;  %6924 = vmatprep.subr.bf16.mxu1 %v12085_v33  ;;  %v12145_v14 = vld [vmem:[#allocation9 + $0x194] ss:$8 sps:$4 sm:$0xff]  }
0x2fa3   :  { %6884 = vmatpush1.bf16.msra.mxu0 %v12080_v63  ;;  %6925 = vmatpush1.bf16.msra.mxu1 %v12083_v29 }
0x2fa4   :  { %6885 = vmatprep.subr.bf16.mxu0 %v12088_v40  ;;  %6926 = vmatprep.subr.bf16.mxu1 %v12091_v4 }
0x2fa7   :  { %6886 = vmatpush1.bf16.msra.mxu0 %v12086_v55  ;;  %6927 = vmatpush1.bf16.msra.mxu1 %v12089_v10  ;;  %v12140_v10 = vld [vmem:[#allocation9 + $0x90] ss:$8 sps:$4 sm:$0xff]  }
0x2fa8   :  { %6887 = vmatprep.subr.bf16.mxu0 %v12094_v25  ;;  %6928 = vmatprep.subr.bf16.mxu1 %v12097_v45  ;;  %v12143_v25 = vld [vmem:[#allocation9 + $0x190] ss:$8 sps:$4 sm:$0xff]  }
0x2fab   :  { %6888 = vmatpush1.bf16.msra.mxu0 %v12092_v48  ;;  %6929 = vmatpush1.bf16.msra.mxu1 %v12095_v22  ;;  %v12151_v22 = vld [vmem:[#allocation9 + $0x184] ss:$8 sps:$4 sm:$0xff]  }
0x2fac   :  { %6889 = vmatprep.subr.bf16.mxu0 %v12100_v19  ;;  %6930 = vmatprep.subr.bf16.mxu1 %v12103_v58  ;;  %v12146_v19 = vld [vmem:[#allocation9 + $0x80] ss:$8 sps:$4 sm:$0xff]  }
0x2fad   :  { %v12149_v58 = vld [vmem:[#allocation9 + $0x180] ss:$8 sps:$4 sm:$0xff]  }
0x2faf   :  { %6890 = vmatpush1.bf16.msra.mxu0 %v12098_v15  ;;  %6931 = vmatpush1.bf16.msra.mxu1 %v12101_v41 }
0x2fb0   :  { %6891 = vmatprep.subr.bf16.mxu0 %v12106_v27  ;;  %6932 = vmatprep.subr.bf16.mxu1 %v12109_v34  ;;  %v12152_v27 = vld [vmem:[%s15775_s25 + $0x78] sm:$0xff]  }
0x2fb1   :  { %v12153_v34 = vld [vmem:[%s15775_s25 + $0x38] sm:$0xff]  }
0x2fb3   :  { %6892 = vmatpush2.bf16.msra.mxu0 %v12104_v32  ;;  %6933 = vmatpush2.bf16.msra.mxu1 %v12107_v26 }
0x2fb4   :  { %6893 = vmatprep.subr.bf16.mxu0 %v12112_v3  ;;  %6934 = vmatprep.subr.bf16.mxu1 %v12115_v39  ;;  %v12154_v3 = vld [vmem:[%s15775_s25 + $0x70] sm:$0xff]  }
0x2fb5   :  { %v12155_v39 = vld [vmem:[%s15775_s25 + $0x30] sm:$0xff]  }
0x2fb7   :  { %6894 = vmatpush2.bf16.msra.mxu0 %v12110_v30  ;;  %6935 = vmatpush2.bf16.msra.mxu1 %v12113_v1  ;;  %v12156_v30 = vld [vmem:[%s15775_s25 + $0x68] sm:$0xff]  }
0x2fb8   :  { %6895 = vmatprep.subr.bf16.mxu0 %v12118_v44  ;;  %6936 = vmatprep.subr.bf16.mxu1 %v12121_v47  ;;  %v12157_v1 = vld [vmem:[%s15775_s25 + $0x28] sm:$0xff]   ;;  %v12158_v44 = vld [vmem:[%s15775_s25 + $0x60] sm:$0xff]  }
0x2fb9   :  { %v12159_v47 = vld [vmem:[%s15775_s25 + $0x20] sm:$0xff]  }
0x2fbb   :  { %6896 = vmatpush2.bf16.msra.mxu0 %v12116_v51  ;;  %6937 = vmatpush2.bf16.msra.mxu1 %v12119_v18  ;;  %v12160_v51 = vld [vmem:[%s15775_s25 + $0x58] sm:$0xff]  }
0x2fbc   :  { %6897 = vmatprep.subr.bf16.mxu0 %v12124_v49  ;;  %6938 = vmatprep.subr.bf16.mxu1 %v12127_v56  ;;  %v12168_v18 = vld [vmem:[%s15776_s2 + $0x78] sm:$0xff]   ;;  %v12170_v56 = vld [vmem:[%s15776_s2 + $0x70] sm:$0xff]  }
0x2fbd   :  { %v12169_v49 = vld [vmem:[%s15776_s2 + $0x38] sm:$0xff]  }
0x2fbf   :  { %6898 = vmatpush2.bf16.msra.mxu0 %v12122_v60  ;;  %6939 = vmatpush2.bf16.msra.mxu1 %v12125_v31  ;;  %v12161_v60 = vld [vmem:[%s15775_s25 + $0x18] sm:$0xff]   ;;  %v12162_v31 = vld [vmem:[%s15775_s25 + $0x50] sm:$0xff]  }
0x2fc0   :  { %v5935_v9 = vpop.f32.mrf.mxu0  ;;  %v5976_v17 = vpop.f32.mrf.mxu1  ;;  %6899 = vmatprep.subr.bf16.mxu0 %v12130_v2  ;;  %6940 = vmatprep.subr.bf16.mxu1 %v12133_v5  ;;  %v12171_v2 = vld [vmem:[%s15776_s2 + $0x30] sm:$0xff]   ;;  %v12172_v5 = vld [vmem:[%s15776_s2 + $0x68] sm:$0xff]  }
0x2fc1   :  { %v5936_v45 = vadd.f32 %v5935_v9, %v5235_v24  ;;  %v5977_v48 = vadd.f32 %v5976_v17, %v5243_v61  ;;  %v12165_v9 = vld [vmem:[%s15775_s25 + $0x8] sm:$0xff]   ;;  %v12166_v17 = vld [vmem:[%s15775_s25 + $0x40] sm:$0xff]  }
0x2fc2   :  { %v5937_v57 = vpop.f32.mrf.mxu0  ;;  %v5978_v43 = vpop.f32.mrf.mxu1  ;;  %v12182_v24 = vld [vmem:[%s15776_s2 + $0x40] sm:$0xff]  }
0x2fc3   :  { %v5938_v54 = vadd.f32 %v5937_v57, %v5239_v35  ;;  %v5979_v50 = vadd.f32 %v5978_v43, %v5247_v28  ;;  %6900 = vmatpush2.bf16.msra.mxu0 %v12128_v21  ;;  %6941 = vmatpush2.bf16.msra.mxu1 %v12131_v7  ;;  %v5987_v15 = vmax.f32 %v5936_v45, 0.0  ;;  %v5989_v41 = vmax.f32 %v5977_v48, 0.0  ;;  %v12163_v35 = vld [vmem:[%s15775_s25 + $0x10] sm:$0xff]   ;;  %v12164_v28 = vld [vmem:[%s15775_s25 + $0x48] sm:$0xff]   ;;  %v12174_v7 = vld [vmem:[%s15776_s2 + $0x60] sm:$0xff]  }
0x2fc4   :  { %v5939_v11 = vpop.f32.mrf.mxu0  ;;  %v5980_v0 = vpop.f32.mrf.mxu1  ;;  %6901 = vmatprep.subr.bf16.mxu0 %v12136_v12  ;;  %6942 = vmatprep.subr.bf16.mxu1 %v12139_v20  ;;  %v12173_v21 = vld [vmem:[%s15776_s2 + $0x28] sm:$0xff]   ;;  %v12175_v12 = vld [vmem:[%s15776_s2 + $0x20] sm:$0xff]   ;;  %v12176_v20 = vld [vmem:[%s15776_s2 + $0x58] sm:$0xff]  }
0x2fc5   :  { %v5988_v33 = vmax.f32 %v5938_v54, 0.0  ;;  %v5990_v63 = vmax.f32 %v5979_v50, 0.0  ;;  %v6475_v32 = vpack.c.bf16 %v5987_v15, %v5987_v15  ;;  %v6477_v26 = vpack.c.bf16 %v5989_v41, %v5989_v41  ;;  %v12167_v57 = vld [vmem:[%s15775_s25] sm:$0xff]   ;;  %v12177_v43 = vld [vmem:[%s15776_s2 + $0x18] sm:$0xff]   ;;  %v12178_v54 = vld [vmem:[%s15776_s2 + $0x50] sm:$0xff]  }
0x2fc6   :  { %v5940_v29 = vpop.f32.mrf.mxu0  ;;  %v5981_v40 = vpop.f32.mrf.mxu1  ;;  %v12179_v50 = vld [vmem:[%s15776_s2 + $0x10] sm:$0xff]   ;;  %v12183_v61 = vld [vmem:[%s15776_s2] sm:$0xff]  }
0x2fc7   :  { %v6476_v4 = vpack.c.bf16 %v5988_v33, %v5988_v33  ;;  %v6478_v55 = vpack.c.bf16 %v5990_v63, %v5990_v63  ;;  %6902 = vmatpush2.bf16.msra.mxu0 %v12134_v38  ;;  %6943 = vmatpush2.bf16.msra.mxu1 %v12137_v42  ;;  %v12180_v38 = vld [vmem:[%s15776_s2 + $0x48] sm:$0xff]   ;;  %v6059_v11 = vld [vmem:[#allocation4] sm:$0x3]  ;;  %v6543_v41 = vld [vmem:[#allocation7] sm:$0x3] }
0x2fc8   :  { %6903 = vmatprep.subr.bf16.mxu0 %v12142_v36  ;;  %6944 = vmatprep.subr.bf16.mxu1 %v12145_v14  ;;  %v12181_v42 = vld [vmem:[%s15776_s2 + $0x8] sm:$0xff]   ;;  %v6064_v0 = vrot.slane %v6059_v11, %v15766_v46  ;;  %v6068_v36 = vrot.slane %v6059_v11, %v15768_v37 }
0x2fc9   :  { %6907 = vmatprep.mubr.bf16.mxu0 %v6476_v4  ;;  %6948 = vmatprep.mubr.bf16.mxu1 %v6478_v55 }
0x2fcb   :  { %6904 = vmatpush2.bf16.msra.mxu0 %v12140_v10  ;;  %6945 = vmatpush2.bf16.msra.mxu1 %v12143_v25 }
0x2fcc   :  { %6905 = vmatprep.subr.bf16.mxu0 %v12148_v16  ;;  %6946 = vmatprep.subr.bf16.mxu1 %v12151_v22 }
0x2fcf   :  { %6906 = vmatpush2.bf16.msra.mxu0 %v12146_v19  ;;  %6947 = vmatpush2.bf16.msra.mxu1 %v12149_v58 }
0x2fd0   :  { %11239 = vmatprep.subr.bf16.mxu0 %v12152_v27  ;;  %11261 = vmatprep.subr.bf16.mxu1 %v12168_v18  ;;  %v6548_v27 = vrot.slane %v6543_v41, %v15766_v46 }
0x2fd2   :  { %6908 = vmatmul.mubr.bf16.vlgmr.msra.gmra.mxu0 %v6475_v32  ;;  %6949 = vmatmul.mubr.bf16.vlgmr.msra.gmra.mxu1 %v6477_v26 }
0x2fd3   :  { %11240 = vmatpush3.bf16.msra.mxu0 %v12153_v34  ;;  %11262 = vmatpush3.bf16.msra.mxu1 %v12169_v49  ;;  %v6552_v34 = vrot.slane %v6543_v41, %v15768_v37  ;;  %v12191_v41 = vld [vmem:[%s15752_s8 + $0x38] ss:$12 sps:$4 sm:$0xff]  }
0x2fd4   :  { %11241 = vmatprep.subr.bf16.mxu0 %v12154_v3  ;;  %11263 = vmatprep.subr.bf16.mxu1 %v12170_v56 }
0x2fd7   :  { %11242 = vmatpush3.bf16.msra.mxu0 %v12155_v39  ;;  %11264 = vmatpush3.bf16.msra.mxu1 %v12171_v2 }
0x2fd8   :  { %11243 = vmatprep.subr.bf16.mxu0 %v12156_v30  ;;  %11265 = vmatprep.subr.bf16.mxu1 %v12172_v5 }
0x2fdb   :  { %11244 = vmatpush3.bf16.msra.mxu0 %v12157_v1  ;;  %11266 = vmatpush3.bf16.msra.mxu1 %v12173_v21 }
0x2fdc   :  { %11245 = vmatprep.subr.bf16.mxu0 %v12158_v44  ;;  %11267 = vmatprep.subr.bf16.mxu1 %v12174_v7 }
0x2fdf   :  { %11246 = vmatpush3.bf16.msra.mxu0 %v12159_v47  ;;  %11268 = vmatpush3.bf16.msra.mxu1 %v12175_v12 }
0x2fe0   :  { %11247 = vmatprep.subr.bf16.mxu0 %v12160_v51  ;;  %11269 = vmatprep.subr.bf16.mxu1 %v12176_v20  ;;  %v12586_v20 = vld [vmem:[%s15733_s14] sm:$0xff] }
0x2fe3   :  { %11248 = vmatpush3.bf16.msra.mxu0 %v12161_v60  ;;  %11270 = vmatpush3.bf16.msra.mxu1 %v12177_v43  ;;  %v10683_v43 = vld [vmem:[%s15742_s19 + $0x4] sm:$0x7] }
0x2fe4   :  { %11249 = vmatprep.subr.bf16.mxu0 %v12162_v31  ;;  %11271 = vmatprep.subr.bf16.mxu1 %v12178_v54  ;;  %v7408_v54 = vsel %vm775_vm0, %v10683_v43, 0 }
0x2fe7   :  { %11250 = vmatpush3.bf16.msra.mxu0 %v12163_v35  ;;  %11272 = vmatpush3.bf16.msra.mxu1 %v12179_v50 }
0x2fe8   :  { %11251 = vmatprep.subr.bf16.mxu0 %v12164_v28  ;;  %11273 = vmatprep.subr.bf16.mxu1 %v12180_v38  ;;  %v10649_v28 = vld [vmem:[#allocation10] ss:$0 sm:$0xff] }
0x2feb   :  { %11252 = vmatpush3.bf16.msra.mxu0 %v12165_v9  ;;  %11274 = vmatpush3.bf16.msra.mxu1 %v12181_v42 }
0x2fec   :  { %11253 = vmatprep.subr.bf16.mxu0 %v12166_v17  ;;  %11275 = vmatprep.subr.bf16.mxu1 %v12182_v24 }
0x2fef   :  { %11254 = vmatpush3.bf16.msra.mxu0 %v12167_v57  ;;  %11276 = vmatpush3.bf16.msra.mxu1 %v12183_v61 }
0x2ff0   :  { %11735 = vmatprep.subr.msk.bf16.mxu0 %vm775_vm0, %v10683_v43  ;;  %vm10094_vm0 = vcmask 179200  }
0x3052   :  { %v6425_v14 = vpop.f32.mrf.mxu0  ;;  %v6466_v33 = vpop.f32.mrf.mxu1 }
0x3053   :  { %v6426_v63 = vadd.f32 %v6425_v14, %v6064_v0 }
0x3054   :  { %v6427_v29 = vpop.f32.mrf.mxu0  ;;  %v6468_v40 = vpop.f32.mrf.mxu1 }
0x3055   :  { %v6467_v4 = vadd.f32 %v6466_v33, %v6426_v63  ;;  %v6428_v55 = vadd.f32 %v6427_v29, %v6068_v36 }
0x3056   :  { %v6429_v10 = vpop.f32.mrf.mxu0  ;;  %v6470_v25 = vpop.f32.mrf.mxu1 }
0x3057   :  { %v6469_v45 = vadd.f32 %v6468_v40, %v6428_v55  ;;  %v6473_v48 = vmax.f32 %v6467_v4, 0.0 }
0x3058   :  { %v6430_v16 = vpop.f32.mrf.mxu0  ;;  %v6471_v22 = vpop.f32.mrf.mxu1 }
0x3059   :  { %v6474_v19 = vmax.f32 %v6469_v45, 0.0  ;;  %v6959_v15 = vpack.c.bf16 %v6473_v48, %v6473_v48  ;;  %v12186_v16 = vld [vmem:[%s15752_s8 + $0x4c] ss:$12 sps:$4 sm:$0xff]   ;;  %v12184_v22 = vld [vmem:[%s15752_s8 + $0x48] ss:$12 sps:$4 sm:$0xff]  }
0x305a   :  { %7559 = vmatprep.subr.bf16.mxu1 %v12186_v16  ;;  %v7328_v16 = vld [vmem:[#allocation16 + $0x3] sm:$0x7] }
0x305b   :  { %v6960_v58 = vpack.c.bf16 %v6474_v19, %v6474_v19  ;;  %v12187_v19 = vld [vmem:[%s15752_s8 + $0x50] ss:$12 sps:$4 sm:$0xff]  }
0x305d   :  { %7128 = vmatprep.mubr.bf16.mxu0 %v6960_v58  ;;  %v12190_v58 = vld [vmem:[%s15752_s8 + $0x34] ss:$12 sps:$4 sm:$0xff]  }
0x305e   :  { %7129 = vmatmul.mubr.bf16.vlgmr.msra.gmra.mxu0 %v6959_v15  ;;  %v12188_v15 = vld [vmem:[%s15752_s8 + $0x30] ss:$12 sps:$4 sm:$0xff]  }
0x305f   :  { %11581 = vmatpush3.bf16.msra.mxu0 %v7408_v54  ;;  %v14976_v54 = vld [vmem:[#allocation18 + $0xf8] ss:$12 sps:$4 sm:$0xff]  }
0x3060   :  { %11590 = vmatprep.subr.bf16.mxu0 %v12187_v19 }
0x3092   :  { %v6909_v32 = vpop.f32.mrf.mxu0  ;;  %v6950_v26 = vpop.f32.mrf.mxu1 }
0x3093   :  { %v6910_v3 = vadd.f32 %v6909_v32, %v6548_v27  ;;  %v14959_v27 = vld [vmem:[#allocation18 + $0x10c] ss:$12 sps:$4 sm:$0xff]  }
0x3094   :  { %v6911_v39 = vpop.f32.mrf.mxu0  ;;  %v6952_v30 = vpop.f32.mrf.mxu1 }
0x3095   :  { %v6951_v1 = vadd.f32 %v6950_v26, %v6910_v3  ;;  %v6912_v44 = vadd.f32 %v6911_v39, %v6552_v34  ;;  %v10692_v26 = vld [vmem:[#allocation13 + $0x1] ss:$0 sm:$0xff] }
0x3096   :  { %v6913_v47 = vpop.f32.mrf.mxu0  ;;  %v6954_v51 = vpop.f32.mrf.mxu1 }
0x3097   :  { %v6953_v18 = vadd.f32 %v6952_v30, %v6912_v44  ;;  %v6957_v49 = vmax.f32 %v6951_v1, 0.0 }
0x3098   :  { %v6914_v56 = vpop.f32.mrf.mxu0  ;;  %v6955_v60 = vpop.f32.mrf.mxu1 }
0x3099   :  { %v6958_v31 = vmax.f32 %v6953_v18, 0.0  ;;  %v7136_v5 = vpack.c.bf16 %v6957_v49, %v6957_v49 }
0x309b   :  { %v7137_v2 = vpack.c.bf16 %v6958_v31, %v6958_v31 }
0x309d   :  { %7305 = vmatprep.mubr.bf16.mxu1 %v7137_v2  ;;  %v14962_v2 = vld [vmem:[#allocation18 + $0x108] ss:$12 sps:$4 sm:$0xff]  }
0x309e   :  { %7306 = vmatmul.mubr.bf16.vlgmr.msra.gmra.mxu1 %v7136_v5 }
0x309f   :  { %7579 = vmatprep.mubr.bf16.mxu1 %v15754_v59  ;;  %7560 = vmatpush1.bf16.msra.mxu1 %v12184_v22  ;;  %v15064_v22 = vrot.slane %v7328_v16, %v15767_v62 }
0x30a0   :  { %7561 = vmatprep.subr.bf16.mxu1 %v12190_v58 }
0x30a3   :  { %7562 = vmatpush1.bf16.msra.mxu1 %v12188_v15 }
0x30a4   :  { %7801 = vmatprep.subr.bf16.mxu1 %v14959_v27 }
0x311e   :  { %v11255_v35 = vpop.f32.mrf.mxu0 }
0x3120   :  { %v11256_v21 = vpop.f32.mrf.mxu0 }
0x3121   :  { %v11257_v7 = vadd.f32 %v11256_v21, %v11255_v35  ;;  %v14964_v35 = vld [vmem:[#allocation18 + $0xf4] ss:$12 sps:$4 sm:$0xff]  }
0x3122   :  { %v11258_v9 = vpop.f32.mrf.mxu0 }
0x3123   :  { %v7131_v17 = vadd.f32 %v11257_v7, %v10649_v28  ;;  %v14966_v28 = vld [vmem:[#allocation18 + $0x110] ss:$12 sps:$4 sm:$0xff]  }
0x3124   :  { %v11259_v12 = vpop.f32.mrf.mxu0 }
0x3125   :  { %v7356_v57 = vsub.f32 %v12586_v20, %v7131_v17 }
0x3127   :  { %7358 = vrot.lane.b32.xlu0 %v7356_v57, %s13173_s7  ;;  %v14972_v57 = vld [vmem:[#allocation18 + $0xf0] ss:$12 sps:$4 sm:$0xff]  }
0x315e   :  { %v11277_v50 = vpop.f32.mrf.mxu1 }
0x3160   :  { %v11278_v38 = vpop.f32.mrf.mxu1 }
0x3161   :  { %v14937_v42 = vadd.f32 %v11278_v38, %v11277_v50  ;;  %v14978_v50 = vld [vmem:[#allocation18 + $0xdc] ss:$12 sps:$4 sm:$0xff]  }
0x3162   :  { %v11280_v24 = vpop.f32.mrf.mxu1 }
0x3163   :  { %15777 = vst [vmem:[#allocation85_spill] sm:$0xff] %v14937_v42 }
0x3164   :  { %v11281_v61 = vpop.f32.mrf.mxu1 }
0x3199   :  { %v7359_v11 = vpop.permute.xlu0 %7358 }
0x319a   :  { %v7361_v0 = vsel %vm726_vm1, 0.0, %v7359_v11 }
0x319b   :  { %v7362_v36 = vsel %vm728_vm2, %v7361_v0, 0.0  ;;  %v14983_v0 = vld [vmem:[#allocation18 + $0xd8] ss:$12 sps:$4 sm:$0xff]  }
0x319c   :  { %7367 = vrot.lane.b32.xlu0 %v7362_v36, %s13209_s5  ;;  %7364 = vrot.lane.b32.xlu1 %v7362_v36, %s13210_s20 }
0x31a0   :  { %7373 = vrot.lane.b32.xlu0 %v7362_v36, %s13212_s3  ;;  %7370 = vrot.lane.b32.xlu1 %v7362_v36, %s13211_s29 }
0x31a4   :  { %7379 = vrot.lane.b32.xlu0 %v7362_v36, %s13214_s13  ;;  %7376 = vrot.lane.b32.xlu1 %v7362_v36, %s13213_s22 }
0x31a8   :  { %7382 = vrot.lane.b32.xlu1 %v7362_v36, %s13215_s26 }
0x320e   :  { %v7368_v14 = vpop.permute.xlu0 %7367  ;;  %v7365_v33 = vpop.permute.xlu1 %7364 }
0x320f   :  { %v7385_v63 = vpack.c.bf16 %v7365_v33, %v7362_v36 }
0x3211   :  { %11582 = vmatprep.mubr.msk.bf16.mxu0 %vm762_vm3, %v7385_v63  ;;  %v14990_v63 = vld [vmem:[#allocation18 + $0xc4] ss:$12 sps:$4 sm:$0xff]  }
0x3212   :  { %v7371_v29 = vpop.permute.xlu1 %7370  ;;  %v7374_v4 = vpop.permute.xlu0 %7373 }
0x3213   :  { %v7386_v40 = vpack.c.bf16 %v7371_v29, %v7368_v14  ;;  %v14987_v14 = vld [vmem:[#allocation18 + $0xe0] ss:$12 sps:$4 sm:$0xff]  }
0x3214   :  { %v14996_v29 = vld [vmem:[#allocation18 + $0xc0] ss:$12 sps:$4 sm:$0xff]  }
0x3215   :  { %11583 = vmatmul.mubr.msk.bf16.vlgmr.msra.gmra.mxu0 %vm762_vm3, %v7386_v40  ;;  %v15000_v40 = vld [vmem:[#allocation18 + $0xc8] ss:$12 sps:$4 sm:$0xff]  }
0x3216   :  { %v7377_v55 = vpop.permute.xlu1 %7376  ;;  %v7380_v25 = vpop.permute.xlu0 %7379  ;;  %11591 = vmatpush3.bf16.msra.mxu0 %v12187_v19 }
0x3217   :  { %v7387_v10 = vpack.c.bf16 %v7377_v55, %v7374_v4  ;;  %11592 = vmatprep.subr.bf16.mxu0 %v12191_v41  ;;  %v15002_v4 = vld [vmem:[#allocation18 + $0xac] ss:$12 sps:$4 sm:$0xff]   ;;  %v15009_v55 = vld [vmem:[#allocation18 + $0xa8] ss:$12 sps:$4 sm:$0xff]  }
0x3219   :  { %11586 = vmatprep.mubr.msk.bf16.mxu0 %vm762_vm3, %v7387_v10  ;;  %v15013_v10 = vld [vmem:[#allocation18 + $0xb0] ss:$12 sps:$4 sm:$0xff]  }
0x321a   :  { %v7383_v45 = vpop.permute.xlu1 %7382  ;;  %11593 = vmatpush3.bf16.msra.mxu0 %v12191_v41 }
0x321b   :  { %v7388_v48 = vpack.c.bf16 %v7383_v45, %v7380_v25  ;;  %11602 = vmatprep.subr.bf16.mxu0 %v15753_v6  ;;  %v15015_v25 = vld [vmem:[#allocation18 + $0x94] ss:$12 sps:$4 sm:$0xff]   ;;  %v15021_v45 = vld [vmem:[#allocation18 + $0x90] ss:$12 sps:$4 sm:$0xff]  }
0x321d   :  { %11587 = vmatmul.mubr.msk.bf16.gmra.mxu0 %vm762_vm3, %v7388_v48  ;;  %v15024_v48 = vld [vmem:[#allocation18 + $0x98] ss:$12 sps:$4 sm:$0xff]  }
0x32d5   :  { %v11584_v34 = vpop.f32.mrf.mxu0 }
0x32d6   :  { %v7453_v1 = vadd.f32 %v11584_v34, %v10692_v26  ;;  %v7491_v34 = vrot.slane %v7328_v16, %v15766_v46 }
0x32d7   :  { %v7444_v32 = vpop.f32.mrf.mxu0 }
0x32d8   :  { %v7445_v39 = vadd.f32 %v10692_v26, %v7444_v32  ;;  %v7477_v60 = vmax.f32 %v7453_v1, 0.0 }
0x32d9   :  { %v11585_v3 = vpop.f32.mrf.mxu0 }
0x32da   :  { %v7456_v30 = vadd.f32 %v11585_v3, %v10692_v26  ;;  %v7475_v49 = vmax.f32 %v7445_v39, 0.0  ;;  %v15075_v3 = vrot.slane %v7328_v16, %v15768_v37 }
0x32db   :  { %v7447_v44 = vpop.f32.mrf.mxu0 }
0x32dc   :  { %v7448_v47 = vadd.f32 %v10692_v26, %v7447_v44  ;;  %v7478_v51 = vmax.f32 %v7456_v30, 0.0 }
0x32dd   :  { %v11588_v18 = vpop.f32.mrf.mxu0 }
0x32de   :  { %v7476_v56 = vmax.f32 %v7448_v47, 0.0  ;;  %v7484_v21 = vpack.c.bf16 %v7478_v51, %v7477_v60  ;;  %v7469_v12 = vadd.f32 %v11588_v18, %v10692_v26 }
0x32df   :  { %v7460_v31 = vpop.f32.mrf.mxu0 }
0x32e0   :  { %v7483_v5 = vpack.c.bf16 %v7476_v56, %v7475_v49  ;;  %v7461_v9 = vadd.f32 %v10692_v26, %v7460_v31  ;;  %v7481_v11 = vmax.f32 %v7469_v12, 0.0 }
0x32e1   :  { %v11589_v7 = vpop.f32.mrf.mxu0 }
0x32e2   :  { %v7472_v17 = vadd.f32 %v11589_v7, %v10692_v26  ;;  %10703 = vmatmul.mubr.msk.bf16.vlgmr.msra.gmra.mxu1 %vm3653_vm8, %v7483_v5  ;;  %11594 = vmatprep.mubr.msk.bf16.mxu0 %vm3653_vm8, %v7483_v5  ;;  %v7479_v24 = vmax.f32 %v7461_v9, 0.0 }
0x32e3   :  { %7802 = vmatpush1.bf16.msra.mxu1 %v14962_v2  ;;  %v7463_v20 = vpop.f32.mrf.mxu0  ;;  %11595 = vmatmul.mubr.msk.bf16.vlgmr.msra.gmra.mxu0 %vm3653_vm8, %v7484_v21 }
0x32e4   :  { %v7464_v43 = vadd.f32 %v10692_v26, %v7463_v20  ;;  %7803 = vmatprep.subr.bf16.mxu1 %v14964_v35  ;;  %11603 = vmatpush3.bf16.msra.mxu0 %v14966_v28  ;;  %v7482_v38 = vmax.f32 %v7472_v17, 0.0 }
0x32e5   :  { %7589 = vmatprep.mubr.bf16.mxu1 %v15754_v59  ;;  %11604 = vmatprep.subr.bf16.mxu0 %v15753_v6 }
0x32e6   :  { %v7480_v61 = vmax.f32 %v7464_v43, 0.0  ;;  %v7486_v33 = vpack.c.bf16 %v7482_v38, %v7481_v11 }
0x32e7   :  { %7804 = vmatpush1.bf16.msra.mxu1 %v14972_v57 }
0x32e8   :  { %v7485_v36 = vpack.c.bf16 %v7480_v61, %v7479_v24  ;;  %11605 = vmatpush3.bf16.msra.mxu0 %v14976_v54  ;;  %7805 = vmatprep.subr.bf16.mxu1 %v14978_v50 }
0x32e9   :  { %11606 = vmatprep.subr.bf16.mxu0 %v15753_v6 }
0x32ea   :  { %10704 = vmatmul.mubr.msk.bf16.gmra.mxu1 %vm3653_vm8, %v7484_v21  ;;  %11598 = vmatprep.mubr.msk.bf16.mxu0 %vm3653_vm8, %v7485_v36 }
0x32eb   :  { %11599 = vmatmul.mubr.msk.bf16.gmra.mxu0 %vm3653_vm8, %v7486_v33  ;;  %7806 = vmatpush1.bf16.msra.mxu1 %v14983_v0 }
0x32ec   :  { %11607 = vmatpush3.bf16.msra.mxu0 %v14987_v14  ;;  %7599 = vmatprep.mubr.bf16.mxu1 %v15754_v59 }
0x32ed   :  { %7807 = vmatprep.subr.bf16.mxu1 %v14990_v63  ;;  %11608 = vmatprep.subr.bf16.mxu0 %v15753_v6 }
0x32ee   :  { %11614 = vmatprep.mubr.msk.bf16.mxu0 %vm13218_vm7, %v15753_v6 }
0x32ef   :  { %7808 = vmatpush1.bf16.msra.mxu1 %v14996_v29 }
0x32f0   :  { %11609 = vmatpush3.bf16.msra.mxu0 %v15000_v40  ;;  %7809 = vmatprep.subr.bf16.mxu1 %v15002_v4 }
0x32f1   :  { %11610 = vmatprep.subr.bf16.mxu0 %v15753_v6 }
0x32f2   :  { %10705 = vmatmul.mubr.msk.bf16.gmra.mxu1 %vm3653_vm8, %v7485_v36 }
0x32f3   :  { %7810 = vmatpush1.bf16.msra.mxu1 %v15009_v55  ;;  %7609 = vmatprep.mubr.bf16.mxu1 %v15754_v59 }
0x32f4   :  { %11611 = vmatpush3.bf16.msra.mxu0 %v15013_v10  ;;  %7811 = vmatprep.subr.bf16.mxu1 %v15015_v25 }
0x32f5   :  { %11612 = vmatprep.subr.bf16.mxu0 %v15753_v6 }
0x32f7   :  { %7812 = vmatpush1.bf16.msra.mxu1 %v15021_v45 }
0x32f8   :  { %11613 = vmatpush3.bf16.msra.mxu0 %v15024_v48  ;;  %7949 = vmatprep.subr.bf16.mxu1 %v14959_v27 }
0x32f9   :  { %11618 = vmatprep.subr.bf16.mxu0 %v15753_v6 }
0x32fa   :  { %10706 = vmatmul.mubr.msk.bf16.gmra.mxu1 %vm3653_vm8, %v7486_v33 }
0x32fb   :  { %11615 = vmatmul.mubr.bf16.vlgmr.msra.gmra.mxu0 %v15754_v59  ;;  %7829 = vmatprep.mubr.bf16.mxu1 %v15754_v59 }
0x32fc   :  { %11619 = vmatpush3.bf16.msra.mxu0 %v14966_v28  ;;  %11630 = vmatprep.mubr.msk.bf16.mxu0 %vm13218_vm7, %v15753_v6 }
0x32fd   :  { %11620 = vmatprep.subr.bf16.mxu0 %v15753_v6 }
0x3300   :  { %11621 = vmatpush3.bf16.msra.mxu0 %v14976_v54 }
0x3301   :  { %11622 = vmatprep.subr.bf16.mxu0 %v15753_v6 }
0x3302   :  { %7830 = vmatmul.mubr.bf16.vlgmr.msra.gmra.mxu1 %v15754_v59 }
0x3303   :  { %7950 = vmatpush1.bf16.msra.mxu1 %v14962_v2  ;;  %7977 = vmatprep.mubr.bf16.mxu1 %v15754_v59 }
0x3304   :  { %7951 = vmatprep.subr.bf16.mxu1 %v14964_v35  ;;  %11623 = vmatpush3.bf16.msra.mxu0 %v14987_v14 }
0x3305   :  { %11624 = vmatprep.subr.bf16.mxu0 %v15753_v6 }
0x3307   :  { %7952 = vmatpush1.bf16.msra.mxu1 %v14972_v57 }
0x3308   :  { %7953 = vmatprep.subr.bf16.mxu1 %v14978_v50  ;;  %11625 = vmatpush3.bf16.msra.mxu0 %v15000_v40 }
0x3309   :  { %11626 = vmatprep.subr.bf16.mxu0 %v15753_v6 }
0x330b   :  { %7954 = vmatpush1.bf16.msra.mxu1 %v14983_v0 }
0x330c   :  { %7955 = vmatprep.subr.bf16.mxu1 %v14990_v63  ;;  %11627 = vmatpush3.bf16.msra.mxu0 %v15013_v10 }
0x330d   :  { %11628 = vmatprep.subr.bf16.mxu0 %v15753_v6 }
0x330f   :  { %7956 = vmatpush1.bf16.msra.mxu1 %v14996_v29 }
0x3310   :  { %7957 = vmatprep.subr.bf16.mxu1 %v15002_v4  ;;  %11629 = vmatpush3.bf16.msra.mxu0 %v15024_v48 }
0x3311   :  { %11634 = vmatprep.subr.bf16.mxu0 %v15753_v6 }
0x3313   :  { %7958 = vmatpush1.bf16.msra.mxu1 %v15009_v55 }
0x3314   :  { %7959 = vmatprep.subr.bf16.mxu1 %v15015_v25 }
0x3317   :  { %7960 = vmatpush1.bf16.msra.mxu1 %v15021_v45 }
0x3318   :  { %8097 = vmatprep.subr.bf16.mxu1 %v14959_v27 }
0x33a2   :  { %v7581_v19 = vpop.f32.mrf.mxu1 }
0x33a3   :  { %v11596_v58 = vpop.f32.mrf.mxu0  ;;  %v7582_v13 = vadd.f32 %v7581_v19, %v7491_v34 }
0x33a4   :  { %v15067_v15 = vadd.f32 %v11596_v58, %v15064_v22  ;;  %v15069_v41 = vpop.f32.mrf.mxu1 }
0x33a5   :  { %v15072_v32 = vpop.f32.mrf.mxu0 }
0x33a6   :  { %v7585_v26 = vpop.f32.mrf.mxu1 }
0x33a7   :  { %v15077_v39 = vadd.f32 %v7585_v26, %v7491_v34  ;;  %v11597_v30 = vpop.f32.mrf.mxu0 }
0x33a8   :  { %v15080_v1 = vadd.f32 %v11597_v30, %v15064_v22  ;;  %v7587_v44 = vpop.f32.mrf.mxu1 }
0x33a9   :  { %v15083_v47 = vadd.f32 %v7587_v44, %v15075_v3  ;;  %v7657_v51 = vpop.f32.mrf.mxu0  ;;  %v7355_v44 = vld [vmem:[#allocation15 + $0x3] sm:$0x7] }
0x33aa   :  { %v15086_v18 = vadd.f32 %v7657_v51, %v15064_v22  ;;  %v7591_v49 = vpop.f32.mrf.mxu1  ;;  %v15139_v8 = vrot.slane %v7355_v44, %v15768_v37 }
0x33ab   :  { %v15088_v56 = vadd.f32 %v7591_v49, %v7491_v34  ;;  %v11600_v60 = vpop.f32.mrf.mxu0  ;;  %v15118_v49 = vrot.slane %v7355_v44, %v15767_v62  ;;  %v15133_v62 = vrot.slane %v7355_v44, %v15766_v46 }
0x33ac   :  { %v15091_v31 = vadd.f32 %v11600_v60, %v15064_v22  ;;  %v7593_v5 = vpop.f32.mrf.mxu1 }
0x33ad   :  { %v15094_v21 = vadd.f32 %v7593_v5, %v15075_v3  ;;  %v7670_v7 = vpop.f32.mrf.mxu0 }
0x33ae   :  { %v15097_v9 = vadd.f32 %v7670_v7, %v15064_v22  ;;  %v7595_v17 = vpop.f32.mrf.mxu1 }
0x33af   :  { %v15099_v12 = vadd.f32 %v7595_v17, %v7491_v34  ;;  %v11601_v20 = vpop.f32.mrf.mxu0 }
0x33b0   :  { %v15102_v43 = vadd.f32 %v11601_v20, %v15064_v22  ;;  %v7597_v38 = vpop.f32.mrf.mxu1 }
0x33b1   :  { %v15105_v24 = vadd.f32 %v7597_v38, %v15075_v3  ;;  %v7673_v61 = vpop.f32.mrf.mxu0 }
0x33b2   :  { %v15108_v11 = vadd.f32 %v7673_v61, %v15064_v22  ;;  %v7601_v36 = vpop.f32.mrf.mxu1 }
0x33b3   :  { %v15110_v33 = vadd.f32 %v7601_v36, %v7491_v34 }
0x33b4   :  { %v7603_v16 = vpop.f32.mrf.mxu1 }
0x33b5   :  { %v15113_v58 = vadd.f32 %v7603_v16, %v15075_v3 }
0x33b6   :  { %v7605_v26 = vpop.f32.mrf.mxu1 }
0x33b7   :  { %v15115_v30 = vadd.f32 %v7605_v26, %v7491_v34 }
0x33b8   :  { %v7607_v51 = vpop.f32.mrf.mxu1 }
0x33b9   :  { %v15121_v60 = vadd.f32 %v7607_v51, %v15075_v3 }
0x33ba   :  { %v7611_v5 = vpop.f32.mrf.mxu1 }
0x33bb   :  { %v15123_v7 = vadd.f32 %v7611_v5, %v7491_v34  ;;  %v7872_v17 = vpop.f32.mrf.mxu0 }
0x33bc   :  { %v7613_v20 = vpop.f32.mrf.mxu1  ;;  %v7873_v38 = vadd.f32 %v7872_v17, %v15118_v49 }
0x33bd   :  { %v15127_v61 = vadd.f32 %v7613_v20, %v15075_v3  ;;  %v11616_v36 = vpop.f32.mrf.mxu0 }
0x33be   :  { %v7615_v16 = vpop.f32.mrf.mxu1  ;;  %7896 = vrot.lane.b32.xlu1 %v7873_v38, %s13200_s15 }
0x33bf   :  { %v15130_v26 = vadd.f32 %v7615_v16, %v7491_v34  ;;  %v7875_v51 = vpop.f32.mrf.mxu0 }
0x33c0   :  { %v7617_v42 = vpop.f32.mrf.mxu1 }
0x33c1   :  { %v15136_v5 = vadd.f32 %v7617_v42, %v15075_v3  ;;  %v11617_v17 = vpop.f32.mrf.mxu0 }
0x33c2   :  { %v7831_v20 = vpop.f32.mrf.mxu1 }
0x33c3   :  { %v7832_v36 = vadd.f32 %v7831_v20, %v15133_v62 }
0x33c4   :  { %v7833_v53 = vpop.f32.mrf.mxu1 }
0x33c5   :  { %v7878_v38 = vadd.f32 %v7832_v36, %v7582_v13  ;;  %v7834_v16 = vadd.f32 %v7833_v53, %v15139_v8  ;;  %v7584_v13 = vadd.f32 %v15069_v41, %v15075_v3 }
0x33c6   :  { %v7835_v23 = vpop.f32.mrf.mxu1 }
0x33c7   :  { %7894 = vrot.lane.b32.xlu0 %v7834_v16, %s13200_s15  ;;  %v10729_v46 = vmul.f32 -1.442695, %v7878_v38  ;;  %v7655_v23 = vadd.f32 %v15072_v32, %v15064_v22 }
0x33c8   :  { %v7836_v51 = vpop.f32.mrf.mxu1 }
0x33c9   :  { %12472 = vpow2.f32 %v10729_v46 }
0x33d6   :  { %v12473_v42 = vpop.eup %12472 }
0x33d7   :  { %v7882_v52 = vadd.f32 1.0, %v12473_v42 }
0x33d9   :  { %12474 = vrcp.f32 %v7882_v52 }
0x33e6   :  { %v12475_v17 = vpop.eup %12474 }
0x3430   :  { %v7897_v44 = vpop.permute.xlu1 %7896 }
0x3439   :  { %v7895_v37 = vpop.permute.xlu0 %7894 }
0x343a   :  { %v7898_v19 = vsel %vm1014_vm5, %v7895_v37, %v7897_v44  ;;  %v7885_v37 = vadd.f32 %v7834_v16, %v7584_v13 }
0x343b   :  { %v7900_v34 = vmul.f32 %v12475_v17, %v7898_v19 }
0x343c   :  { %v10730_v42 = vmul.f32 -1.442695, %v7885_v37 }
0x343d   :  { %7902 = vrot.lane.b32.xlu0 %v7900_v34, %s13200_s15 }
0x34af   :  { %v7903_v53 = vpop.permute.xlu0 %7902 }
0x34b0   :  { %v7905_v20 = vadd.f32 %v7903_v53, %v7584_v13  ;;  %v7906_v46 = vadd.f32 %v7903_v53, %v7655_v23 }
0x34b2   :  { %12476 = vtanh.f32 %v7905_v20 }
0x34b3   :  { %12478 = vtanh.f32 %v7906_v46 }
0x34b4   :  { %12480 = vpow2.f32 %v10730_v42 }
0x34bf   :  { %v12477_v52 = vpop.eup %12476 }
0x34c0   :  { %v12479_v36 = vpop.eup %12478  ;;  %v7909_v38 = vsub.f32 0.0, %v12477_v52 }
0x34c1   :  { %v7910_v51 = vsub.f32 0.0, %v12479_v36  ;;  %v12481_v41 = vpop.eup %12480 }
0x34c2   :  { %7913 = vrot.lane.b32.xlu1 %v7909_v38, %s13172_s0  ;;  %v7889_v3 = vadd.f32 1.0, %v12481_v41 }
0x34c3   :  { %7915 = vrot.lane.b32.xlu0 %v7910_v51, %s13172_s0 }
0x34c4   :  { %12482 = vrcp.f32 %v7889_v3 }
0x34d1   :  { %v12483_v19 = vpop.eup %12482 }
0x3534   :  { %v7914_v22 = vpop.permute.xlu1 %7913 }
0x3535   :  { %v7916_v32 = vpop.permute.xlu0 %7915  ;;  %v7920_v44 = vmul.f32 %v12475_v17, %v7914_v22 }
0x3536   :  { %v7917_v34 = vsel %vm3653_vm8, %v7914_v22, %v7916_v32 }
0x3537   :  { %v7921_v23 = vmul.f32 %v12483_v19, %v7917_v34  ;;  %7924 = vrot.lane.b32.xlu1 %v7920_v44, %s13219_s23 }
0x3539   :  { %7926 = vrot.lane.b32.xlu0 %v7921_v23, %s13219_s23 }
0x35a9   :  { %v7925_v53 = vpop.permute.xlu1 %7924 }
0x35ab   :  { %v7927_v20 = vpop.permute.xlu0 %7926 }
0x35ac   :  { %v7928_v16 = vsel %vm3916_vm9, %v7925_v53, %v7927_v20  ;;  %v15156_v13 = vadd.f32 %v12479_v36, %v7927_v20 }
0x35ad   :  { %v15158_v46 = vadd.f32 %v12477_v52, %v7928_v16 }
0x35ae   :  { %v7934_v38 = vpack.c.bf16 %v15156_v13, %v15156_v13 }
0x35af   :  { %v7933_v17 = vpack.c.bf16 %v15158_v46, %v15158_v46 }
0x35b0   :  { %7939 = vrot.lane.b32.xlu0 %v7934_v38, %s13200_s15 }
0x35b1   :  { %7937 = vrot.lane.b32.xlu1 %v7933_v17, %s13200_s15 }
0x3622   :  { %v7940_v51 = vpop.permute.xlu0 %7939 }
0x3623   :  { %v7938_v37 = vpop.permute.xlu1 %7937 }
0x3624   :  { %v7941_v42 = vsel %vm1014_vm5, %v7938_v37, %v7940_v51 }
0x3625   :  { %10731 = vmatmul.mubr.msk.bf16.vlgmr.msra.gmra.mxu1 %vm3916_vm9, %v7941_v42  ;;  %11631 = vmatmul.mubr.msk.bf16.vlgmr.msra.gmra.mxu0 %vm3916_vm9, %v7941_v42 }
0x3626   :  { %8098 = vmatpush1.bf16.msra.mxu1 %v14962_v2  ;;  %11635 = vmatpush3.bf16.msra.mxu0 %v14966_v28 }
0x3627   :  { %8099 = vmatprep.subr.bf16.mxu1 %v14964_v35  ;;  %11636 = vmatprep.subr.bf16.mxu0 %v15753_v6 }
0x3628   :  { %8125 = vmatprep.mubr.bf16.mxu1 %v15754_v59  ;;  %11646 = vmatprep.mubr.msk.bf16.mxu0 %vm13218_vm7, %v15753_v6 }
0x362a   :  { %8100 = vmatpush1.bf16.msra.mxu1 %v14972_v57  ;;  %11637 = vmatpush3.bf16.msra.mxu0 %v14976_v54 }
0x362b   :  { %8101 = vmatprep.subr.bf16.mxu1 %v14978_v50  ;;  %11638 = vmatprep.subr.bf16.mxu0 %v15753_v6 }
0x362e   :  { %8102 = vmatpush1.bf16.msra.mxu1 %v14983_v0  ;;  %11639 = vmatpush3.bf16.msra.mxu0 %v14987_v14 }
0x362f   :  { %8103 = vmatprep.subr.bf16.mxu1 %v14990_v63  ;;  %11640 = vmatprep.subr.bf16.mxu0 %v15753_v6 }
0x3632   :  { %8104 = vmatpush1.bf16.msra.mxu1 %v14996_v29  ;;  %11641 = vmatpush3.bf16.msra.mxu0 %v15000_v40 }
0x3633   :  { %8105 = vmatprep.subr.bf16.mxu1 %v15002_v4  ;;  %11642 = vmatprep.subr.bf16.mxu0 %v15753_v6 }
0x3636   :  { %8106 = vmatpush1.bf16.msra.mxu1 %v15009_v55  ;;  %11643 = vmatpush3.bf16.msra.mxu0 %v15013_v10 }
0x3637   :  { %8107 = vmatprep.subr.bf16.mxu1 %v15015_v25  ;;  %11644 = vmatprep.subr.bf16.mxu0 %v15753_v6 }
0x363a   :  { %8108 = vmatpush1.bf16.msra.mxu1 %v15021_v45  ;;  %11645 = vmatpush3.bf16.msra.mxu0 %v15024_v48 }
0x363b   :  { %8245 = vmatprep.subr.bf16.mxu1 %v14959_v27  ;;  %11650 = vmatprep.subr.bf16.mxu0 %v15753_v6 }
0x36e5   :  { %v7979_v52 = vpop.f32.mrf.mxu1  ;;  %v8020_v36 = vpop.f32.mrf.mxu0 }
0x36e6   :  { %v7980_v41 = vadd.f32 %v7979_v52, %v15133_v62  ;;  %v8021_v3 = vadd.f32 %v8020_v36, %v15118_v49 }
0x36e7   :  { %v7981_v22 = vpop.f32.mrf.mxu1  ;;  %v11632_v32 = vpop.f32.mrf.mxu0 }
0x36e8   :  { %v8026_v44 = vadd.f32 %v7980_v41, %v15077_v39  ;;  %v7982_v19 = vadd.f32 %v7981_v22, %v15139_v8  ;;  %8044 = vrot.lane.b32.xlu0 %v8021_v3, %s13200_s15 }
0x36e9   :  { %v7983_v34 = vpop.f32.mrf.mxu1  ;;  %v8023_v23 = vpop.f32.mrf.mxu0 }
0x36ea   :  { %8042 = vrot.lane.b32.xlu1 %v7982_v19, %s13200_s15  ;;  %v10733_v16 = vmul.f32 -1.442695, %v8026_v44  ;;  %v8033_v23 = vadd.f32 %v7982_v19, %v15083_v47 }
0x36eb   :  { %v7984_v53 = vpop.f32.mrf.mxu1  ;;  %v11633_v20 = vpop.f32.mrf.mxu0 }
0x36ec   :  { %12484 = vpow2.f32 %v10733_v16  ;;  %v10734_v53 = vmul.f32 -1.442695, %v8033_v23 }
0x36f9   :  { %v12485_v38 = vpop.eup %12484 }
0x36fa   :  { %v8030_v17 = vadd.f32 1.0, %v12485_v38 }
0x36fc   :  { %12486 = vrcp.f32 %v8030_v17 }
0x3709   :  { %v12487_v42 = vpop.eup %12486 }
0x375a   :  { %v8045_v51 = vpop.permute.xlu0 %8044 }
0x375c   :  { %v8043_v37 = vpop.permute.xlu1 %8042 }
0x375d   :  { %v8046_v39 = vsel %vm1014_vm5, %v8043_v37, %v8045_v51 }
0x375e   :  { %v8048_v52 = vmul.f32 %v12487_v42, %v8046_v39 }
0x3760   :  { %8050 = vrot.lane.b32.xlu1 %v8048_v52, %s13200_s15 }
0x37d2   :  { %v8051_v36 = vpop.permute.xlu1 %8050 }
0x37d3   :  { %v8053_v41 = vadd.f32 %v8051_v36, %v15083_v47  ;;  %v8054_v3 = vadd.f32 %v8051_v36, %v15086_v18 }
0x37d5   :  { %12488 = vtanh.f32 %v8053_v41 }
0x37d6   :  { %12490 = vtanh.f32 %v8054_v3 }
0x37d7   :  { %12492 = vpow2.f32 %v10734_v53 }
0x37e2   :  { %v12489_v22 = vpop.eup %12488 }
0x37e3   :  { %v12491_v32 = vpop.eup %12490  ;;  %v8057_v44 = vsub.f32 %v15158_v46, %v12489_v22 }
0x37e4   :  { %v8058_v34 = vsub.f32 %v15156_v13, %v12491_v32  ;;  %v12493_v20 = vpop.eup %12492 }
0x37e5   :  { %8061 = vrot.lane.b32.xlu0 %v8057_v44, %s13172_s0  ;;  %v8037_v16 = vadd.f32 1.0, %v12493_v20 }
0x37e6   :  { %8063 = vrot.lane.b32.xlu1 %v8058_v34, %s13172_s0 }
0x37e7   :  { %12494 = vrcp.f32 %v8037_v16 }
0x37f4   :  { %v12495_v51 = vpop.eup %12494 }
0x3857   :  { %v8062_v18 = vpop.permute.xlu0 %8061 }
0x3858   :  { %v8064_v38 = vpop.permute.xlu1 %8063  ;;  %v8068_v17 = vmul.f32 %v12487_v42, %v8062_v18 }
0x3859   :  { %v8065_v37 = vsel %vm3653_vm8, %v8062_v18, %v8064_v38 }
0x385a   :  { %v8069_v46 = vmul.f32 %v12495_v51, %v8065_v37  ;;  %8072 = vrot.lane.b32.xlu0 %v8068_v17, %s13219_s23 }
0x385c   :  { %8074 = vrot.lane.b32.xlu1 %v8069_v46, %s13219_s23 }
0x38cc   :  { %v8073_v13 = vpop.permute.xlu0 %8072 }
0x38ce   :  { %v8075_v39 = vpop.permute.xlu1 %8074 }
0x38cf   :  { %v8076_v47 = vsel %vm3916_vm9, %v8073_v13, %v8075_v39  ;;  %v15215_v19 = vadd.f32 %v12491_v32, %v8075_v39 }
0x38d0   :  { %v15217_v52 = vadd.f32 %v12489_v22, %v8076_v47 }
0x38d1   :  { %v8082_v36 = vpack.c.bf16 %v15215_v19, %v15215_v19 }
0x38d2   :  { %v8081_v42 = vpack.c.bf16 %v15217_v52, %v15217_v52 }
0x38d3   :  { %8087 = vrot.lane.b32.xlu1 %v8082_v36, %s13200_s15 }
0x38d4   :  { %8085 = vrot.lane.b32.xlu0 %v8081_v42, %s13200_s15 }
0x3945   :  { %v8088_v41 = vpop.permute.xlu1 %8087 }
0x3946   :  { %v8086_v3 = vpop.permute.xlu0 %8085 }
0x3947   :  { %v8089_v44 = vsel %vm1014_vm5, %v8086_v3, %v8088_v41 }
0x3948   :  { %10735 = vmatmul.mubr.msk.bf16.vlgmr.msra.gmra.mxu1 %vm3916_vm9, %v8089_v44  ;;  %11647 = vmatmul.mubr.msk.bf16.vlgmr.msra.gmra.mxu0 %vm3916_vm9, %v8089_v44 }
0x3949   :  { %8246 = vmatpush1.bf16.msra.mxu1 %v14962_v2  ;;  %11651 = vmatpush3.bf16.msra.mxu0 %v14966_v28 }
0x394a   :  { %8247 = vmatprep.subr.bf16.mxu1 %v14964_v35  ;;  %11652 = vmatprep.subr.bf16.mxu0 %v15753_v6 }
0x394b   :  { %8273 = vmatprep.mubr.bf16.mxu1 %v15754_v59  ;;  %11662 = vmatprep.mubr.msk.bf16.mxu0 %vm13218_vm7, %v15753_v6 }
0x394d   :  { %8248 = vmatpush1.bf16.msra.mxu1 %v14972_v57  ;;  %11653 = vmatpush3.bf16.msra.mxu0 %v14976_v54 }
0x394e   :  { %8249 = vmatprep.subr.bf16.mxu1 %v14978_v50  ;;  %11654 = vmatprep.subr.bf16.mxu0 %v15753_v6 }
0x3951   :  { %8250 = vmatpush1.bf16.msra.mxu1 %v14983_v0  ;;  %11655 = vmatpush3.bf16.msra.mxu0 %v14987_v14 }
0x3952   :  { %8251 = vmatprep.subr.bf16.mxu1 %v14990_v63  ;;  %11656 = vmatprep.subr.bf16.mxu0 %v15753_v6 }
0x3955   :  { %8252 = vmatpush1.bf16.msra.mxu1 %v14996_v29  ;;  %11657 = vmatpush3.bf16.msra.mxu0 %v15000_v40 }
0x3956   :  { %8253 = vmatprep.subr.bf16.mxu1 %v15002_v4  ;;  %11658 = vmatprep.subr.bf16.mxu0 %v15753_v6 }
0x3959   :  { %8254 = vmatpush1.bf16.msra.mxu1 %v15009_v55  ;;  %11659 = vmatpush3.bf16.msra.mxu0 %v15013_v10 }
0x395a   :  { %8255 = vmatprep.subr.bf16.mxu1 %v15015_v25  ;;  %11660 = vmatprep.subr.bf16.mxu0 %v15753_v6 }
0x395d   :  { %8256 = vmatpush1.bf16.msra.mxu1 %v15021_v45  ;;  %11661 = vmatpush3.bf16.msra.mxu0 %v15024_v48 }
0x395e   :  { %8393 = vmatprep.subr.bf16.mxu1 %v14959_v27  ;;  %11666 = vmatprep.subr.bf16.mxu0 %v15753_v6 }
0x3a08   :  { %v8127_v22 = vpop.f32.mrf.mxu1  ;;  %v8168_v32 = vpop.f32.mrf.mxu0 }
0x3a09   :  { %v8128_v34 = vadd.f32 %v8127_v22, %v15133_v62  ;;  %v8169_v23 = vadd.f32 %v8168_v32, %v15118_v49 }
0x3a0a   :  { %v8129_v53 = vpop.f32.mrf.mxu1  ;;  %v11648_v20 = vpop.f32.mrf.mxu0 }
0x3a0b   :  { %v8174_v16 = vadd.f32 %v8128_v34, %v15088_v56  ;;  %v8130_v18 = vadd.f32 %v8129_v53, %v15139_v8  ;;  %8192 = vrot.lane.b32.xlu1 %v8169_v23, %s13200_s15 }
0x3a0c   :  { %v8131_v38 = vpop.f32.mrf.mxu1  ;;  %v8171_v17 = vpop.f32.mrf.mxu0 }
0x3a0d   :  { %8190 = vrot.lane.b32.xlu0 %v8130_v18, %s13200_s15  ;;  %v10737_v46 = vmul.f32 -1.442695, %v8174_v16  ;;  %v8181_v20 = vadd.f32 %v8130_v18, %v15094_v21 }
0x3a0e   :  { %v8132_v51 = vpop.f32.mrf.mxu1  ;;  %v11649_v37 = vpop.f32.mrf.mxu0 }
0x3a0f   :  { %12496 = vpow2.f32 %v10737_v46  ;;  %v10738_v16 = vmul.f32 -1.442695, %v8181_v20 }
0x3a1c   :  { %v12497_v13 = vpop.eup %12496 }
0x3a1d   :  { %v8178_v39 = vadd.f32 1.0, %v12497_v13 }
0x3a1f   :  { %12498 = vrcp.f32 %v8178_v39 }
0x3a2c   :  { %v12499_v42 = vpop.eup %12498 }
0x3a7d   :  { %v8193_v47 = vpop.permute.xlu1 %8192 }
0x3a7f   :  { %v8191_v36 = vpop.permute.xlu0 %8190 }
0x3a80   :  { %v8194_v56 = vsel %vm1014_vm5, %v8191_v36, %v8193_v47 }
0x3a81   :  { %v8196_v41 = vmul.f32 %v12499_v42, %v8194_v56 }
0x3a83   :  { %8198 = vrot.lane.b32.xlu0 %v8196_v41, %s13200_s15 }
0x3af5   :  { %v8199_v3 = vpop.permute.xlu0 %8198 }
0x3af6   :  { %v8201_v44 = vadd.f32 %v8199_v3, %v15094_v21  ;;  %v8202_v22 = vadd.f32 %v8199_v3, %v15067_v15 }
0x3af8   :  { %12500 = vtanh.f32 %v8201_v44 }
0x3af9   :  { %12502 = vtanh.f32 %v8202_v22 }
0x3afa   :  { %12504 = vpow2.f32 %v10738_v16 }
0x3b05   :  { %v12501_v32 = vpop.eup %12500 }
0x3b06   :  { %v12503_v34 = vpop.eup %12502  ;;  %v8205_v23 = vsub.f32 %v15217_v52, %v12501_v32 }
0x3b07   :  { %v8206_v53 = vsub.f32 %v15215_v19, %v12503_v34  ;;  %v12505_v38 = vpop.eup %12504 }
0x3b08   :  { %8209 = vrot.lane.b32.xlu1 %v8205_v23, %s13172_s0  ;;  %v8185_v17 = vadd.f32 1.0, %v12505_v38 }
0x3b09   :  { %8211 = vrot.lane.b32.xlu0 %v8206_v53, %s13172_s0 }
0x3b0a   :  { %12506 = vrcp.f32 %v8185_v17 }
0x3b17   :  { %v12507_v46 = vpop.eup %12506 }
0x3b7a   :  { %v8210_v15 = vpop.permute.xlu1 %8209 }
0x3b7b   :  { %v8212_v51 = vpop.permute.xlu0 %8211  ;;  %v8216_v37 = vmul.f32 %v12499_v42, %v8210_v15 }
0x3b7c   :  { %v8213_v13 = vsel %vm3653_vm8, %v8210_v15, %v8212_v51 }
0x3b7d   :  { %v8217_v52 = vmul.f32 %v12507_v46, %v8213_v13  ;;  %8220 = vrot.lane.b32.xlu1 %v8216_v37, %s13219_s23 }
0x3b7f   :  { %8222 = vrot.lane.b32.xlu0 %v8217_v52, %s13219_s23 }
0x3bef   :  { %v8221_v19 = vpop.permute.xlu1 %8220 }
0x3bf1   :  { %v8223_v39 = vpop.permute.xlu0 %8222 }
0x3bf2   :  { %v8224_v21 = vsel %vm3916_vm9, %v8221_v19, %v8223_v39  ;;  %v15274_v18 = vadd.f32 %v12503_v34, %v8223_v39 }
0x3bf3   :  { %v15276_v47 = vadd.f32 %v12501_v32, %v8224_v21 }
0x3bf4   :  { %v8230_v36 = vpack.c.bf16 %v15274_v18, %v15274_v18 }
0x3bf5   :  { %v8229_v42 = vpack.c.bf16 %v15276_v47, %v15276_v47 }
0x3bf6   :  { %8235 = vrot.lane.b32.xlu0 %v8230_v36, %s13200_s15 }
0x3bf7   :  { %8233 = vrot.lane.b32.xlu1 %v8229_v42, %s13200_s15 }
0x3c68   :  { %v8236_v56 = vpop.permute.xlu0 %8235 }
0x3c69   :  { %v8234_v41 = vpop.permute.xlu1 %8233 }
0x3c6a   :  { %v8237_v3 = vsel %vm1014_vm5, %v8234_v41, %v8236_v56 }
0x3c6b   :  { %10739 = vmatmul.mubr.msk.bf16.vlgmr.msra.gmra.mxu1 %vm3916_vm9, %v8237_v3  ;;  %11663 = vmatmul.mubr.msk.bf16.vlgmr.msra.gmra.mxu0 %vm3916_vm9, %v8237_v3 }
0x3c6c   :  { %8394 = vmatpush1.bf16.msra.mxu1 %v14962_v2  ;;  %11667 = vmatpush3.bf16.msra.mxu0 %v14966_v28 }
0x3c6d   :  { %8395 = vmatprep.subr.bf16.mxu1 %v14964_v35  ;;  %11668 = vmatprep.subr.bf16.mxu0 %v15753_v6 }
0x3c6e   :  { %8421 = vmatprep.mubr.bf16.mxu1 %v15754_v59  ;;  %11678 = vmatprep.mubr.msk.bf16.mxu0 %vm13218_vm7, %v15753_v6 }
0x3c70   :  { %8396 = vmatpush1.bf16.msra.mxu1 %v14972_v57  ;;  %11669 = vmatpush3.bf16.msra.mxu0 %v14976_v54 }
0x3c71   :  { %8397 = vmatprep.subr.bf16.mxu1 %v14978_v50  ;;  %11670 = vmatprep.subr.bf16.mxu0 %v15753_v6 }
0x3c74   :  { %8398 = vmatpush1.bf16.msra.mxu1 %v14983_v0  ;;  %11671 = vmatpush3.bf16.msra.mxu0 %v14987_v14 }
0x3c75   :  { %8399 = vmatprep.subr.bf16.mxu1 %v14990_v63  ;;  %11672 = vmatprep.subr.bf16.mxu0 %v15753_v6 }
0x3c78   :  { %8400 = vmatpush1.bf16.msra.mxu1 %v14996_v29  ;;  %11673 = vmatpush3.bf16.msra.mxu0 %v15000_v40 }
0x3c79   :  { %8401 = vmatprep.subr.bf16.mxu1 %v15002_v4  ;;  %11674 = vmatprep.subr.bf16.mxu0 %v15753_v6 }
0x3c7c   :  { %8402 = vmatpush1.bf16.msra.mxu1 %v15009_v55  ;;  %11675 = vmatpush3.bf16.msra.mxu0 %v15013_v10 }
0x3c7d   :  { %8403 = vmatprep.subr.bf16.mxu1 %v15015_v25  ;;  %11676 = vmatprep.subr.bf16.mxu0 %v15753_v6 }
0x3c80   :  { %8404 = vmatpush1.bf16.msra.mxu1 %v15021_v45  ;;  %11677 = vmatpush3.bf16.msra.mxu0 %v15024_v48 }
0x3c81   :  { %8541 = vmatprep.subr.bf16.mxu1 %v14959_v27  ;;  %11682 = vmatprep.subr.bf16.mxu0 %v15753_v6 }
0x3d2b   :  { %v8275_v44 = vpop.f32.mrf.mxu1  ;;  %v8316_v22 = vpop.f32.mrf.mxu0 }
0x3d2c   :  { %v8276_v32 = vadd.f32 %v8275_v44, %v15133_v62  ;;  %v8317_v34 = vadd.f32 %v8316_v22, %v15118_v49 }
0x3d2d   :  { %v8277_v23 = vpop.f32.mrf.mxu1  ;;  %v11664_v53 = vpop.f32.mrf.mxu0 }
0x3d2e   :  { %v8322_v20 = vadd.f32 %v8276_v32, %v15099_v12  ;;  %v8278_v16 = vadd.f32 %v8277_v23, %v15139_v8  ;;  %8340 = vrot.lane.b32.xlu0 %v8317_v34, %s13200_s15 }
0x3d2f   :  { %v8279_v38 = vpop.f32.mrf.mxu1  ;;  %v8319_v17 = vpop.f32.mrf.mxu0 }
0x3d30   :  { %8338 = vrot.lane.b32.xlu1 %v8278_v16, %s13200_s15  ;;  %v10741_v51 = vmul.f32 -1.442695, %v8322_v20  ;;  %v8329_v22 = vadd.f32 %v8278_v16, %v15105_v24 }
0x3d31   :  { %v8280_v27 = vpop.f32.mrf.mxu1  ;;  %v11665_v15 = vpop.f32.mrf.mxu0 }
0x3d32   :  { %12508 = vpow2.f32 %v10741_v51  ;;  %v10742_v32 = vmul.f32 -1.442695, %v8329_v22 }
0x3d3f   :  { %v12509_v37 = vpop.eup %12508 }
0x3d40   :  { %v8326_v46 = vadd.f32 1.0, %v12509_v37 }
0x3d42   :  { %12510 = vrcp.f32 %v8326_v46 }
0x3d4f   :  { %v12511_v19 = vpop.eup %12510 }
0x3da0   :  { %v8341_v13 = vpop.permute.xlu0 %8340 }
0x3da2   :  { %v8339_v52 = vpop.permute.xlu1 %8338 }
0x3da3   :  { %v8342_v12 = vsel %vm1014_vm5, %v8339_v52, %v8341_v13 }
0x3da4   :  { %v8344_v39 = vmul.f32 %v12511_v19, %v8342_v12 }
0x3da6   :  { %8346 = vrot.lane.b32.xlu1 %v8344_v39, %s13200_s15 }
0x3e18   :  { %v8347_v21 = vpop.permute.xlu1 %8346 }
0x3e19   :  { %v8349_v36 = vadd.f32 %v8347_v21, %v15105_v24  ;;  %v8350_v42 = vadd.f32 %v8347_v21, %v15080_v1 }
0x3e1b   :  { %12512 = vtanh.f32 %v8349_v36 }
0x3e1c   :  { %12514 = vtanh.f32 %v8350_v42 }
0x3e1d   :  { %12516 = vpow2.f32 %v10742_v32 }
0x3e28   :  { %v12513_v56 = vpop.eup %12512 }
0x3e29   :  { %v12515_v41 = vpop.eup %12514  ;;  %v8353_v3 = vsub.f32 %v15276_v47, %v12513_v56 }
0x3e2a   :  { %v8354_v44 = vsub.f32 %v15274_v18, %v12515_v41  ;;  %v12517_v34 = vpop.eup %12516 }
0x3e2b   :  { %8357 = vrot.lane.b32.xlu0 %v8353_v3, %s13172_s0  ;;  %v8333_v23 = vadd.f32 1.0, %v12517_v34 }
0x3e2c   :  { %8359 = vrot.lane.b32.xlu1 %v8354_v44, %s13172_s0 }
0x3e2d   :  { %12518 = vrcp.f32 %v8333_v23 }
0x3e3a   :  { %v12519_v38 = vpop.eup %12518 }
0x3e9d   :  { %v8358_v1 = vpop.permute.xlu0 %8357 }
0x3e9e   :  { %v8360_v53 = vpop.permute.xlu1 %8359  ;;  %v8364_v20 = vmul.f32 %v12511_v19, %v8358_v1 }
0x3e9f   :  { %v8361_v17 = vsel %vm3653_vm8, %v8358_v1, %v8360_v53 }
0x3ea0   :  { %v8365_v47 = vmul.f32 %v12519_v38, %v8361_v17  ;;  %8368 = vrot.lane.b32.xlu0 %v8364_v20, %s13219_s23 }
0x3ea2   :  { %8370 = vrot.lane.b32.xlu1 %v8365_v47, %s13219_s23 }
0x3f12   :  { %v8369_v18 = vpop.permute.xlu0 %8368 }
0x3f14   :  { %v8371_v27 = vpop.permute.xlu1 %8370 }
0x3f15   :  { %v8372_v24 = vsel %vm3916_vm9, %v8369_v18, %v8371_v27  ;;  %v15333_v16 = vadd.f32 %v12515_v41, %v8371_v27 }
0x3f16   :  { %v15335_v15 = vadd.f32 %v12513_v56, %v8372_v24 }
0x3f17   :  { %v8378_v51 = vpack.c.bf16 %v15333_v16, %v15333_v16 }
0x3f18   :  { %v8377_v37 = vpack.c.bf16 %v15335_v15, %v15335_v15 }
0x3f19   :  { %8383 = vrot.lane.b32.xlu1 %v8378_v51, %s13200_s15 }
0x3f1a   :  { %8381 = vrot.lane.b32.xlu0 %v8377_v37, %s13200_s15 }
0x3f8b   :  { %v8384_v46 = vpop.permute.xlu1 %8383 }
0x3f8c   :  { %v8382_v13 = vpop.permute.xlu0 %8381 }
0x3f8d   :  { %v8385_v52 = vsel %vm1014_vm5, %v8382_v13, %v8384_v46  ;;  %v15407_v13 = vld [vmem:[#allocation18 + $0x108] ss:$12 sps:$4 sm:$0xff]  }
0x3f8e   :  { %10743 = vmatmul.mubr.msk.bf16.vlgmr.msra.gmra.mxu1 %vm3916_vm9, %v8385_v52  ;;  %11679 = vmatmul.mubr.msk.bf16.vlgmr.msra.gmra.mxu0 %vm3916_vm9, %v8385_v52  ;;  %v15410_v52 = vld [vmem:[#allocation18 + $0x110] ss:$12 sps:$4 sm:$0xff]  }
0x3f8f   :  { %8542 = vmatpush1.bf16.msra.mxu1 %v14962_v2  ;;  %11683 = vmatpush3.bf16.msra.mxu0 %v14966_v28  ;;  %v15371_v2 = vld [vmem:[#allocation18 + $0x10c] ss:$12 sps:$4 sm:$0xff]  }
0x3f90   :  { %8543 = vmatprep.subr.bf16.mxu1 %v14964_v35  ;;  %11684 = vmatprep.subr.bf16.mxu0 %v15753_v6 }
0x3f91   :  { %8569 = vmatprep.mubr.bf16.mxu1 %v15754_v59  ;;  %11694 = vmatprep.mubr.msk.bf16.mxu0 %vm13218_vm7, %v15753_v6 }
0x3f93   :  { %8544 = vmatpush1.bf16.msra.mxu1 %v14972_v57  ;;  %11685 = vmatpush3.bf16.msra.mxu0 %v14976_v54 }
0x3f94   :  { %8545 = vmatprep.subr.bf16.mxu1 %v14978_v50  ;;  %11686 = vmatprep.subr.bf16.mxu0 %v15753_v6 }
0x3f97   :  { %8546 = vmatpush1.bf16.msra.mxu1 %v14983_v0  ;;  %11687 = vmatpush3.bf16.msra.mxu0 %v14987_v14 }
0x3f98   :  { %8547 = vmatprep.subr.bf16.mxu1 %v14990_v63  ;;  %11688 = vmatprep.subr.bf16.mxu0 %v15753_v6 }
0x3f9b   :  { %8548 = vmatpush1.bf16.msra.mxu1 %v14996_v29  ;;  %11689 = vmatpush3.bf16.msra.mxu0 %v15000_v40 }
0x3f9c   :  { %8549 = vmatprep.subr.bf16.mxu1 %v15002_v4  ;;  %11690 = vmatprep.subr.bf16.mxu0 %v15753_v6 }
0x3f9f   :  { %8550 = vmatpush1.bf16.msra.mxu1 %v15009_v55  ;;  %11691 = vmatpush3.bf16.msra.mxu0 %v15013_v10 }
0x3fa0   :  { %8551 = vmatprep.subr.bf16.mxu1 %v15015_v25  ;;  %11692 = vmatprep.subr.bf16.mxu0 %v15753_v6 }
0x3fa3   :  { %8552 = vmatpush1.bf16.msra.mxu1 %v15021_v45  ;;  %11693 = vmatpush3.bf16.msra.mxu0 %v15024_v48 }
0x3fa4   :  { %8689 = vmatprep.subr.bf16.mxu1 %v15371_v2  ;;  %11698 = vmatprep.subr.bf16.mxu0 %v15753_v6 }
0x404e   :  { %v8423_v35 = vpop.f32.mrf.mxu1  ;;  %v8464_v28 = vpop.f32.mrf.mxu0 }
0x404f   :  { %v8424_v57 = vadd.f32 %v8423_v35, %v15133_v62  ;;  %v8465_v54 = vadd.f32 %v8464_v28, %v15118_v49  ;;  %v15413_v35 = vld [vmem:[#allocation18 + $0xf4] ss:$12 sps:$4 sm:$0xff]   ;;  %v15420_v28 = vld [vmem:[#allocation18 + $0xf0] ss:$12 sps:$4 sm:$0xff]  }
0x4050   :  { %v8425_v50 = vpop.f32.mrf.mxu1  ;;  %v11680_v0 = vpop.f32.mrf.mxu0 }
0x4051   :  { %v8470_v14 = vadd.f32 %v8424_v57, %v15110_v33  ;;  %v8426_v63 = vadd.f32 %v8425_v50, %v15139_v8  ;;  %8488 = vrot.lane.b32.xlu1 %v8465_v54, %s13200_s15  ;;  %v15423_v57 = vld [vmem:[#allocation18 + $0xf8] ss:$12 sps:$4 sm:$0xff]   ;;  %v15426_v54 = vld [vmem:[#allocation18 + $0xdc] ss:$12 sps:$4 sm:$0xff]   ;;  %v15433_v0 = vld [vmem:[#allocation18 + $0xe0] ss:$12 sps:$4 sm:$0xff]  }
0x4052   :  { %v8427_v29 = vpop.f32.mrf.mxu1  ;;  %v8467_v40 = vpop.f32.mrf.mxu0  ;;  %v15430_v50 = vld [vmem:[#allocation18 + $0xd8] ss:$12 sps:$4 sm:$0xff]  }
0x4053   :  { %8486 = vrot.lane.b32.xlu0 %v8426_v63, %s13200_s15  ;;  %v10745_v10 = vmul.f32 -1.442695, %v8470_v14  ;;  %v8477_v22 = vadd.f32 %v8426_v63, %v15113_v58  ;;  %v15436_v14 = vld [vmem:[#allocation18 + $0xc4] ss:$12 sps:$4 sm:$0xff]   ;;  %v15440_v63 = vld [vmem:[#allocation18 + $0xc0] ss:$12 sps:$4 sm:$0xff]  }
0x4054   :  { %v8428_v4 = vpop.f32.mrf.mxu1  ;;  %v11681_v55 = vpop.f32.mrf.mxu0  ;;  %v15443_v29 = vld [vmem:[#allocation18 + $0xc8] ss:$12 sps:$4 sm:$0xff]   ;;  %v15446_v40 = vld [vmem:[#allocation18 + $0xac] ss:$12 sps:$4 sm:$0xff]  }
0x4055   :  { %12520 = vpow2.f32 %v10745_v10  ;;  %v10746_v32 = vmul.f32 -1.442695, %v8477_v22  ;;  %v15450_v4 = vld [vmem:[#allocation18 + $0xa8] ss:$12 sps:$4 sm:$0xff]   ;;  %v15453_v55 = vld [vmem:[#allocation18 + $0xb0] ss:$12 sps:$4 sm:$0xff]  }
0x4056   :  { %v15456_v10 = vld [vmem:[#allocation18 + $0x94] ss:$12 sps:$4 sm:$0xff]  }
0x4062   :  { %v12521_v25 = vpop.eup %12520 }
0x4063   :  { %v8474_v45 = vadd.f32 1.0, %v12521_v25  ;;  %v15460_v25 = vld [vmem:[#allocation18 + $0x90] ss:$12 sps:$4 sm:$0xff]  }
0x4065   :  { %12522 = vrcp.f32 %v8474_v45  ;;  %v15463_v45 = vld [vmem:[#allocation18 + $0x98] ss:$12 sps:$4 sm:$0xff]  }
0x4072   :  { %v12523_v12 = vpop.eup %12522 }
0x40c3   :  { %v8489_v48 = vpop.permute.xlu1 %8488 }
0x40c5   :  { %v8487_v19 = vpop.permute.xlu0 %8486 }
0x40c6   :  { %v8490_v33 = vsel %vm1014_vm5, %v8487_v19, %v8489_v48 }
0x40c7   :  { %v8492_v39 = vmul.f32 %v12523_v12, %v8490_v33 }
0x40c9   :  { %8494 = vrot.lane.b32.xlu0 %v8492_v39, %s13200_s15 }
0x413b   :  { %v8495_v21 = vpop.permute.xlu0 %8494 }
0x413c   :  { %v8497_v36 = vadd.f32 %v8495_v21, %v15113_v58  ;;  %v8498_v42 = vadd.f32 %v8495_v21, %v15097_v9 }
0x413e   :  { %12524 = vtanh.f32 %v8497_v36 }
0x413f   :  { %12526 = vtanh.f32 %v8498_v42 }
0x4140   :  { %12528 = vpow2.f32 %v10746_v32 }
0x414b   :  { %v12525_v56 = vpop.eup %12524 }
0x414c   :  { %v12527_v41 = vpop.eup %12526  ;;  %v8501_v3 = vsub.f32 %v15335_v15, %v12525_v56 }
0x414d   :  { %v8502_v44 = vsub.f32 %v15333_v16, %v12527_v41  ;;  %v12529_v34 = vpop.eup %12528 }
0x414e   :  { %8505 = vrot.lane.b32.xlu1 %v8501_v3, %s13172_s0  ;;  %v8481_v23 = vadd.f32 1.0, %v12529_v34 }
0x414f   :  { %8507 = vrot.lane.b32.xlu0 %v8502_v44, %s13172_s0 }
0x4150   :  { %12530 = vrcp.f32 %v8481_v23 }
0x415d   :  { %v12531_v20 = vpop.eup %12530 }
0x41c0   :  { %v8506_v9 = vpop.permute.xlu1 %8505 }
0x41c1   :  { %v8508_v1 = vpop.permute.xlu0 %8507  ;;  %v8512_v53 = vmul.f32 %v12523_v12, %v8506_v9 }
0x41c2   :  { %v8509_v38 = vsel %vm3653_vm8, %v8506_v9, %v8508_v1 }
0x41c3   :  { %v8513_v17 = vmul.f32 %v12531_v20, %v8509_v38  ;;  %8516 = vrot.lane.b32.xlu1 %v8512_v53, %s13219_s23 }
0x41c5   :  { %8518 = vrot.lane.b32.xlu0 %v8513_v17, %s13219_s23 }
0x4235   :  { %v8517_v47 = vpop.permute.xlu1 %8516 }
0x4237   :  { %v8519_v18 = vpop.permute.xlu0 %8518 }
0x4238   :  { %v8520_v58 = vsel %vm3916_vm9, %v8517_v47, %v8519_v18  ;;  %v15394_v27 = vadd.f32 %v12527_v41, %v8519_v18 }
0x4239   :  { %v15396_v24 = vadd.f32 %v12525_v56, %v8520_v58 }
0x423a   :  { %v8526_v16 = vpack.c.bf16 %v15394_v27, %v15394_v27 }
0x423b   :  { %v8525_v15 = vpack.c.bf16 %v15396_v24, %v15396_v24 }
0x423c   :  { %8531 = vrot.lane.b32.xlu0 %v8526_v16, %s13200_s15 }
0x423d   :  { %8529 = vrot.lane.b32.xlu1 %v8525_v15, %s13200_s15 }
0x42ae   :  { %v8532_v51 = vpop.permute.xlu0 %8531 }
0x42af   :  { %v8530_v37 = vpop.permute.xlu1 %8529 }
0x42b0   :  { %v8533_v46 = vsel %vm1014_vm5, %v8530_v37, %v8532_v51 }
0x42b1   :  { %10747 = vmatmul.mubr.msk.bf16.vlgmr.msra.gmra.mxu1 %vm3916_vm9, %v8533_v46  ;;  %11695 = vmatmul.mubr.msk.bf16.vlgmr.msra.gmra.mxu0 %vm3916_vm9, %v8533_v46 }
0x42b2   :  { %8690 = vmatpush1.bf16.msra.mxu1 %v15407_v13  ;;  %11699 = vmatpush3.bf16.msra.mxu0 %v15410_v52 }
0x42b3   :  { %8691 = vmatprep.subr.bf16.mxu1 %v15413_v35  ;;  %11700 = vmatprep.subr.bf16.mxu0 %v15753_v6 }
0x42b4   :  { %8717 = vmatprep.mubr.bf16.mxu1 %v15754_v59  ;;  %11710 = vmatprep.mubr.msk.bf16.mxu0 %vm13218_vm7, %v15753_v6 }
0x42b6   :  { %8692 = vmatpush1.bf16.msra.mxu1 %v15420_v28  ;;  %11701 = vmatpush3.bf16.msra.mxu0 %v15423_v57 }
0x42b7   :  { %8693 = vmatprep.subr.bf16.mxu1 %v15426_v54  ;;  %11702 = vmatprep.subr.bf16.mxu0 %v15753_v6 }
0x42ba   :  { %8694 = vmatpush1.bf16.msra.mxu1 %v15430_v50  ;;  %11703 = vmatpush3.bf16.msra.mxu0 %v15433_v0 }
0x42bb   :  { %8695 = vmatprep.subr.bf16.mxu1 %v15436_v14  ;;  %11704 = vmatprep.subr.bf16.mxu0 %v15753_v6 }
0x42be   :  { %8696 = vmatpush1.bf16.msra.mxu1 %v15440_v63  ;;  %11705 = vmatpush3.bf16.msra.mxu0 %v15443_v29 }
0x42bf   :  { %8697 = vmatprep.subr.bf16.mxu1 %v15446_v40  ;;  %11706 = vmatprep.subr.bf16.mxu0 %v15753_v6 }
0x42c2   :  { %8698 = vmatpush1.bf16.msra.mxu1 %v15450_v4  ;;  %11707 = vmatpush3.bf16.msra.mxu0 %v15453_v55 }
0x42c3   :  { %8699 = vmatprep.subr.bf16.mxu1 %v15456_v10  ;;  %11708 = vmatprep.subr.bf16.mxu0 %v15753_v6 }
0x42c6   :  { %8700 = vmatpush1.bf16.msra.mxu1 %v15460_v25  ;;  %11709 = vmatpush3.bf16.msra.mxu0 %v15463_v45 }
0x42c7   :  { %8837 = vmatprep.subr.bf16.mxu1 %v15371_v2  ;;  %11714 = vmatprep.subr.bf16.mxu0 %v15753_v6 }
0x4371   :  { %v8571_v48 = vpop.f32.mrf.mxu1  ;;  %v8612_v19 = vpop.f32.mrf.mxu0 }
0x4372   :  { %v8572_v12 = vadd.f32 %v8571_v48, %v15133_v62  ;;  %v8613_v33 = vadd.f32 %v8612_v19, %v15118_v49 }
0x4373   :  { %v8573_v39 = vpop.f32.mrf.mxu1  ;;  %v11696_v21 = vpop.f32.mrf.mxu0 }
0x4374   :  { %v8618_v36 = vadd.f32 %v8572_v12, %v15115_v30  ;;  %v8574_v42 = vadd.f32 %v8573_v39, %v15139_v8  ;;  %8636 = vrot.lane.b32.xlu0 %v8613_v33, %s13200_s15 }
0x4375   :  { %v8575_v56 = vpop.f32.mrf.mxu1  ;;  %v8615_v41 = vpop.f32.mrf.mxu0 }
0x4376   :  { %8634 = vrot.lane.b32.xlu1 %v8574_v42, %s13200_s15  ;;  %v10749_v44 = vmul.f32 -1.442695, %v8618_v36  ;;  %v8625_v16 = vadd.f32 %v8574_v42, %v15121_v60 }
0x4377   :  { %v8576_v2 = vpop.f32.mrf.mxu1  ;;  %v11697_v3 = vpop.f32.mrf.mxu0 }
0x4378   :  { %12532 = vpow2.f32 %v10749_v44  ;;  %v10750_v15 = vmul.f32 -1.442695, %v8625_v16 }
0x4385   :  { %v12533_v22 = vpop.eup %12532 }
0x4386   :  { %v8622_v32 = vadd.f32 1.0, %v12533_v22 }
0x4388   :  { %12534 = vrcp.f32 %v8622_v32 }
0x4395   :  { %v12535_v9 = vpop.eup %12534 }
0x43e6   :  { %v8637_v34 = vpop.permute.xlu0 %8636 }
0x43e8   :  { %v8635_v23 = vpop.permute.xlu1 %8634 }
0x43e9   :  { %v8638_v30 = vsel %vm1014_vm5, %v8635_v23, %v8637_v34 }
0x43ea   :  { %v8640_v1 = vmul.f32 %v12535_v9, %v8638_v30 }
0x43ec   :  { %8642 = vrot.lane.b32.xlu1 %v8640_v1, %s13200_s15 }
0x445e   :  { %v8643_v53 = vpop.permute.xlu1 %8642 }
0x445f   :  { %v8645_v20 = vadd.f32 %v8643_v53, %v15121_v60  ;;  %v8646_v38 = vadd.f32 %v8643_v53, %v15108_v11 }
0x4461   :  { %12536 = vtanh.f32 %v8645_v20 }
0x4462   :  { %12538 = vtanh.f32 %v8646_v38 }
0x4463   :  { %12540 = vpow2.f32 %v10750_v15 }
0x446e   :  { %v12537_v17 = vpop.eup %12536 }
0x446f   :  { %v12539_v47 = vpop.eup %12538  ;;  %v8649_v18 = vsub.f32 %v15396_v24, %v12537_v17 }
0x4470   :  { %v8650_v58 = vsub.f32 %v15394_v27, %v12539_v47  ;;  %v12541_v51 = vpop.eup %12540 }
0x4471   :  { %8653 = vrot.lane.b32.xlu0 %v8649_v18, %s13172_s0  ;;  %v8629_v37 = vadd.f32 1.0, %v12541_v51 }
0x4472   :  { %8655 = vrot.lane.b32.xlu1 %v8650_v58, %s13172_s0 }
0x4473   :  { %12542 = vrcp.f32 %v8629_v37 }
0x4480   :  { %v12543_v19 = vpop.eup %12542 }
0x44e3   :  { %v8654_v11 = vpop.permute.xlu0 %8653 }
0x44e4   :  { %v8656_v46 = vpop.permute.xlu1 %8655  ;;  %v8660_v48 = vmul.f32 %v12535_v9, %v8654_v11 }
0x44e5   :  { %v8657_v12 = vsel %vm3653_vm8, %v8654_v11, %v8656_v46 }
0x44e6   :  { %v8661_v24 = vmul.f32 %v12543_v19, %v8657_v12  ;;  %8664 = vrot.lane.b32.xlu0 %v8660_v48, %s13219_s23 }
0x44e8   :  { %8666 = vrot.lane.b32.xlu1 %v8661_v24, %s13219_s23 }
0x4558   :  { %v8665_v27 = vpop.permute.xlu0 %8664 }
0x455a   :  { %v8667_v33 = vpop.permute.xlu1 %8666 }
0x455b   :  { %v8668_v60 = vsel %vm3916_vm9, %v8665_v27, %v8667_v33  ;;  %v15487_v39 = vadd.f32 %v12539_v47, %v8667_v33 }
0x455c   :  { %v15489_v21 = vadd.f32 %v12537_v17, %v8668_v60 }
0x455d   :  { %v8674_v36 = vpack.c.bf16 %v15487_v39, %v15487_v39 }
0x455e   :  { %v8673_v42 = vpack.c.bf16 %v15489_v21, %v15489_v21 }
0x455f   :  { %8679 = vrot.lane.b32.xlu1 %v8674_v36, %s13200_s15 }
0x4560   :  { %8677 = vrot.lane.b32.xlu0 %v8673_v42, %s13200_s15 }
0x45d1   :  { %v8680_v56 = vpop.permute.xlu1 %8679 }
0x45d2   :  { %v8678_v41 = vpop.permute.xlu0 %8677 }
0x45d3   :  { %v8681_v2 = vsel %vm1014_vm5, %v8678_v41, %v8680_v56 }
0x45d4   :  { %10751 = vmatmul.mubr.msk.bf16.vlgmr.msra.gmra.mxu1 %vm3916_vm9, %v8681_v2  ;;  %11711 = vmatmul.mubr.msk.bf16.vlgmr.msra.gmra.mxu0 %vm3916_vm9, %v8681_v2 }
0x45d5   :  { %8838 = vmatpush1.bf16.msra.mxu1 %v15407_v13  ;;  %11715 = vmatpush3.bf16.msra.mxu0 %v15410_v52 }
0x45d6   :  { %8839 = vmatprep.subr.bf16.mxu1 %v15413_v35  ;;  %11716 = vmatprep.subr.bf16.mxu0 %v15753_v6 }
0x45d7   :  { %8865 = vmatprep.mubr.bf16.mxu1 %v15754_v59  ;;  %11726 = vmatprep.mubr.msk.bf16.mxu0 %vm13218_vm7, %v15753_v6 }
0x45d9   :  { %8840 = vmatpush1.bf16.msra.mxu1 %v15420_v28  ;;  %11717 = vmatpush3.bf16.msra.mxu0 %v15423_v57 }
0x45da   :  { %8841 = vmatprep.subr.bf16.mxu1 %v15426_v54  ;;  %11718 = vmatprep.subr.bf16.mxu0 %v15753_v6 }
0x45dd   :  { %8842 = vmatpush1.bf16.msra.mxu1 %v15430_v50  ;;  %11719 = vmatpush3.bf16.msra.mxu0 %v15433_v0 }
0x45de   :  { %8843 = vmatprep.subr.bf16.mxu1 %v15436_v14  ;;  %11720 = vmatprep.subr.bf16.mxu0 %v15753_v6 }
0x45e1   :  { %8844 = vmatpush1.bf16.msra.mxu1 %v15440_v63  ;;  %11721 = vmatpush3.bf16.msra.mxu0 %v15443_v29 }
0x45e2   :  { %8845 = vmatprep.subr.bf16.mxu1 %v15446_v40  ;;  %11722 = vmatprep.subr.bf16.mxu0 %v15753_v6 }
0x45e5   :  { %8846 = vmatpush1.bf16.msra.mxu1 %v15450_v4  ;;  %11723 = vmatpush3.bf16.msra.mxu0 %v15453_v55 }
0x45e6   :  { %8847 = vmatprep.subr.bf16.mxu1 %v15456_v10  ;;  %11724 = vmatprep.subr.bf16.mxu0 %v15753_v6 }
0x45e9   :  { %8848 = vmatpush1.bf16.msra.mxu1 %v15460_v25  ;;  %11725 = vmatpush3.bf16.msra.mxu0 %v15463_v45 }
0x4694   :  { %v8719_v59 = vpop.f32.mrf.mxu1  ;;  %v8760_v13 = vpop.f32.mrf.mxu0 }
0x4695   :  { %v8720_v52 = vadd.f32 %v8719_v59, %v15133_v62  ;;  %v8761_v35 = vadd.f32 %v8760_v13, %v15118_v49 }
0x4696   :  { %v8721_v28 = vpop.f32.mrf.mxu1  ;;  %v11712_v57 = vpop.f32.mrf.mxu0 }
0x4697   :  { %v8766_v54 = vadd.f32 %v8720_v52, %v15123_v7  ;;  %v8722_v50 = vadd.f32 %v8721_v28, %v15139_v8  ;;  %8784 = vrot.lane.b32.xlu1 %v8761_v35, %s13200_s15 }
0x4698   :  { %v8723_v0 = vpop.f32.mrf.mxu1  ;;  %v8763_v6 = vpop.f32.mrf.mxu0 }
0x4699   :  { %8782 = vrot.lane.b32.xlu0 %v8722_v50, %s13200_s15  ;;  %v10753_v29 = vmul.f32 -1.442695, %v8766_v54  ;;  %v8773_v30 = vadd.f32 %v8722_v50, %v15127_v61 }
0x469a   :  { %v8724_v14 = vpop.f32.mrf.mxu1  ;;  %v11713_v63 = vpop.f32.mrf.mxu0 }
0x469b   :  { %12544 = vpow2.f32 %v10753_v29  ;;  %v10754_v1 = vmul.f32 -1.442695, %v8773_v30  ;;  %v10779_v30 = vld [vmem:[%s15756_s10 + $0x4d0] sm:$0xff] }
0x46a8   :  { %v12545_v40 = vpop.eup %12544 }
0x46a9   :  { %v8770_v4 = vadd.f32 1.0, %v12545_v40 }
0x46ab   :  { %12546 = vrcp.f32 %v8770_v4 }
0x46b8   :  { %v12547_v25 = vpop.eup %12546 }
0x4709   :  { %v8785_v55 = vpop.permute.xlu1 %8784 }
0x470b   :  { %v8783_v10 = vpop.permute.xlu0 %8782 }
0x470c   :  { %v8786_v7 = vsel %vm1014_vm5, %v8783_v10, %v8785_v55  ;;  %v10787_v55 = vld [vmem:[%s15756_s10 + $0x550] sm:$0xff] }
0x470d   :  { %v8788_v45 = vmul.f32 %v12547_v25, %v8786_v7  ;;  %v10789_v10 = vld [vmem:[%s15756_s10 + $0x570] sm:$0xff] }
0x470e   :  { %v10843_v7 = vcombine.low %v10787_v55, %v10789_v10 }
0x470f   :  { %8790 = vrot.lane.b32.xlu0 %v8788_v45, %s13200_s15  ;;  %v10844_v45 = vcombine.high %v10787_v55, %v10789_v10  ;;  %v10760_v55 = vld [vmem:[%s15756_s10 + $0x398] sm:$0xff] }
0x4710   :  { %v10762_v10 = vld [vmem:[%s15756_s10 + $0x3b8] sm:$0xff] }
0x4711   :  { %9341 = vmatprep.subr.bf16.mxu1 %v10844_v45 }
0x4781   :  { %v8791_v3 = vpop.permute.xlu0 %8790 }
0x4782   :  { %v8793_v44 = vadd.f32 %v8791_v3, %v15127_v61  ;;  %v8794_v22 = vadd.f32 %v8791_v3, %v15091_v31  ;;  %v10790_v3 = vld [vmem:[%s15756_s10 + $0x578] sm:$0xff] }
0x4784   :  { %12548 = vtanh.f32 %v8793_v44  ;;  %v10783_v44 = vld [vmem:[%s15756_s10 + $0x510] sm:$0xff] }
0x4785   :  { %12550 = vtanh.f32 %v8794_v22  ;;  %v10785_v22 = vld [vmem:[%s15756_s10 + $0x530] sm:$0xff] }
0x4786   :  { %12552 = vpow2.f32 %v10754_v1 }
0x4791   :  { %v12549_v32 = vpop.eup %12548 }
0x4792   :  { %v12551_v34 = vpop.eup %12550  ;;  %v8797_v23 = vsub.f32 %v15489_v21, %v12549_v32 }
0x4793   :  { %v8798_v9 = vsub.f32 %v15487_v39, %v12551_v34  ;;  %v12553_v53 = vpop.eup %12552 }
0x4794   :  { %8801 = vrot.lane.b32.xlu1 %v8797_v23, %s13172_s0  ;;  %v8777_v20 = vadd.f32 1.0, %v12553_v53  ;;  %v10784_v23 = vld [vmem:[%s15756_s10 + $0x518] sm:$0xff] }
0x4795   :  { %8803 = vrot.lane.b32.xlu0 %v8798_v9, %s13172_s0  ;;  %v10786_v9 = vld [vmem:[%s15756_s10 + $0x538] sm:$0xff] }
0x4796   :  { %12554 = vrcp.f32 %v8777_v20  ;;  %v10842_v53 = vcombine.high %v10784_v23, %v10786_v9  ;;  %v10781_v20 = vld [vmem:[%s15756_s10 + $0x4f0] sm:$0xff] }
0x47a3   :  { %v12555_v47 = vpop.eup %12554 }
0x4806   :  { %v8802_v31 = vpop.permute.xlu1 %8801 }
0x4807   :  { %v8804_v38 = vpop.permute.xlu0 %8803  ;;  %v8808_v17 = vmul.f32 %v12547_v25, %v8802_v31  ;;  %v10788_v25 = vld [vmem:[%s15756_s10 + $0x558] sm:$0xff] }
0x4808   :  { %v8805_v18 = vsel %vm3653_vm8, %v8802_v31, %v8804_v38  ;;  %v10780_v31 = vld [vmem:[%s15756_s10 + $0x4d8] sm:$0xff] }
0x4809   :  { %v8809_v58 = vmul.f32 %v12555_v47, %v8805_v18  ;;  %8812 = vrot.lane.b32.xlu1 %v8808_v17, %s13219_s23  ;;  %v10782_v38 = vld [vmem:[%s15756_s10 + $0x4f8] sm:$0xff]  ;;  %v10839_v18 = vcombine.low %v10783_v44, %v10785_v22 }
0x480b   :  { %8814 = vrot.lane.b32.xlu0 %v8809_v58, %s13219_s23 }
0x487b   :  { %v8813_v16 = vpop.permute.xlu1 %8812 }
0x487d   :  { %v8815_v15 = vpop.permute.xlu0 %8814 }
0x487e   :  { %v8816_v61 = vsel %vm3916_vm9, %v8813_v16, %v8815_v15  ;;  %v8820_v51 = vadd.f32 %v12551_v34, %v8815_v15  ;;  %v10840_v34 = vcombine.high %v10783_v44, %v10785_v22  ;;  %v10841_v15 = vcombine.low %v10784_v23, %v10786_v9  ;;  %v10811_v44 = vld [vmem:[%s15756_s10 + $0x6d0] sm:$0xff] }
0x487f   :  { %v8819_v37 = vadd.f32 %v12549_v32, %v8816_v61  ;;  %v10846_v32 = vcombine.high %v10788_v25, %v10790_v3  ;;  %v10836_v61 = vcombine.high %v10779_v30, %v10781_v20  ;;  %v10813_v22 = vld [vmem:[%s15756_s10 + $0x6f0] sm:$0xff]  ;;  %v10817_v23 = vcombine.low %v10760_v55, %v10762_v10 }
0x4880   :  { %v8822_v11 = vpack.c.bf16 %v8820_v51, %v8820_v51  ;;  %v10868_v9 = vcombine.high %v10811_v44, %v10813_v22 }
0x4881   :  { %v8821_v46 = vpack.c.bf16 %v8819_v37, %v8819_v37  ;;  %9382 = vmatprep.subr.bf16.mxu0 %v10846_v32  ;;  %v10814_v32 = vld [vmem:[%s15756_s10 + $0x6f8] sm:$0xff] }
0x4882   :  { %8827 = vrot.lane.b32.xlu0 %v8822_v11, %s13200_s15  ;;  %v10775_v11 = vld [vmem:[%s15756_s10 + $0x490] sm:$0xff] }
0x4883   :  { %8825 = vrot.lane.b32.xlu1 %v8821_v46, %s13200_s15  ;;  %v10777_v46 = vld [vmem:[%s15756_s10 + $0x4b0] sm:$0xff] }
0x48f4   :  { %v8828_v48 = vpop.permute.xlu0 %8827 }
0x48f5   :  { %v8826_v19 = vpop.permute.xlu1 %8825 }
0x48f6   :  { %v8829_v12 = vsel %vm1014_vm5, %v8826_v19, %v8828_v48  ;;  %v10776_v48 = vld [vmem:[%s15756_s10 + $0x498] sm:$0xff] }
0x48f7   :  { %10755 = vmatmul.mubr.msk.bf16.vlgmr.msra.gmra.mxu1 %vm3916_vm9, %v8829_v12  ;;  %11727 = vmatmul.mubr.msk.bf16.vlgmr.msra.gmra.mxu0 %vm3916_vm9, %v8829_v12  ;;  %v10778_v19 = vld [vmem:[%s15756_s10 + $0x4b8] sm:$0xff]  ;;  %v10835_v12 = vcombine.low %v10779_v30, %v10781_v20 }
0x48f8   :  { %9342 = vmatpush1.bf16.msra.mxu1 %v10843_v7  ;;  %v10808_v20 = vld [vmem:[%s15756_s10 + $0x698] sm:$0xff] }
0x48f9   :  { %9343 = vmatprep.subr.bf16.mxu1 %v10840_v34 }
0x48fc   :  { %9344 = vmatpush1.bf16.msra.mxu1 %v10839_v18 }
0x48fd   :  { %9345 = vmatprep.subr.bf16.mxu1 %v10836_v61  ;;  %v10806_v61 = vld [vmem:[%s15756_s10 + $0x678] sm:$0xff] }
0x4900   :  { %9346 = vmatpush1.bf16.msra.mxu1 %v10835_v12  ;;  %v10800_v12 = vld [vmem:[%s15756_s10 + $0x618] sm:$0xff] }
0x49b7   :  { %v8867_v24 = vpop.f32.mrf.mxu1  ;;  %v8908_v27 = vpop.f32.mrf.mxu0 }
0x49b8   :  { %v8868_v33 = vadd.f32 %v8867_v24, %v15133_v62  ;;  %v8909_v60 = vadd.f32 %v8908_v27, %v15118_v49  ;;  %v10837_v24 = vcombine.low %v10780_v31, %v10782_v38  ;;  %v10832_v27 = vcombine.high %v10775_v11, %v10777_v46 }
0x49b9   :  { %v8869_v39 = vpop.f32.mrf.mxu1  ;;  %v11728_v21 = vpop.f32.mrf.mxu0 }
0x49ba   :  { %v8914_v36 = vadd.f32 %v8868_v33, %v15130_v26  ;;  %v8870_v42 = vadd.f32 %v8869_v39, %v15139_v8  ;;  %8932 = vrot.lane.b32.xlu0 %v8909_v60, %s13200_s15  ;;  %v10834_v33 = vcombine.high %v10776_v48, %v10778_v19  ;;  %v10771_v60 = vld [vmem:[%s15756_s10 + $0x450] sm:$0xff]  ;;  %v10772_v21 = vld [vmem:[%s15756_s10 + $0x458] sm:$0xff]  ;;  %9347 = vmatprep.subr.bf16.mxu1 %v10832_v27 }
0x49bb   :  { %v8871_v56 = vpop.f32.mrf.mxu1  ;;  %v8911_v41 = vpop.f32.mrf.mxu0  ;;  %v10773_v39 = vld [vmem:[%s15756_s10 + $0x470] sm:$0xff] }
0x49bc   :  { %8930 = vrot.lane.b32.xlu1 %v8870_v42, %s13200_s15  ;;  %v10757_v13 = vmul.f32 -1.442695, %v8914_v36  ;;  %v10774_v36 = vld [vmem:[%s15756_s10 + $0x478] sm:$0xff]  ;;  %v10833_v56 = vcombine.low %v10776_v48, %v10778_v19  ;;  %v10828_v41 = vcombine.high %v10771_v60, %v10773_v39  ;;  %v10799_v48 = vld [vmem:[%s15756_s10 + $0x610] sm:$0xff] }
0x49bd   :  { %v8872_v2 = vpop.f32.mrf.mxu1  ;;  %v11729_v59 = vpop.f32.mrf.mxu0  ;;  %v10801_v19 = vld [vmem:[%s15756_s10 + $0x630] sm:$0xff] }
0x49be   :  { %12556 = vpow2.f32 %v10757_v13  ;;  %v10830_v2 = vcombine.high %v10772_v21, %v10774_v36  ;;  %v10767_v59 = vld [vmem:[%s15756_s10 + $0x410] sm:$0xff] }
0x49bf   :  { %v10769_v13 = vld [vmem:[%s15756_s10 + $0x430] sm:$0xff] }
0x49cb   :  { %v12557_v52 = vpop.eup %12556 }
0x49cc   :  { %v8918_v62 = vadd.f32 1.0, %v12557_v52  ;;  %v10768_v52 = vld [vmem:[%s15756_s10 + $0x418] sm:$0xff] }
0x49ce   :  { %12558 = vrcp.f32 %v8918_v62  ;;  %v10770_v62 = vld [vmem:[%s15756_s10 + $0x438] sm:$0xff] }
0x49db   :  { %v12559_v28 = vpop.eup %12558 }
0x4a2c   :  { %v8933_v49 = vpop.permute.xlu0 %8932 }
0x4a2e   :  { %v8931_v35 = vpop.permute.xlu1 %8930 }
0x4a2f   :  { %v8934_v26 = vsel %vm1014_vm5, %v8931_v35, %v8933_v49  ;;  %v10827_v49 = vcombine.low %v10771_v60, %v10773_v39  ;;  %v10829_v35 = vcombine.low %v10772_v21, %v10774_v36  ;;  %v10856_v60 = vcombine.high %v10799_v48, %v10801_v19  ;;  %v10795_v21 = vld [vmem:[%s15756_s10 + $0x5d0] sm:$0xff] }
0x4a30   :  { %v8936_v57 = vmul.f32 %v12559_v28, %v8934_v26  ;;  %v10826_v26 = vcombine.high %v10768_v52, %v10770_v62  ;;  %v10797_v36 = vld [vmem:[%s15756_s10 + $0x5f0] sm:$0xff] }
0x4a32   :  { %8938 = vrot.lane.b32.xlu1 %v8936_v57, %s13200_s15  ;;  %v10763_v57 = vld [vmem:[%s15756_s10 + $0x3d0] sm:$0xff] }
0x4aa4   :  { %v8939_v8 = vpop.permute.xlu1 %8938 }
0x4aa5   :  { %v8941_v54 = vadd.f32 %v8939_v8, %v15136_v5  ;;  %v8942_v50 = vadd.f32 %v8939_v8, %v15102_v43  ;;  %v8921_v43 = vadd.f32 %v8870_v42, %v15136_v5  ;;  %v10845_v5 = vcombine.low %v10788_v25, %v10790_v3  ;;  %v10765_v8 = vld [vmem:[%s15756_s10 + $0x3f0] sm:$0xff] }
0x4aa6   :  { %v10831_v42 = vcombine.low %v10775_v11, %v10777_v46  ;;  %v10819_v25 = vcombine.low %v10763_v57, %v10765_v8  ;;  %v10818_v3 = vcombine.high %v10760_v55, %v10762_v10 }
0x4aa7   :  { %12560 = vtanh.f32 %v8941_v54  ;;  %v10758_v29 = vmul.f32 -1.442695, %v8921_v43  ;;  %9383 = vmatpush1.bf16.msra.mxu0 %v10845_v5  ;;  %v10764_v54 = vld [vmem:[%s15756_s10 + $0x3d8] sm:$0xff]  ;;  %v10820_v43 = vcombine.high %v10763_v57, %v10765_v8 }
0x4aa8   :  { %12562 = vtanh.f32 %v8942_v50  ;;  %9384 = vmatprep.subr.bf16.mxu0 %v10842_v53  ;;  %9348 = vmatpush1.bf16.msra.mxu1 %v10831_v42  ;;  %v10766_v50 = vld [vmem:[%s15756_s10 + $0x3f8] sm:$0xff]  ;;  %v10809_v53 = vld [vmem:[%s15756_s10 + $0x6b0] sm:$0xff] }
0x4aa9   :  { %12564 = vpow2.f32 %v10758_v29  ;;  %9349 = vmatprep.subr.bf16.mxu1 %v10828_v41  ;;  %v10822_v29 = vcombine.high %v10764_v54, %v10766_v50  ;;  %v10821_v7 = vcombine.low %v10764_v54, %v10766_v50  ;;  %v10812_v5 = vld [vmem:[%s15756_s10 + $0x6d8] sm:$0xff]  ;;  %v10855_v41 = vcombine.low %v10799_v48, %v10801_v19  ;;  %v12252_v48 = vld [vmem:[#allocation9 + $0x210] ss:$8 sps:$4 sm:$0xff]  }
0x4aaa   :  { %v10870_v30 = vcombine.high %v10812_v5, %v10814_v32  ;;  %v10796_v42 = vld [vmem:[%s15756_s10 + $0x5d8] sm:$0xff]  ;;  %v12255_v19 = vld [vmem:[#allocation9 + $0x310] ss:$8 sps:$4 sm:$0xff]  }
0x4aab   :  { %9385 = vmatpush1.bf16.msra.mxu0 %v10841_v15  ;;  %v10804_v15 = vld [vmem:[%s15756_s10 + $0x658] sm:$0xff] }
0x4aac   :  { %9350 = vmatpush1.bf16.msra.mxu1 %v10827_v49  ;;  %v10862_v46 = vcombine.high %v10804_v15, %v10806_v61  ;;  %v10791_v49 = vld [vmem:[%s15756_s10 + $0x590] sm:$0xff]  ;;  %v10794_v57 = vld [vmem:[%s15756_s10 + $0x5b8] sm:$0xff] }
0x4ab4   :  { %v15559_v0 = vpop.eup %12560 }
0x4ab5   :  { %v15561_v6 = vpop.eup %12562  ;;  %v8945_v14 = vsub.f32 %v8819_v37, %v15559_v0  ;;  %v10838_v37 = vcombine.high %v10780_v31, %v10782_v38  ;;  %v10810_v31 = vld [vmem:[%s15756_s10 + $0x6b8] sm:$0xff]  ;;  %v10867_v38 = vcombine.low %v10811_v44, %v10813_v22  ;;  %v12216_v22 = vld [vmem:[#allocation9 + $0x270] ss:$8 sps:$4 sm:$0xff]  }
0x4ab6   :  { %v8946_v63 = vsub.f32 %v8820_v51, %v15561_v6  ;;  %v12565_v40 = vpop.eup %12564  ;;  %v10866_v18 = vcombine.high %v10808_v20, %v10810_v31 }
0x4ab7   :  { %8949 = vrot.lane.b32.xlu0 %v8945_v14, %s13172_s0  ;;  %v8925_v4 = vadd.f32 1.0, %v12565_v40  ;;  %9386 = vmatprep.subr.bf16.mxu0 %v10838_v37  ;;  %v10823_v14 = vcombine.low %v10767_v59, %v10769_v13  ;;  %v10759_v40 = vld [vmem:[%s15756_s10 + $0x390] sm:$0xff]  ;;  %v10865_v37 = vcombine.low %v10808_v20, %v10810_v31  ;;  %v12236_v20 = vld [vmem:[#allocation9 + $0x244] ss:$8 sps:$4 sm:$0xff]  }
0x4ab8   :  { %8951 = vrot.lane.b32.xlu1 %v8946_v63, %s13172_s0  ;;  %9387 = vmatpush1.bf16.msra.mxu0 %v10837_v24  ;;  %v10825_v63 = vcombine.low %v10768_v52, %v10770_v62  ;;  %v10802_v24 = vld [vmem:[%s15756_s10 + $0x638] sm:$0xff]  ;;  %v10851_v52 = vcombine.low %v10795_v21, %v10797_v36  ;;  %s15785_s0 = sld [smem:[#allocation58_spill]] }
0x4ab9   :  { %12566 = vrcp.f32 %v8925_v4  ;;  %9388 = vmatprep.subr.bf16.mxu0 %v10834_v33  ;;  %v10761_v4 = vld [vmem:[%s15756_s10 + $0x3b0] sm:$0xff]  ;;  %v10861_v33 = vcombine.low %v10804_v15, %v10806_v61  ;;  %v10858_v39 = vcombine.high %v10800_v12, %v10802_v24  ;;  %v12239_v31 = vld [vmem:[#allocation9 + $0x344] ss:$8 sps:$4 sm:$0xff]  }
0x4aba   :  { %v10816_v45 = vcombine.high %v10759_v40, %v10761_v4  ;;  %v10815_v34 = vcombine.low %v10759_v40, %v10761_v4  ;;  %v12248_v15 = vld [vmem:[#allocation9 + $0x224] ss:$8 sps:$4 sm:$0xff]  }
0x4abb   :  { %v12251_v61 = vld [vmem:[#allocation9 + $0x324] ss:$8 sps:$4 sm:$0xff]  }
0x4abc   :  { %9389 = vmatpush1.bf16.msra.mxu0 %v10833_v56  ;;  %v10798_v56 = vld [vmem:[%s15756_s10 + $0x5f8] sm:$0xff] }
0x4abd   :  { %9390 = vmatprep.subr.bf16.mxu0 %v10830_v2  ;;  %v10857_v2 = vcombine.low %v10800_v12, %v10802_v24  ;;  %v10853_v62 = vcombine.low %v10796_v42, %v10798_v56  ;;  %v12260_v12 = vld [vmem:[#allocation9 + $0x204] ss:$8 sps:$4 sm:$0xff]  }
0x4abe   :  { %v12263_v24 = vld [vmem:[#allocation9 + $0x304] ss:$8 sps:$4 sm:$0xff]  }
0x4ac0   :  { %9391 = vmatpush1.bf16.msra.mxu0 %v10829_v35  ;;  %v10793_v35 = vld [vmem:[%s15756_s10 + $0x5b0] sm:$0xff] }
0x4ac1   :  { %9392 = vmatprep.subr.bf16.mxu0 %v10826_v26  ;;  %v10848_v26 = vcombine.high %v10791_v49, %v10793_v35  ;;  %v10847_v8 = vcombine.low %v10791_v49, %v10793_v35  ;;  %v12284_v49 = vld [vmem:[#allocation9 + $0x2c4] ss:$8 sps:$4 sm:$0xff]  }
0x4ac2   :  { %v12287_v35 = vld [vmem:[#allocation9 + $0x3c4] ss:$8 sps:$4 sm:$0xff]  }
0x4ac4   :  { %9393 = vmatpush1.bf16.msra.mxu0 %v10825_v63  ;;  %v12218_v63 = vld [vmem:[#allocation9 + $0x274] ss:$8 sps:$4 sm:$0xff]  }
0x4ac5   :  { %9394 = vmatprep.subr.bf16.mxu0 %v10822_v29  ;;  %v12221_v29 = vld [vmem:[#allocation9 + $0x374] ss:$8 sps:$4 sm:$0xff]  }
0x4ac6   :  { %v12567_v58 = vpop.eup %12566 }
0x4ac8   :  { %9395 = vmatpush1.bf16.msra.mxu0 %v10821_v7 }
0x4ac9   :  { %9396 = vmatprep.subr.bf16.mxu0 %v10818_v3 }
0x4acc   :  { %9397 = vmatpush1.bf16.msra.mxu0 %v10817_v23  ;;  %v12225_v23 = vld [vmem:[#allocation9 + $0x360] ss:$8 sps:$4 sm:$0xff]  }
0x4acd   :  { %9402 = vmatprep.subr.bf16.mxu0 %v10870_v30  ;;  %v12233_v30 = vld [vmem:[#allocation9 + $0x354] ss:$8 sps:$4 sm:$0xff]  }
0x4b29   :  { %v8950_v1 = vpop.permute.xlu0 %8949 }
0x4b2a   :  { %v8952_v17 = vpop.permute.xlu1 %8951  ;;  %v8956_v47 = vmul.f32 %v12559_v28, %v8950_v1  ;;  %v10824_v28 = vcombine.high %v10767_v59, %v10769_v13  ;;  %v10852_v59 = vcombine.high %v10795_v21, %v10797_v36  ;;  %v10854_v13 = vcombine.high %v10796_v42, %v10798_v56  ;;  %v12264_v21 = vld [vmem:[#allocation9 + $0x2f0] ss:$8 sps:$4 sm:$0xff]   ;;  %v12272_v42 = vld [vmem:[#allocation9 + $0x2e4] ss:$8 sps:$4 sm:$0xff]  }
0x4b2b   :  { %v8953_v16 = vsel %vm3653_vm8, %v8950_v1, %v8952_v17  ;;  %v10807_v1 = vld [vmem:[%s15756_s10 + $0x690] sm:$0xff]  ;;  %v10869_v17 = vcombine.low %v10812_v5, %v10814_v32  ;;  %v12224_v32 = vld [vmem:[#allocation9 + $0x264] ss:$8 sps:$4 sm:$0xff]  }
0x4b2c   :  { %v8957_v51 = vmul.f32 %v12567_v58, %v8953_v16  ;;  %8960 = vrot.lane.b32.xlu0 %v8956_v47, %s13219_s23  ;;  %9351 = vmatprep.subr.bf16.mxu1 %v10824_v28  ;;  %v10864_v47 = vcombine.high %v10807_v1, %v10809_v53  ;;  %v10803_v58 = vld [vmem:[%s15756_s10 + $0x650] sm:$0xff]  ;;  %v10792_v28 = vld [vmem:[%s15756_s10 + $0x598] sm:$0xff] }
0x4b2d   :  { %9352 = vmatpush1.bf16.msra.mxu1 %v10823_v14  ;;  %v10805_v16 = vld [vmem:[%s15756_s10 + $0x670] sm:$0xff]  ;;  %9403 = vmatpush2.bf16.msra.mxu0 %v10869_v17  ;;  %v10849_v54 = vcombine.low %v10792_v28, %v10794_v57  ;;  %v10850_v50 = vcombine.high %v10792_v28, %v10794_v57  ;;  %v12237_v17 = vld [vmem:[#allocation9 + $0x340] ss:$8 sps:$4 sm:$0xff]   ;;  %v12275_v56 = vld [vmem:[#allocation9 + $0x3e4] ss:$8 sps:$4 sm:$0xff]  }
0x4b2e   :  { %8962 = vrot.lane.b32.xlu1 %v8957_v51, %s13219_s23  ;;  %9353 = vmatprep.subr.bf16.mxu1 %v10820_v43  ;;  %v10863_v51 = vcombine.low %v10807_v1, %v10809_v53  ;;  %v10860_v11 = vcombine.high %v10803_v58, %v10805_v16  ;;  %v10859_v27 = vcombine.low %v10803_v58, %v10805_v16  ;;  %v12219_v5 = vld [vmem:[#allocation9 + $0x370] ss:$8 sps:$4 sm:$0xff]   ;;  %v12282_v28 = vld [vmem:[#allocation9 + $0x2c0] ss:$8 sps:$4 sm:$0xff]   ;;  %v12290_v57 = vld [vmem:[#allocation9 + $0x2b4] ss:$8 sps:$4 sm:$0xff]  }
0x4b2f   :  { %9404 = vmatprep.subr.bf16.mxu0 %v10866_v18  ;;  %v12228_v1 = vld [vmem:[#allocation9 + $0x250] ss:$8 sps:$4 sm:$0xff]   ;;  %v12245_v18 = vld [vmem:[#allocation9 + $0x334] ss:$8 sps:$4 sm:$0xff]  }
0x4b30   :  { %v12231_v53 = vld [vmem:[#allocation9 + $0x350] ss:$8 sps:$4 sm:$0xff]  }
0x4b31   :  { %9354 = vmatpush1.bf16.msra.mxu1 %v10819_v25  ;;  %9405 = vmatpush2.bf16.msra.mxu0 %v10865_v37  ;;  %v12240_v58 = vld [vmem:[#allocation9 + $0x230] ss:$8 sps:$4 sm:$0xff]   ;;  %v12249_v37 = vld [vmem:[#allocation9 + $0x320] ss:$8 sps:$4 sm:$0xff]  }
0x4b32   :  { %9355 = vmatprep.subr.bf16.mxu1 %v10816_v45  ;;  %9406 = vmatprep.subr.bf16.mxu0 %v10862_v46  ;;  %v12243_v16 = vld [vmem:[#allocation9 + $0x330] ss:$8 sps:$4 sm:$0xff]   ;;  %v12257_v46 = vld [vmem:[#allocation9 + $0x314] ss:$8 sps:$4 sm:$0xff]  }
0x4b33   :  { %v12267_v36 = vld [vmem:[#allocation9 + $0x3f0] ss:$8 sps:$4 sm:$0xff]  }
0x4b35   :  { %9356 = vmatpush1.bf16.msra.mxu1 %v10815_v34  ;;  %9407 = vmatpush2.bf16.msra.mxu0 %v10861_v33  ;;  %v12227_v34 = vld [vmem:[#allocation9 + $0x364] ss:$8 sps:$4 sm:$0xff]   ;;  %v12261_v33 = vld [vmem:[#allocation9 + $0x300] ss:$8 sps:$4 sm:$0xff]  }
0x4b36   :  { %9361 = vmatprep.subr.bf16.mxu1 %v10868_v9  ;;  %9408 = vmatprep.subr.bf16.mxu0 %v10858_v39  ;;  %v12230_v9 = vld [vmem:[#allocation9 + $0x254] ss:$8 sps:$4 sm:$0xff]  }
0x4b37   :  { %v12269_v39 = vld [vmem:[#allocation9 + $0x3f4] ss:$8 sps:$4 sm:$0xff]  }
0x4b39   :  { %9362 = vmatpush2.bf16.msra.mxu1 %v10867_v38  ;;  %9409 = vmatpush2.bf16.msra.mxu0 %v10857_v2  ;;  %v12234_v38 = vld [vmem:[#allocation9 + $0x240] ss:$8 sps:$4 sm:$0xff]  }
0x4b3a   :  { %9363 = vmatprep.subr.bf16.mxu1 %v10864_v47  ;;  %9410 = vmatprep.subr.bf16.mxu0 %v10854_v13  ;;  %v12242_v47 = vld [vmem:[#allocation9 + $0x234] ss:$8 sps:$4 sm:$0xff]   ;;  %v12273_v2 = vld [vmem:[#allocation9 + $0x3e0] ss:$8 sps:$4 sm:$0xff]  }
0x4b3b   :  { %v12281_v13 = vld [vmem:[#allocation9 + $0x3d4] ss:$8 sps:$4 sm:$0xff]  }
0x4b3d   :  { %9364 = vmatpush2.bf16.msra.mxu1 %v10863_v51  ;;  %9411 = vmatpush2.bf16.msra.mxu0 %v10853_v62  ;;  %v12246_v51 = vld [vmem:[#allocation9 + $0x220] ss:$8 sps:$4 sm:$0xff]   ;;  %v12279_v62 = vld [vmem:[#allocation9 + $0x3d0] ss:$8 sps:$4 sm:$0xff]  }
0x4b3e   :  { %9365 = vmatprep.subr.bf16.mxu1 %v10860_v11  ;;  %9412 = vmatprep.subr.bf16.mxu0 %v10850_v50  ;;  %v12254_v11 = vld [vmem:[#allocation9 + $0x214] ss:$8 sps:$4 sm:$0xff]   ;;  %v12291_v50 = vld [vmem:[#allocation9 + $0x3b0] ss:$8 sps:$4 sm:$0xff]  }
0x4b41   :  { %9366 = vmatpush2.bf16.msra.mxu1 %v10859_v27  ;;  %9413 = vmatpush2.bf16.msra.mxu0 %v10849_v54  ;;  %v12258_v27 = vld [vmem:[#allocation9 + $0x200] ss:$8 sps:$4 sm:$0xff]   ;;  %v12288_v54 = vld [vmem:[#allocation9 + $0x2b0] ss:$8 sps:$4 sm:$0xff]  }
0x4b42   :  { %9367 = vmatprep.subr.bf16.mxu1 %v10856_v60  ;;  %9870 = vmatprep.subr.bf16.mxu0 %v12221_v29  ;;  %v12266_v60 = vld [vmem:[#allocation9 + $0x2f4] ss:$8 sps:$4 sm:$0xff]   ;;  %v12297_v29 = vld [vmem:[#allocation9 + $0x3a0] ss:$8 sps:$4 sm:$0xff]  }
0x4b45   :  { %9368 = vmatpush2.bf16.msra.mxu1 %v10855_v41  ;;  %v12270_v41 = vld [vmem:[#allocation9 + $0x2e0] ss:$8 sps:$4 sm:$0xff]  }
0x4b46   :  { %9369 = vmatprep.subr.bf16.mxu1 %v10852_v59  ;;  %v12278_v59 = vld [vmem:[#allocation9 + $0x2d4] ss:$8 sps:$4 sm:$0xff]  }
0x4b49   :  { %9370 = vmatpush2.bf16.msra.mxu1 %v10851_v52  ;;  %v12276_v52 = vld [vmem:[#allocation9 + $0x2d0] ss:$8 sps:$4 sm:$0xff]  }
0x4b4a   :  { %9371 = vmatprep.subr.bf16.mxu1 %v10848_v26  ;;  %v12285_v26 = vld [vmem:[#allocation9 + $0x3c0] ss:$8 sps:$4 sm:$0xff]  }
0x4b4d   :  { %9372 = vmatpush2.bf16.msra.mxu1 %v10847_v8  ;;  %v12293_v8 = vld [vmem:[#allocation9 + $0x3b4] ss:$8 sps:$4 sm:$0xff]  }
0x4b4e   :  { %9829 = vmatprep.subr.bf16.mxu1 %v12218_v63  ;;  %v12299_v63 = vld [vmem:[#allocation9 + $0x3a4] ss:$8 sps:$4 sm:$0xff]  }
0x4b9e   :  { %v8961_v14 = vpop.permute.xlu0 %8960 }
0x4ba0   :  { %v8963_v43 = vpop.permute.xlu1 %8962 }
0x4ba1   :  { %v8964_v40 = vsel %vm3916_vm9, %v8961_v14, %v8963_v43  ;;  %v8968_v4 = vadd.f32 %v15561_v6, %v8963_v43  ;;  %v15778_v6 = vld [vmem:[#allocation84_spill] sm:$0xff]  ;;  %v12296_v14 = vld [vmem:[#allocation9 + $0x2a4] ss:$8 sps:$4 sm:$0xff]   ;;  %v12294_v43 = vld [vmem:[#allocation9 + $0x2a0] ss:$8 sps:$4 sm:$0xff]  }
0x4ba2   :  { %v8967_v55 = vadd.f32 %v15559_v0, %v8964_v40  ;;  %v12222_v0 = vld [vmem:[#allocation9 + $0x260] ss:$8 sps:$4 sm:$0xff]   ;;  %v12302_v40 = vld [vmem:[#allocation9 + $0x294] ss:$8 sps:$4 sm:$0xff]  }
0x4ba4   :  { %v11832_v10 = vpack.i.bf16 %v8968_v4, %v8967_v55  ;;  %v12305_v4 = vld [vmem:[#allocation9 + $0x394] ss:$8 sps:$4 sm:$0xff]   ;;  %v12300_v55 = vld [vmem:[#allocation9 + $0x290] ss:$8 sps:$4 sm:$0xff]  }
0x4ba6   :  { %11833 = vrot.lane.b32.xlu0 %v11832_v10, %s13200_s15  ;;  %v12303_v10 = vld [vmem:[#allocation9 + $0x390] ss:$8 sps:$4 sm:$0xff]  }
0x4c18   :  { %v11834_v25 = vpop.permute.xlu0 %11833 }
0x4c19   :  { %v11836_v7 = vunpack.i.h.bf16 %v11834_v25  ;;  %v11835_v45 = vunpack.i.l.bf16 %v11834_v25  ;;  %v12308_v25 = vld [vmem:[#allocation9 + $0x284] ss:$8 sps:$4 sm:$0xff]  }
0x4c1b   :  { %v8975_v3 = vsel %vm1014_vm5, %v11835_v45, %v11836_v7  ;;  %v12311_v7 = vld [vmem:[#allocation9 + $0x384] ss:$8 sps:$4 sm:$0xff]   ;;  %v12306_v45 = vld [vmem:[#allocation9 + $0x280] ss:$8 sps:$4 sm:$0xff]  }
0x4c1c   :  { %v8977_v44 = vpack.c.bf16 %v8975_v3, %v8975_v3  ;;  %v12309_v3 = vld [vmem:[#allocation9 + $0x380] ss:$8 sps:$4 sm:$0xff]  }
0x4c1e   :  { %10871 = vmatprep.mubr.msk.bf16.mxu1 %vm3916_vm9, %v8977_v44  ;;  %10872 = vmatprep.mubr.msk.bf16.mxu0 %vm3916_vm9, %v8977_v44  ;;  %v12312_v44 = vld [vmem:[%s15776_s2 + $0xf8] sm:$0xff]  }
0x4c1f   :  { %9374 = vmatmul.mubr.bf16.vlgmr.msra.gmra.mxu1 %v15778_v6  ;;  %9415 = vmatmul.mubr.bf16.vlgmr.msra.gmra.mxu0 %v15778_v6 }
0x4c20   :  { %9830 = vmatpush1.bf16.msra.mxu1 %v12216_v22  ;;  %9871 = vmatpush1.bf16.msra.mxu0 %v12219_v5  ;;  %v9036_v22 = vld [vmem:[#allocation2 + $0x8] sm:$0xff]  ;;  %v15779_v5 = vld [vmem:[#allocation82_spill] sm:$0xff] }
0x4c21   :  { %9831 = vmatprep.subr.bf16.mxu1 %v12224_v32  ;;  %9872 = vmatprep.subr.bf16.mxu0 %v12227_v34  ;;  %v9041_v32 = vrot.slane %v9036_v22, %v15779_v5  ;;  %v15780_v34 = vld [vmem:[#allocation83_spill] sm:$0xff] }
0x4c22   :  { %v9049_v6 = vrot.slane %v9036_v22, %v15780_v34  ;;  %v10969_v34 = vld [vmem:[#allocation12 + $0x1] ss:$0 sm:$0xff] }
0x4c24   :  { %9832 = vmatpush1.bf16.msra.mxu1 %v12222_v0  ;;  %9873 = vmatpush1.bf16.msra.mxu0 %v12225_v23  ;;  %v15781_v0 = vld [vmem:[#allocation80_spill] sm:$0xff] }
0x4c25   :  { %9833 = vmatprep.subr.bf16.mxu1 %v12230_v9  ;;  %9874 = vmatprep.subr.bf16.mxu0 %v12233_v30  ;;  %v9045_v23 = vrot.slane %v9036_v22, %v15781_v0  ;;  %v15782_v9 = vld [vmem:[#allocation81_spill] sm:$0xff] }
0x4c26   :  { %v9053_v30 = vrot.slane %v9036_v22, %v15782_v9  ;;  %v15786_v9 = vld [vmem:[#allocation85_spill] sm:$0xff] }
0x4c28   :  { %9834 = vmatpush1.bf16.msra.mxu1 %v12228_v1  ;;  %9875 = vmatpush1.bf16.msra.mxu0 %v12231_v53 }
0x4c29   :  { %9835 = vmatprep.subr.bf16.mxu1 %v12236_v20  ;;  %9876 = vmatprep.subr.bf16.mxu0 %v12239_v31 }
0x4c2c   :  { %9836 = vmatpush1.bf16.msra.mxu1 %v12234_v38  ;;  %9877 = vmatpush1.bf16.msra.mxu0 %v12237_v17 }
0x4c2d   :  { %9837 = vmatprep.subr.bf16.mxu1 %v12242_v47  ;;  %9878 = vmatprep.subr.bf16.mxu0 %v12245_v18 }
0x4c30   :  { %9838 = vmatpush1.bf16.msra.mxu1 %v12240_v58  ;;  %9879 = vmatpush1.bf16.msra.mxu0 %v12243_v16 }
0x4c31   :  { %9839 = vmatprep.subr.bf16.mxu1 %v12248_v15  ;;  %9880 = vmatprep.subr.bf16.mxu0 %v12251_v61 }
0x4c34   :  { %9840 = vmatpush1.bf16.msra.mxu1 %v12246_v51  ;;  %9881 = vmatpush1.bf16.msra.mxu0 %v12249_v37 }
0x4c35   :  { %9841 = vmatprep.subr.bf16.mxu1 %v12254_v11  ;;  %9882 = vmatprep.subr.bf16.mxu0 %v12257_v46 }
0x4c38   :  { %9842 = vmatpush1.bf16.msra.mxu1 %v12252_v48  ;;  %9883 = vmatpush1.bf16.msra.mxu0 %v12255_v19 }
0x4c39   :  { %9843 = vmatprep.subr.bf16.mxu1 %v12260_v12  ;;  %9884 = vmatprep.subr.bf16.mxu0 %v12263_v24  ;;  %v12313_v12 = vld [vmem:[%s15776_s2 + $0xb8] sm:$0xff]  }
0x4c3c   :  { %9844 = vmatpush1.bf16.msra.mxu1 %v12258_v27  ;;  %9885 = vmatpush1.bf16.msra.mxu0 %v12261_v33  ;;  %v12314_v33 = vld [vmem:[%s15776_s2 + $0xf0] sm:$0xff]  }
0x4c3d   :  { %9845 = vmatprep.subr.bf16.mxu1 %v12266_v60  ;;  %9886 = vmatprep.subr.bf16.mxu0 %v12269_v39  ;;  %v12315_v60 = vld [vmem:[%s15776_s2 + $0xb0] sm:$0xff]   ;;  %v12316_v39 = vld [vmem:[%s15776_s2 + $0xe8] sm:$0xff]  }
0x4c40   :  { %9846 = vmatpush2.bf16.msra.mxu1 %v12264_v21  ;;  %9887 = vmatpush2.bf16.msra.mxu0 %v12267_v36  ;;  %v12317_v21 = vld [vmem:[%s15776_s2 + $0xa8] sm:$0xff]   ;;  %v12318_v36 = vld [vmem:[%s15776_s2 + $0xe0] sm:$0xff]  }
0x4c41   :  { %9847 = vmatprep.subr.bf16.mxu1 %v12272_v42  ;;  %9888 = vmatprep.subr.bf16.mxu0 %v12275_v56  ;;  %v12319_v42 = vld [vmem:[%s15776_s2 + $0xa0] sm:$0xff]   ;;  %v12320_v56 = vld [vmem:[%s15776_s2 + $0xd8] sm:$0xff]  }
0x4c44   :  { %9848 = vmatpush2.bf16.msra.mxu1 %v12270_v41  ;;  %9889 = vmatpush2.bf16.msra.mxu0 %v12273_v2  ;;  %v12321_v41 = vld [vmem:[%s15776_s2 + $0x98] sm:$0xff]   ;;  %v12322_v2 = vld [vmem:[%s15776_s2 + $0xd0] sm:$0xff]  }
0x4c45   :  { %9849 = vmatprep.subr.bf16.mxu1 %v12278_v59  ;;  %9890 = vmatprep.subr.bf16.mxu0 %v12281_v13  ;;  %v12323_v59 = vld [vmem:[%s15776_s2 + $0x90] sm:$0xff]   ;;  %v12324_v13 = vld [vmem:[%s15776_s2 + $0xc8] sm:$0xff]  }
0x4c48   :  { %9850 = vmatpush2.bf16.msra.mxu1 %v12276_v52  ;;  %9891 = vmatpush2.bf16.msra.mxu0 %v12279_v62  ;;  %v12325_v52 = vld [vmem:[%s15776_s2 + $0x88] sm:$0xff]   ;;  %v12326_v62 = vld [vmem:[%s15776_s2 + $0xc0] sm:$0xff]  }
0x4c49   :  { %9851 = vmatprep.subr.bf16.mxu1 %v12284_v49  ;;  %9892 = vmatprep.subr.bf16.mxu0 %v12287_v35  ;;  %v12327_v49 = vld [vmem:[%s15776_s2 + $0x80] sm:$0xff]   ;;  %v9497_v35 = vld [vmem:[#allocation7 + $0x2] sm:$0x3] }
0x4c4c   :  { %9852 = vmatpush2.bf16.msra.mxu1 %v12282_v28  ;;  %9893 = vmatpush2.bf16.msra.mxu0 %v12285_v26  ;;  %v15783_v28 = vld [vmem:[#allocation77_spill] sm:$0xff] }
0x4c4d   :  { %9853 = vmatprep.subr.bf16.mxu1 %v12290_v57  ;;  %9894 = vmatprep.subr.bf16.mxu0 %v12293_v8  ;;  %v9502_v26 = vrot.slane %v9497_v35, %v15783_v28  ;;  %v15784_v57 = vld [vmem:[#allocation78_spill] sm:$0xff] }
0x4c4e   :  { %v9506_v8 = vrot.slane %v9497_v35, %v15784_v57 }
0x4c50   :  { %9854 = vmatpush2.bf16.msra.mxu1 %v12288_v54  ;;  %9895 = vmatpush2.bf16.msra.mxu0 %v12291_v50 }
0x4c51   :  { %9855 = vmatprep.subr.bf16.mxu1 %v12296_v14  ;;  %9896 = vmatprep.subr.bf16.mxu0 %v12299_v63 }
0x4c54   :  { %9856 = vmatpush2.bf16.msra.mxu1 %v12294_v43  ;;  %9897 = vmatpush2.bf16.msra.mxu0 %v12297_v29 }
0x4c55   :  { %9857 = vmatprep.subr.bf16.mxu1 %v12302_v40  ;;  %9898 = vmatprep.subr.bf16.mxu0 %v12305_v4 }
0x4c58   :  { %9858 = vmatpush2.bf16.msra.mxu1 %v12300_v55  ;;  %9899 = vmatpush2.bf16.msra.mxu0 %v12303_v10 }
0x4c59   :  { %9859 = vmatprep.subr.bf16.mxu1 %v12308_v25  ;;  %9900 = vmatprep.subr.bf16.mxu0 %v12311_v7 }
0x4c5c   :  { %9860 = vmatpush2.bf16.msra.mxu1 %v12306_v45  ;;  %9901 = vmatpush2.bf16.msra.mxu0 %v12309_v3 }
0x4c5d   :  { %11350 = vmatprep.subr.bf16.mxu1 %v12312_v44 }
0x4cdf   :  { %v9375_v1 = vpop.f32.mrf.mxu1  ;;  %v9416_v53 = vpop.f32.mrf.mxu0 }
0x4ce0   :  { %v9376_v20 = vadd.f32 %v9375_v1, %v9041_v32  ;;  %v9417_v31 = vadd.f32 %v9416_v53, %v9049_v6  ;;  %v10666_v32 = vld [vmem:[#allocation12] ss:$0 sm:$0xff]  ;;  %v3438_v53 = vld [vmem:[%s15785_s0] sm:$0xff] }
0x4ce1   :  { %v9377_v38 = vpop.f32.mrf.mxu1  ;;  %v9418_v17 = vpop.f32.mrf.mxu0 }
0x4ce2   :  { %v9378_v47 = vadd.f32 %v9377_v38, %v9045_v23  ;;  %v9419_v18 = vadd.f32 %v9418_v17, %v9053_v30  ;;  %v9423_v58 = vmax.f32 %v9376_v20, 0.0  ;;  %v9425_v16 = vmax.f32 %v9417_v31, 0.0 }
0x4ce3   :  { %v9379_v15 = vpop.f32.mrf.mxu1  ;;  %v9420_v61 = vpop.f32.mrf.mxu0  ;;  %v7308_v30 = vadd.f32 %v15786_v9, %v10666_v32 }
0x4ce4   :  { %v9424_v51 = vmax.f32 %v9378_v47, 0.0  ;;  %v9426_v37 = vmax.f32 %v9419_v18, 0.0  ;;  %v9427_v24 = vpack.c.bf16 %v9423_v58, %v9423_v58  ;;  %v9429_v27 = vpack.c.bf16 %v9425_v16, %v9425_v16 }
0x4ce5   :  { %v9380_v11 = vpop.f32.mrf.mxu1  ;;  %v9421_v46 = vpop.f32.mrf.mxu0 }
0x4ce6   :  { %v9428_v48 = vpack.c.bf16 %v9424_v51, %v9424_v51  ;;  %v9430_v19 = vpack.c.bf16 %v9426_v37, %v9426_v37 }
0x4ce8   :  { %9861 = vmatprep.mubr.bf16.mxu1 %v9428_v48  ;;  %9902 = vmatprep.mubr.bf16.mxu0 %v9430_v19 }
0x4ce9   :  { %9862 = vmatmul.mubr.bf16.vlgmr.msra.gmra.mxu1 %v9427_v24  ;;  %9903 = vmatmul.mubr.bf16.vlgmr.msra.gmra.mxu0 %v9429_v27 }
0x4cea   :  { %11351 = vmatpush3.bf16.msra.mxu1 %v12313_v12 }
0x4ceb   :  { %11352 = vmatprep.subr.bf16.mxu1 %v12314_v33 }
0x4cee   :  { %11353 = vmatpush3.bf16.msra.mxu1 %v12315_v60 }
0x4cef   :  { %11354 = vmatprep.subr.bf16.mxu1 %v12316_v39 }
0x4cf2   :  { %11355 = vmatpush3.bf16.msra.mxu1 %v12317_v21 }
0x4cf3   :  { %11356 = vmatprep.subr.bf16.mxu1 %v12318_v36 }
0x4cf6   :  { %11357 = vmatpush3.bf16.msra.mxu1 %v12319_v42 }
0x4cf7   :  { %11358 = vmatprep.subr.bf16.mxu1 %v12320_v56 }
0x4cfa   :  { %11359 = vmatpush3.bf16.msra.mxu1 %v12321_v41 }
0x4cfb   :  { %11360 = vmatprep.subr.bf16.mxu1 %v12322_v2 }
0x4cfe   :  { %11361 = vmatpush3.bf16.msra.mxu1 %v12323_v59 }
0x4cff   :  { %11362 = vmatprep.subr.bf16.mxu1 %v12324_v13 }
0x4d02   :  { %11363 = vmatpush3.bf16.msra.mxu1 %v12325_v52 }
0x4d03   :  { %11364 = vmatprep.subr.bf16.mxu1 %v12326_v62 }
0x4d06   :  { %11365 = vmatpush3.bf16.msra.mxu1 %v12327_v49 }
0x4da9   :  { %v9863_v54 = vpop.f32.mrf.mxu1  ;;  %v9904_v50 = vpop.f32.mrf.mxu0 }
0x4daa   :  { %v9864_v14 = vadd.f32 %v9863_v54, %v9502_v26 }
0x4dab   :  { %v9865_v63 = vpop.f32.mrf.mxu1  ;;  %v9906_v43 = vpop.f32.mrf.mxu0 }
0x4dac   :  { %v9905_v29 = vadd.f32 %v9904_v50, %v9864_v14  ;;  %v9866_v40 = vadd.f32 %v9865_v63, %v9506_v8 }
0x4dad   :  { %v9867_v4 = vpop.f32.mrf.mxu1  ;;  %v9908_v55 = vpop.f32.mrf.mxu0 }
0x4dae   :  { %v9907_v10 = vadd.f32 %v9906_v43, %v9866_v40  ;;  %v9911_v25 = vmax.f32 %v9905_v29, 0.0 }
0x4daf   :  { %v9868_v7 = vpop.f32.mrf.mxu1  ;;  %v9909_v45 = vpop.f32.mrf.mxu0 }
0x4db0   :  { %v9912_v3 = vmax.f32 %v9907_v10, 0.0  ;;  %v9913_v22 = vpack.c.bf16 %v9911_v25, %v9911_v25 }
0x4db2   :  { %v9914_v44 = vpack.c.bf16 %v9912_v3, %v9912_v3 }
0x4db4   :  { %10084 = vmatprep.mubr.bf16.mxu1 %v9914_v44 }
0x4db5   :  { %10085 = vmatmul.mubr.bf16.vlgmr.msra.gmra.mxu1 %v9913_v22 }
0x4e75   :  { %v11366_v5 = vpop.f32.mrf.mxu1 }
0x4e77   :  { %v11367_v6 = vpop.f32.mrf.mxu1 }
0x4e78   :  { %v11368_v0 = vadd.f32 %v11367_v6, %v11366_v5 }
0x4e79   :  { %v11369_v23 = vpop.f32.mrf.mxu1 }
0x4e7a   :  { %v10087_v1 = vadd.f32 %v11368_v0, %v10969_v34 }
0x4e7b   :  { %v11370_v20 = vpop.f32.mrf.mxu1 }
0x4e7c   :  { %v10092_v31 = vadd.f32 %v10087_v1, %v7308_v30 }
0x4e7e   :  { %v10093_v38 = vadd.f32 %v10092_v31, %v3438_v53 }
0x4e80   :  { %10095 = vst.msk [vmem:[%s13428_s21] sm:$0xff] %vm10094_vm0, %v10093_v38 }
0x4e81   :  { %10100 = vsyncpa [#allocation3], 1 }
0x4e82   :  { %10101 = vsyncpa [#allocation5], 1 }
0x4e83   :  { %10102 = vsyncpa [#allocation8], 1 }
0x4e84   :  { %10103 = vsyncpa [#allocation11], 1 }
0x4e85   :  { %10104 = vsyncpa [#allocation14], 1 }
0x4e86   :  { %10105 = vsyncpa [#allocation17], 1 }
0x4e87   :  { %10106 = vsyncpa [#allocation20], 1 }
0x4e88   :  { %10107 = vsyncpa [#allocation23], 1 }
0x4e89   :  { %10108 = vsyncpa [#allocation26], 1 }
0x4e8a   :  { %10109 = vsyncpa [#allocation29], 1 }
0x4e8b   :  { %10110 = vsyncpa [#allocation32], 1 }
0x4e8c   :  { %10111 = vsyncpa [#allocation35], 1 }
0x4e8d   :  { %10112 = vsyncpa [#allocation38], 1 }

</bundles_post_ra>
